<compile_context>
chip_gen: v5e
topology: v5e:2x2
jax: 0.10.0
libtpu: 0.0.40
codegen_flags: <defaults>
</compile_context>

<pallas_src>
import jax
import jax.numpy as jnp
from jax import lax
from jax.experimental import pallas as pl
from jax.experimental.pallas import tpu as pltpu

ITERATIONS = 3
EPSILON = 1e-8     # slot-attention eps
LN_EPS = 1e-5      # torch.nn.LayerNorm default eps

_VMEM_CAP_BYTES = 60 << 20   # stay under v7x's 64 MiB physical VMEM


def _layer_norm(x, gamma, beta):
    mean = jnp.mean(x, axis=-1, keepdims=True)
    xc = x - mean
    var = jnp.mean(xc * xc, axis=-1, keepdims=True)
    inv = lax.rsqrt(var + LN_EPS)
    return xc * inv * gamma + beta


def slot_attention_kernel(
    # data
    inputs_ref, slots_init_ref,
    # layer_norm_in
    ln_in_g, ln_in_b,
    # fused K|V projection
    wkv, bkv,
    # Q projection (scale pre-folded)
    wq, bq,
    # layer_norm_slots
    ln_s_g, ln_s_b,
    # fully fused GRUCell: one (2D, 4D) weight producing r|z|i_n|h_n columns
    w_gru, b_gru,
    # layer_norm_pre_mlp
    ln_m_g, ln_m_b,
    # MLP
    w1, b1, w2, b2,
    # outputs
    slots_out_ref, attn_out_ref,
    # VMEM scratch (loop-invariant key^T / value, kept out of the vreg file)
    key_t_ref, val_ref,
):
    f32, bf16 = jnp.float32, jnp.bfloat16
    Bb, N, D = inputs_ref.shape
    K = slots_init_ref.shape[1]
    M = Bb * K  # flattened slot rows (fattened MXU M dim)

    # --- pre-iteration: LN(inputs), fused K|V projection (Bb*N rows) --------
    x = inputs_ref[...].reshape(Bb * N, D).astype(f32)
    x = _layer_norm(x, ln_in_g[...], ln_in_b[...])
    kv = jnp.dot(x.astype(bf16), wkv[...], preferred_element_type=f32) + bkv[...]
    # key transposed ONCE (loop-invariant) -> no per-iteration XLU transpose.
    key_t_ref[...] = jnp.swapaxes(kv[:, :D].reshape(Bb, N, D), 1, 2).astype(bf16)
    val_ref[...] = kv[:, D:].astype(bf16).reshape(Bb, N, D)

    # Small (1, .) bias / LayerNorm rows loaded once (a vreg or two each).
    # The big weights are deliberately NOT hoisted: each dot below re-reads
    # its weight ref from VMEM (cheap vld; 3 load slots/cycle of headroom),
    # so nothing large has to stay live across the unrolled loop.
    g_s, b_s = ln_s_g[...], ln_s_b[...]
    g_m, b_m = ln_m_g[...], ln_m_b[...]
    bq_v = bq[...]
    bgru_v = b_gru[...]
    b1_v = b1[...]
    b2_v = b2[...]

    slots = slots_init_ref[...].reshape(M, D).astype(f32)   # (Bb*K, D)

    attn_output = None
    for _ in range(ITERATIONS):
        slots_prev = slots

        s_ln = _layer_norm(slots, g_s, b_s)
        # D**-0.5 scale is folded into wq / bq at parameter-prep time.
        q = jnp.dot(s_ln.astype(bf16), wq[...], preferred_element_type=f32) + bq_v
        q_b = q.astype(bf16).reshape(Bb, K, D)

        # dots[b,k,n] = sum_d q[b,k,d] * key_t[b,d,n]  (plain batched matmul)
        dots = jnp.einsum('bkd,bdn->bkn', q_b, key_t_ref[...],
                          preferred_element_type=f32)                       # (Bb, K, N)

        # softmax over the SLOT axis (dim=1); denominator via EUP reciprocal.
        m = jnp.max(dots, axis=1, keepdims=True)
        e = jnp.exp(dots - m)
        attn = e * pl.reciprocal(jnp.sum(e, axis=1, keepdims=True),
                                 approx=True) + EPSILON
        attn_output = attn
        # token-axis renormalization defines the convex combo over values:
        # use the exact reciprocal here (correctness feedback).
        attn_n = attn * pl.reciprocal(jnp.sum(attn, axis=-1, keepdims=True),
                                      approx=False)

        # updates[b,k,d] = sum_n attn_n[b,k,n] * val[b,n,d]
        updates = jnp.einsum('bkn,bnd->bkd', attn_n.astype(bf16), val_ref[...],
                             preferred_element_type=f32).reshape(M, D)

        # --- fully fused GRUCell: one (M,2D) x (2D,4D) matmul ----------------
        uh = jnp.concatenate([updates, slots_prev], axis=-1).astype(bf16)    # (M, 2D)
        g = jnp.dot(uh, w_gru[...], preferred_element_type=f32) + bgru_v     # (M, 4D)
        r = jax.nn.sigmoid(g[:, :D])
        z = jax.nn.sigmoid(g[:, D:2 * D])
        n = jnp.tanh(g[:, 2 * D:3 * D] + r * g[:, 3 * D:])
        slots = (1.0 - z) * n + z * slots_prev

        # --- residual MLP -----------------------------------------------------
        s_m = _layer_norm(slots, g_m, b_m)
        h1 = jnp.maximum(
            jnp.dot(s_m.astype(bf16), w1[...], preferred_element_type=f32) + b1_v,
            0.0)
        slots = slots + (
            jnp.dot(h1.astype(bf16), w2[...], preferred_element_type=f32) + b2_v)

    slots_out_ref[...] = slots.reshape(Bb, K, D).astype(slots_out_ref.dtype)
    attn_out_ref[...] = attn_output.astype(attn_out_ref.dtype)


PARAM_ORDER = (
    "ln_in_g", "ln_in_b",
    "wkv", "bkv",
    "wq", "bq",
    "ln_s_g", "ln_s_b",
    "w_gru", "b_gru",
    "ln_m_g", "ln_m_b",
    "w1", "b1", "w2", "b2",
)


def prepare_params(params, dim):
    """One-time host-side fusion/packing of the raw SlotAttention params.

    - K|V projection weights concatenated into one (D, 2D) matmul.
    - D**-0.5 attention scale folded into the Q weights/bias.
    - All three GRU matmuls fused into a single (2D, 4D) weight
          [[w_ih_rz | w_in |   0 ],
           [w_hh_rz |   0  | w_hn]]
      producing r|z|i_n|h_n columns from one uh = [updates | slots_prev]
      matmul (zero blocks cost nothing: those MXU rows were idle anyway).
    - All matmul weights cast to bf16 (f32 accumulation in-kernel);
      biases and LayerNorm parameters stay f32.
    """
    D = dim
    scale = float(D) ** -0.5
    bf16, f32 = jnp.bfloat16, jnp.float32

    w_ih, w_hh = params["w_ih"], params["w_hh"]       # (D, 3D), gate order r,z,n
    b_ih, b_hh = params["b_ih"], params["b_hh"]       # (1, 3D)
    zeros = jnp.zeros((D, D), f32)
    w_gru_top = jnp.concatenate([w_ih[:, :2 * D], w_ih[:, 2 * D:], zeros], axis=1)
    w_gru_bot = jnp.concatenate([w_hh[:, :2 * D], zeros, w_hh[:, 2 * D:]], axis=1)
    w_gru = jnp.concatenate([w_gru_top, w_gru_bot], axis=0).astype(bf16)      # (2D, 4D)
    b_gru = jnp.concatenate(
        [b_ih[:, :2 * D] + b_hh[:, :2 * D], b_ih[:, 2 * D:], b_hh[:, 2 * D:]],
        axis=1).astype(f32)                                                   # (1, 4D)

    return {
        "ln_in_g": params["ln_in_g"].astype(f32),
        "ln_in_b": params["ln_in_b"].astype(f32),
        "wkv": jnp.concatenate([params["wk"], params["wv"]], axis=1).astype(bf16),
        "bkv": jnp.concatenate([params["bk"], params["bv"]], axis=1).astype(f32),
        "wq": (params["wq"] * scale).astype(bf16),
        "bq": (params["bq"] * scale).astype(f32),
        "ln_s_g": params["ln_s_g"].astype(f32),
        "ln_s_b": params["ln_s_b"].astype(f32),
        "w_gru": w_gru,
        "b_gru": b_gru,
        "ln_m_g": params["ln_m_g"].astype(f32),
        "ln_m_b": params["ln_m_b"].astype(f32),
        "w1": params["w1"].astype(bf16),
        "b1": params["b1"].astype(f32),
        "w2": params["w2"].astype(bf16),
        "b2": params["b2"].astype(f32),
    }


def _is_multi_tensorcore():
    """True only for generations with 2 TensorCores/chip (v7x)."""
    try:
        kind = jax.devices()[0].device_kind.lower()
    except Exception:
        return False
    return "v7" in kind


def _step_vmem_bytes(block_b, N, D, K, H, param_bytes):
    """Rough per-grid-step VMEM estimate (double-buffered I/O + params +
    single-buffered scratch)."""
    io = (block_b * N * D * 2          # inputs (bf16)
          + block_b * K * D * 4        # slot init (f32)
          + block_b * K * D * 4        # slots out (f32)
          + block_b * K * N * 4)       # attn out (f32)
    scratch = 2 * block_b * N * D * 2  # key_t + val scratch (bf16)
    return 2 * io + 2 * param_bytes + scratch


def _pick_block_b(B, N, D, K, H, param_bytes):
    # Single-TC chips (v5e/v6e): one grid step (fattest matmul M, no per-step
    # pipeline overhead).  v7x: 2-way split so both TensorCores get work via
    # the "parallel" grid axis.  Shrink further only if VMEM would overflow.
    steps = 2 if (_is_multi_tensorcore() and B >= 2 and B % 2 == 0) else 1
    bb = max(B // steps, 1)
    while bb > 1 and _step_vmem_bytes(bb, N, D, K, H, param_bytes) > _VMEM_CAP_BYTES:
        nb = bb - 1
        while nb > 1 and B % nb != 0:
            nb -= 1
        bb = nb
    return bb


@jax.jit
def slot_attention(inputs, slots_init, prepped):
    B, N, D = inputs.shape
    K = slots_init.shape[1]
    H = prepped["w1"].shape[1]

    param_vals = [prepped[name] for name in PARAM_ORDER]
    param_bytes = int(sum(p.size * p.dtype.itemsize for p in param_vals))

    block_b = _pick_block_b(B, N, D, K, H, param_bytes)
    grid = (B // block_b,)

    vmem_limit = int(min(
        max(_step_vmem_bytes(block_b, N, D, K, H, param_bytes) + (4 << 20), 32 << 20),
        _VMEM_CAP_BYTES))

    inputs_bf = inputs.astype(jnp.bfloat16)          # halves input DMA bytes
    slots_init = slots_init.astype(jnp.float32)

    # Params are full-shape blocks with a constant index_map -> the pipeline
    # fetches each of them once and never re-DMAs across grid steps.
    param_specs = [pl.BlockSpec(p.shape, lambda b: (0, 0)) for p in param_vals]

    in_specs = [
        pl.BlockSpec((block_b, N, D), lambda b: (b, 0, 0)),   # inputs
        pl.BlockSpec((block_b, K, D), lambda b: (b, 0, 0)),   # slot init
    ] + param_specs

    out_specs = [
        pl.BlockSpec((block_b, K, D), lambda b: (b, 0, 0)),   # slots
        pl.BlockSpec((block_b, K, N), lambda b: (b, 0, 0)),   # attn (pre-renorm)
    ]

    out_shape = (
        jax.ShapeDtypeStruct((B, K, D), jnp.float32),
        jax.ShapeDtypeStruct((B, K, N), jnp.float32),
    )

    return pl.pallas_call(
        slot_attention_kernel,
        grid=grid,
        in_specs=in_specs,
        out_specs=out_specs,
        out_shape=out_shape,
        scratch_shapes=[
            pltpu.VMEM((block_b, D, N), jnp.bfloat16),   # key^T (loop-invariant)
            pltpu.VMEM((block_b, N, D), jnp.bfloat16),   # value (loop-invariant)
        ],
        compiler_params=pltpu.CompilerParams(
            dimension_semantics=("parallel",),
            vmem_limit_bytes=vmem_limit),
    )(inputs_bf, slots_init, *param_vals)


def init_params(key, dim, hidden_dim):
    """Raw parameters in the same layout as the PyTorch module (transposed to
    (in, out) so the kernel does x @ W + b; GRU gate order r, z, n)."""
    ks = jax.random.split(key, 16)
    s = 0.02
    return {
        # LayerNorms
        "ln_in_g": jnp.ones((1, dim), jnp.float32),
        "ln_in_b": jnp.zeros((1, dim), jnp.float32),
        "ln_s_g": jnp.ones((1, dim), jnp.float32),
        "ln_s_b": jnp.zeros((1, dim), jnp.float32),
        "ln_m_g": jnp.ones((1, dim), jnp.float32),
        "ln_m_b": jnp.zeros((1, dim), jnp.float32),
        # Q / K / V linear layers: (in, out) layout
        "wq": s * jax.random.normal(ks[0], (dim, dim), jnp.float32),
        "bq": s * jax.random.normal(ks[1], (1, dim), jnp.float32),
        "wk": s * jax.random.normal(ks[2], (dim, dim), jnp.float32),
        "bk": s * jax.random.normal(ks[3], (1, dim), jnp.float32),
        "wv": s * jax.random.normal(ks[4], (dim, dim), jnp.float32),
        "bv": s * jax.random.normal(ks[5], (1, dim), jnp.float32),
        # GRUCell: gates concatenated along out axis in order (r, z, n)
        "w_ih": s * jax.random.normal(ks[6], (dim, 3 * dim), jnp.float32),
        "b_ih": s * jax.random.normal(ks[7], (1, 3 * dim), jnp.float32),
        "w_hh": s * jax.random.normal(ks[8], (dim, 3 * dim), jnp.float32),
        "b_hh": s * jax.random.normal(ks[9], (1, 3 * dim), jnp.float32),
        # MLP
        "w1": s * jax.random.normal(ks[10], (dim, hidden_dim), jnp.float32),
        "b1": s * jax.random.normal(ks[11], (1, hidden_dim), jnp.float32),
        "w2": s * jax.random.normal(ks[12], (hidden_dim, dim), jnp.float32),
        "b2": s * jax.random.normal(ks[13], (1, dim), jnp.float32),
        # slot init distribution (matches nn.Parameter shapes (1, 1, DIM))
        "slots_mu": jax.random.normal(ks[14], (1, 1, dim), jnp.float32),
        "slots_sigma": jax.random.uniform(ks[15], (1, 1, dim), jnp.float32),
    }


if __name__ == "__main__":
    # Small shapes consistent with the module's [B, N, DIM] -> [B, K, DIM]
    # contract; N and HIDDEN chosen lane-dense (128), HIDDEN matches the
    # module's actual HIDDEN_DIM.
    B, N, D, K, HIDDEN = 4, 128, 128, 8, 128

    key = jax.random.PRNGKey(0)
    k_in, k_par, k_noise = jax.random.split(key, 3)

    inputs = jax.random.normal(k_in, (B, N, D), jnp.float32)
    raw_params = init_params(k_par, D, HIDDEN)
    prepped = prepare_params(raw_params, D)

    # slots = torch.normal(mu.expand(B,K,D), sigma.expand(B,K,D))
    # -> reparameterized sampling done in plain JAX (glue), fed to the kernel.
    noise = jax.random.normal(k_noise, (B, K, D), jnp.float32)
    slots_init = raw_params["slots_mu"] + raw_params["slots_sigma"] * noise

    slots, attn = slot_attention(inputs, slots_init, prepped)
    slots = jax.block_until_ready(slots)
    attn = jax.block_until_ready(attn)

    assert slots.shape == (B, K, D)
    assert attn.shape == (B, K, N)
    assert bool(jnp.all(jnp.isfinite(slots)))
    assert bool(jnp.all(jnp.isfinite(attn)))
    print("KERNEL_OK")
</pallas_src>

<mosaic_0001>
module attributes {stable_mosaic.version = 11 : i64} {
  func.func @slot_attention_kernel(%arg0: i32, %arg1: memref<4x128x128xbf16, #tpu.memory_space<vmem>>, %arg2: memref<4x8x128xf32, #tpu.memory_space<vmem>>, %arg3: memref<1x128xf32, #tpu.memory_space<vmem>>, %arg4: memref<1x128xf32, #tpu.memory_space<vmem>>, %arg5: memref<128x256xbf16, #tpu.memory_space<vmem>>, %arg6: memref<1x256xf32, #tpu.memory_space<vmem>>, %arg7: memref<128x128xbf16, #tpu.memory_space<vmem>>, %arg8: memref<1x128xf32, #tpu.memory_space<vmem>>, %arg9: memref<1x128xf32, #tpu.memory_space<vmem>>, %arg10: memref<1x128xf32, #tpu.memory_space<vmem>>, %arg11: memref<256x512xbf16, #tpu.memory_space<vmem>>, %arg12: memref<1x512xf32, #tpu.memory_space<vmem>>, %arg13: memref<1x128xf32, #tpu.memory_space<vmem>>, %arg14: memref<1x128xf32, #tpu.memory_space<vmem>>, %arg15: memref<128x128xbf16, #tpu.memory_space<vmem>>, %arg16: memref<1x128xf32, #tpu.memory_space<vmem>>, %arg17: memref<128x128xbf16, #tpu.memory_space<vmem>>, %arg18: memref<1x128xf32, #tpu.memory_space<vmem>>, %arg19: memref<4x8x128xf32, #tpu.memory_space<vmem>>, %arg20: memref<4x8x128xf32, #tpu.memory_space<vmem>>, %arg21: memref<4x128x128xbf16, #tpu.memory_space<vmem>>, %arg22: memref<4x128x128xbf16, #tpu.memory_space<vmem>>) attributes {dimension_semantics = [#tpu.dimension_semantics<parallel>], iteration_bounds = array<i64: 1>, scalar_prefetch = 0 : i64, scratch_operands = 2 : i64, tpu.core_type = #tpu.core_type<tc>, window_params = [{transform_indices = @transform_0, window_bounds = array<i64: 4, 128, 128>}, {transform_indices = @transform_1, window_bounds = array<i64: 4, 8, 128>}, {pipeline_mode = #tpu.pipeline_mode<synchronous>, transform_indices = @transform_2, window_bounds = array<i64: 1, 128>}, {pipeline_mode = #tpu.pipeline_mode<synchronous>, transform_indices = @transform_3, window_bounds = array<i64: 1, 128>}, {pipeline_mode = #tpu.pipeline_mode<synchronous>, transform_indices = @transform_4, window_bounds = array<i64: 128, 256>}, {pipeline_mode = #tpu.pipeline_mode<synchronous>, transform_indices = @transform_5, window_bounds = array<i64: 1, 256>}, {pipeline_mode = #tpu.pipeline_mode<synchronous>, transform_indices = @transform_6, window_bounds = array<i64: 128, 128>}, {pipeline_mode = #tpu.pipeline_mode<synchronous>, transform_indices = @transform_7, window_bounds = array<i64: 1, 128>}, {pipeline_mode = #tpu.pipeline_mode<synchronous>, transform_indices = @transform_8, window_bounds = array<i64: 1, 128>}, {pipeline_mode = #tpu.pipeline_mode<synchronous>, transform_indices = @transform_9, window_bounds = array<i64: 1, 128>}, {pipeline_mode = #tpu.pipeline_mode<synchronous>, transform_indices = @transform_10, window_bounds = array<i64: 256, 512>}, {pipeline_mode = #tpu.pipeline_mode<synchronous>, transform_indices = @transform_11, window_bounds = array<i64: 1, 512>}, {pipeline_mode = #tpu.pipeline_mode<synchronous>, transform_indices = @transform_12, window_bounds = array<i64: 1, 128>}, {pipeline_mode = #tpu.pipeline_mode<synchronous>, transform_indices = @transform_13, window_bounds = array<i64: 1, 128>}, {pipeline_mode = #tpu.pipeline_mode<synchronous>, transform_indices = @transform_14, window_bounds = array<i64: 128, 128>}, {pipeline_mode = #tpu.pipeline_mode<synchronous>, transform_indices = @transform_15, window_bounds = array<i64: 1, 128>}, {pipeline_mode = #tpu.pipeline_mode<synchronous>, transform_indices = @transform_16, window_bounds = array<i64: 128, 128>}, {pipeline_mode = #tpu.pipeline_mode<synchronous>, transform_indices = @transform_17, window_bounds = array<i64: 1, 128>}, {transform_indices = @transform_18, window_bounds = array<i64: 4, 8, 128>}, {transform_indices = @transform_19, window_bounds = array<i64: 4, 8, 128>}]} {
    %c0 = arith.constant 0 : index
    %c0_0 = arith.constant 0 : index
    %c0_1 = arith.constant 0 : index
    %0 = vector.load %arg1[%c0, %c0_0, %c0_1] : memref<4x128x128xbf16, #tpu.memory_space<vmem>>, vector<4x128x128xbf16>
    %1 = vector.shape_cast %0 : vector<4x128x128xbf16> to vector<512x128xbf16>
    %2 = arith.extf %1 : vector<512x128xbf16> to vector<512x128xf32>
    %c0_2 = arith.constant 0 : index
    %c0_3 = arith.constant 0 : index
    %3 = vector.load %arg3[%c0_2, %c0_3] : memref<1x128xf32, #tpu.memory_space<vmem>>, vector<1x128xf32>
    %c0_4 = arith.constant 0 : index
    %c0_5 = arith.constant 0 : index
    %4 = vector.load %arg4[%c0_4, %c0_5] : memref<1x128xf32, #tpu.memory_space<vmem>>, vector<1x128xf32>
    %cst = arith.constant dense<0.000000e+00> : vector<512xf32>
    %5 = vector.multi_reduction <add>, %2, %cst [1] : vector<512x128xf32> to vector<512xf32>
    %6 = vector.shape_cast %5 : vector<512xf32> to vector<512x1xf32>
    %cst_6 = arith.constant 1.280000e+02 : f32
    %7 = vector.broadcast %cst_6 : f32 to vector<512x1xf32>
    %8 = arith.divf %6, %7 : vector<512x1xf32>
    %9 = vector.broadcast %8 : vector<512x1xf32> to vector<512x128xf32>
    %10 = arith.subf %2, %9 : vector<512x128xf32>
    %11 = arith.mulf %10, %10 : vector<512x128xf32>
    %cst_7 = arith.constant dense<0.000000e+00> : vector<512xf32>
    %12 = vector.multi_reduction <add>, %11, %cst_7 [1] : vector<512x128xf32> to vector<512xf32>
    %13 = vector.shape_cast %12 : vector<512xf32> to vector<512x1xf32>
    %cst_8 = arith.constant 1.280000e+02 : f32
    %14 = vector.broadcast %cst_8 : f32 to vector<512x1xf32>
    %15 = arith.divf %13, %14 : vector<512x1xf32>
    %cst_9 = arith.constant 9.99999974E-6 : f32
    %16 = vector.broadcast %cst_9 : f32 to vector<512x1xf32>
    %17 = arith.addf %15, %16 : vector<512x1xf32>
    %18 = math.rsqrt %17 : vector<512x1xf32>
    %19 = vector.broadcast %18 : vector<512x1xf32> to vector<512x128xf32>
    %20 = arith.mulf %10, %19 : vector<512x128xf32>
    %21 = vector.broadcast %3 : vector<1x128xf32> to vector<512x128xf32>
    %22 = arith.mulf %20, %21 : vector<512x128xf32>
    %23 = vector.broadcast %4 : vector<1x128xf32> to vector<512x128xf32>
    %24 = arith.addf %22, %23 : vector<512x128xf32>
    %25 = arith.truncf %24 : vector<512x128xf32> to vector<512x128xbf16>
    %c0_10 = arith.constant 0 : index
    %c0_11 = arith.constant 0 : index
    %26 = vector.load %arg5[%c0_10, %c0_11] : memref<128x256xbf16, #tpu.memory_space<vmem>>, vector<128x256xbf16>
    %cst_12 = arith.constant dense<0.000000e+00> : vector<512x256xf32>
    %27 = tpu.matmul %25, %26, %cst_12 {dimension_numbers = #tpu.dot_dimension_numbers<[1], [0], [0], [1], [0, 0, 1, 1], [], []>} : vector<512x128xbf16>, vector<128x256xbf16>, vector<512x256xf32> -> vector<512x256xf32>
    %c0_13 = arith.constant 0 : index
    %c0_14 = arith.constant 0 : index
    %28 = vector.load %arg6[%c0_13, %c0_14] : memref<1x256xf32, #tpu.memory_space<vmem>>, vector<1x256xf32>
    %29 = vector.broadcast %28 : vector<1x256xf32> to vector<512x256xf32>
    %30 = arith.addf %27, %29 : vector<512x256xf32>
    %31 = vector.extract_strided_slice %30 {offsets = [0, 0], sizes = [512, 128], strides = [1, 1]} : vector<512x256xf32> to vector<512x128xf32>
    %32 = vector.shape_cast %31 : vector<512x128xf32> to vector<4x128x128xf32>
    %33 = tpu.transpose %32, [0, 2, 1] : vector<4x128x128xf32> -> vector<4x128x128xf32>
    %34 = arith.truncf %33 : vector<4x128x128xf32> to vector<4x128x128xbf16>
    %c0_15 = arith.constant 0 : index
    %c0_16 = arith.constant 0 : index
    %c0_17 = arith.constant 0 : index
    %35 = vector.load %arg21[%c0_15, %c0_16, %c0_17] : memref<4x128x128xbf16, #tpu.memory_space<vmem>>, vector<4x128x128xbf16>
    tpu.vector_store %arg21[%c0_15, %c0_16, %c0_17], %34 {strides = array<i32>} : memref<4x128x128xbf16, #tpu.memory_space<vmem>>, vector<4x128x128xbf16>,
    %36 = vector.extract_strided_slice %30 {offsets = [0, 128], sizes = [512, 128], strides = [1, 1]} : vector<512x256xf32> to vector<512x128xf32>
    %37 = arith.truncf %36 : vector<512x128xf32> to vector<512x128xbf16>
    %38 = vector.shape_cast %37 : vector<512x128xbf16> to vector<4x128x128xbf16>
    %c0_18 = arith.constant 0 : index
    %c0_19 = arith.constant 0 : index
    %c0_20 = arith.constant 0 : index
    %39 = vector.load %arg22[%c0_18, %c0_19, %c0_20] : memref<4x128x128xbf16, #tpu.memory_space<vmem>>, vector<4x128x128xbf16>
    tpu.vector_store %arg22[%c0_18, %c0_19, %c0_20], %38 {strides = array<i32>} : memref<4x128x128xbf16, #tpu.memory_space<vmem>>, vector<4x128x128xbf16>,
    %c0_21 = arith.constant 0 : index
    %c0_22 = arith.constant 0 : index
    %40 = vector.load %arg9[%c0_21, %c0_22] : memref<1x128xf32, #tpu.memory_space<vmem>>, vector<1x128xf32>
    %c0_23 = arith.constant 0 : index
    %c0_24 = arith.constant 0 : index
    %41 = vector.load %arg10[%c0_23, %c0_24] : memref<1x128xf32, #tpu.memory_space<vmem>>, vector<1x128xf32>
    %c0_25 = arith.constant 0 : index
    %c0_26 = arith.constant 0 : index
    %42 = vector.load %arg13[%c0_25, %c0_26] : memref<1x128xf32, #tpu.memory_space<vmem>>, vector<1x128xf32>
    %c0_27 = arith.constant 0 : index
    %c0_28 = arith.constant 0 : index
    %43 = vector.load %arg14[%c0_27, %c0_28] : memref<1x128xf32, #tpu.memory_space<vmem>>, vector<1x128xf32>
    %c0_29 = arith.constant 0 : index
    %c0_30 = arith.constant 0 : index
    %44 = vector.load %arg8[%c0_29, %c0_30] : memref<1x128xf32, #tpu.memory_space<vmem>>, vector<1x128xf32>
    %c0_31 = arith.constant 0 : index
    %c0_32 = arith.constant 0 : index
    %45 = vector.load %arg12[%c0_31, %c0_32] : memref<1x512xf32, #tpu.memory_space<vmem>>, vector<1x512xf32>
    %c0_33 = arith.constant 0 : index
    %c0_34 = arith.constant 0 : index
    %46 = vector.load %arg16[%c0_33, %c0_34] : memref<1x128xf32, #tpu.memory_space<vmem>>, vector<1x128xf32>
    %c0_35 = arith.constant 0 : index
    %c0_36 = arith.constant 0 : index
    %47 = vector.load %arg18[%c0_35, %c0_36] : memref<1x128xf32, #tpu.memory_space<vmem>>, vector<1x128xf32>
    %c0_37 = arith.constant 0 : index
    %c0_38 = arith.constant 0 : index
    %c0_39 = arith.constant 0 : index
    %48 = vector.load %arg2[%c0_37, %c0_38, %c0_39] : memref<4x8x128xf32, #tpu.memory_space<vmem>>, vector<4x8x128xf32>
    %49 = vector.shape_cast %48 : vector<4x8x128xf32> to vector<32x128xf32>
    %cst_40 = arith.constant dense<0.000000e+00> : vector<32xf32>
    %50 = vector.multi_reduction <add>, %49, %cst_40 [1] : vector<32x128xf32> to vector<32xf32>
    %51 = vector.shape_cast %50 : vector<32xf32> to vector<32x1xf32>
    %cst_41 = arith.constant 1.280000e+02 : f32
    %52 = vector.broadcast %cst_41 : f32 to vector<32x1xf32>
    %53 = arith.divf %51, %52 : vector<32x1xf32>
    %54 = vector.broadcast %53 : vector<32x1xf32> to vector<32x128xf32>
    %55 = arith.subf %49, %54 : vector<32x128xf32>
    %56 = arith.mulf %55, %55 : vector<32x128xf32>
    %cst_42 = arith.constant dense<0.000000e+00> : vector<32xf32>
    %57 = vector.multi_reduction <add>, %56, %cst_42 [1] : vector<32x128xf32> to vector<32xf32>
    %58 = vector.shape_cast %57 : vector<32xf32> to vector<32x1xf32>
    %cst_43 = arith.constant 1.280000e+02 : f32
    %59 = vector.broadcast %cst_43 : f32 to vector<32x1xf32>
    %60 = arith.divf %58, %59 : vector<32x1xf32>
    %cst_44 = arith.constant 9.99999974E-6 : f32
    %61 = vector.broadcast %cst_44 : f32 to vector<32x1xf32>
    %62 = arith.addf %60, %61 : vector<32x1xf32>
    %63 = math.rsqrt %62 : vector<32x1xf32>
    %64 = vector.broadcast %63 : vector<32x1xf32> to vector<32x128xf32>
    %65 = arith.mulf %55, %64 : vector<32x128xf32>
    %66 = vector.broadcast %40 : vector<1x128xf32> to vector<32x128xf32>
    %67 = arith.mulf %65, %66 : vector<32x128xf32>
    %68 = vector.broadcast %41 : vector<1x128xf32> to vector<32x128xf32>
    %69 = arith.addf %67, %68 : vector<32x128xf32>
    %70 = arith.truncf %69 : vector<32x128xf32> to vector<32x128xbf16>
    %c0_45 = arith.constant 0 : index
    %c0_46 = arith.constant 0 : index
    %71 = vector.load %arg7[%c0_45, %c0_46] : memref<128x128xbf16, #tpu.memory_space<vmem>>, vector<128x128xbf16>
    %cst_47 = arith.constant dense<0.000000e+00> : vector<32x128xf32>
    %72 = tpu.matmul %70, %71, %cst_47 {dimension_numbers = #tpu.dot_dimension_numbers<[1], [0], [0], [1], [0, 0, 1, 1], [], []>} : vector<32x128xbf16>, vector<128x128xbf16>, vector<32x128xf32> -> vector<32x128xf32>
    %73 = vector.broadcast %44 : vector<1x128xf32> to vector<32x128xf32>
    %74 = arith.addf %72, %73 : vector<32x128xf32>
    %75 = arith.truncf %74 : vector<32x128xf32> to vector<32x128xbf16>
    %76 = vector.shape_cast %75 : vector<32x128xbf16> to vector<4x8x128xbf16>
    %c0_48 = arith.constant 0 : index
    %c0_49 = arith.constant 0 : index
    %c0_50 = arith.constant 0 : index
    %77 = vector.load %arg21[%c0_48, %c0_49, %c0_50] : memref<4x128x128xbf16, #tpu.memory_space<vmem>>, vector<4x128x128xbf16>
    "tpu.trace_start"() <{level = 10 : i32, message = "bkd,bdn->bkn"}> : () -> ()
    %cst_51 = arith.constant dense<0.000000e+00> : vector<4x8x128xf32>
    %78 = tpu.matmul %76, %77, %cst_51 {dimension_numbers = #tpu.dot_dimension_numbers<[2], [1], [1], [2], [0, 0, 0, 1, 1, 2], [0], [0]>} : vector<4x8x128xbf16>, vector<4x128x128xbf16>, vector<4x8x128xf32> -> vector<4x8x128xf32>
    "tpu.trace_stop"() : () -> ()
    %cst_52 = arith.constant dense<0xFF800000> : vector<4x128xf32>
    %79 = vector.multi_reduction <maximumf>, %78, %cst_52 [1] : vector<4x8x128xf32> to vector<4x128xf32>
    %80 = vector.shape_cast %79 : vector<4x128xf32> to vector<4x1x128xf32>
    %81 = vector.broadcast %80 : vector<4x1x128xf32> to vector<4x8x128xf32>
    %82 = arith.subf %78, %81 : vector<4x8x128xf32>
    %83 = math.exp %82 : vector<4x8x128xf32>
    %cst_53 = arith.constant dense<0.000000e+00> : vector<4x128xf32>
    %84 = vector.multi_reduction <add>, %83, %cst_53 [1] : vector<4x8x128xf32> to vector<4x128xf32>
    %85 = vector.shape_cast %84 : vector<4x128xf32> to vector<4x1x128xf32>
    %86 = tpu.reciprocal %85 {approx = true} : vector<4x1x128xf32> -> vector<4x1x128xf32>
    %87 = vector.broadcast %86 : vector<4x1x128xf32> to vector<4x8x128xf32>
    %88 = arith.mulf %83, %87 : vector<4x8x128xf32>
    %cst_54 = arith.constant 9.99999993E-9 : f32
    %89 = vector.broadcast %cst_54 : f32 to vector<4x8x128xf32>
    %90 = arith.addf %88, %89 : vector<4x8x128xf32>
    %cst_55 = arith.constant dense<0.000000e+00> : vector<4x8xf32>
    %91 = vector.multi_reduction <add>, %90, %cst_55 [2] : vector<4x8x128xf32> to vector<4x8xf32>
    %92 = vector.shape_cast %91 : vector<4x8xf32> to vector<4x8x1xf32>
    %93 = tpu.reciprocal %92 : vector<4x8x1xf32> -> vector<4x8x1xf32>
    %94 = vector.broadcast %93 : vector<4x8x1xf32> to vector<4x8x128xf32>
    %95 = arith.mulf %90, %94 : vector<4x8x128xf32>
    %96 = arith.truncf %95 : vector<4x8x128xf32> to vector<4x8x128xbf16>
    %c0_56 = arith.constant 0 : index
    %c0_57 = arith.constant 0 : index
    %c0_58 = arith.constant 0 : index
    %97 = vector.load %arg22[%c0_56, %c0_57, %c0_58] : memref<4x128x128xbf16, #tpu.memory_space<vmem>>, vector<4x128x128xbf16>
    "tpu.trace_start"() <{level = 10 : i32, message = "bkn,bnd->bkd"}> : () -> ()
    %cst_59 = arith.constant dense<0.000000e+00> : vector<4x8x128xf32>
    %98 = tpu.matmul %96, %97, %cst_59 {dimension_numbers = #tpu.dot_dimension_numbers<[2], [1], [1], [2], [0, 0, 0, 1, 1, 2], [0], [0]>} : vector<4x8x128xbf16>, vector<4x128x128xbf16>, vector<4x8x128xf32> -> vector<4x8x128xf32>
    "tpu.trace_stop"() : () -> ()
    %99 = vector.shape_cast %98 : vector<4x8x128xf32> to vector<32x128xf32>
    %100 = tpu.concatenate %99, %49 in 1 : vector<32x128xf32>, vector<32x128xf32> -> vector<32x256xf32>
    %101 = arith.truncf %100 : vector<32x256xf32> to vector<32x256xbf16>
    %c0_60 = arith.constant 0 : index
    %c0_61 = arith.constant 0 : index
    %102 = vector.load %arg11[%c0_60, %c0_61] : memref<256x512xbf16, #tpu.memory_space<vmem>>, vector<256x512xbf16>
    %cst_62 = arith.constant dense<0.000000e+00> : vector<32x512xf32>
    %103 = tpu.matmul %101, %102, %cst_62 {dimension_numbers = #tpu.dot_dimension_numbers<[1], [0], [0], [1], [0, 0, 1, 1], [], []>} : vector<32x256xbf16>, vector<256x512xbf16>, vector<32x512xf32> -> vector<32x512xf32>
    %104 = vector.broadcast %45 : vector<1x512xf32> to vector<32x512xf32>
    %105 = arith.addf %103, %104 : vector<32x512xf32>
    %106 = vector.extract_strided_slice %105 {offsets = [0, 0], sizes = [32, 128], strides = [1, 1]} : vector<32x512xf32> to vector<32x128xf32>
    %107 = arith.negf %106 : vector<32x128xf32>
    %108 = math.exp %107 : vector<32x128xf32>
    %cst_63 = arith.constant 1.000000e+00 : f32
    %109 = vector.broadcast %cst_63 : f32 to vector<32x128xf32>
    %110 = arith.addf %109, %108 : vector<32x128xf32>
    %111 = arith.divf %109, %110 : vector<32x128xf32>
    %112 = vector.extract_strided_slice %105 {offsets = [0, 128], sizes = [32, 128], strides = [1, 1]} : vector<32x512xf32> to vector<32x128xf32>
    %113 = arith.negf %112 : vector<32x128xf32>
    %114 = math.exp %113 : vector<32x128xf32>
    %cst_64 = arith.constant 1.000000e+00 : f32
    %115 = vector.broadcast %cst_64 : f32 to vector<32x128xf32>
    %116 = arith.addf %115, %114 : vector<32x128xf32>
    %117 = arith.divf %115, %116 : vector<32x128xf32>
    %118 = vector.extract_strided_slice %105 {offsets = [0, 256], sizes = [32, 128], strides = [1, 1]} : vector<32x512xf32> to vector<32x128xf32>
    %119 = vector.extract_strided_slice %105 {offsets = [0, 384], sizes = [32, 128], strides = [1, 1]} : vector<32x512xf32> to vector<32x128xf32>
    %120 = arith.mulf %111, %119 : vector<32x128xf32>
    %121 = arith.addf %118, %120 : vector<32x128xf32>
    %122 = math.tanh %121 : vector<32x128xf32>
    %cst_65 = arith.constant 1.000000e+00 : f32
    %123 = vector.broadcast %cst_65 : f32 to vector<32x128xf32>
    %124 = arith.subf %123, %117 : vector<32x128xf32>
    %125 = arith.mulf %124, %122 : vector<32x128xf32>
    %126 = arith.mulf %117, %49 : vector<32x128xf32>
    %127 = arith.addf %125, %126 : vector<32x128xf32>
    %cst_66 = arith.constant dense<0.000000e+00> : vector<32xf32>
    %128 = vector.multi_reduction <add>, %127, %cst_66 [1] : vector<32x128xf32> to vector<32xf32>
    %129 = vector.shape_cast %128 : vector<32xf32> to vector<32x1xf32>
    %cst_67 = arith.constant 1.280000e+02 : f32
    %130 = vector.broadcast %cst_67 : f32 to vector<32x1xf32>
    %131 = arith.divf %129, %130 : vector<32x1xf32>
    %132 = vector.broadcast %131 : vector<32x1xf32> to vector<32x128xf32>
    %133 = arith.subf %127, %132 : vector<32x128xf32>
    %134 = arith.mulf %133, %133 : vector<32x128xf32>
    %cst_68 = arith.constant dense<0.000000e+00> : vector<32xf32>
    %135 = vector.multi_reduction <add>, %134, %cst_68 [1] : vector<32x128xf32> to vector<32xf32>
    %136 = vector.shape_cast %135 : vector<32xf32> to vector<32x1xf32>
    %cst_69 = arith.constant 1.280000e+02 : f32
    %137 = vector.broadcast %cst_69 : f32 to vector<32x1xf32>
    %138 = arith.divf %136, %137 : vector<32x1xf32>
    %cst_70 = arith.constant 9.99999974E-6 : f32
    %139 = vector.broadcast %cst_70 : f32 to vector<32x1xf32>
    %140 = arith.addf %138, %139 : vector<32x1xf32>
    %141 = math.rsqrt %140 : vector<32x1xf32>
    %142 = vector.broadcast %141 : vector<32x1xf32> to vector<32x128xf32>
    %143 = arith.mulf %133, %142 : vector<32x128xf32>
    %144 = vector.broadcast %42 : vector<1x128xf32> to vector<32x128xf32>
    %145 = arith.mulf %143, %144 : vector<32x128xf32>
    %146 = vector.broadcast %43 : vector<1x128xf32> to vector<32x128xf32>
    %147 = arith.addf %145, %146 : vector<32x128xf32>
    %148 = arith.truncf %147 : vector<32x128xf32> to vector<32x128xbf16>
    %c0_71 = arith.constant 0 : index
    %c0_72 = arith.constant 0 : index
    %149 = vector.load %arg15[%c0_71, %c0_72] : memref<128x128xbf16, #tpu.memory_space<vmem>>, vector<128x128xbf16>
    %cst_73 = arith.constant dense<0.000000e+00> : vector<32x128xf32>
    %150 = tpu.matmul %148, %149, %cst_73 {dimension_numbers = #tpu.dot_dimension_numbers<[1], [0], [0], [1], [0, 0, 1, 1], [], []>} : vector<32x128xbf16>, vector<128x128xbf16>, vector<32x128xf32> -> vector<32x128xf32>
    %151 = vector.broadcast %46 : vector<1x128xf32> to vector<32x128xf32>
    %152 = arith.addf %150, %151 : vector<32x128xf32>
    %cst_74 = arith.constant 0.000000e+00 : f32
    %153 = vector.broadcast %cst_74 : f32 to vector<32x128xf32>
    %154 = arith.maximumf %152, %153 : vector<32x128xf32>
    %155 = arith.truncf %154 : vector<32x128xf32> to vector<32x128xbf16>
    %c0_75 = arith.constant 0 : index
    %c0_76 = arith.constant 0 : index
    %156 = vector.load %arg17[%c0_75, %c0_76] : memref<128x128xbf16, #tpu.memory_space<vmem>>, vector<128x128xbf16>
    %cst_77 = arith.constant dense<0.000000e+00> : vector<32x128xf32>
    %157 = tpu.matmul %155, %156, %cst_77 {dimension_numbers = #tpu.dot_dimension_numbers<[1], [0], [0], [1], [0, 0, 1, 1], [], []>} : vector<32x128xbf16>, vector<128x128xbf16>, vector<32x128xf32> -> vector<32x128xf32>
    %158 = vector.broadcast %47 : vector<1x128xf32> to vector<32x128xf32>
    %159 = arith.addf %157, %158 : vector<32x128xf32>
    %160 = arith.addf %127, %159 : vector<32x128xf32>
    %cst_78 = arith.constant dense<0.000000e+00> : vector<32xf32>
    %161 = vector.multi_reduction <add>, %160, %cst_78 [1] : vector<32x128xf32> to vector<32xf32>
    %162 = vector.shape_cast %161 : vector<32xf32> to vector<32x1xf32>
    %cst_79 = arith.constant 1.280000e+02 : f32
    %163 = vector.broadcast %cst_79 : f32 to vector<32x1xf32>
    %164 = arith.divf %162, %163 : vector<32x1xf32>
    %165 = vector.broadcast %164 : vector<32x1xf32> to vector<32x128xf32>
    %166 = arith.subf %160, %165 : vector<32x128xf32>
    %167 = arith.mulf %166, %166 : vector<32x128xf32>
    %cst_80 = arith.constant dense<0.000000e+00> : vector<32xf32>
    %168 = vector.multi_reduction <add>, %167, %cst_80 [1] : vector<32x128xf32> to vector<32xf32>
    %169 = vector.shape_cast %168 : vector<32xf32> to vector<32x1xf32>
    %cst_81 = arith.constant 1.280000e+02 : f32
    %170 = vector.broadcast %cst_81 : f32 to vector<32x1xf32>
    %171 = arith.divf %169, %170 : vector<32x1xf32>
    %cst_82 = arith.constant 9.99999974E-6 : f32
    %172 = vector.broadcast %cst_82 : f32 to vector<32x1xf32>
    %173 = arith.addf %171, %172 : vector<32x1xf32>
    %174 = math.rsqrt %173 : vector<32x1xf32>
    %175 = vector.broadcast %174 : vector<32x1xf32> to vector<32x128xf32>
    %176 = arith.mulf %166, %175 : vector<32x128xf32>
    %177 = vector.broadcast %40 : vector<1x128xf32> to vector<32x128xf32>
    %178 = arith.mulf %176, %177 : vector<32x128xf32>
    %179 = vector.broadcast %41 : vector<1x128xf32> to vector<32x128xf32>
    %180 = arith.addf %178, %179 : vector<32x128xf32>
    %181 = arith.truncf %180 : vector<32x128xf32> to vector<32x128xbf16>
    %c0_83 = arith.constant 0 : index
    %c0_84 = arith.constant 0 : index
    %182 = vector.load %arg7[%c0_83, %c0_84] : memref<128x128xbf16, #tpu.memory_space<vmem>>, vector<128x128xbf16>
    %cst_85 = arith.constant dense<0.000000e+00> : vector<32x128xf32>
    %183 = tpu.matmul %181, %182, %cst_85 {dimension_numbers = #tpu.dot_dimension_numbers<[1], [0], [0], [1], [0, 0, 1, 1], [], []>} : vector<32x128xbf16>, vector<128x128xbf16>, vector<32x128xf32> -> vector<32x128xf32>
    %184 = vector.broadcast %44 : vector<1x128xf32> to vector<32x128xf32>
    %185 = arith.addf %183, %184 : vector<32x128xf32>
    %186 = arith.truncf %185 : vector<32x128xf32> to vector<32x128xbf16>
    %187 = vector.shape_cast %186 : vector<32x128xbf16> to vector<4x8x128xbf16>
    %c0_86 = arith.constant 0 : index
    %c0_87 = arith.constant 0 : index
    %c0_88 = arith.constant 0 : index
    %188 = vector.load %arg21[%c0_86, %c0_87, %c0_88] : memref<4x128x128xbf16, #tpu.memory_space<vmem>>, vector<4x128x128xbf16>
    "tpu.trace_start"() <{level = 10 : i32, message = "bkd,bdn->bkn"}> : () -> ()
    %cst_89 = arith.constant dense<0.000000e+00> : vector<4x8x128xf32>
    %189 = tpu.matmul %187, %188, %cst_89 {dimension_numbers = #tpu.dot_dimension_numbers<[2], [1], [1], [2], [0, 0, 0, 1, 1, 2], [0], [0]>} : vector<4x8x128xbf16>, vector<4x128x128xbf16>, vector<4x8x128xf32> -> vector<4x8x128xf32>
    "tpu.trace_stop"() : () -> ()
    %cst_90 = arith.constant dense<0xFF800000> : vector<4x128xf32>
    %190 = vector.multi_reduction <maximumf>, %189, %cst_90 [1] : vector<4x8x128xf32> to vector<4x128xf32>
    %191 = vector.shape_cast %190 : vector<4x128xf32> to vector<4x1x128xf32>
    %192 = vector.broadcast %191 : vector<4x1x128xf32> to vector<4x8x128xf32>
    %193 = arith.subf %189, %192 : vector<4x8x128xf32>
    %194 = math.exp %193 : vector<4x8x128xf32>
    %cst_91 = arith.constant dense<0.000000e+00> : vector<4x128xf32>
    %195 = vector.multi_reduction <add>, %194, %cst_91 [1] : vector<4x8x128xf32> to vector<4x128xf32>
    %196 = vector.shape_cast %195 : vector<4x128xf32> to vector<4x1x128xf32>
    %197 = tpu.reciprocal %196 {approx = true} : vector<4x1x128xf32> -> vector<4x1x128xf32>
    %198 = vector.broadcast %197 : vector<4x1x128xf32> to vector<4x8x128xf32>
    %199 = arith.mulf %194, %198 : vector<4x8x128xf32>
    %cst_92 = arith.constant 9.99999993E-9 : f32
    %200 = vector.broadcast %cst_92 : f32 to vector<4x8x128xf32>
    %201 = arith.addf %199, %200 : vector<4x8x128xf32>
    %cst_93 = arith.constant dense<0.000000e+00> : vector<4x8xf32>
    %202 = vector.multi_reduction <add>, %201, %cst_93 [2] : vector<4x8x128xf32> to vector<4x8xf32>
    %203 = vector.shape_cast %202 : vector<4x8xf32> to vector<4x8x1xf32>
    %204 = tpu.reciprocal %203 : vector<4x8x1xf32> -> vector<4x8x1xf32>
    %205 = vector.broadcast %204 : vector<4x8x1xf32> to vector<4x8x128xf32>
    %206 = arith.mulf %201, %205 : vector<4x8x128xf32>
    %207 = arith.truncf %206 : vector<4x8x128xf32> to vector<4x8x128xbf16>
    %c0_94 = arith.constant 0 : index
    %c0_95 = arith.constant 0 : index
    %c0_96 = arith.constant 0 : index
    %208 = vector.load %arg22[%c0_94, %c0_95, %c0_96] : memref<4x128x128xbf16, #tpu.memory_space<vmem>>, vector<4x128x128xbf16>
    "tpu.trace_start"() <{level = 10 : i32, message = "bkn,bnd->bkd"}> : () -> ()
    %cst_97 = arith.constant dense<0.000000e+00> : vector<4x8x128xf32>
    %209 = tpu.matmul %207, %208, %cst_97 {dimension_numbers = #tpu.dot_dimension_numbers<[2], [1], [1], [2], [0, 0, 0, 1, 1, 2], [0], [0]>} : vector<4x8x128xbf16>, vector<4x128x128xbf16>, vector<4x8x128xf32> -> vector<4x8x128xf32>
    "tpu.trace_stop"() : () -> ()
    %210 = vector.shape_cast %209 : vector<4x8x128xf32> to vector<32x128xf32>
    %211 = tpu.concatenate %210, %160 in 1 : vector<32x128xf32>, vector<32x128xf32> -> vector<32x256xf32>
    %212 = arith.truncf %211 : vector<32x256xf32> to vector<32x256xbf16>
    %c0_98 = arith.constant 0 : index
    %c0_99 = arith.constant 0 : index
    %213 = vector.load %arg11[%c0_98, %c0_99] : memref<256x512xbf16, #tpu.memory_space<vmem>>, vector<256x512xbf16>
    %cst_100 = arith.constant dense<0.000000e+00> : vector<32x512xf32>
    %214 = tpu.matmul %212, %213, %cst_100 {dimension_numbers = #tpu.dot_dimension_numbers<[1], [0], [0], [1], [0, 0, 1, 1], [], []>} : vector<32x256xbf16>, vector<256x512xbf16>, vector<32x512xf32> -> vector<32x512xf32>
    %215 = vector.broadcast %45 : vector<1x512xf32> to vector<32x512xf32>
    %216 = arith.addf %214, %215 : vector<32x512xf32>
    %217 = vector.extract_strided_slice %216 {offsets = [0, 0], sizes = [32, 128], strides = [1, 1]} : vector<32x512xf32> to vector<32x128xf32>
    %218 = arith.negf %217 : vector<32x128xf32>
    %219 = math.exp %218 : vector<32x128xf32>
    %cst_101 = arith.constant 1.000000e+00 : f32
    %220 = vector.broadcast %cst_101 : f32 to vector<32x128xf32>
    %221 = arith.addf %220, %219 : vector<32x128xf32>
    %222 = arith.divf %220, %221 : vector<32x128xf32>
    %223 = vector.extract_strided_slice %216 {offsets = [0, 128], sizes = [32, 128], strides = [1, 1]} : vector<32x512xf32> to vector<32x128xf32>
    %224 = arith.negf %223 : vector<32x128xf32>
    %225 = math.exp %224 : vector<32x128xf32>
    %cst_102 = arith.constant 1.000000e+00 : f32
    %226 = vector.broadcast %cst_102 : f32 to vector<32x128xf32>
    %227 = arith.addf %226, %225 : vector<32x128xf32>
    %228 = arith.divf %226, %227 : vector<32x128xf32>
    %229 = vector.extract_strided_slice %216 {offsets = [0, 256], sizes = [32, 128], strides = [1, 1]} : vector<32x512xf32> to vector<32x128xf32>
    %230 = vector.extract_strided_slice %216 {offsets = [0, 384], sizes = [32, 128], strides = [1, 1]} : vector<32x512xf32> to vector<32x128xf32>
    %231 = arith.mulf %222, %230 : vector<32x128xf32>
    %232 = arith.addf %229, %231 : vector<32x128xf32>
    %233 = math.tanh %232 : vector<32x128xf32>
    %cst_103 = arith.constant 1.000000e+00 : f32
    %234 = vector.broadcast %cst_103 : f32 to vector<32x128xf32>
    %235 = arith.subf %234, %228 : vector<32x128xf32>
    %236 = arith.mulf %235, %233 : vector<32x128xf32>
    %237 = arith.mulf %228, %160 : vector<32x128xf32>
    %238 = arith.addf %236, %237 : vector<32x128xf32>
    %cst_104 = arith.constant dense<0.000000e+00> : vector<32xf32>
    %239 = vector.multi_reduction <add>, %238, %cst_104 [1] : vector<32x128xf32> to vector<32xf32>
    %240 = vector.shape_cast %239 : vector<32xf32> to vector<32x1xf32>
    %cst_105 = arith.constant 1.280000e+02 : f32
    %241 = vector.broadcast %cst_105 : f32 to vector<32x1xf32>
    %242 = arith.divf %240, %241 : vector<32x1xf32>
    %243 = vector.broadcast %242 : vector<32x1xf32> to vector<32x128xf32>
    %244 = arith.subf %238, %243 : vector<32x128xf32>
    %245 = arith.mulf %244, %244 : vector<32x128xf32>
    %cst_106 = arith.constant dense<0.000000e+00> : vector<32xf32>
    %246 = vector.multi_reduction <add>, %245, %cst_106 [1] : vector<32x128xf32> to vector<32xf32>
    %247 = vector.shape_cast %246 : vector<32xf32> to vector<32x1xf32>
    %cst_107 = arith.constant 1.280000e+02 : f32
    %248 = vector.broadcast %cst_107 : f32 to vector<32x1xf32>
    %249 = arith.divf %247, %248 : vector<32x1xf32>
    %cst_108 = arith.constant 9.99999974E-6 : f32
    %250 = vector.broadcast %cst_108 : f32 to vector<32x1xf32>
    %251 = arith.addf %249, %250 : vector<32x1xf32>
    %252 = math.rsqrt %251 : vector<32x1xf32>
    %253 = vector.broadcast %252 : vector<32x1xf32> to vector<32x128xf32>
    %254 = arith.mulf %244, %253 : vector<32x128xf32>
    %255 = vector.broadcast %42 : vector<1x128xf32> to vector<32x128xf32>
    %256 = arith.mulf %254, %255 : vector<32x128xf32>
    %257 = vector.broadcast %43 : vector<1x128xf32> to vector<32x128xf32>
    %258 = arith.addf %256, %257 : vector<32x128xf32>
    %259 = arith.truncf %258 : vector<32x128xf32> to vector<32x128xbf16>
    %c0_109 = arith.constant 0 : index
    %c0_110 = arith.constant 0 : index
    %260 = vector.load %arg15[%c0_109, %c0_110] : memref<128x128xbf16, #tpu.memory_space<vmem>>, vector<128x128xbf16>
    %cst_111 = arith.constant dense<0.000000e+00> : vector<32x128xf32>
    %261 = tpu.matmul %259, %260, %cst_111 {dimension_numbers = #tpu.dot_dimension_numbers<[1], [0], [0], [1], [0, 0, 1, 1], [], []>} : vector<32x128xbf16>, vector<128x128xbf16>, vector<32x128xf32> -> vector<32x128xf32>
    %262 = vector.broadcast %46 : vector<1x128xf32> to vector<32x128xf32>
    %263 = arith.addf %261, %262 : vector<32x128xf32>
    %cst_112 = arith.constant 0.000000e+00 : f32
    %264 = vector.broadcast %cst_112 : f32 to vector<32x128xf32>
    %265 = arith.maximumf %263, %264 : vector<32x128xf32>
    %266 = arith.truncf %265 : vector<32x128xf32> to vector<32x128xbf16>
    %c0_113 = arith.constant 0 : index
    %c0_114 = arith.constant 0 : index
    %267 = vector.load %arg17[%c0_113, %c0_114] : memref<128x128xbf16, #tpu.memory_space<vmem>>, vector<128x128xbf16>
    %cst_115 = arith.constant dense<0.000000e+00> : vector<32x128xf32>
    %268 = tpu.matmul %266, %267, %cst_115 {dimension_numbers = #tpu.dot_dimension_numbers<[1], [0], [0], [1], [0, 0, 1, 1], [], []>} : vector<32x128xbf16>, vector<128x128xbf16>, vector<32x128xf32> -> vector<32x128xf32>
    %269 = vector.broadcast %47 : vector<1x128xf32> to vector<32x128xf32>
    %270 = arith.addf %268, %269 : vector<32x128xf32>
    %271 = arith.addf %238, %270 : vector<32x128xf32>
    %cst_116 = arith.constant dense<0.000000e+00> : vector<32xf32>
    %272 = vector.multi_reduction <add>, %271, %cst_116 [1] : vector<32x128xf32> to vector<32xf32>
    %273 = vector.shape_cast %272 : vector<32xf32> to vector<32x1xf32>
    %cst_117 = arith.constant 1.280000e+02 : f32
    %274 = vector.broadcast %cst_117 : f32 to vector<32x1xf32>
    %275 = arith.divf %273, %274 : vector<32x1xf32>
    %276 = vector.broadcast %275 : vector<32x1xf32> to vector<32x128xf32>
    %277 = arith.subf %271, %276 : vector<32x128xf32>
    %278 = arith.mulf %277, %277 : vector<32x128xf32>
    %cst_118 = arith.constant dense<0.000000e+00> : vector<32xf32>
    %279 = vector.multi_reduction <add>, %278, %cst_118 [1] : vector<32x128xf32> to vector<32xf32>
    %280 = vector.shape_cast %279 : vector<32xf32> to vector<32x1xf32>
    %cst_119 = arith.constant 1.280000e+02 : f32
    %281 = vector.broadcast %cst_119 : f32 to vector<32x1xf32>
    %282 = arith.divf %280, %281 : vector<32x1xf32>
    %cst_120 = arith.constant 9.99999974E-6 : f32
    %283 = vector.broadcast %cst_120 : f32 to vector<32x1xf32>
    %284 = arith.addf %282, %283 : vector<32x1xf32>
    %285 = math.rsqrt %284 : vector<32x1xf32>
    %286 = vector.broadcast %285 : vector<32x1xf32> to vector<32x128xf32>
    %287 = arith.mulf %277, %286 : vector<32x128xf32>
    %288 = vector.broadcast %40 : vector<1x128xf32> to vector<32x128xf32>
    %289 = arith.mulf %287, %288 : vector<32x128xf32>
    %290 = vector.broadcast %41 : vector<1x128xf32> to vector<32x128xf32>
    %291 = arith.addf %289, %290 : vector<32x128xf32>
    %292 = arith.truncf %291 : vector<32x128xf32> to vector<32x128xbf16>
    %c0_121 = arith.constant 0 : index
    %c0_122 = arith.constant 0 : index
    %293 = vector.load %arg7[%c0_121, %c0_122] : memref<128x128xbf16, #tpu.memory_space<vmem>>, vector<128x128xbf16>
    %cst_123 = arith.constant dense<0.000000e+00> : vector<32x128xf32>
    %294 = tpu.matmul %292, %293, %cst_123 {dimension_numbers = #tpu.dot_dimension_numbers<[1], [0], [0], [1], [0, 0, 1, 1], [], []>} : vector<32x128xbf16>, vector<128x128xbf16>, vector<32x128xf32> -> vector<32x128xf32>
    %295 = vector.broadcast %44 : vector<1x128xf32> to vector<32x128xf32>
    %296 = arith.addf %294, %295 : vector<32x128xf32>
    %297 = arith.truncf %296 : vector<32x128xf32> to vector<32x128xbf16>
    %298 = vector.shape_cast %297 : vector<32x128xbf16> to vector<4x8x128xbf16>
    %c0_124 = arith.constant 0 : index
    %c0_125 = arith.constant 0 : index
    %c0_126 = arith.constant 0 : index
    %299 = vector.load %arg21[%c0_124, %c0_125, %c0_126] : memref<4x128x128xbf16, #tpu.memory_space<vmem>>, vector<4x128x128xbf16>
    "tpu.trace_start"() <{level = 10 : i32, message = "bkd,bdn->bkn"}> : () -> ()
    %cst_127 = arith.constant dense<0.000000e+00> : vector<4x8x128xf32>
    %300 = tpu.matmul %298, %299, %cst_127 {dimension_numbers = #tpu.dot_dimension_numbers<[2], [1], [1], [2], [0, 0, 0, 1, 1, 2], [0], [0]>} : vector<4x8x128xbf16>, vector<4x128x128xbf16>, vector<4x8x128xf32> -> vector<4x8x128xf32>
    "tpu.trace_stop"() : () -> ()
    %cst_128 = arith.constant dense<0xFF800000> : vector<4x128xf32>
    %301 = vector.multi_reduction <maximumf>, %300, %cst_128 [1] : vector<4x8x128xf32> to vector<4x128xf32>
    %302 = vector.shape_cast %301 : vector<4x128xf32> to vector<4x1x128xf32>
    %303 = vector.broadcast %302 : vector<4x1x128xf32> to vector<4x8x128xf32>
    %304 = arith.subf %300, %303 : vector<4x8x128xf32>
    %305 = math.exp %304 : vector<4x8x128xf32>
    %cst_129 = arith.constant dense<0.000000e+00> : vector<4x128xf32>
    %306 = vector.multi_reduction <add>, %305, %cst_129 [1] : vector<4x8x128xf32> to vector<4x128xf32>
    %307 = vector.shape_cast %306 : vector<4x128xf32> to vector<4x1x128xf32>
    %308 = tpu.reciprocal %307 {approx = true} : vector<4x1x128xf32> -> vector<4x1x128xf32>
    %309 = vector.broadcast %308 : vector<4x1x128xf32> to vector<4x8x128xf32>
    %310 = arith.mulf %305, %309 : vector<4x8x128xf32>
    %cst_130 = arith.constant 9.99999993E-9 : f32
    %311 = vector.broadcast %cst_130 : f32 to vector<4x8x128xf32>
    %312 = arith.addf %310, %311 : vector<4x8x128xf32>
    %cst_131 = arith.constant dense<0.000000e+00> : vector<4x8xf32>
    %313 = vector.multi_reduction <add>, %312, %cst_131 [2] : vector<4x8x128xf32> to vector<4x8xf32>
    %314 = vector.shape_cast %313 : vector<4x8xf32> to vector<4x8x1xf32>
    %315 = tpu.reciprocal %314 : vector<4x8x1xf32> -> vector<4x8x1xf32>
    %316 = vector.broadcast %315 : vector<4x8x1xf32> to vector<4x8x128xf32>
    %317 = arith.mulf %312, %316 : vector<4x8x128xf32>
    %318 = arith.truncf %317 : vector<4x8x128xf32> to vector<4x8x128xbf16>
    %c0_132 = arith.constant 0 : index
    %c0_133 = arith.constant 0 : index
    %c0_134 = arith.constant 0 : index
    %319 = vector.load %arg22[%c0_132, %c0_133, %c0_134] : memref<4x128x128xbf16, #tpu.memory_space<vmem>>, vector<4x128x128xbf16>
    "tpu.trace_start"() <{level = 10 : i32, message = "bkn,bnd->bkd"}> : () -> ()
    %cst_135 = arith.constant dense<0.000000e+00> : vector<4x8x128xf32>
    %320 = tpu.matmul %318, %319, %cst_135 {dimension_numbers = #tpu.dot_dimension_numbers<[2], [1], [1], [2], [0, 0, 0, 1, 1, 2], [0], [0]>} : vector<4x8x128xbf16>, vector<4x128x128xbf16>, vector<4x8x128xf32> -> vector<4x8x128xf32>
    "tpu.trace_stop"() : () -> ()
    %321 = vector.shape_cast %320 : vector<4x8x128xf32> to vector<32x128xf32>
    %322 = tpu.concatenate %321, %271 in 1 : vector<32x128xf32>, vector<32x128xf32> -> vector<32x256xf32>
    %323 = arith.truncf %322 : vector<32x256xf32> to vector<32x256xbf16>
    %c0_136 = arith.constant 0 : index
    %c0_137 = arith.constant 0 : index
    %324 = vector.load %arg11[%c0_136, %c0_137] : memref<256x512xbf16, #tpu.memory_space<vmem>>, vector<256x512xbf16>
    %cst_138 = arith.constant dense<0.000000e+00> : vector<32x512xf32>
    %325 = tpu.matmul %323, %324, %cst_138 {dimension_numbers = #tpu.dot_dimension_numbers<[1], [0], [0], [1], [0, 0, 1, 1], [], []>} : vector<32x256xbf16>, vector<256x512xbf16>, vector<32x512xf32> -> vector<32x512xf32>
    %326 = vector.broadcast %45 : vector<1x512xf32> to vector<32x512xf32>
    %327 = arith.addf %325, %326 : vector<32x512xf32>
    %328 = vector.extract_strided_slice %327 {offsets = [0, 0], sizes = [32, 128], strides = [1, 1]} : vector<32x512xf32> to vector<32x128xf32>
    %329 = arith.negf %328 : vector<32x128xf32>
    %330 = math.exp %329 : vector<32x128xf32>
    %cst_139 = arith.constant 1.000000e+00 : f32
    %331 = vector.broadcast %cst_139 : f32 to vector<32x128xf32>
    %332 = arith.addf %331, %330 : vector<32x128xf32>
    %333 = arith.divf %331, %332 : vector<32x128xf32>
    %334 = vector.extract_strided_slice %327 {offsets = [0, 128], sizes = [32, 128], strides = [1, 1]} : vector<32x512xf32> to vector<32x128xf32>
    %335 = arith.negf %334 : vector<32x128xf32>
    %336 = math.exp %335 : vector<32x128xf32>
    %cst_140 = arith.constant 1.000000e+00 : f32
    %337 = vector.broadcast %cst_140 : f32 to vector<32x128xf32>
    %338 = arith.addf %337, %336 : vector<32x128xf32>
    %339 = arith.divf %337, %338 : vector<32x128xf32>
    %340 = vector.extract_strided_slice %327 {offsets = [0, 256], sizes = [32, 128], strides = [1, 1]} : vector<32x512xf32> to vector<32x128xf32>
    %341 = vector.extract_strided_slice %327 {offsets = [0, 384], sizes = [32, 128], strides = [1, 1]} : vector<32x512xf32> to vector<32x128xf32>
    %342 = arith.mulf %333, %341 : vector<32x128xf32>
    %343 = arith.addf %340, %342 : vector<32x128xf32>
    %344 = math.tanh %343 : vector<32x128xf32>
    %cst_141 = arith.constant 1.000000e+00 : f32
    %345 = vector.broadcast %cst_141 : f32 to vector<32x128xf32>
    %346 = arith.subf %345, %339 : vector<32x128xf32>
    %347 = arith.mulf %346, %344 : vector<32x128xf32>
    %348 = arith.mulf %339, %271 : vector<32x128xf32>
    %349 = arith.addf %347, %348 : vector<32x128xf32>
    %cst_142 = arith.constant dense<0.000000e+00> : vector<32xf32>
    %350 = vector.multi_reduction <add>, %349, %cst_142 [1] : vector<32x128xf32> to vector<32xf32>
    %351 = vector.shape_cast %350 : vector<32xf32> to vector<32x1xf32>
    %cst_143 = arith.constant 1.280000e+02 : f32
    %352 = vector.broadcast %cst_143 : f32 to vector<32x1xf32>
    %353 = arith.divf %351, %352 : vector<32x1xf32>
    %354 = vector.broadcast %353 : vector<32x1xf32> to vector<32x128xf32>
    %355 = arith.subf %349, %354 : vector<32x128xf32>
    %356 = arith.mulf %355, %355 : vector<32x128xf32>
    %cst_144 = arith.constant dense<0.000000e+00> : vector<32xf32>
    %357 = vector.multi_reduction <add>, %356, %cst_144 [1] : vector<32x128xf32> to vector<32xf32>
    %358 = vector.shape_cast %357 : vector<32xf32> to vector<32x1xf32>
    %cst_145 = arith.constant 1.280000e+02 : f32
    %359 = vector.broadcast %cst_145 : f32 to vector<32x1xf32>
    %360 = arith.divf %358, %359 : vector<32x1xf32>
    %cst_146 = arith.constant 9.99999974E-6 : f32
    %361 = vector.broadcast %cst_146 : f32 to vector<32x1xf32>
    %362 = arith.addf %360, %361 : vector<32x1xf32>
    %363 = math.rsqrt %362 : vector<32x1xf32>
    %364 = vector.broadcast %363 : vector<32x1xf32> to vector<32x128xf32>
    %365 = arith.mulf %355, %364 : vector<32x128xf32>
    %366 = vector.broadcast %42 : vector<1x128xf32> to vector<32x128xf32>
    %367 = arith.mulf %365, %366 : vector<32x128xf32>
    %368 = vector.broadcast %43 : vector<1x128xf32> to vector<32x128xf32>
    %369 = arith.addf %367, %368 : vector<32x128xf32>
    %370 = arith.truncf %369 : vector<32x128xf32> to vector<32x128xbf16>
    %c0_147 = arith.constant 0 : index
    %c0_148 = arith.constant 0 : index
    %371 = vector.load %arg15[%c0_147, %c0_148] : memref<128x128xbf16, #tpu.memory_space<vmem>>, vector<128x128xbf16>
    %cst_149 = arith.constant dense<0.000000e+00> : vector<32x128xf32>
    %372 = tpu.matmul %370, %371, %cst_149 {dimension_numbers = #tpu.dot_dimension_numbers<[1], [0], [0], [1], [0, 0, 1, 1], [], []>} : vector<32x128xbf16>, vector<128x128xbf16>, vector<32x128xf32> -> vector<32x128xf32>
    %373 = vector.broadcast %46 : vector<1x128xf32> to vector<32x128xf32>
    %374 = arith.addf %372, %373 : vector<32x128xf32>
    %cst_150 = arith.constant 0.000000e+00 : f32
    %375 = vector.broadcast %cst_150 : f32 to vector<32x128xf32>
    %376 = arith.maximumf %374, %375 : vector<32x128xf32>
    %377 = arith.truncf %376 : vector<32x128xf32> to vector<32x128xbf16>
    %c0_151 = arith.constant 0 : index
    %c0_152 = arith.constant 0 : index
    %378 = vector.load %arg17[%c0_151, %c0_152] : memref<128x128xbf16, #tpu.memory_space<vmem>>, vector<128x128xbf16>
    %cst_153 = arith.constant dense<0.000000e+00> : vector<32x128xf32>
    %379 = tpu.matmul %377, %378, %cst_153 {dimension_numbers = #tpu.dot_dimension_numbers<[1], [0], [0], [1], [0, 0, 1, 1], [], []>} : vector<32x128xbf16>, vector<128x128xbf16>, vector<32x128xf32> -> vector<32x128xf32>
    %380 = vector.broadcast %47 : vector<1x128xf32> to vector<32x128xf32>
    %381 = arith.addf %379, %380 : vector<32x128xf32>
    %382 = arith.addf %349, %381 : vector<32x128xf32>
    %383 = vector.shape_cast %382 : vector<32x128xf32> to vector<4x8x128xf32>
    %c0_154 = arith.constant 0 : index
    %c0_155 = arith.constant 0 : index
    %c0_156 = arith.constant 0 : index
    %384 = vector.load %arg19[%c0_154, %c0_155, %c0_156] : memref<4x8x128xf32, #tpu.memory_space<vmem>>, vector<4x8x128xf32>
    tpu.vector_store %arg19[%c0_154, %c0_155, %c0_156], %383 {strides = array<i32>} : memref<4x8x128xf32, #tpu.memory_space<vmem>>, vector<4x8x128xf32>,
    %c0_157 = arith.constant 0 : index
    %c0_158 = arith.constant 0 : index
    %c0_159 = arith.constant 0 : index
    %385 = vector.load %arg20[%c0_157, %c0_158, %c0_159] : memref<4x8x128xf32, #tpu.memory_space<vmem>>, vector<4x8x128xf32>
    tpu.vector_store %arg20[%c0_157, %c0_158, %c0_159], %312 {strides = array<i32>} : memref<4x8x128xf32, #tpu.memory_space<vmem>>, vector<4x8x128xf32>,
    return
  }
  func.func @transform_0(%arg0: i32) -> (i32, i32, i32) {
    %c0_i32 = arith.constant 0 : i32
    %c0_i32_0 = arith.constant 0 : i32
    %c0_i32_1 = arith.constant 0 : i32
    return %arg0, %c0_i32, %c0_i32_0 : i32, i32, i32
  }
  func.func @transform_1(%arg0: i32) -> (i32, i32, i32) {
    %c0_i32 = arith.constant 0 : i32
    %c0_i32_0 = arith.constant 0 : i32
    %c0_i32_1 = arith.constant 0 : i32
    return %arg0, %c0_i32, %c0_i32_0 : i32, i32, i32
  }
  func.func @transform_2(%arg0: i32) -> (i32, i32) {
    %c0_i32 = arith.constant 0 : i32
    %c0_i32_0 = arith.constant 0 : i32
    %c0_i32_1 = arith.constant 0 : i32
    return %c0_i32, %c0_i32_0 : i32, i32
  }
  func.func @transform_3(%arg0: i32) -> (i32, i32) {
    %c0_i32 = arith.constant 0 : i32
    %c0_i32_0 = arith.constant 0 : i32
    %c0_i32_1 = arith.constant 0 : i32
    return %c0_i32, %c0_i32_0 : i32, i32
  }
  func.func @transform_4(%arg0: i32) -> (i32, i32) {
    %c0_i32 = arith.constant 0 : i32
    %c0_i32_0 = arith.constant 0 : i32
    %c0_i32_1 = arith.constant 0 : i32
    return %c0_i32, %c0_i32_0 : i32, i32
  }
  func.func @transform_5(%arg0: i32) -> (i32, i32) {
    %c0_i32 = arith.constant 0 : i32
    %c0_i32_0 = arith.constant 0 : i32
    %c0_i32_1 = arith.constant 0 : i32
    return %c0_i32, %c0_i32_0 : i32, i32
  }
  func.func @transform_6(%arg0: i32) -> (i32, i32) {
    %c0_i32 = arith.constant 0 : i32
    %c0_i32_0 = arith.constant 0 : i32
    %c0_i32_1 = arith.constant 0 : i32
    return %c0_i32, %c0_i32_0 : i32, i32
  }
  func.func @transform_7(%arg0: i32) -> (i32, i32) {
    %c0_i32 = arith.constant 0 : i32
    %c0_i32_0 = arith.constant 0 : i32
    %c0_i32_1 = arith.constant 0 : i32
    return %c0_i32, %c0_i32_0 : i32, i32
  }
  func.func @transform_8(%arg0: i32) -> (i32, i32) {
    %c0_i32 = arith.constant 0 : i32
    %c0_i32_0 = arith.constant 0 : i32
    %c0_i32_1 = arith.constant 0 : i32
    return %c0_i32, %c0_i32_0 : i32, i32
  }
  func.func @transform_9(%arg0: i32) -> (i32, i32) {
    %c0_i32 = arith.constant 0 : i32
    %c0_i32_0 = arith.constant 0 : i32
    %c0_i32_1 = arith.constant 0 : i32
    return %c0_i32, %c0_i32_0 : i32, i32
  }
  func.func @transform_10(%arg0: i32) -> (i32, i32) {
    %c0_i32 = arith.constant 0 : i32
    %c0_i32_0 = arith.constant 0 : i32
    %c0_i32_1 = arith.constant 0 : i32
    return %c0_i32, %c0_i32_0 : i32, i32
  }
  func.func @transform_11(%arg0: i32) -> (i32, i32) {
    %c0_i32 = arith.constant 0 : i32
    %c0_i32_0 = arith.constant 0 : i32
    %c0_i32_1 = arith.constant 0 : i32
    return %c0_i32, %c0_i32_0 : i32, i32
  }
  func.func @transform_12(%arg0: i32) -> (i32, i32) {
    %c0_i32 = arith.constant 0 : i32
    %c0_i32_0 = arith.constant 0 : i32
    %c0_i32_1 = arith.constant 0 : i32
    return %c0_i32, %c0_i32_0 : i32, i32
  }
  func.func @transform_13(%arg0: i32) -> (i32, i32) {
    %c0_i32 = arith.constant 0 : i32
    %c0_i32_0 = arith.constant 0 : i32
    %c0_i32_1 = arith.constant 0 : i32
    return %c0_i32, %c0_i32_0 : i32, i32
  }
  func.func @transform_14(%arg0: i32) -> (i32, i32) {
    %c0_i32 = arith.constant 0 : i32
    %c0_i32_0 = arith.constant 0 : i32
    %c0_i32_1 = arith.constant 0 : i32
    return %c0_i32, %c0_i32_0 : i32, i32
  }
  func.func @transform_15(%arg0: i32) -> (i32, i32) {
    %c0_i32 = arith.constant 0 : i32
    %c0_i32_0 = arith.constant 0 : i32
    %c0_i32_1 = arith.constant 0 : i32
    return %c0_i32, %c0_i32_0 : i32, i32
  }
  func.func @transform_16(%arg0: i32) -> (i32, i32) {
    %c0_i32 = arith.constant 0 : i32
    %c0_i32_0 = arith.constant 0 : i32
    %c0_i32_1 = arith.constant 0 : i32
    return %c0_i32, %c0_i32_0 : i32, i32
  }
  func.func @transform_17(%arg0: i32) -> (i32, i32) {
    %c0_i32 = arith.constant 0 : i32
    %c0_i32_0 = arith.constant 0 : i32
    %c0_i32_1 = arith.constant 0 : i32
    return %c0_i32, %c0_i32_0 : i32, i32
  }
  func.func @transform_18(%arg0: i32) -> (i32, i32, i32) {
    %c0_i32 = arith.constant 0 : i32
    %c0_i32_0 = arith.constant 0 : i32
    %c0_i32_1 = arith.constant 0 : i32
    return %arg0, %c0_i32, %c0_i32_0 : i32, i32, i32
  }
  func.func @transform_19(%arg0: i32) -> (i32, i32, i32) {
    %c0_i32 = arith.constant 0 : i32
    %c0_i32_0 = arith.constant 0 : i32
    %c0_i32_1 = arith.constant 0 : i32
    return %arg0, %c0_i32, %c0_i32_0 : i32, i32, i32
  }
}

</mosaic_0001>

<bundles_post_ra>
// kernel: slot_attention.1
= control target key start
LH: loop header
LB: loop body
LE: loop exit
PB: predicated region body
PF: predicated region fallthrough
CT: control target
= control target key end

     0   :  { %s16781_s0 = inlined_call_operand.vmem [shape: bf16[4,128,128], index: 0, kind: input, shape index: {}]   ;;  %s16782_s1 = inlined_call_operand.hbm [shape: f32[4,8,128], index: 1, kind: input, shape index: {}]   ;;  %s16783_s2 = inlined_call_operand.vmem [shape: f32[1,128], index: 2, kind: input, shape index: {}]   ;;  %s16784_s3 = inlined_call_operand.vmem [shape: f32[1,128], index: 3, kind: input, shape index: {}]   ;;  %s16785_s4 = inlined_call_operand.vmem [shape: bf16[128,256], index: 4, kind: input, shape index: {}]   ;;  %s16786_s5 = inlined_call_operand.vmem [shape: f32[1,256], index: 5, kind: input, shape index: {}]   ;;  %s16787_s6 = inlined_call_operand.vmem [shape: bf16[128,128], index: 6, kind: input, shape index: {}]   ;;  %s16788_s7 = inlined_call_operand.vmem [shape: f32[1,128], index: 7, kind: input, shape index: {}]   ;;  %s16789_s8 = inlined_call_operand.vmem [shape: f32[1,128], index: 8, kind: input, shape index: {}]   ;;  %s16790_s9 = inlined_call_operand.vmem [shape: f32[1,128], index: 9, kind: input, shape index: {}]   ;;  %s16791_s10 = inlined_call_operand.vmem [shape: bf16[256,512], index: 10, kind: input, shape index: {}]   ;;  %s16792_s11 = inlined_call_operand.vmem [shape: f32[1,512], index: 11, kind: input, shape index: {}]   ;;  %s16793_s12 = inlined_call_operand.vmem [shape: f32[1,128], index: 12, kind: input, shape index: {}]   ;;  %s16794_s13 = inlined_call_operand.vmem [shape: f32[1,128], index: 13, kind: input, shape index: {}]   ;;  %s16795_s14 = inlined_call_operand.vmem [shape: bf16[128,128], index: 14, kind: input, shape index: {}]   ;;  %s16796_s15 = inlined_call_operand.vmem [shape: f32[1,128], index: 15, kind: input, shape index: {}]   ;;  %s16797_s16 = inlined_call_operand.hbm [shape: bf16[128,128], index: 16, kind: input, shape index: {}]   ;;  %s16798_s17 = inlined_call_operand.hbm [shape: f32[1,128], index: 17, kind: input, shape index: {}]   ;;  %s16799_s18 = inlined_call_operand.hbm [shape: f32[4,8,128], index: 18, kind: output, shape index: {0}]   ;;  %s16800_s19 = inlined_call_operand.hbm [shape: f32[4,8,128], index: 19, kind: output, shape index: {1}]  }
   0x1   :  { %16832 = sst [smem:[#allocation31_spill]] %s16781_s0 }
   0x2   :  { %16833 = sst [smem:[#allocation32_spill]] %s16782_s1 }
   0x3   :  { %16834 = sst [smem:[#allocation33_spill]] %s16783_s2 }
   0x4   :  { %16835 = sst [smem:[#allocation34_spill]] %s16784_s3 }
   0x5   :  { %25 = vsyncpa [#allocation5], 0 }
   0x6   :  { %26 = vsyncpa [#allocation8], 0 }
   0x7   :  { %27 = vsyncpa [#allocation6], 0  ;;  %s76_s20 = sshll.u32 %s16797_s16, 4  ;;  %s77_s20 = int_to_ptr.hbm [resolvable:$true] %s76_s20 }
   0x8   :  { %28 = vsyncpa [#allocation12], 0  ;;  %s12070_s21 = smov [#allocation7]   ;;  %s16836_s23 = sld [smem:[#allocation32_spill]] }
   0x9   :  { %s78_s1 = sshll.u32 %s12070_s21, 4  ;;  %s12071_s25 = smov 64   ;;  %s79_s1 = int_to_ptr.vmem [resolvable:$true] %s78_s1 }
   0xa   :  { %s12072_s3 = smov 4   ;;  %s12073_s26 = smov [#allocation4]  }
   0xb   :  { %84 = dma.hbm_to_vmem [thread:$0]  %s77_s20, 1024, %s79_s1, [#allocation8], %s12071_s25, %s12071_s25, %s12072_s3  }
   0xc   :  { %s37_s27 = sshll.u32 %s12073_s26, 4  ;;  %s12074_s28 = smov 128   ;;  %s38_s27 = int_to_ptr.vmem [resolvable:$true] %s37_s27 }
   0xd   :  { %s12075_s29 = smov 8   ;;  %s90_s30 = sshll.u32 %s16798_s17, 4  ;;  %s91_s30 = int_to_ptr.hbm [resolvable:$true] %s90_s30 }
   0xe   :  { %s35_s24 = sshll.u32 %s16836_s23, 4  ;;  %s12076_s21 = smov [#allocation9]   ;;  %s36_s24 = int_to_ptr.hbm [resolvable:$true] %s35_s24 }
   0xf   :  { %43 = dma.hbm_to_vmem [thread:$0]  %s36_s24, 512, %s38_s27, [#allocation5], %s12074_s28, %s12074_s28, %s12075_s29  }
  0x10   :  { %s92_s22 = sshll.u32 %s12076_s21, 4  ;;  %s93_s22 = int_to_ptr.vmem [resolvable:$true] %s92_s22 }
  0x11   :  { %95 = dma.hbm_to_vmem [thread:$0]  %s91_s30, 16, %s93_s22, [#allocation8]  }
  0x12   :  { %12062 = dma.done.wait [#allocation5], 512  }
  0x13   :  { %12063 = vsyncadd [#allocation5], 4294966784 }
  0x14   :  { %12064 = dma.done.wait [#allocation8], 1040  }
  0x15   :  { %12065 = vsyncadd [#allocation8], 4294966256  ;;  %s16837_s2 = sld [smem:[#allocation31_spill]]  ;;  %v12077_v11 = vmov 128.0   ;;  %v8430_v58 = vld [vmem:[%s16785_s4 + $0x70] sm:$0xf] }
  0x16   :  { %11548 = vrcp.f32 %v12077_v11  ;;  %v10299_v59 = vld [vmem:[%s16785_s4 + $0x74] sm:$0xf0]  ;;  %v10298_v60 = vld [vmem:[%s16785_s4 + $0x74] sm:$0xf]  ;;  %v8432_v62 = vld [vmem:[%s16785_s4 + $0x78] sm:$0xf0] }
  0x17   :  { %v8431_v61 = vor.u32 %v10299_v59, %v8430_v58  ;;  %v8435_v63 = vor.u32 %v10298_v60, %v8432_v62  ;;  %v8416_v11 = vld [vmem:[%s16785_s4 + $0x58] sm:$0xf0]  ;;  %v8374_v60 = vld [vmem:[%s16785_s4] sm:$0xf]  ;;  %s16842_s30 = sld [smem:[#allocation33_spill]]  ;;  %s8340_s26 = sshll.u32 %s16799_s18, 4  ;;  %s8341_s26 = int_to_ptr.hbm [resolvable:$true] %s8340_s26 }
  0x18   :  { %s16843_s23 = sld [smem:[#allocation34_spill]] }
  0x19   :  { %1793 = vmatpush.bf16.msra.mxu0 %v8431_v61  ;;  %1962 = vmatpush.bf16.msra.mxu1 %v8435_v63  ;;  %v10285_v61 = vld [vmem:[%s16785_s4 + $0x4] sm:$0xf0]  ;;  %v10284_v63 = vld [vmem:[%s16785_s4 + $0x4] sm:$0xf] }
  0x1a   :  { %v8375_v62 = vor.u32 %v10285_v61, %v8374_v60 }
  0x1b   :  { %v11204_v0 = vld [vmem:[%s16837_s2 + $0x8] sm:$0xff]   ;;  %v10757_v1 = vld [vmem:[%s16837_s2] sm:$0xff]   ;;  %v11205_v2 = vld [vmem:[%s16837_s2 + $0x10] sm:$0xff]  }
  0x1c   :  { %v10762_v3 = vunpack.c.l.bf16 %v11204_v0  ;;  %v10758_v4 = vunpack.c.l.bf16 %v10757_v1  ;;  %v10766_v5 = vunpack.c.l.bf16 %v11205_v2  ;;  %v10763_v6 = vunpack.c.h.bf16 %v11204_v0  ;;  %v12204_v9 = vld [vmem:[%s16837_s2 + $0x18] sm:$0xff]   ;;  %v11549_v12 = vpop.eup %11548  ;;  %v12236_v38 = vld [vmem:[%s16837_s2 + $0x20] sm:$0xff]   ;;  %v12251_v44 = vld [vmem:[%s16837_s2 + $0x28] sm:$0xff]  }
  0x1d   :  { %v10759_v7 = vunpack.c.h.bf16 %v10757_v1  ;;  %v10767_v8 = vunpack.c.h.bf16 %v11205_v2  ;;  %v10770_v10 = vunpack.c.l.bf16 %v12204_v9  ;;  %v367_v13 = vmul.f32 128.0, %v11549_v12  ;;  %v12267_v51 = vld [vmem:[%s16837_s2 + $0x30] sm:$0xff]   ;;  %v12283_v56 = vld [vmem:[%s16837_s2 + $0x38] sm:$0xff]   ;;  %v8422_v0 = vld [vmem:[%s16785_s4 + $0x60] sm:$0xf] }
  0x1e   :  { %242 = vadd.xlane.f32.xlu1 %v10762_v3  ;;  %238 = vadd.xlane.f32.xlu0 %v10758_v4  ;;  %vm371_vm0 = vweird.f32 %v11549_v12  ;;  %v10771_v29 = vunpack.c.h.bf16 %v12204_v9  ;;  %v10774_v40 = vunpack.c.l.bf16 %v12236_v38  ;;  %v10779_v46 = vunpack.c.h.bf16 %v12251_v44  ;;  %v10297_v1 = vld [vmem:[%s16785_s4 + $0x64] sm:$0xf0]  ;;  %v10296_v2 = vld [vmem:[%s16785_s4 + $0x64] sm:$0xf] }
  0x1f   :  { %246 = vadd.xlane.f32.xlu2 %v10766_v5  ;;  %v368_v14 = vsub.f32 1.0, %v367_v13  ;;  %v10775_v49 = vunpack.c.h.bf16 %v12236_v38  ;;  %v10782_v52 = vunpack.c.l.bf16 %v12267_v51  ;;  %v10778_v54 = vunpack.c.l.bf16 %v12251_v44  ;;  %v8406_v13 = vld [vmem:[%s16785_s4 + $0x40] sm:$0xf] }
  0x20   :  { %v10783_v55 = vunpack.c.h.bf16 %v12267_v51  ;;  %v10786_v57 = vunpack.c.l.bf16 %v12283_v56 }
  0x21   :  { %v369_v15 = vmul.f32 %v11549_v12, %v368_v14  ;;  %v10293_v14 = vld [vmem:[%s16785_s4 + $0x44] sm:$0xf0] }
  0x23   :  { %v370_v16 = vadd.f32 %v11549_v12, %v369_v15  ;;  %v10292_v15 = vld [vmem:[%s16785_s4 + $0x44] sm:$0xf] }
  0x25   :  { %v12207_v17 = vsel %vm371_vm0, %v11549_v12, %v370_v16  ;;  %v8407_v16 = vor.u32 %v10293_v14, %v8406_v13 }
  0x26   :  { %244 = vadd.xlane.f32.xlu1 %v10763_v6  ;;  %240 = vadd.xlane.f32.xlu0 %v10759_v7 }
  0x27   :  { %248 = vadd.xlane.f32.xlu2 %v10767_v8 }
  0x2f   :  { %250 = vadd.xlane.f32.xlu2 %v10770_v10 }
  0x91   :  { %v243_v18 = vpop.xlane.xlu1 %242  ;;  %v239_v19 = vpop.xlane.xlu0 %238 }
  0x92   :  { %v373_v20 = vmul.f32 %v12207_v17, %v239_v19  ;;  %v247_v22 = vpop.xlane.xlu2 %246  ;;  %v375_v32 = vmul.f32 %v12207_v17, %v243_v18  ;;  %v8408_v18 = vld [vmem:[%s16785_s4 + $0x48] sm:$0xf0] }
  0x93   :  { %v377_v31 = vmul.f32 %v12207_v17, %v247_v22  ;;  %v8411_v19 = vor.u32 %v10292_v15, %v8408_v18  ;;  %v10291_v22 = vld [vmem:[%s16785_s4 + $0x34] sm:$0xf0] }
  0x94   :  { %v12210_v21 = vsub.f32 %v10758_v4, %v373_v20  ;;  %v12231_v37 = vsub.f32 %v10762_v3, %v375_v32  ;;  %v8423_v3 = vor.u32 %v10297_v1, %v8422_v0  ;;  %v8424_v4 = vld [vmem:[%s16785_s4 + $0x68] sm:$0xf0]  ;;  %v8398_v20 = vld [vmem:[%s16785_s4 + $0x30] sm:$0xf]  ;;  %v10288_v32 = vld [vmem:[%s16785_s4 + $0x24] sm:$0xf] }
  0x95   :  { %v12229_v36 = vsub.f32 %v10766_v5, %v377_v31  ;;  %v8427_v5 = vor.u32 %v10296_v2, %v8424_v4  ;;  %v10289_v31 = vld [vmem:[%s16785_s4 + $0x24] sm:$0xf0]  ;;  %v8376_v0 = vld [vmem:[%s16785_s4 + $0x8] sm:$0xf0] }
  0x96   :  { %v501_v23 = vmul.f32 %v12210_v21, %v12210_v21  ;;  %v503_v42 = vmul.f32 %v12231_v37, %v12231_v37  ;;  %1794 = vmatpush.bf16.msra.mxu0 %v8423_v3  ;;  %v8379_v1 = vor.u32 %v10284_v63, %v8376_v0 }
  0x97   :  { %v505_v39 = vmul.f32 %v12229_v36, %v12229_v36  ;;  %1963 = vmatpush.bf16.msra.mxu1 %v8427_v5 }
  0x98   :  { %565 = vadd.xlane.f32.xlu0 %v501_v23  ;;  %v10290_v23 = vld [vmem:[%s16785_s4 + $0x34] sm:$0xf] }
  0x99   :  { %v245_v24 = vpop.xlane.xlu1 %244  ;;  %v241_v25 = vpop.xlane.xlu0 %240 }
  0x9a   :  { %v376_v26 = vmul.f32 %v12207_v17, %v245_v24  ;;  %v374_v27 = vmul.f32 %v12207_v17, %v241_v25  ;;  %v249_v35 = vpop.xlane.xlu2 %248  ;;  %v8399_v24 = vor.u32 %v10291_v22, %v8398_v20  ;;  %v8400_v25 = vld [vmem:[%s16785_s4 + $0x38] sm:$0xf0] }
  0x9b   :  { %v378_v41 = vmul.f32 %v12207_v17, %v249_v35 }
  0x9c   :  { %v12216_v28 = vsub.f32 %v10763_v6, %v376_v26  ;;  %v12219_v30 = vsub.f32 %v10759_v7, %v374_v27  ;;  %v8414_v6 = vld [vmem:[%s16785_s4 + $0x50] sm:$0xf]  ;;  %v10295_v7 = vld [vmem:[%s16785_s4 + $0x54] sm:$0xf0]  ;;  %v8403_v26 = vor.u32 %v10290_v23, %v8400_v25  ;;  %v8390_v27 = vld [vmem:[%s16785_s4 + $0x20] sm:$0xf] }
  0x9d   :  { %v12246_v43 = vsub.f32 %v10767_v8, %v378_v41  ;;  %v10294_v8 = vld [vmem:[%s16785_s4 + $0x54] sm:$0xf]  ;;  %v10287_v41 = vld [vmem:[%s16785_s4 + $0x14] sm:$0xf0] }
  0x9e   :  { %v504_v33 = vmul.f32 %v12216_v28, %v12216_v28  ;;  %v502_v34 = vmul.f32 %v12219_v30, %v12219_v30  ;;  %v8419_v12 = vor.u32 %v10294_v8, %v8416_v11 }
  0x9f   :  { %v506_v47 = vmul.f32 %v12246_v43, %v12246_v43 }
  0xa0   :  { %571 = vadd.xlane.f32.xlu2 %v504_v33  ;;  %252 = vadd.xlane.f32.xlu0 %v10771_v29  ;;  %v8391_v33 = vor.u32 %v10289_v31, %v8390_v27 }
  0xa1   :  { %567 = vadd.xlane.f32.xlu1 %v502_v34  ;;  %1964 = vmatpush.bf16.msra.mxu1 %v8419_v12  ;;  %v8392_v34 = vld [vmem:[%s16785_s4 + $0x28] sm:$0xf0] }
  0xa2   :  { %v251_v45 = vpop.xlane.xlu2 %250  ;;  %v8395_v35 = vor.u32 %v10288_v32, %v8392_v34 }
  0xa3   :  { %v379_v48 = vmul.f32 %v12207_v17, %v251_v45 }
  0xa5   :  { %v12260_v50 = vsub.f32 %v10770_v10, %v379_v48  ;;  %v8415_v10 = vor.u32 %v10295_v7, %v8414_v6  ;;  %1965 = vmatpush.bf16.msra.mxu1 %v8411_v19  ;;  %v8384_v48 = vld [vmem:[%s16785_s4 + $0x18] sm:$0xf0] }
  0xa7   :  { %v507_v53 = vmul.f32 %v12260_v50, %v12260_v50  ;;  %1795 = vmatpush.bf16.msra.mxu0 %v8415_v10 }
  0xa8   :  { %573 = vadd.xlane.f32.xlu2 %v505_v39  ;;  %254 = vadd.xlane.f32.xlu0 %v10774_v40  ;;  %v8382_v39 = vld [vmem:[%s16785_s4 + $0x10] sm:$0xf] }
  0xa9   :  { %569 = vadd.xlane.f32.xlu1 %v503_v42  ;;  %1966 = vmatpush.bf16.msra.mxu1 %v8403_v26  ;;  %v10286_v42 = vld [vmem:[%s16785_s4 + $0x14] sm:$0xf] }
  0xaa   :  { %v8387_v58 = vor.u32 %v10286_v42, %v8384_v48 }
  0xab   :  { %1796 = vmatpush.bf16.msra.mxu0 %v8407_v16 }
  0xad   :  { %1967 = vmatpush.bf16.msra.mxu1 %v8395_v35 }
  0xaf   :  { %1797 = vmatpush.bf16.msra.mxu0 %v8399_v24 }
  0xb0   :  { %260 = vadd.xlane.f32.xlu2 %v10779_v46  ;;  %575 = vadd.xlane.f32.xlu0 %v506_v47  ;;  %v8383_v47 = vor.u32 %v10287_v41, %v8382_v39 }
  0xb1   :  { %256 = vadd.xlane.f32.xlu1 %v10775_v49  ;;  %1968 = vmatpush.bf16.msra.mxu1 %v8387_v58 }
  0xb3   :  { %1798 = vmatpush.bf16.msra.mxu0 %v8391_v33 }
  0xb5   :  { %1969 = vmatpush.bf16.msra.mxu1 %v8379_v1 }
  0xb7   :  { %1799 = vmatpush.bf16.msra.mxu0 %v8383_v47 }
  0xb8   :  { %262 = vadd.xlane.f32.xlu2 %v10782_v52  ;;  %577 = vadd.xlane.f32.xlu0 %v507_v53 }
  0xb9   :  { %258 = vadd.xlane.f32.xlu1 %v10778_v54 }
  0xbb   :  { %1800 = vmatpush.bf16.msra.mxu0 %v8375_v62 }
  0xc0   :  { %264 = vadd.xlane.f32.xlu0 %v10783_v55 }
  0xc8   :  { %266 = vadd.xlane.f32.xlu0 %v10786_v57 }
 0x10b   :  { %v566_v45 = vpop.xlane.xlu0 %565 }
 0x10c   :  { %v693_v53 = vmul.f32 %v566_v45, %v12207_v17 }
 0x10e   :  { %v757_v59 = vadd.f32 1e-05, %v693_v53 }
 0x110   :  { %11550 = vrsqrt.f32 %v757_v59  ;;  %vm827_vm2 = vweird.f32 %v757_v59 }
 0x113   :  { %v572_v2 = vpop.xlane.xlu2 %571  ;;  %v253_v3 = vpop.xlane.xlu0 %252 }
 0x114   :  { %v696_v4 = vmul.f32 %v572_v2, %v12207_v17  ;;  %v568_v5 = vpop.xlane.xlu1 %567  ;;  %v380_v6 = vmul.f32 %v12207_v17, %v253_v3 }
 0x115   :  { %v694_v7 = vmul.f32 %v568_v5, %v12207_v17 }
 0x116   :  { %v11551_v8 = vpop.eup %11550  ;;  %v12388_v10 = vadd.f32 1e-05, %v696_v4  ;;  %v12392_v11 = vsub.f32 %v10771_v29, %v380_v6  ;;  %v10787_v4 = vunpack.c.h.bf16 %v12283_v56 }
 0x117   :  { %v822_v12 = vmul.f32 %v11551_v8, %v757_v59  ;;  %v758_v13 = vadd.f32 1e-05, %v694_v7  ;;  %vm828_vm1 = vweird.f32 %v11551_v8 }
 0x118   :  { %11552 = vrsqrt.f32 %v12388_v10  ;;  %v508_v14 = vmul.f32 %v12392_v11, %v12392_v11  ;;  %vm12415_vm5 = vmor %vm827_vm2, %vm828_vm1  ;;  %vm857_vm9 = vweird.f32 %v12388_v10 }
 0x119   :  { %v823_v15 = vmul.f32 %v11551_v8, %v822_v12  ;;  %11554 = vrsqrt.f32 %v758_v13  ;;  %vm837_vm3 = vweird.f32 %v758_v13 }
 0x11a   :  { %579 = vadd.xlane.f32.xlu1 %v508_v14 }
 0x11b   :  { %v824_v16 = vmul.f32 0.5, %v823_v15  ;;  %v574_v18 = vpop.xlane.xlu2 %573  ;;  %v255_v19 = vpop.xlane.xlu0 %254 }
 0x11c   :  { %v570_v20 = vpop.xlane.xlu1 %569  ;;  %v381_v22 = vmul.f32 %v12207_v17, %v255_v19  ;;  %v697_v32 = vmul.f32 %v574_v18, %v12207_v17  ;;  %v12469_v19 = vld [vmem:[%s16837_s2 + $0x40] sm:$0xff]  }
 0x11d   :  { %v695_v9 = vmul.f32 %v570_v20, %v12207_v17  ;;  %v825_v23 = vsub.f32 1.5, %v824_v16 }
 0x11e   :  { %v12399_v29 = vpop.eup %11552  ;;  %v12403_v24 = vsub.f32 %v10774_v40, %v381_v22  ;;  %v12420_v58 = vadd.f32 1e-05, %v697_v32 }
 0x11f   :  { %v11555_v25 = vpop.eup %11554  ;;  %v12405_v26 = vadd.f32 1e-05, %v695_v9  ;;  %v852_v31 = vmul.f32 %v12399_v29, %v12388_v10  ;;  %v826_v34 = vmul.f32 %v11551_v8, %v825_v23  ;;  %v12478_v9 = vld [vmem:[%s16843_s23] ss:$0 sm:$0xff]  ;;  %vm858_vm10 = vweird.f32 %v12399_v29 }
 0x120   :  { %v832_v27 = vmul.f32 %v11555_v25, %v758_v13  ;;  %v509_v33 = vmul.f32 %v12403_v24, %v12403_v24  ;;  %vm838_vm4 = vweird.f32 %v11555_v25  ;;  %vm12514_vm12 = vmor %vm857_vm9, %vm858_vm10  ;;  %vm867_vm15 = vweird.f32 %v12420_v58 }
 0x121   :  { %11556 = vrsqrt.f32 %v12405_v26  ;;  %v853_v53 = vmul.f32 %v12399_v29, %v852_v31  ;;  %v830_v63 = vsel %vm12415_vm5, %v11551_v8, %v826_v34  ;;  %vm12434_vm6 = vmor %vm837_vm3, %vm838_vm4  ;;  %vm847_vm7 = vweird.f32 %v12405_v26 }
 0x122   :  { %v833_v35 = vmul.f32 %v11555_v25, %v832_v27  ;;  %581 = vadd.xlane.f32.xlu1 %v509_v33  ;;  %v1461_v38 = vmul.f32 %v830_v63, %v12210_v21  ;;  %v10790_v34 = vunpack.c.l.bf16 %v12469_v19 }
 0x123   :  { %v261_v40 = vpop.xlane.xlu2 %260  ;;  %v576_v39 = vpop.xlane.xlu0 %575  ;;  %v854_v7 = vmul.f32 0.5, %v853_v53 }
 0x124   :  { %v834_v41 = vmul.f32 0.5, %v833_v35  ;;  %v384_v42 = vmul.f32 %v12207_v17, %v261_v40  ;;  %v257_v45 = vpop.xlane.xlu1 %256  ;;  %v698_v47 = vmul.f32 %v576_v39, %v12207_v17 }
 0x125   :  { %v382_v59 = vmul.f32 %v12207_v17, %v257_v45 }
 0x126   :  { %v835_v60 = vsub.f32 1.5, %v834_v41  ;;  %v12425_v61 = vsub.f32 %v10779_v46, %v384_v42  ;;  %v12427_v62 = vadd.f32 1e-05, %v698_v47 }
 0x127   :  { %v12431_v0 = vpop.eup %11556  ;;  %v12440_v2 = vsub.f32 %v10775_v49, %v382_v59  ;;  %v12455_v49 = vld [vmem:[%s16842_s30] ss:$0 sm:$0xff]  ;;  %v12525_v59 = vld [vmem:[%s16837_s2 + $0x48] sm:$0xff]  }
 0x128   :  { %v836_v3 = vmul.f32 %v11555_v25, %v835_v60  ;;  %v842_v46 = vmul.f32 %v12431_v0, %v12405_v26  ;;  %11558 = vrsqrt.f32 %v12427_v62  ;;  %v512_v5 = vmul.f32 %v12425_v61, %v12425_v61 }
 0x129   :  { %11560 = vrsqrt.f32 %v12420_v58  ;;  %v510_v6 = vmul.f32 %v12440_v2, %v12440_v2  ;;  %v1528_v22 = vmul.f32 %v12455_v49, %v1461_v38  ;;  %vm848_vm8 = vweird.f32 %v12431_v0 }
 0x12a   :  { %v843_v8 = vmul.f32 %v12431_v0, %v842_v46  ;;  %v840_v12 = vsel %vm12434_vm6, %v11555_v25, %v836_v3  ;;  %587 = vadd.xlane.f32.xlu0 %v512_v5  ;;  %268 = vadd.xlane.f32.xlu1 %v10787_v4  ;;  %v855_v25 = vsub.f32 1.5, %v854_v7  ;;  %vm12503_vm11 = vmor %vm847_vm7, %vm848_vm8  ;;  %v10795_v46 = vunpack.c.h.bf16 %v12525_v59 }
 0x12b   :  { %583 = vadd.xlane.f32.xlu2 %v510_v6  ;;  %v263_v13 = vpop.xlane.xlu2 %262  ;;  %v12460_v14 = vpop.xlane.xlu0 %577  ;;  %v1462_v15 = vmul.f32 %v840_v12, %v12219_v30  ;;  %v10791_v5 = vunpack.c.h.bf16 %v12469_v19  ;;  %v12553_v12 = vld [vmem:[%s16837_s2 + $0x50] sm:$0xff]   ;;  %vm877_vm13 = vweird.f32 %v12427_v62 }
 0x12c   :  { %v844_v16 = vmul.f32 0.5, %v843_v8  ;;  %v385_v21 = vmul.f32 %v12207_v17, %v263_v13  ;;  %v259_v18 = vpop.xlane.xlu1 %258  ;;  %v856_v41 = vmul.f32 %v12399_v29, %v855_v25 }
 0x12d   :  { %v383_v20 = vmul.f32 %v12207_v17, %v259_v18  ;;  %v1529_v30 = vmul.f32 %v12455_v49, %v1462_v15 }
 0x12e   :  { %v12480_v23 = vpop.eup %11558  ;;  %v845_v27 = vsub.f32 1.5, %v844_v16  ;;  %v12485_v31 = vsub.f32 %v10782_v52, %v385_v21  ;;  %v860_v3 = vsel %vm12514_vm12, %v12399_v29, %v856_v41  ;;  %v10798_v16 = vunpack.c.l.bf16 %v12553_v12 }
 0x12f   :  { %v12487_v32 = vpop.eup %11560  ;;  %v12492_v33 = vsub.f32 %v10778_v54, %v383_v20  ;;  %v872_v40 = vmul.f32 %v12480_v23, %v12427_v62  ;;  %v1595_v54 = vadd.f32 %v12478_v9, %v1528_v22  ;;  %v1596_v39 = vadd.f32 %v12478_v9, %v1529_v30 }
 0x130   :  { %v846_v35 = vmul.f32 %v12431_v0, %v845_v27  ;;  %v513_v52 = vmul.f32 %v12485_v31, %v12485_v31  ;;  %v862_v42 = vmul.f32 %v12487_v32, %v12420_v58  ;;  %v1464_v7 = vmul.f32 %v860_v3, %v12216_v28 }
 0x131   :  { %v511_v44 = vmul.f32 %v12492_v33, %v12492_v33  ;;  %v1659_v26 = vpack.c.bf16 %v1596_v39, %v1595_v54  ;;  %v873_v48 = vmul.f32 %v12480_v23, %v872_v40  ;;  %vm878_vm14 = vweird.f32 %v12480_v23 }
 0x132   :  { %589 = vadd.xlane.f32.xlu0 %v513_v52  ;;  %270 = vadd.xlane.f32.xlu1 %v10790_v34  ;;  %v850_v60 = vsel %vm12503_vm11, %v12431_v0, %v846_v35  ;;  %v863_v63 = vmul.f32 %v12487_v32, %v862_v42  ;;  %v1531_v28 = vmul.f32 %v12455_v49, %v1464_v7  ;;  %v10794_v21 = vunpack.c.l.bf16 %v12525_v59  ;;  %vm879_vm1 = vmor %vm877_vm13, %vm878_vm14 }
 0x133   :  { %585 = vadd.xlane.f32.xlu2 %v511_v44  ;;  %v265_v47 = vpop.xlane.xlu0 %264  ;;  %1801 = vmatmul.bf16.vlgmr.msra.gmra.mxu0 %v1659_v26  ;;  %v1463_v6 = vmul.f32 %v850_v60, %v12231_v37  ;;  %v874_v38 = vmul.f32 0.5, %v873_v48  ;;  %vm868_vm0 = vweird.f32 %v12487_v32  ;;  %v10799_v35 = vunpack.c.h.bf16 %v12553_v12 }
 0x134   :  { %v386_v53 = vmul.f32 %v12207_v17, %v265_v47  ;;  %1970 = vmatmul.bf16.vlgmr.msra.gmra.mxu1 %v1659_v26  ;;  %v864_v8 = vmul.f32 0.5, %v863_v63  ;;  %v1598_v22 = vadd.f32 %v12478_v9, %v1531_v28  ;;  %vm869_vm2 = vmor %vm867_vm15, %vm868_vm0 }
 0x135   :  { %v875_v29 = vsub.f32 1.5, %v874_v38 }
 0x136   :  { %v12533_v1 = vsub.f32 %v10783_v55, %v386_v53  ;;  %v1530_v55 = vmul.f32 %v12455_v49, %v1463_v6  ;;  %v865_v13 = vsub.f32 1.5, %v864_v8 }
 0x137   :  { %v876_v20 = vmul.f32 %v12480_v23, %v875_v29 }
 0x138   :  { %v514_v0 = vmul.f32 %v12533_v1, %v12533_v1  ;;  %v1597_v18 = vadd.f32 %v12478_v9, %v1530_v55 }
 0x139   :  { %v880_v30 = vsel %vm879_vm1, %v12480_v23, %v876_v20  ;;  %v12588_v23 = vld [vmem:[%s16837_s2 + $0x58] sm:$0xff]  }
 0x13a   :  { %276 = vadd.xlane.f32.xlu0 %v10795_v46  ;;  %591 = vadd.xlane.f32.xlu1 %v514_v0  ;;  %v1660_v58 = vpack.c.bf16 %v1598_v22, %v1597_v18  ;;  %v1466_v27 = vmul.f32 %v880_v30, %v12246_v43  ;;  %v10802_v43 = vunpack.c.l.bf16 %v12588_v23  ;;  %v10803_v19 = vunpack.c.h.bf16 %v12588_v23 }
 0x13b   :  { %272 = vadd.xlane.f32.xlu2 %v10791_v5  ;;  %v267_v51 = vpop.xlane.xlu0 %266 }
 0x13c   :  { %v387_v37 = vmul.f32 %v12207_v17, %v267_v51  ;;  %v1533_v52 = vmul.f32 %v12455_v49, %v1466_v27 }
 0x13e   :  { %v12560_v15 = vsub.f32 %v10786_v57, %v387_v37  ;;  %v866_v57 = vmul.f32 %v12487_v32, %v865_v13 }
 0x140   :  { %v515_v62 = vmul.f32 %v12560_v15, %v12560_v15  ;;  %v870_v25 = vsel %vm869_vm2, %v12487_v32, %v866_v57  ;;  %v1600_v32 = vadd.f32 %v12478_v9, %v1533_v52 }
 0x141   :  { %v1465_v40 = vmul.f32 %v870_v25, %v12229_v36  ;;  %v699_v36 = vmul.f32 %v12460_v14, %v12207_v17 }
 0x142   :  { %278 = vadd.xlane.f32.xlu0 %v10798_v16  ;;  %593 = vadd.xlane.f32.xlu1 %v515_v62 }
 0x143   :  { %274 = vadd.xlane.f32.xlu2 %v10794_v21  ;;  %1806 = vmatmul.bf16.gmra.mxu0 %v1660_v58  ;;  %v1532_v10 = vmul.f32 %v12455_v49, %v1465_v40  ;;  %v763_v39 = vadd.f32 1e-05, %v699_v36 }
 0x144   :  { %1975 = vmatmul.bf16.gmra.mxu1 %v1660_v58 }
 0x145   :  { %v1599_v44 = vadd.f32 %v12478_v9, %v1532_v10  ;;  %11562 = vrsqrt.f32 %v763_v39  ;;  %vm887_vm3 = vweird.f32 %v763_v39 }
 0x147   :  { %v1661_v54 = vpack.c.bf16 %v1600_v32, %v1599_v44 }
 0x14a   :  { %280 = vadd.xlane.f32.xlu1 %v10799_v35 }
 0x14b   :  { %v11563_v41 = vpop.eup %11562 }
 0x14c   :  { %v882_v42 = vmul.f32 %v11563_v41, %v763_v39  ;;  %vm888_vm4 = vweird.f32 %v11563_v41 }
 0x14d   :  { %vm12602_vm5 = vmor %vm887_vm3, %vm888_vm4 }
 0x14e   :  { %v883_v47 = vmul.f32 %v11563_v41, %v882_v42 }
 0x150   :  { %v884_v53 = vmul.f32 0.5, %v883_v47 }
 0x152   :  { %282 = vadd.xlane.f32.xlu1 %v10802_v43  ;;  %v885_v6 = vsub.f32 1.5, %v884_v53 }
 0x153   :  { %1811 = vmatmul.bf16.gmra.mxu0 %v1661_v54 }
 0x154   :  { %1980 = vmatmul.bf16.gmra.mxu1 %v1661_v54  ;;  %v886_v7 = vmul.f32 %v11563_v41, %v885_v6 }
 0x156   :  { %v890_v62 = vsel %vm12602_vm5, %v11563_v41, %v886_v7 }
 0x157   :  { %v1467_v52 = vmul.f32 %v890_v62, %v12260_v50 }
 0x159   :  { %v1534_v50 = vmul.f32 %v12455_v49, %v1467_v52 }
 0x15b   :  { %v1601_v6 = vadd.f32 %v12478_v9, %v1534_v50 }
 0x18d   :  { %v580_v45 = vpop.xlane.xlu1 %579 }
 0x18e   :  { %v700_v26 = vmul.f32 %v580_v45, %v12207_v17 }
 0x190   :  { %v764_v48 = vadd.f32 1e-05, %v700_v26 }
 0x192   :  { %11564 = vrsqrt.f32 %v764_v48  ;;  %vm897_vm7 = vweird.f32 %v764_v48 }
 0x195   :  { %v582_v60 = vpop.xlane.xlu1 %581 }
 0x196   :  { %v701_v63 = vmul.f32 %v582_v60, %v12207_v17 }
 0x198   :  { %v11565_v3 = vpop.eup %11564  ;;  %v12599_v0 = vadd.f32 1e-05, %v701_v63 }
 0x199   :  { %v892_v38 = vmul.f32 %v11565_v3, %v764_v48  ;;  %vm898_vm6 = vweird.f32 %v11565_v3 }
 0x19a   :  { %11566 = vrsqrt.f32 %v12599_v0  ;;  %vm899_vm8 = vmor %vm897_vm7, %vm898_vm6  ;;  %vm907_vm10 = vweird.f32 %v12599_v0 }
 0x19b   :  { %v893_v14 = vmul.f32 %v11565_v3, %v892_v38 }
 0x19d   :  { %v894_v51 = vmul.f32 0.5, %v893_v14  ;;  %v588_v29 = vpop.xlane.xlu0 %587  ;;  %v269_v13 = vpop.xlane.xlu1 %268 }
 0x19e   :  { %v584_v55 = vpop.xlane.xlu2 %583  ;;  %v704_v18 = vmul.f32 %v588_v29, %v12207_v17  ;;  %v388_v20 = vmul.f32 %v12207_v17, %v269_v13 }
 0x19f   :  { %v895_v37 = vsub.f32 1.5, %v894_v51  ;;  %v702_v28 = vmul.f32 %v584_v55, %v12207_v17 }
 0x1a0   :  { %v12611_v22 = vpop.eup %11566  ;;  %v12613_v30 = vadd.f32 1e-05, %v704_v18  ;;  %v12619_v27 = vsub.f32 %v10787_v4, %v388_v20 }
 0x1a1   :  { %v896_v57 = vmul.f32 %v11565_v3, %v895_v37  ;;  %v766_v58 = vadd.f32 1e-05, %v702_v28  ;;  %v902_v25 = vmul.f32 %v12611_v22, %v12599_v0  ;;  %vm908_vm9 = vweird.f32 %v12611_v22 }
 0x1a2   :  { %v516_v32 = vmul.f32 %v12619_v27, %v12619_v27  ;;  %vm12652_vm12 = vmor %vm907_vm10, %vm908_vm9  ;;  %vm937_vm1 = vweird.f32 %v12613_v30 }
 0x1a3   :  { %11568 = vrsqrt.f32 %v766_v58  ;;  %v900_v40 = vsel %vm899_vm8, %v11565_v3, %v896_v57  ;;  %v903_v10 = vmul.f32 %v12611_v22, %v902_v25  ;;  %vm917_vm11 = vweird.f32 %v766_v58 }
 0x1a4   :  { %11570 = vrsqrt.f32 %v12613_v30  ;;  %v1468_v44 = vmul.f32 %v900_v40, %v12392_v11  ;;  %595 = vadd.xlane.f32.xlu2 %v516_v32 }
 0x1a5   :  { %v904_v54 = vmul.f32 0.5, %v903_v10  ;;  %v590_v39 = vpop.xlane.xlu0 %589  ;;  %v271_v41 = vpop.xlane.xlu1 %270 }
 0x1a6   :  { %v586_v36 = vpop.xlane.xlu2 %585  ;;  %v1535_v56 = vmul.f32 %v12455_v49, %v1468_v44  ;;  %v389_v45 = vmul.f32 %v12207_v17, %v271_v41  ;;  %v705_v63 = vmul.f32 %v590_v39, %v12207_v17 }
 0x1a7   :  { %v703_v4 = vmul.f32 %v586_v36, %v12207_v17  ;;  %v905_v42 = vsub.f32 1.5, %v904_v54 }
 0x1a8   :  { %v1602_v48 = vadd.f32 %v12478_v9, %v1535_v56  ;;  %v12638_v60 = vsub.f32 %v10790_v34, %v389_v45  ;;  %v12650_v51 = vadd.f32 1e-05, %v705_v63  ;;  %v12706_v45 = vld [vmem:[%s16837_s2 + $0x60] sm:$0xff]  }
 0x1a9   :  { %v11569_v26 = vpop.eup %11568  ;;  %v12631_v47 = vadd.f32 1e-05, %v703_v4  ;;  %v906_v38 = vmul.f32 %v12611_v22, %v905_v42 }
 0x1aa   :  { %v12634_v11 = vpop.eup %11570  ;;  %v912_v53 = vmul.f32 %v11569_v26, %v766_v58  ;;  %v517_v7 = vmul.f32 %v12638_v60, %v12638_v60  ;;  %v1662_v8 = vpack.c.bf16 %v1602_v48, %v1601_v6  ;;  %vm918_vm13 = vweird.f32 %v11569_v26 }
 0x1ab   :  { %v932_v3 = vmul.f32 %v12634_v11, %v12613_v30  ;;  %11572 = vrsqrt.f32 %v12631_v47  ;;  %v910_v57 = vsel %vm12652_vm12, %v12611_v22, %v906_v38  ;;  %vm12674_vm14 = vmor %vm917_vm11, %vm918_vm13  ;;  %vm927_vm15 = vweird.f32 %v12631_v47 }
 0x1ac   :  { %v913_v14 = vmul.f32 %v11569_v26, %v912_v53  ;;  %597 = vadd.xlane.f32.xlu2 %v517_v7  ;;  %1816 = vmatmul.bf16.gmra.mxu0 %v1662_v8  ;;  %11574 = vrsqrt.f32 %v12650_v51  ;;  %v1469_v58 = vmul.f32 %v910_v57, %v12403_v24  ;;  %vm938_vm2 = vweird.f32 %v12634_v11 }
 0x1ad   :  { %v277_v29 = vpop.xlane.xlu0 %276  ;;  %v933_v28 = vmul.f32 %v12634_v11, %v932_v3  ;;  %1985 = vmatmul.bf16.gmra.mxu1 %v1662_v8  ;;  %v592_v18 = vpop.xlane.xlu1 %591  ;;  %v10806_v8 = vunpack.c.l.bf16 %v12706_v45  ;;  %vm12748_vm4 = vmor %vm937_vm1, %vm938_vm2  ;;  %vm947_vm7 = vweird.f32 %v12650_v51 }
 0x1ae   :  { %v914_v34 = vmul.f32 0.5, %v913_v14  ;;  %v273_v55 = vpop.xlane.xlu2 %272  ;;  %v392_v0 = vmul.f32 %v12207_v17, %v277_v29  ;;  %v706_v62 = vmul.f32 %v592_v18, %v12207_v17  ;;  %v1536_v6 = vmul.f32 %v12455_v49, %v1469_v58 }
 0x1af   :  { %v390_v13 = vmul.f32 %v12207_v17, %v273_v55 }
 0x1b0   :  { %v915_v20 = vsub.f32 1.5, %v914_v34  ;;  %v12671_v52 = vsub.f32 %v10795_v46, %v392_v0  ;;  %v12680_v22 = vadd.f32 1e-05, %v706_v62  ;;  %v12687_v46 = vld [vmem:[%s16786_s5] sm:$0x3] }
 0x1b1   :  { %v12663_v25 = vpop.eup %11572  ;;  %v12667_v40 = vsub.f32 %v10791_v5, %v390_v13  ;;  %v1971_v54 = vpop.f32.mrf.mxu1  ;;  %v934_v5 = vmul.f32 0.5, %v933_v28  ;;  %v12699_v50 = vperm.slane %v12687_v46, 1  ;;  %v1603_v28 = vadd.f32 %v12478_v9, %v1536_v6 }
 0x1b2   :  { %v916_v10 = vmul.f32 %v11569_v26, %v915_v20  ;;  %v922_v44 = vmul.f32 %v12663_v25, %v12631_v47  ;;  %11576 = vrsqrt.f32 %v12680_v22  ;;  %v520_v56 = vmul.f32 %v12671_v52, %v12671_v52  ;;  %v12717_v7 = vpop.eup %11574 }
 0x1b3   :  { %v518_v39 = vmul.f32 %v12667_v40, %v12667_v40  ;;  %v935_v53 = vsub.f32 1.5, %v934_v5  ;;  %vm928_vm0 = vweird.f32 %v12663_v25  ;;  %v942_v30 = vmul.f32 %v12717_v7, %v12650_v51 }
 0x1b4   :  { %v923_v36 = vmul.f32 %v12663_v25, %v922_v44  ;;  %v920_v4 = vsel %vm12674_vm14, %v11569_v26, %v916_v10  ;;  %284 = vadd.xlane.f32.xlu2 %v10803_v19  ;;  %603 = vadd.xlane.f32.xlu1 %v520_v56  ;;  %vm12735_vm3 = vmor %vm927_vm15, %vm928_vm0  ;;  %v1972_v13 = vadd.f32 %v1971_v54, %v12699_v50  ;;  %vm957_vm5 = vweird.f32 %v12680_v22 }
 0x1b5   :  { %v279_v42 = vpop.xlane.xlu0 %278  ;;  %v1470_v48 = vmul.f32 %v920_v4, %v12440_v2  ;;  %599 = vadd.xlane.f32.xlu0 %v518_v39  ;;  %v12710_v63 = vpop.xlane.xlu1 %593  ;;  %v936_v59 = vmul.f32 %v12634_v11, %v935_v53  ;;  %v943_v5 = vmul.f32 %v12717_v7, %v942_v30  ;;  %v12768_v39 = vld [vmem:[%s16837_s2 + $0x68] sm:$0xff]   ;;  %vm948_vm8 = vweird.f32 %v12717_v7 }
 0x1b6   :  { %v924_v41 = vmul.f32 0.5, %v923_v36  ;;  %v275_v24 = vpop.xlane.xlu2 %274  ;;  %v393_v3 = vmul.f32 %v12207_v17, %v279_v42  ;;  %v10811_v53 = vunpack.c.h.bf16 %v12768_v39  ;;  %vm949_vm10 = vmor %vm947_vm7, %vm948_vm8 }
 0x1b7   :  { %v391_v26 = vmul.f32 %v12207_v17, %v275_v24  ;;  %v1537_v14 = vmul.f32 %v12455_v49, %v1470_v48  ;;  %v940_v36 = vsel %vm12748_vm4, %v12634_v11, %v936_v59  ;;  %v10807_v24 = vunpack.c.h.bf16 %v12706_v45  ;;  %v12942_v45 = vld [vmem:[%s16837_s2 + $0x80] sm:$0xff]  }
 0x1b8   :  { %v925_v38 = vsub.f32 1.5, %v924_v41  ;;  %v12726_v34 = vsub.f32 %v10798_v16, %v393_v3  ;;  %v12728_v55 = vpop.eup %11576  ;;  %v1472_v42 = vmul.f32 %v940_v36, %v12425_v61  ;;  %v944_v48 = vmul.f32 0.5, %v943_v5 }
 0x1b9   :  { %v12721_v2 = vsub.f32 %v10794_v21, %v391_v26  ;;  %v1973_v29 = vpop.f32.mrf.mxu1  ;;  %v1604_v37 = vadd.f32 %v12478_v9, %v1537_v14  ;;  %v952_v16 = vmul.f32 %v12728_v55, %v12680_v22  ;;  %vm958_vm6 = vweird.f32 %v12728_v55 }
 0x1ba   :  { %v926_v47 = vmul.f32 %v12663_v25, %v925_v38  ;;  %v1974_v18 = vadd.f32 %v1973_v29, %v12699_v50  ;;  %v521_v57 = vmul.f32 %v12726_v34, %v12726_v34  ;;  %v1539_v12 = vmul.f32 %v12455_v49, %v1472_v42  ;;  %v12793_v38 = vld [vmem:[%s16837_s2 + $0x70] sm:$0xff]   ;;  %vm12802_vm9 = vmor %vm957_vm5, %vm958_vm6 }
 0x1bb   :  { %v519_v0 = vmul.f32 %v12721_v2, %v12721_v2  ;;  %v1663_v62 = vpack.c.bf16 %v1604_v37, %v1603_v28  ;;  %v953_v10 = vmul.f32 %v12728_v55, %v952_v16  ;;  %v10810_v21 = vunpack.c.l.bf16 %v12768_v39 }
 0x1bc   :  { %v11047_v32 = vpack.c.bf16 %v1974_v18, %v1972_v13  ;;  %286 = vadd.xlane.f32.xlu2 %v10806_v8  ;;  %v930_v44 = vsel %vm12735_vm3, %v12663_v25, %v926_v47  ;;  %605 = vadd.xlane.f32.xlu1 %v521_v57  ;;  %v1606_v51 = vadd.f32 %v12478_v9, %v1539_v12  ;;  %v10815_v57 = vunpack.c.h.bf16 %v12793_v38 }
 0x1bd   :  { %601 = vadd.xlane.f32.xlu0 %v519_v0  ;;  %1821 = vmatmul.bf16.gmra.mxu0 %v1663_v62  ;;  %v281_v54 = vpop.xlane.xlu1 %280  ;;  %v1471_v25 = vmul.f32 %v930_v44, %v12492_v33  ;;  %v954_v56 = vmul.f32 0.5, %v953_v10 }
 0x1be   :  { %11048 = vst [vmem:[#allocation3 + $0x80] sm:$0xff] %v11047_v32   ;;  %1990 = vmatmul.bf16.gmra.mxu1 %v1663_v62  ;;  %v394_v58 = vmul.f32 %v12207_v17, %v281_v54  ;;  %v12831_v32 = vld [vmem:[%s16837_s2 + $0x78] sm:$0xff]  }
 0x1bf   :  { %v1538_v26 = vmul.f32 %v12455_v49, %v1471_v25  ;;  %v955_v3 = vsub.f32 1.5, %v954_v56  ;;  %v10818_v54 = vunpack.c.l.bf16 %v12831_v32  ;;  %v707_v56 = vmul.f32 %v12710_v63, %v12207_v17 }
 0x1c0   :  { %v12773_v41 = vsub.f32 %v10799_v35, %v394_v58  ;;  %v945_v35 = vsub.f32 1.5, %v944_v48 }
 0x1c1   :  { %v1976_v4 = vpop.f32.mrf.mxu1  ;;  %v1605_v6 = vadd.f32 %v12478_v9, %v1538_v26  ;;  %v956_v22 = vmul.f32 %v12728_v55, %v955_v3 }
 0x1c2   :  { %v522_v11 = vmul.f32 %v12773_v41, %v12773_v41  ;;  %v1977_v37 = vadd.f32 %v1976_v4, %v12699_v50  ;;  %v946_v16 = vmul.f32 %v12717_v7, %v945_v35  ;;  %v771_v4 = vadd.f32 1e-05, %v707_v56 }
 0x1c3   :  { %v1664_v13 = vpack.c.bf16 %v1606_v51, %v1605_v6  ;;  %v960_v18 = vsel %vm12802_vm9, %v12728_v55, %v956_v22 }
 0x1c4   :  { %607 = vadd.xlane.f32.xlu2 %v522_v11  ;;  %292 = vadd.xlane.f32.xlu1 %v10811_v53  ;;  %v950_v0 = vsel %vm949_vm10, %v12717_v7, %v946_v16  ;;  %v1474_v20 = vmul.f32 %v960_v18, %v12533_v1  ;;  %11578 = vrsqrt.f32 %v771_v4  ;;  %vm967_vm11 = vweird.f32 %v771_v4 }
 0x1c5   :  { %288 = vadd.xlane.f32.xlu0 %v10807_v24  ;;  %v283_v33 = vpop.xlane.xlu1 %282  ;;  %v1473_v10 = vmul.f32 %v950_v0, %v12485_v31 }
 0x1c6   :  { %v395_v61 = vmul.f32 %v12207_v17, %v283_v33  ;;  %v1541_v55 = vmul.f32 %v12455_v49, %v1474_v20 }
 0x1c7   :  { %v1540_v44 = vmul.f32 %v12455_v49, %v1473_v10 }
 0x1c8   :  { %v12800_v47 = vsub.f32 %v10802_v43, %v395_v61  ;;  %v10814_v43 = vunpack.c.l.bf16 %v12793_v38  ;;  %v1608_v7 = vadd.f32 %v12478_v9, %v1541_v55 }
 0x1c9   :  { %v1978_v14 = vpop.f32.mrf.mxu1  ;;  %v1607_v58 = vadd.f32 %v12478_v9, %v1540_v44 }
 0x1ca   :  { %v1979_v59 = vadd.f32 %v1978_v14, %v12699_v50  ;;  %v523_v28 = vmul.f32 %v12800_v47, %v12800_v47  ;;  %v11579_v42 = vpop.eup %11578 }
 0x1cb   :  { %v1665_v25 = vpack.c.bf16 %v1608_v7, %v1607_v58  ;;  %v962_v48 = vmul.f32 %v11579_v42, %v771_v4  ;;  %vm968_vm12 = vweird.f32 %v11579_v42 }
 0x1cc   :  { %v11052_v30 = vpack.c.bf16 %v1979_v59, %v1977_v37  ;;  %609 = vadd.xlane.f32.xlu2 %v523_v28  ;;  %294 = vadd.xlane.f32.xlu1 %v10814_v43  ;;  %vm12848_vm13 = vmor %vm967_vm11, %vm968_vm12 }
 0x1cd   :  { %290 = vadd.xlane.f32.xlu0 %v10810_v21  ;;  %1826 = vmatmul.bf16.gmra.mxu0 %v1664_v13  ;;  %v963_v3 = vmul.f32 %v11579_v42, %v962_v48 }
 0x1ce   :  { %11266 = vst [vmem:[#allocation3 + $0xc8] sm:$0xff] %v11052_v30   ;;  %1995 = vmatmul.bf16.gmra.mxu1 %v1664_v13 }
 0x1cf   :  { %v964_v12 = vmul.f32 0.5, %v963_v3 }
 0x1d1   :  { %v1981_v62 = vpop.f32.mrf.mxu1  ;;  %v965_v22 = vsub.f32 1.5, %v964_v12 }
 0x1d2   :  { %v1982_v5 = vadd.f32 %v1981_v62, %v12699_v50 }
 0x1d3   :  { %v966_v37 = vmul.f32 %v11579_v42, %v965_v22 }
 0x1d4   :  { %296 = vadd.xlane.f32.xlu2 %v10815_v57 }
 0x1d5   :  { %v970_v44 = vsel %vm12848_vm13, %v11579_v42, %v966_v37 }
 0x1d9   :  { %v1983_v1 = vpop.f32.mrf.mxu1 }
 0x1da   :  { %v1984_v31 = vadd.f32 %v1983_v1, %v12699_v50 }
 0x1dc   :  { %v11057_v36 = vpack.c.bf16 %v1984_v31, %v1982_v5  ;;  %298 = vadd.xlane.f32.xlu2 %v10818_v54 }
 0x1dd   :  { %1831 = vmatmul.bf16.gmra.mxu0 %v1665_v25 }
 0x1de   :  { %11267 = vst [vmem:[#allocation3 + $0xe8] sm:$0xff] %v11057_v36   ;;  %2000 = vmatmul.bf16.gmra.mxu1 %v1665_v25  ;;  %v1475_v36 = vmul.f32 %v970_v44, %v12560_v15  ;;  %v12874_v25 = vpop.f32.mrf.mxu0 }
 0x1e0   :  { %v1542_v12 = vmul.f32 %v12455_v49, %v1475_v36 }
 0x217   :  { %v596_v11 = vpop.xlane.xlu2 %595 }
 0x218   :  { %v708_v26 = vmul.f32 %v596_v11, %v12207_v17 }
 0x21a   :  { %v772_v33 = vadd.f32 1e-05, %v708_v26 }
 0x21c   :  { %11580 = vrsqrt.f32 %v772_v33  ;;  %vm977_vm15 = vweird.f32 %v772_v33 }
 0x21f   :  { %v598_v35 = vpop.xlane.xlu2 %597 }
 0x220   :  { %v709_v61 = vmul.f32 %v598_v35, %v12207_v17 }
 0x222   :  { %v11581_v6 = vpop.eup %11580  ;;  %v12845_v14 = vadd.f32 1e-05, %v709_v61 }
 0x223   :  { %v972_v29 = vmul.f32 %v11581_v6, %v772_v33  ;;  %vm978_vm14 = vweird.f32 %v11581_v6 }
 0x224   :  { %11582 = vrsqrt.f32 %v12845_v14  ;;  %vm979_vm0 = vmor %vm977_vm15, %vm978_vm14  ;;  %vm987_vm2 = vweird.f32 %v12845_v14 }
 0x225   :  { %v973_v63 = vmul.f32 %v11581_v6, %v972_v29 }
 0x227   :  { %v974_v51 = vmul.f32 0.5, %v973_v63  ;;  %v285_v16 = vpop.xlane.xlu2 %284  ;;  %v604_v30 = vpop.xlane.xlu1 %603 }
 0x228   :  { %v396_v28 = vmul.f32 %v12207_v17, %v285_v16  ;;  %v600_v13 = vpop.xlane.xlu0 %599  ;;  %v712_v0 = vmul.f32 %v604_v30, %v12207_v17 }
 0x229   :  { %v975_v18 = vsub.f32 1.5, %v974_v51  ;;  %v710_v20 = vmul.f32 %v600_v13, %v12207_v17 }
 0x22a   :  { %v12855_v62 = vpop.eup %11582  ;;  %v1986_v10 = vpop.f32.mrf.mxu1  ;;  %v12859_v55 = vsub.f32 %v10803_v19, %v396_v28  ;;  %v12865_v5 = vadd.f32 1e-05, %v712_v0  ;;  %v1609_v28 = vadd.f32 %v12478_v9, %v1542_v12 }
 0x22b   :  { %v976_v7 = vmul.f32 %v11581_v6, %v975_v18  ;;  %v982_v1 = vmul.f32 %v12855_v62, %v12845_v14  ;;  %v12867_v31 = vadd.f32 1e-05, %v710_v20  ;;  %v1987_v37 = vadd.f32 %v1986_v10, %v12699_v50  ;;  %v12903_v10 = vpop.f32.mrf.mxu0 }
 0x22c   :  { %v524_v58 = vmul.f32 %v12859_v55, %v12859_v55  ;;  %11584 = vrsqrt.f32 %v12865_v5  ;;  %vm988_vm1 = vweird.f32 %v12855_v62  ;;  %vm1017_vm9 = vweird.f32 %v12865_v5 }
 0x22d   :  { %v983_v23 = vmul.f32 %v12855_v62, %v982_v1  ;;  %v980_v19 = vsel %vm979_vm0, %v11581_v6, %v976_v7  ;;  %11586 = vrsqrt.f32 %v12867_v31  ;;  %vm997_vm3 = vweird.f32 %v12867_v31  ;;  %vm12910_vm4 = vmor %vm987_vm2, %vm988_vm1 }
 0x22e   :  { %611 = vadd.xlane.f32.xlu0 %v524_v58  ;;  %v1476_v56 = vmul.f32 %v980_v19, %v12619_v27 }
 0x22f   :  { %v984_v4 = vmul.f32 0.5, %v983_v23  ;;  %v287_v42 = vpop.xlane.xlu2 %286  ;;  %v606_v3 = vpop.xlane.xlu1 %605 }
 0x230   :  { %v397_v48 = vmul.f32 %v12207_v17, %v287_v42  ;;  %v602_v11 = vpop.xlane.xlu0 %601  ;;  %v1543_v26 = vmul.f32 %v12455_v49, %v1476_v56  ;;  %v713_v59 = vmul.f32 %v606_v3, %v12207_v17  ;;  %v10819_v42 = vunpack.c.h.bf16 %v12831_v32 }
 0x231   :  { %v711_v33 = vmul.f32 %v602_v11, %v12207_v17  ;;  %v985_v15 = vsub.f32 1.5, %v984_v4 }
 0x232   :  { %v1988_v35 = vpop.f32.mrf.mxu1  ;;  %v12884_v61 = vsub.f32 %v10806_v8, %v397_v48  ;;  %v12886_v6 = vpop.eup %11584  ;;  %v1610_v29 = vadd.f32 %v12478_v9, %v1543_v26  ;;  %v12907_v44 = vadd.f32 1e-05, %v713_v59 }
 0x233   :  { %v12888_v27 = vadd.f32 1e-05, %v711_v33  ;;  %v1989_v22 = vadd.f32 %v1988_v35, %v12699_v50  ;;  %v11587_v63 = vpop.eup %11586  ;;  %v1012_v8 = vmul.f32 %v12886_v6, %v12865_v5  ;;  %v986_v30 = vmul.f32 %v12855_v62, %v985_v15 }
 0x234   :  { %v525_v51 = vmul.f32 %v12884_v61, %v12884_v61  ;;  %v992_v16 = vmul.f32 %v11587_v63, %v12867_v31  ;;  %v1666_v0 = vpack.c.bf16 %v1610_v29, %v1609_v28  ;;  %vm998_vm5 = vweird.f32 %v11587_v63 }
 0x235   :  { %11588 = vrsqrt.f32 %v12888_v27  ;;  %v11062_v13 = vpack.c.bf16 %v1989_v22, %v1987_v37  ;;  %v1013_v23 = vmul.f32 %v12886_v6, %v1012_v8  ;;  %v990_v48 = vsel %vm12910_vm4, %v12855_v62, %v986_v30  ;;  %vm12931_vm6 = vmor %vm997_vm3, %vm998_vm5 }
 0x236   :  { %613 = vadd.xlane.f32.xlu0 %v525_v51  ;;  %v993_v18 = vmul.f32 %v11587_v63, %v992_v16  ;;  %1836 = vmatmul.bf16.gmra.mxu0 %v1666_v0  ;;  %v10822_v16 = vunpack.c.l.bf16 %v12942_v45  ;;  %vm1007_vm7 = vweird.f32 %v12888_v27  ;;  %vm1018_vm10 = vweird.f32 %v12886_v6 }
 0x237   :  { %v608_v20 = vpop.xlane.xlu2 %607  ;;  %11268 = vst [vmem:[#allocation3 + $0x78] sm:$0xff] %v11062_v13   ;;  %2005 = vmatmul.bf16.gmra.mxu1 %v1666_v0  ;;  %v293_v36 = vpop.xlane.xlu1 %292  ;;  %v1014_v62 = vmul.f32 0.5, %v1013_v23  ;;  %vm13008_vm12 = vmor %vm1017_vm9, %vm1018_vm10  ;;  %vm1027_vm15 = vweird.f32 %v12907_v44 }
 0x238   :  { %v714_v7 = vmul.f32 %v608_v20, %v12207_v17  ;;  %v289_v1 = vpop.xlane.xlu0 %288  ;;  %v994_v19 = vmul.f32 0.5, %v993_v18  ;;  %v400_v4 = vmul.f32 %v12207_v17, %v293_v36 }
 0x239   :  { %v398_v14 = vmul.f32 %v12207_v17, %v289_v1 }
 0x23a   :  { %v12916_v56 = vadd.f32 1e-05, %v714_v7  ;;  %v995_v26 = vsub.f32 1.5, %v994_v19  ;;  %v12950_v22 = vsub.f32 %v10811_v53, %v400_v4  ;;  %v1015_v53 = vsub.f32 1.5, %v1014_v62 }
 0x23b   :  { %v12923_v11 = vpop.eup %11588  ;;  %v1991_v3 = vpop.f32.mrf.mxu1  ;;  %v12927_v33 = vsub.f32 %v10807_v24, %v398_v14  ;;  %v1477_v24 = vmul.f32 %v990_v48, %v12638_v60 }
 0x23c   :  { %v1002_v15 = vmul.f32 %v12923_v11, %v12888_v27  ;;  %11590 = vrsqrt.f32 %v12916_v56  ;;  %v996_v35 = vmul.f32 %v11587_v63, %v995_v26  ;;  %v528_v60 = vmul.f32 %v12950_v22, %v12950_v22 }
 0x23d   :  { %11592 = vrsqrt.f32 %v12907_v44  ;;  %v526_v29 = vmul.f32 %v12927_v33, %v12927_v33  ;;  %vm1008_vm8 = vweird.f32 %v12923_v11  ;;  %v1544_v13 = vmul.f32 %v12455_v49, %v1477_v24 }
 0x23e   :  { %v1003_v31 = vmul.f32 %v12923_v11, %v1002_v15  ;;  %300 = vadd.xlane.f32.xlu0 %v10819_v42  ;;  %v1000_v59 = vsel %vm12931_vm6, %v11587_v63, %v996_v35  ;;  %v12967_v63 = vpop.f32.mrf.mxu0  ;;  %619 = vadd.xlane.f32.xlu2 %v528_v60  ;;  %v1992_v36 = vadd.f32 %v1991_v3, %v12699_v50  ;;  %vm12985_vm11 = vmor %vm1007_vm7, %vm1008_vm8  ;;  %vm1037_vm13 = vweird.f32 %v12916_v56 }
 0x23f   :  { %v12954_v37 = vpop.xlane.xlu2 %609  ;;  %615 = vadd.xlane.f32.xlu1 %v526_v29  ;;  %v1478_v28 = vmul.f32 %v1000_v59, %v12667_v40  ;;  %v295_v30 = vpop.xlane.xlu1 %294  ;;  %v1611_v48 = vadd.f32 %v12478_v9, %v1544_v13  ;;  %v1016_v3 = vmul.f32 %v12886_v6, %v1015_v53  ;;  %v10823_v13 = vunpack.c.h.bf16 %v12942_v45 }
 0x240   :  { %v1004_v51 = vmul.f32 0.5, %v1003_v31  ;;  %v291_v8 = vpop.xlane.xlu0 %290  ;;  %v401_v20 = vmul.f32 %v12207_v17, %v295_v30 }
 0x241   :  { %v399_v7 = vmul.f32 %v12207_v17, %v291_v8  ;;  %v1545_v40 = vmul.f32 %v12455_v49, %v1478_v28  ;;  %v13032_v8 = vld [vmem:[%s16837_s2 + $0x88] sm:$0xff]  }
 0x242   :  { %v12965_v18 = vpop.eup %11590  ;;  %v1005_v0 = vsub.f32 1.5, %v1004_v51  ;;  %v12991_v4 = vsub.f32 %v10814_v43, %v401_v20  ;;  %v1020_v51 = vsel %vm13008_vm12, %v12886_v6, %v1016_v3  ;;  %v10827_v6 = vunpack.c.h.bf16 %v13032_v8  ;;  %v13045_v20 = vld [vmem:[%s16842_s30] ss:$0 sm:$0xff] }
 0x243   :  { %v12972_v1 = vpop.eup %11592  ;;  %v1993_v58 = vpop.f32.mrf.mxu1  ;;  %v1032_v19 = vmul.f32 %v12965_v18, %v12916_v56  ;;  %v1612_v26 = vadd.f32 %v12478_v9, %v1545_v40  ;;  %v13002_v27 = vsub.f32 %v10810_v21, %v399_v7  ;;  %vm1038_vm14 = vweird.f32 %v12965_v18  ;;  %v13065_v56 = vld [vmem:[%s16837_s2 + $0x90] sm:$0xff]   ;;  %v13080_v3 = vld [vmem:[%s16843_s23] ss:$0 sm:$0xff] }
 0x244   :  { %v1006_v23 = vmul.f32 %v12923_v11, %v1005_v0  ;;  %v1994_v14 = vadd.f32 %v1993_v58, %v12699_v50  ;;  %v1022_v12 = vmul.f32 %v12972_v1, %v12907_v44  ;;  %v529_v62 = vmul.f32 %v12991_v4, %v12991_v4  ;;  %vm13073_vm1 = vmor %vm1037_vm13, %vm1038_vm14 }
 0x245   :  { %v1667_v35 = vpack.c.bf16 %v1612_v26, %v1611_v48  ;;  %v1033_v31 = vmul.f32 %v12965_v18, %v1032_v19  ;;  %v527_v39 = vmul.f32 %v13002_v27, %v13002_v27  ;;  %vm1028_vm0 = vweird.f32 %v12972_v1 }
 0x246   :  { %v11067_v15 = vpack.c.bf16 %v1994_v14, %v1992_v36  ;;  %302 = vadd.xlane.f32.xlu0 %v10822_v16  ;;  %v1010_v5 = vsel %vm12985_vm11, %v12923_v11, %v1006_v23  ;;  %v1023_v29 = vmul.f32 %v12972_v1, %v1022_v12  ;;  %621 = vadd.xlane.f32.xlu2 %v529_v62  ;;  %v13035_v28 = vpop.f32.mrf.mxu0  ;;  %v10830_v62 = vunpack.c.l.bf16 %v13065_v56  ;;  %vm1029_vm2 = vmor %vm1027_vm15, %vm1028_vm0 }
 0x247   :  { %v297_v24 = vpop.xlane.xlu2 %296  ;;  %1841 = vmatmul.bf16.gmra.mxu0 %v1667_v35  ;;  %2010 = vmatmul.bf16.gmra.mxu1 %v1667_v35  ;;  %v1479_v11 = vmul.f32 %v1010_v5, %v12721_v2  ;;  %v1034_v53 = vmul.f32 0.5, %v1033_v31  ;;  %v16807_v35 = vunpack.c.l.bf16 %v13032_v8 }
 0x248   :  { %11269 = vst [vmem:[#allocation3 + $0x8] sm:$0xff] %v11067_v15   ;;  %v402_v21 = vmul.f32 %v12207_v17, %v297_v24  ;;  %617 = vadd.xlane.f32.xlu1 %v527_v39  ;;  %v1024_v30 = vmul.f32 0.5, %v1023_v29  ;;  %v16806_v39 = vunpack.c.h.bf16 %v13065_v56 }
 0x249   :  { %v1546_v2 = vmul.f32 %v13045_v20, %v1479_v11  ;;  %v1035_v7 = vsub.f32 1.5, %v1034_v53 }
 0x24a   :  { %v13024_v59 = vsub.f32 %v10815_v57, %v402_v21  ;;  %v1480_v57 = vmul.f32 %v1020_v51, %v12671_v52  ;;  %v1025_v52 = vsub.f32 1.5, %v1024_v30 }
 0x24b   :  { %v1996_v60 = vpop.f32.mrf.mxu1  ;;  %v1613_v36 = vadd.f32 %v12478_v9, %v1546_v2  ;;  %v1036_v14 = vmul.f32 %v12965_v18, %v1035_v7 }
 0x24c   :  { %v530_v38 = vmul.f32 %v13024_v59, %v13024_v59  ;;  %v1547_v58 = vmul.f32 %v13045_v20, %v1480_v57  ;;  %v1997_v49 = vadd.f32 %v1996_v60, %v12699_v50  ;;  %v1026_v15 = vmul.f32 %v12972_v1, %v1025_v52 }
 0x24d   :  { %v1040_v31 = vsel %vm13073_vm1, %v12965_v18, %v1036_v14  ;;  %v13108_v18 = vld [vmem:[%s16837_s2 + $0x98] sm:$0xff]   ;;  %v715_v52 = vmul.f32 %v12954_v37, %v12207_v17 }
 0x24e   :  { %623 = vadd.xlane.f32.xlu0 %v530_v38  ;;  %308 = vadd.xlane.f32.xlu2 %v10827_v6  ;;  %v1614_v9 = vadd.f32 %v13080_v3, %v1547_v58  ;;  %v13083_v12 = vpop.f32.mrf.mxu0  ;;  %v1030_v21 = vsel %vm1029_vm2, %v12972_v1, %v1026_v15  ;;  %v1482_v5 = vmul.f32 %v1040_v31, %v12773_v41  ;;  %v16805_v1 = vunpack.c.l.bf16 %v13108_v18 }
 0x24f   :  { %v299_v0 = vpop.xlane.xlu2 %298  ;;  %v1481_v29 = vmul.f32 %v1030_v21, %v12726_v34 }
 0x250   :  { %v403_v40 = vmul.f32 %v12207_v17, %v299_v0  ;;  %304 = vadd.xlane.f32.xlu1 %v10823_v13  ;;  %v1668_v24 = vpack.c.bf16 %v1614_v9, %v1613_v36  ;;  %v1549_v51 = vmul.f32 %v13045_v20, %v1482_v5 }
 0x251   :  { %v1548_v11 = vmul.f32 %v13045_v20, %v1481_v29 }
 0x252   :  { %v13058_v23 = vsub.f32 %v10818_v54, %v403_v40  ;;  %v1616_v41 = vadd.f32 %v13080_v3, %v1549_v51 }
 0x253   :  { %v1998_v19 = vpop.f32.mrf.mxu1  ;;  %v1615_v57 = vadd.f32 %v13080_v3, %v1548_v11 }
 0x254   :  { %v1999_v48 = vadd.f32 %v1998_v19, %v12699_v50  ;;  %v531_v54 = vmul.f32 %v13058_v23, %v13058_v23  ;;  %v779_v19 = vadd.f32 1e-05, %v715_v52 }
 0x255   :  { %v1669_v0 = vpack.c.bf16 %v1616_v41, %v1615_v57 }
 0x256   :  { %v11072_v43 = vpack.c.bf16 %v1999_v48, %v1997_v49  ;;  %625 = vadd.xlane.f32.xlu0 %v531_v54  ;;  %310 = vadd.xlane.f32.xlu2 %v10830_v62  ;;  %v13111_v60 = vpop.f32.mrf.mxu0  ;;  %11594 = vrsqrt.f32 %v779_v19  ;;  %vm1047_vm3 = vweird.f32 %v779_v19 }
 0x257   :  { %1846 = vmatmul.bf16.gmra.mxu0 %v1668_v24  ;;  %2015 = vmatmul.bf16.gmra.mxu1 %v1668_v24 }
 0x258   :  { %11270 = vst [vmem:[#allocation3 + $0x90] sm:$0xff] %v11072_v43   ;;  %306 = vadd.xlane.f32.xlu1 %v16807_v35 }
 0x25b   :  { %v2001_v44 = vpop.f32.mrf.mxu1 }
 0x25c   :  { %v2002_v34 = vadd.f32 %v2001_v44, %v12699_v50  ;;  %v11595_v14 = vpop.eup %11594 }
 0x25d   :  { %v1042_v48 = vmul.f32 %v11595_v14, %v779_v19  ;;  %vm1048_vm4 = vweird.f32 %v11595_v14 }
 0x25e   :  { %312 = vadd.xlane.f32.xlu0 %v16806_v39  ;;  %v13121_v2 = vpop.f32.mrf.mxu0  ;;  %vm1049_vm5 = vmor %vm1047_vm3, %vm1048_vm4 }
 0x25f   :  { %v1043_v54 = vmul.f32 %v11595_v14, %v1042_v48 }
 0x261   :  { %v1044_v24 = vmul.f32 0.5, %v1043_v54 }
 0x263   :  { %v2003_v53 = vpop.f32.mrf.mxu1  ;;  %v1045_v31 = vsub.f32 1.5, %v1044_v24 }
 0x264   :  { %v2004_v38 = vadd.f32 %v2003_v53, %v12699_v50 }
 0x265   :  { %v1046_v29 = vmul.f32 %v11595_v14, %v1045_v31 }
 0x266   :  { %v11077_v30 = vpack.c.bf16 %v2004_v38, %v2002_v34  ;;  %314 = vadd.xlane.f32.xlu0 %v16805_v1  ;;  %v13123_v7 = vpop.f32.mrf.mxu0 }
 0x267   :  { %1851 = vmatmul.bf16.gmra.mxu0 %v1669_v0  ;;  %2020 = vmatmul.bf16.gmra.mxu1 %v1669_v0  ;;  %v1050_v38 = vsel %vm1049_vm5, %v11595_v14, %v1046_v29 }
 0x268   :  { %11271 = vst [vmem:[#allocation3 + $0x58] sm:$0xff] %v11077_v30   ;;  %v1483_v54 = vmul.f32 %v1050_v38, %v12800_v47 }
 0x26e   :  { %v13125_v40 = vpop.f32.mrf.mxu0 }
 0x276   :  { %v13127_v58 = vpop.f32.mrf.mxu0 }
 0x277   :  { %16872 = vst [vmem:[#allocation17_spill] sm:$0xff] %v13127_v58 }
 0x27e   :  { %v13131_v36 = vpop.f32.mrf.mxu0 }
 0x286   :  { %v13133_v49 = vpop.f32.mrf.mxu0 }
 0x287   :  { %16873 = vst [vmem:[#allocation18_spill] sm:$0xff] %v13133_v49 }
 0x28e   :  { %v13136_v15 = vpop.f32.mrf.mxu0 }
 0x296   :  { %v13141_v11 = vpop.f32.mrf.mxu0 }
 0x297   :  { %16874 = vst [vmem:[#allocation19_spill] sm:$0xff] %v13141_v11 }
 0x2a1   :  { %v612_v26 = vpop.xlane.xlu0 %611 }
 0x2a2   :  { %v716_v9 = vmul.f32 %v612_v26, %v12207_v17 }
 0x2a4   :  { %v780_v43 = vadd.f32 1e-05, %v716_v9 }
 0x2a6   :  { %11596 = vrsqrt.f32 %v780_v43  ;;  %vm1057_vm7 = vweird.f32 %v780_v43 }
 0x2a9   :  { %v614_v21 = vpop.xlane.xlu0 %613 }
 0x2aa   :  { %v717_v37 = vmul.f32 %v614_v21, %v12207_v17 }
 0x2ac   :  { %v11597_v44 = vpop.eup %11596  ;;  %v13139_v5 = vadd.f32 1e-05, %v717_v37 }
 0x2ad   :  { %v1052_v51 = vmul.f32 %v11597_v44, %v780_v43  ;;  %vm1058_vm6 = vweird.f32 %v11597_v44 }
 0x2ae   :  { %11598 = vrsqrt.f32 %v13139_v5  ;;  %vm1059_vm8 = vmor %vm1057_vm7, %vm1058_vm6  ;;  %vm1067_vm12 = vweird.f32 %v13139_v5 }
 0x2af   :  { %v1053_v53 = vmul.f32 %v11597_v44, %v1052_v51  ;;  %v1550_v51 = vmul.f32 %v13045_v20, %v1483_v54 }
 0x2b1   :  { %v1054_v41 = vmul.f32 0.5, %v1053_v53  ;;  %v301_v34 = vpop.xlane.xlu0 %300  ;;  %v620_v9 = vpop.xlane.xlu2 %619 }
 0x2b2   :  { %v404_v57 = vmul.f32 %v12207_v17, %v301_v34  ;;  %v616_v0 = vpop.xlane.xlu1 %615  ;;  %v720_v24 = vmul.f32 %v620_v9, %v12207_v17 }
 0x2b3   :  { %v1055_v30 = vsub.f32 1.5, %v1054_v41  ;;  %v718_v19 = vmul.f32 %v616_v0, %v12207_v17  ;;  %v13158_v21 = vpop.f32.mrf.mxu0 }
 0x2b4   :  { %v13145_v52 = vpop.eup %11598  ;;  %v13150_v48 = vsub.f32 %v10819_v42, %v404_v57  ;;  %v2006_v37 = vpop.f32.mrf.mxu1  ;;  %v13163_v29 = vadd.f32 1e-05, %v720_v24  ;;  %v1617_v57 = vadd.f32 %v13080_v3, %v1550_v51 }
 0x2b5   :  { %v1056_v26 = vmul.f32 %v11597_v44, %v1055_v30  ;;  %v1062_v14 = vmul.f32 %v13145_v52, %v13139_v5  ;;  %v13156_v31 = vadd.f32 1e-05, %v718_v19  ;;  %vm1068_vm9 = vweird.f32 %v13145_v52 }
 0x2b6   :  { %v532_v32 = vmul.f32 %v13150_v48, %v13150_v48  ;;  %vm13211_vm13 = vmor %vm1067_vm12, %vm1068_vm9  ;;  %vm1097_vm15 = vweird.f32 %v13163_v29 }
 0x2b7   :  { %v1063_v42 = vmul.f32 %v13145_v52, %v1062_v14  ;;  %v1060_v47 = vsel %vm1059_vm8, %v11597_v44, %v1056_v26  ;;  %11600 = vrsqrt.f32 %v13156_v31  ;;  %vm1077_vm10 = vweird.f32 %v13156_v31 }
 0x2b8   :  { %627 = vadd.xlane.f32.xlu1 %v532_v32  ;;  %v1484_v43 = vmul.f32 %v1060_v47, %v12859_v55  ;;  %11602 = vrsqrt.f32 %v13163_v29 }
 0x2b9   :  { %v303_v53 = vpop.xlane.xlu0 %302  ;;  %v1064_v41 = vmul.f32 0.5, %v1063_v42  ;;  %v622_v0 = vpop.xlane.xlu2 %621 }
 0x2ba   :  { %v405_v34 = vmul.f32 %v12207_v17, %v303_v53  ;;  %v1551_v38 = vmul.f32 %v13045_v20, %v1484_v43 }
 0x2bb   :  { %v618_v55 = vpop.xlane.xlu1 %617  ;;  %v1065_v54 = vsub.f32 1.5, %v1064_v41  ;;  %v13180_v14 = vpop.f32.mrf.mxu0 }
 0x2bc   :  { %v1618_v44 = vadd.f32 %v13080_v3, %v1551_v38  ;;  %v13175_v30 = vsub.f32 %v10822_v16, %v405_v34  ;;  %v719_v26 = vmul.f32 %v618_v55, %v12207_v17  ;;  %16875 = vst [vmem:[#allocation20_spill] sm:$0xff] %v13180_v14  ;;  %v2008_v9 = vpop.f32.mrf.mxu1  ;;  %v2007_v16 = vadd.f32 %v2006_v37, %v12699_v50 }
 0x2bd   :  { %v13177_v19 = vpop.eup %11600  ;;  %v2009_v43 = vadd.f32 %v2008_v9, %v12699_v50  ;;  %v13194_v34 = vperm.slane %v12687_v46, 0  ;;  %v1066_v38 = vmul.f32 %v13145_v52, %v1065_v54 }
 0x2be   :  { %v1670_v24 = vpack.c.bf16 %v1618_v44, %v1617_v57  ;;  %v533_v32 = vmul.f32 %v13175_v30, %v13175_v30  ;;  %v1072_v42 = vmul.f32 %v13177_v19, %v13156_v31  ;;  %v13187_v47 = vadd.f32 1e-05, %v719_v26  ;;  %v13190_v51 = vpop.eup %11602 }
 0x2bf   :  { %v11082_v37 = vpack.c.bf16 %v2009_v43, %v2007_v16  ;;  %v721_v44 = vmul.f32 %v622_v0, %v12207_v17  ;;  %v1092_v26 = vmul.f32 %v13190_v51, %v13163_v29  ;;  %vm1078_vm11 = vweird.f32 %v13177_v19 }
 0x2c0   :  { %1856 = vmatmul.bf16.gmra.mxu0 %v1670_v24  ;;  %2025 = vmatmul.bf16.gmra.mxu1 %v1670_v24  ;;  %v1073_v53 = vmul.f32 %v13177_v19, %v1072_v42  ;;  %11604 = vrsqrt.f32 %v13187_v47  ;;  %v16804_v0 = vunpack.c.h.bf16 %v13108_v18  ;;  %v13219_v5 = vadd.f32 %v12874_v25, %v13194_v34  ;;  %vm13229_vm14 = vmor %vm1077_vm10, %vm1078_vm11 }
 0x2c1   :  { %629 = vadd.xlane.f32.xlu1 %v533_v32  ;;  %v624_v41 = vpop.xlane.xlu0 %623  ;;  %11272 = vst [vmem:[#allocation3 + $0xa8] sm:$0xff] %v11082_v37   ;;  %v309_v54 = vpop.xlane.xlu2 %308  ;;  %vm1087_vm0 = vweird.f32 %v13187_v47  ;;  %vm1098_vm2 = vweird.f32 %v13190_v51 }
 0x2c2   :  { %v1074_v57 = vmul.f32 0.5, %v1073_v53  ;;  %v722_v55 = vmul.f32 %v624_v41, %v12207_v17  ;;  %v408_v42 = vmul.f32 %v12207_v17, %v309_v54  ;;  %v1070_v41 = vsel %vm13211_vm13, %v13145_v52, %v1066_v38  ;;  %vm13322_vm4 = vmor %vm1097_vm15, %vm1098_vm2 }
 0x2c3   :  { %v305_v9 = vpop.xlane.xlu1 %304  ;;  %v1093_v54 = vmul.f32 %v13190_v51, %v1092_v26 }
 0x2c4   :  { %v1075_v46 = vsub.f32 1.5, %v1074_v57  ;;  %v13206_v24 = vadd.f32 1e-05, %v722_v55  ;;  %v406_v16 = vmul.f32 %v12207_v17, %v305_v9  ;;  %v1842_v43 = vpop.f32.mrf.mxu0  ;;  %v2011_v53 = vpop.f32.mrf.mxu1  ;;  %v13233_v55 = vadd.f32 1e-05, %v721_v44 }
 0x2c5   :  { %v13238_v25 = vsub.f32 %v10827_v6, %v408_v42  ;;  %v13245_v38 = vadd.f32 %v1842_v43, %v13194_v34  ;;  %v1094_v32 = vmul.f32 0.5, %v1093_v54 }
 0x2c6   :  { %v1076_v37 = vmul.f32 %v13177_v19, %v1075_v46  ;;  %v13242_v52 = vsub.f32 %v10823_v13, %v406_v16  ;;  %v13247_v31 = vpop.eup %11604  ;;  %11606 = vrsqrt.f32 %v13206_v24  ;;  %v13266_v46 = vld [vmem:[%s16837_s2 + $0xa0] sm:$0xff]   ;;  %vm1117_vm5 = vweird.f32 %v13206_v24 }
 0x2c7   :  { %v1082_v45 = vmul.f32 %v13247_v31, %v13187_v47  ;;  %v536_v26 = vmul.f32 %v13238_v25, %v13238_v25  ;;  %11608 = vrsqrt.f32 %v13233_v55  ;;  %v10838_v57 = vunpack.c.l.bf16 %v13266_v46 }
 0x2c8   :  { %v1080_v6 = vsel %vm13229_vm14, %v13177_v19, %v1076_v37  ;;  %v534_v9 = vmul.f32 %v13242_v52, %v13242_v52  ;;  %v1485_v19 = vmul.f32 %v1070_v41, %v12884_v61  ;;  %v1095_v54 = vsub.f32 1.5, %v1094_v32 }
 0x2c9   :  { %316 = vadd.xlane.f32.xlu1 %v16804_v0  ;;  %v13252_v44 = vpop.xlane.xlu0 %625  ;;  %v1083_v42 = vmul.f32 %v13247_v31, %v1082_v45  ;;  %635 = vadd.xlane.f32.xlu0 %v536_v26  ;;  %v311_v16 = vpop.xlane.xlu2 %310  ;;  %v1486_v37 = vmul.f32 %v1080_v6, %v12927_v33  ;;  %vm1088_vm1 = vweird.f32 %v13247_v31  ;;  %v2012_v26 = vadd.f32 %v2011_v53, %v12699_v50 }
 0x2ca   :  { %631 = vadd.xlane.f32.xlu2 %v534_v9  ;;  %v409_v0 = vmul.f32 %v12207_v17, %v311_v16  ;;  %v1552_v41 = vmul.f32 %v13045_v20, %v1485_v19  ;;  %v16880_v9 = vunpack.c.l.bf16 %v13032_v8  ;;  %vm13308_vm3 = vmor %vm1087_vm0, %vm1088_vm1  ;;  %vm1107_vm7 = vweird.f32 %v13233_v55 }
 0x2cb   :  { %v307_v43 = vpop.xlane.xlu1 %306  ;;  %v1084_v13 = vmul.f32 0.5, %v1083_v42  ;;  %v1553_v19 = vmul.f32 %v13045_v20, %v1486_v37 }
 0x2cc   :  { %v13276_v1 = vpop.f32.mrf.mxu0  ;;  %v2013_v39 = vpop.f32.mrf.mxu1  ;;  %v407_v61 = vmul.f32 %v12207_v17, %v307_v43  ;;  %v13287_v6 = vsub.f32 %v10830_v62, %v409_v0  ;;  %v1619_v43 = vadd.f32 %v13080_v3, %v1552_v41  ;;  %v13329_v41 = vld [vmem:[%s16837_s2 + $0xa8] sm:$0xff]  }
 0x2cd   :  { %v13278_v35 = vpop.eup %11606  ;;  %v1085_v33 = vsub.f32 1.5, %v1084_v13  ;;  %v2014_v16 = vadd.f32 %v2013_v39, %v12699_v50  ;;  %v1620_v37 = vadd.f32 %v13080_v3, %v1553_v19 }
 0x2ce   :  { %v13289_v45 = vpop.eup %11608  ;;  %v13294_v42 = vsub.f32 %v16880_v9, %v407_v61  ;;  %v1112_v0 = vmul.f32 %v13278_v35, %v13206_v24  ;;  %v537_v8 = vmul.f32 %v13287_v6, %v13287_v6  ;;  %v1096_v61 = vmul.f32 %v13190_v51, %v1095_v54 }
 0x2cf   :  { %v1086_v62 = vmul.f32 %v13247_v31, %v1085_v33  ;;  %v11087_v53 = vpack.c.bf16 %v2014_v16, %v2012_v26  ;;  %v1102_v33 = vmul.f32 %v13289_v45, %v13233_v55  ;;  %v1671_v26 = vpack.c.bf16 %v1620_v37, %v1619_v43 }
 0x2d0   :  { %v535_v32 = vmul.f32 %v13294_v42, %v13294_v42  ;;  %v1113_v16 = vmul.f32 %v13278_v35, %v1112_v0  ;;  %v16813_v0 = vunpack.c.h.bf16 %v13329_v41  ;;  %v16812_v43 = vunpack.c.h.bf16 %v13266_v46 }
 0x2d1   :  { %318 = vadd.xlane.f32.xlu1 %v10838_v57  ;;  %v313_v13 = vpop.xlane.xlu0 %312  ;;  %637 = vadd.xlane.f32.xlu0 %v537_v8  ;;  %11273 = vst [vmem:[#allocation3 + $0xd0] sm:$0xff] %v11087_v53   ;;  %v1090_v54 = vsel %vm13308_vm3, %v13247_v31, %v1086_v62  ;;  %v13341_v53 = vadd.f32 %v12967_v63, %v13194_v34  ;;  %vm1118_vm6 = vweird.f32 %v13278_v35  ;;  %vm1108_vm8 = vweird.f32 %v13289_v45 }
 0x2d2   :  { %v410_v47 = vmul.f32 %v12207_v17, %v313_v13  ;;  %633 = vadd.xlane.f32.xlu2 %v535_v32  ;;  %v16885_v13 = vunpack.c.h.bf16 %v13065_v56  ;;  %1861 = vmatmul.bf16.gmra.mxu0 %v1671_v26  ;;  %v1100_v31 = vsel %vm13322_vm4, %v13190_v51, %v1096_v61  ;;  %v1103_v62 = vmul.f32 %v13289_v45, %v1102_v33  ;;  %vm13388_vm9 = vmor %vm1117_vm5, %vm1118_vm6 }
 0x2d3   :  { %2030 = vmatmul.bf16.gmra.mxu1 %v1671_v26  ;;  %v1487_v39 = vmul.f32 %v1090_v54, %v13002_v27  ;;  %v1488_v51 = vmul.f32 %v1100_v31, %v12950_v22  ;;  %v16886_v33 = vunpack.c.l.bf16 %v13108_v18  ;;  %v13370_v27 = vld [vmem:[%s16837_s2 + $0xb0] sm:$0xff]   ;;  %vm1109_vm10 = vmor %vm1107_vm7, %vm1108_vm8 }
 0x2d4   :  { %v1847_v19 = vpop.f32.mrf.mxu0  ;;  %v2016_v29 = vpop.f32.mrf.mxu1  ;;  %v13337_v8 = vsub.f32 %v16885_v13, %v410_v47  ;;  %v1114_v47 = vmul.f32 0.5, %v1113_v16  ;;  %v1104_v61 = vmul.f32 0.5, %v1103_v62 }
 0x2d5   :  { %v13344_v32 = vadd.f32 %v1847_v19, %v13194_v34  ;;  %v1554_v54 = vmul.f32 %v13045_v20, %v1487_v39  ;;  %v2017_v31 = vadd.f32 %v2016_v29, %v12699_v50  ;;  %v16810_v39 = vunpack.c.l.bf16 %v13370_v27 }
 0x2d6   :  { %v538_v56 = vmul.f32 %v13337_v8, %v13337_v8  ;;  %v1115_v16 = vsub.f32 1.5, %v1114_v47 }
 0x2d8   :  { %v1116_v29 = vmul.f32 %v13278_v35, %v1115_v16 }
 0x2d9   :  { %v315_v37 = vpop.xlane.xlu0 %314  ;;  %639 = vadd.xlane.f32.xlu1 %v538_v56  ;;  %324 = vadd.xlane.f32.xlu0 %v16813_v0  ;;  %v1555_v56 = vmul.f32 %v13045_v20, %v1488_v51 }
 0x2da   :  { %v411_v9 = vmul.f32 %v12207_v17, %v315_v37  ;;  %320 = vadd.xlane.f32.xlu2 %v16812_v43  ;;  %v1105_v37 = vsub.f32 1.5, %v1104_v61 }
 0x2db   :  { %v1622_v24 = vadd.f32 %v13080_v3, %v1555_v56 }
 0x2dc   :  { %v13363_v26 = vsub.f32 %v16886_v33, %v411_v9  ;;  %v13373_v22 = vpop.f32.mrf.mxu0  ;;  %v2018_v19 = vpop.f32.mrf.mxu1  ;;  %v16811_v9 = vunpack.c.l.bf16 %v13329_v41  ;;  %v1621_v33 = vadd.f32 %v13080_v3, %v1554_v54  ;;  %v1106_v61 = vmul.f32 %v13289_v45, %v1105_v37 }
 0x2dd   :  { %v2019_v62 = vadd.f32 %v2018_v19, %v12699_v50  ;;  %v1120_v54 = vsel %vm13388_vm9, %v13278_v35, %v1116_v29 }
 0x2de   :  { %v539_v13 = vmul.f32 %v13363_v26, %v13363_v26  ;;  %v1672_v55 = vpack.c.bf16 %v1622_v24, %v1621_v33  ;;  %v1110_v56 = vsel %vm1109_vm10, %v13289_v45, %v1106_v61  ;;  %v1490_v35 = vmul.f32 %v1120_v54, %v13024_v59 }
 0x2df   :  { %v11092_v47 = vpack.c.bf16 %v2019_v62, %v2017_v31  ;;  %v13404_v31 = vadd.f32 %v13083_v12, %v13194_v34  ;;  %v13419_v12 = vld [vmem:[%s16837_s2 + $0xb8] sm:$0xff]  }
 0x2e0   :  { %v1557_v33 = vmul.f32 %v13045_v20, %v1490_v35  ;;  %v16808_v45 = vunpack.c.l.bf16 %v13419_v12 }
 0x2e1   :  { %641 = vadd.xlane.f32.xlu1 %v539_v13  ;;  %11274 = vst [vmem:[#allocation3 + $0xb0] sm:$0xff] %v11092_v47   ;;  %326 = vadd.xlane.f32.xlu0 %v16810_v39  ;;  %v16809_v13 = vunpack.c.h.bf16 %v13370_v27  ;;  %v1489_v47 = vmul.f32 %v1110_v56, %v12991_v4 }
 0x2e2   :  { %322 = vadd.xlane.f32.xlu2 %v16811_v9  ;;  %1866 = vmatmul.bf16.gmra.mxu0 %v1672_v55 }
 0x2e3   :  { %2035 = vmatmul.bf16.gmra.mxu1 %v1672_v55  ;;  %v1556_v59 = vmul.f32 %v13045_v20, %v1489_v47  ;;  %v1624_v55 = vadd.f32 %v13080_v3, %v1557_v33 }
 0x2e4   :  { %v1852_v16 = vpop.f32.mrf.mxu0  ;;  %v2021_v19 = vpop.f32.mrf.mxu1 }
 0x2e5   :  { %v13407_v62 = vadd.f32 %v1852_v16, %v13194_v34  ;;  %v2022_v51 = vadd.f32 %v2021_v19, %v12699_v50  ;;  %v1623_v4 = vadd.f32 %v13080_v3, %v1556_v59  ;;  %v723_v16 = vmul.f32 %v13252_v44, %v12207_v17 }
 0x2e7   :  { %v1673_v54 = vpack.c.bf16 %v1624_v55, %v1623_v4  ;;  %v787_v19 = vadd.f32 1e-05, %v723_v16 }
 0x2e9   :  { %328 = vadd.xlane.f32.xlu1 %v16809_v13  ;;  %11610 = vrsqrt.f32 %v787_v19  ;;  %vm1127_vm11 = vweird.f32 %v787_v19 }
 0x2ec   :  { %v2023_v29 = vpop.f32.mrf.mxu1  ;;  %v13433_v59 = vpop.f32.mrf.mxu0 }
 0x2ed   :  { %v2024_v24 = vadd.f32 %v2023_v29, %v12699_v50 }
 0x2ef   :  { %v11097_v61 = vpack.c.bf16 %v2024_v24, %v2022_v51  ;;  %v11611_v56 = vpop.eup %11610 }
 0x2f0   :  { %v1122_v35 = vmul.f32 %v11611_v56, %v787_v19  ;;  %vm1128_vm12 = vweird.f32 %v11611_v56 }
 0x2f1   :  { %330 = vadd.xlane.f32.xlu1 %v16808_v45  ;;  %11275 = vst [vmem:[#allocation3 + $0x38] sm:$0xff] %v11097_v61   ;;  %vm13438_vm13 = vmor %vm1127_vm11, %vm1128_vm12 }
 0x2f2   :  { %1871 = vmatmul.bf16.gmra.mxu0 %v1673_v54  ;;  %v1123_v29 = vmul.f32 %v11611_v56, %v1122_v35 }
 0x2f3   :  { %2040 = vmatmul.bf16.gmra.mxu1 %v1673_v54 }
 0x2f4   :  { %v1124_v24 = vmul.f32 0.5, %v1123_v29 }
 0x2f6   :  { %v1125_v61 = vsub.f32 1.5, %v1124_v24 }
 0x2f8   :  { %v1126_v16 = vmul.f32 %v11611_v56, %v1125_v61  ;;  %v13448_v61 = vadd.f32 %v13121_v2, %v13194_v34 }
 0x32b   :  { %v628_v47 = vpop.xlane.xlu1 %627 }
 0x32c   :  { %v724_v33 = vmul.f32 %v628_v47, %v12207_v17 }
 0x32e   :  { %v788_v51 = vadd.f32 1e-05, %v724_v33  ;;  %v1130_v33 = vsel %vm13438_vm13, %v11611_v56, %v1126_v16  ;;  %v16891_v56 = vunpack.c.h.bf16 %v13108_v18 }
 0x330   :  { %11612 = vrsqrt.f32 %v788_v51  ;;  %vm1137_vm15 = vweird.f32 %v788_v51 }
 0x334   :  { %v630_v37 = vpop.xlane.xlu1 %629 }
 0x335   :  { %v725_v55 = vmul.f32 %v630_v37, %v12207_v17 }
 0x336   :  { %v11613_v4 = vpop.eup %11612 }
 0x337   :  { %v1132_v44 = vmul.f32 %v11613_v4, %v788_v51  ;;  %v13436_v54 = vadd.f32 1e-05, %v725_v55  ;;  %vm1138_vm14 = vweird.f32 %v11613_v4 }
 0x338   :  { %vm1139_vm0 = vmor %vm1137_vm15, %vm1138_vm14 }
 0x339   :  { %v1133_v47 = vmul.f32 %v11613_v4, %v1132_v44  ;;  %11614 = vrsqrt.f32 %v13436_v54  ;;  %vm1147_vm2 = vweird.f32 %v13436_v54 }
 0x33b   :  { %v1134_v29 = vmul.f32 0.5, %v1133_v47 }
 0x33c   :  { %v317_v24 = vpop.xlane.xlu1 %316  ;;  %v636_v35 = vpop.xlane.xlu0 %635 }
 0x33d   :  { %v1135_v37 = vsub.f32 1.5, %v1134_v29  ;;  %v412_v19 = vmul.f32 %v12207_v17, %v317_v24  ;;  %v1857_v63 = vpop.f32.mrf.mxu0  ;;  %v2026_v55 = vpop.f32.mrf.mxu1  ;;  %v1491_v29 = vmul.f32 %v1130_v33, %v13058_v23  ;;  %v728_v13 = vmul.f32 %v636_v35, %v12207_v17 }
 0x33e   :  { %v13451_v45 = vadd.f32 %v1857_v63, %v13194_v34  ;;  %v632_v2 = vpop.xlane.xlu2 %631 }
 0x33f   :  { %v13453_v44 = vpop.eup %11614  ;;  %v1136_v47 = vmul.f32 %v11613_v4, %v1135_v37  ;;  %v13457_v16 = vsub.f32 %v16891_v56, %v412_v19  ;;  %v726_v51 = vmul.f32 %v632_v2, %v12207_v17  ;;  %v13470_v33 = vadd.f32 1e-05, %v728_v13 }
 0x340   :  { %v1142_v24 = vmul.f32 %v13453_v44, %v13436_v54  ;;  %v1558_v56 = vmul.f32 %v13045_v20, %v1491_v29  ;;  %vm1148_vm1 = vweird.f32 %v13453_v44 }
 0x341   :  { %v1140_v39 = vsel %vm1139_vm0, %v11613_v4, %v1136_v47  ;;  %v540_v18 = vmul.f32 %v13457_v16, %v13457_v16  ;;  %v790_v19 = vadd.f32 1e-05, %v726_v51  ;;  %11616 = vrsqrt.f32 %v13470_v33  ;;  %vm13500_vm3 = vmor %vm1147_vm2, %vm1148_vm1 }
 0x342   :  { %v1492_v37 = vmul.f32 %v1140_v39, %v13150_v48  ;;  %v1143_v23 = vmul.f32 %v13453_v44, %v1142_v24  ;;  %v2027_v48 = vadd.f32 %v2026_v55, %v12699_v50  ;;  %vm1177_vm9 = vweird.f32 %v13470_v33 }
 0x343   :  { %643 = vadd.xlane.f32.xlu2 %v540_v18  ;;  %11618 = vrsqrt.f32 %v790_v19  ;;  %v1625_v18 = vadd.f32 %v13080_v3, %v1558_v56  ;;  %vm1157_vm4 = vweird.f32 %v790_v19 }
 0x344   :  { %v1144_v35 = vmul.f32 0.5, %v1143_v23  ;;  %v319_v63 = vpop.xlane.xlu1 %318  ;;  %v1559_v4 = vmul.f32 %v13045_v20, %v1492_v37  ;;  %v638_v51 = vpop.xlane.xlu0 %637 }
 0x345   :  { %v413_v47 = vmul.f32 %v12207_v17, %v319_v63  ;;  %v2028_v2 = vpop.f32.mrf.mxu1  ;;  %v729_v56 = vmul.f32 %v638_v51, %v12207_v17 }
 0x346   :  { %v2029_v39 = vadd.f32 %v2028_v2, %v12699_v50  ;;  %v1626_v13 = vadd.f32 %v13080_v3, %v1559_v4  ;;  %v1145_v24 = vsub.f32 1.5, %v1144_v35  ;;  %v634_v23 = vpop.xlane.xlu2 %633  ;;  %v13489_v2 = vpop.f32.mrf.mxu0 }
 0x347   :  { %v13481_v29 = vsub.f32 %v10838_v57, %v413_v47  ;;  %v727_v9 = vmul.f32 %v634_v23, %v12207_v17  ;;  %v13487_v43 = vpop.eup %11616  ;;  %v16814_v23 = vunpack.c.h.bf16 %v13419_v12 }
 0x348   :  { %v11102_v37 = vpack.c.bf16 %v2029_v39, %v2027_v48  ;;  %v1674_v55 = vpack.c.bf16 %v1626_v13, %v1625_v18  ;;  %v1146_v57 = vmul.f32 %v13453_v44, %v1145_v24  ;;  %v1172_v48 = vmul.f32 %v13487_v43, %v13470_v33 }
 0x349   :  { %v541_v63 = vmul.f32 %v13481_v29, %v13481_v29  ;;  %v11619_v35 = vpop.eup %11618  ;;  %v13493_v4 = vadd.f32 1e-05, %v727_v9  ;;  %v13508_v18 = vadd.f32 1e-05, %v729_v56  ;;  %vm1178_vm10 = vweird.f32 %v13487_v43 }
 0x34a   :  { %11276 = vst [vmem:[#allocation3 + $0x40] sm:$0xff] %v11102_v37   ;;  %1876 = vmatmul.bf16.gmra.mxu0 %v1674_v55  ;;  %v1152_v47 = vmul.f32 %v11619_v35, %v790_v19  ;;  %2045 = vmatmul.bf16.gmra.mxu1 %v1674_v55  ;;  %v1150_v51 = vsel %vm13500_vm3, %v13453_v44, %v1146_v57  ;;  %vm1158_vm5 = vweird.f32 %v11619_v35  ;;  %v16894_v44 = vunpack.c.h.bf16 %v13329_v41  ;;  %vm13605_vm12 = vmor %vm1177_vm9, %vm1178_vm10 }
 0x34b   :  { %645 = vadd.xlane.f32.xlu2 %v541_v63  ;;  %11620 = vrsqrt.f32 %v13493_v4  ;;  %v1493_v13 = vmul.f32 %v1150_v51, %v13175_v30  ;;  %vm13525_vm6 = vmor %vm1157_vm4, %vm1158_vm5  ;;  %v13547_v51 = vadd.f32 %v13125_v40, %v13194_v34  ;;  %vm1167_vm7 = vweird.f32 %v13493_v4 }
 0x34c   :  { %v640_v39 = vpop.xlane.xlu1 %639  ;;  %v1153_v9 = vmul.f32 %v11619_v35, %v1152_v47  ;;  %v325_v54 = vpop.xlane.xlu0 %324  ;;  %v1173_v47 = vmul.f32 %v13487_v43, %v1172_v48  ;;  %v16897_v48 = vunpack.c.h.bf16 %v13266_v46  ;;  %v13543_v46 = vld [vmem:[%s16837_s2 + $0xc0] sm:$0xff]   ;;  %vm1187_vm15 = vweird.f32 %v13508_v18 }
 0x34d   :  { %v730_v24 = vmul.f32 %v640_v39, %v12207_v17  ;;  %v416_v0 = vmul.f32 %v12207_v17, %v325_v54  ;;  %16898 = vst [vmem:[#allocation21_spill] sm:$0xff] %v13547_v51 }
 0x34e   :  { %v1154_v37 = vmul.f32 0.5, %v1153_v9  ;;  %v321_v63 = vpop.xlane.xlu2 %320 }
 0x34f   :  { %v13511_v55 = vadd.f32 1e-05, %v730_v24  ;;  %v414_v39 = vmul.f32 %v12207_v17, %v321_v63  ;;  %v13519_v57 = vsub.f32 %v16894_v44, %v416_v0 }
 0x350   :  { %v1155_v14 = vsub.f32 1.5, %v1154_v37  ;;  %v1862_v37 = vpop.f32.mrf.mxu0  ;;  %v2031_v30 = vpop.f32.mrf.mxu1 }
 0x351   :  { %11622 = vrsqrt.f32 %v13511_v55  ;;  %v13521_v56 = vpop.eup %11620  ;;  %v13531_v24 = vsub.f32 %v16897_v48, %v414_v39  ;;  %v544_v19 = vmul.f32 %v13519_v57, %v13519_v57  ;;  %v13550_v63 = vadd.f32 %v1862_v37, %v13194_v34 }
 0x352   :  { %v1156_v54 = vmul.f32 %v11619_v35, %v1155_v14  ;;  %v1162_v0 = vmul.f32 %v13521_v56, %v13493_v4  ;;  %11624 = vrsqrt.f32 %v13508_v18  ;;  %v1174_v14 = vmul.f32 0.5, %v1173_v47 }
 0x353   :  { %332 = vadd.xlane.f32.xlu2 %v16814_v23  ;;  %16899 = vst [vmem:[#allocation22_spill] sm:$0xff] %v13550_v63  ;;  %v542_v23 = vmul.f32 %v13531_v24, %v13531_v24  ;;  %651 = vadd.xlane.f32.xlu1 %v544_v19  ;;  %v16815_v37 = vunpack.c.l.bf16 %v13543_v46  ;;  %vm1168_vm8 = vweird.f32 %v13521_v56  ;;  %v16901_v4 = vunpack.c.l.bf16 %v13370_v27 }
 0x354   :  { %v13552_v39 = vpop.xlane.xlu1 %641  ;;  %v1160_v44 = vsel %vm13525_vm6, %v11619_v35, %v1156_v54  ;;  %v1163_v48 = vmul.f32 %v13521_v56, %v1162_v0  ;;  %v327_v47 = vpop.xlane.xlu0 %326  ;;  %v1560_v54 = vmul.f32 %v13045_v20, %v1493_v13  ;;  %v1175_v0 = vsub.f32 1.5, %v1174_v14  ;;  %vm13588_vm11 = vmor %vm1167_vm7, %vm1168_vm8 }
 0x355   :  { %v1494_v11 = vmul.f32 %v1160_v44, %v13242_v52  ;;  %647 = vadd.xlane.f32.xlu0 %v542_v23  ;;  %v417_v35 = vmul.f32 %v12207_v17, %v327_v47  ;;  %v16900_v13 = vunpack.c.l.bf16 %v13329_v41  ;;  %vm1197_vm13 = vweird.f32 %v13511_v55 }
 0x356   :  { %v1164_v58 = vmul.f32 0.5, %v1163_v48  ;;  %v323_v9 = vpop.xlane.xlu2 %322  ;;  %v1627_v41 = vadd.f32 %v13080_v3, %v1560_v54 }
 0x357   :  { %v13563_v49 = vpop.eup %11622  ;;  %v415_v52 = vmul.f32 %v12207_v17, %v323_v9  ;;  %v1561_v48 = vmul.f32 %v13045_v20, %v1494_v11  ;;  %v13585_v47 = vsub.f32 %v16901_v4, %v417_v35  ;;  %v2032_v35 = vadd.f32 %v2031_v30, %v12699_v50 }
 0x358   :  { %v13570_v19 = vpop.eup %11624  ;;  %v1165_v44 = vsub.f32 1.5, %v1164_v58  ;;  %v1192_v23 = vmul.f32 %v13563_v49, %v13511_v55  ;;  %v13592_v9 = vpop.f32.mrf.mxu0  ;;  %vm1198_vm14 = vweird.f32 %v13563_v49 }
 0x359   :  { %v13579_v14 = vsub.f32 %v16900_v13, %v415_v52  ;;  %16904 = vst [vmem:[#allocation23_spill] sm:$0xff] %v13592_v9  ;;  %v2033_v40 = vpop.f32.mrf.mxu1  ;;  %v1628_v52 = vadd.f32 %v13080_v3, %v1561_v48  ;;  %v1176_v13 = vmul.f32 %v13487_v43, %v1175_v0  ;;  %v545_v48 = vmul.f32 %v13585_v47, %v13585_v47  ;;  %vm13670_vm1 = vmor %vm1197_vm13, %vm1198_vm14 }
 0x35a   :  { %v1166_v58 = vmul.f32 %v13521_v56, %v1165_v44  ;;  %v2034_v44 = vadd.f32 %v2033_v40, %v12699_v50  ;;  %v1193_v40 = vmul.f32 %v13563_v49, %v1192_v23  ;;  %v13630_v23 = vld [vmem:[%s16837_s2 + $0xc8] sm:$0xff]   ;;  %vm1188_vm0 = vweird.f32 %v13570_v19 }
 0x35b   :  { %334 = vadd.xlane.f32.xlu2 %v16815_v37  ;;  %v1182_v37 = vmul.f32 %v13570_v19, %v13508_v18  ;;  %v543_v54 = vmul.f32 %v13579_v14, %v13579_v14  ;;  %v1675_v0 = vpack.c.bf16 %v1628_v52, %v1627_v41  ;;  %v1180_v63 = vsel %vm13605_vm12, %v13487_v43, %v1176_v13  ;;  %vm1189_vm2 = vmor %vm1187_vm15, %vm1188_vm0 }
 0x35c   :  { %v329_v4 = vpop.xlane.xlu1 %328  ;;  %v1170_v30 = vsel %vm13588_vm11, %v13521_v56, %v1166_v58  ;;  %v11107_v51 = vpack.c.bf16 %v2034_v44, %v2032_v35  ;;  %653 = vadd.xlane.f32.xlu1 %v545_v48  ;;  %v16907_v56 = vunpack.c.h.bf16 %v13370_v27  ;;  %v1194_v11 = vmul.f32 0.5, %v1193_v40 }
 0x35d   :  { %649 = vadd.xlane.f32.xlu0 %v543_v54  ;;  %1881 = vmatmul.bf16.gmra.mxu0 %v1675_v0  ;;  %v418_v33 = vmul.f32 %v12207_v17, %v329_v4  ;;  %v1183_v41 = vmul.f32 %v13570_v19, %v1182_v37  ;;  %v1495_v52 = vmul.f32 %v1170_v30, %v13294_v42  ;;  %v16823_v43 = vunpack.c.h.bf16 %v13543_v46 }
 0x35e   :  { %11277 = vst [vmem:[#allocation3 + $0xe0] sm:$0xff] %v11107_v51   ;;  %2050 = vmatmul.bf16.gmra.mxu1 %v1675_v0  ;;  %v1496_v37 = vmul.f32 %v1180_v63, %v13238_v25  ;;  %v13638_v42 = vadd.f32 %v13131_v36, %v13194_v34  ;;  %v16822_v44 = vunpack.c.h.bf16 %v13630_v23  ;;  %v1195_v48 = vsub.f32 1.5, %v1194_v11 }
 0x35f   :  { %v13625_v58 = vsub.f32 %v16907_v56, %v418_v33  ;;  %v1184_v27 = vmul.f32 0.5, %v1183_v41  ;;  %v1562_v0 = vmul.f32 %v13045_v20, %v1495_v52  ;;  %v16908_v36 = vunpack.c.l.bf16 %v13419_v12  ;;  %v13665_v52 = vld [vmem:[%s16837_s2 + $0xd0] sm:$0xff]  }
 0x360   :  { %v1867_v35 = vpop.f32.mrf.mxu0  ;;  %v1563_v30 = vmul.f32 %v13045_v20, %v1496_v37  ;;  %v1196_v20 = vmul.f32 %v13563_v49, %v1195_v48 }
 0x361   :  { %v2036_v9 = vpop.f32.mrf.mxu1  ;;  %v546_v51 = vmul.f32 %v13625_v58, %v13625_v58  ;;  %v13641_v13 = vadd.f32 %v1867_v35, %v13194_v34  ;;  %v1185_v40 = vsub.f32 1.5, %v1184_v27  ;;  %v1629_v41 = vadd.f32 %v13080_v3, %v1562_v0 }
 0x362   :  { %v16820_v35 = vunpack.c.l.bf16 %v13630_v23  ;;  %v2037_v27 = vadd.f32 %v2036_v9, %v12699_v50  ;;  %v1200_v0 = vsel %vm13670_vm1, %v13563_v49, %v1196_v20 }
 0x363   :  { %655 = vadd.xlane.f32.xlu2 %v546_v51  ;;  %v1630_v51 = vadd.f32 %v13080_v3, %v1563_v30  ;;  %v1186_v37 = vmul.f32 %v13570_v19, %v1185_v40  ;;  %v1498_v9 = vmul.f32 %v1200_v0, %v13337_v8  ;;  %v13705_v8 = vld [vmem:[%s16842_s30] ss:$0 sm:$0xff] }
 0x364   :  { %v331_v4 = vpop.xlane.xlu1 %330  ;;  %340 = vadd.xlane.f32.xlu1 %v16822_v44 }
 0x365   :  { %v419_v54 = vmul.f32 %v12207_v17, %v331_v4  ;;  %336 = vadd.xlane.f32.xlu0 %v16823_v43  ;;  %v16821_v4 = vunpack.c.l.bf16 %v13665_v52  ;;  %v1190_v3 = vsel %vm1189_vm2, %v13570_v19, %v1186_v37  ;;  %v1565_v19 = vmul.f32 %v13705_v8, %v1498_v9 }
 0x366   :  { %v1497_v49 = vmul.f32 %v1190_v3, %v13287_v6  ;;  %v731_v3 = vmul.f32 %v13552_v39, %v12207_v17 }
 0x367   :  { %v13652_v63 = vsub.f32 %v16908_v36, %v419_v54  ;;  %v1676_v54 = vpack.c.bf16 %v1630_v51, %v1629_v41  ;;  %v16819_v36 = vunpack.c.h.bf16 %v13665_v52 }
 0x368   :  { %v13674_v56 = vpop.f32.mrf.mxu0  ;;  %v1564_v20 = vmul.f32 %v13705_v8, %v1497_v49  ;;  %v795_v9 = vadd.f32 1e-05, %v731_v3 }
 0x369   :  { %v547_v33 = vmul.f32 %v13652_v63, %v13652_v63  ;;  %v2038_v11 = vpop.f32.mrf.mxu1 }
 0x36a   :  { %v2039_v18 = vadd.f32 %v2038_v11, %v12699_v50  ;;  %v13720_v11 = vld [vmem:[%s16843_s23] ss:$0 sm:$0xff]  ;;  %11626 = vrsqrt.f32 %v795_v9  ;;  %vm1207_vm3 = vweird.f32 %v795_v9 }
 0x36b   :  { %657 = vadd.xlane.f32.xlu2 %v547_v33  ;;  %v13695_v33 = vadd.f32 %v13136_v15, %v13194_v34  ;;  %v13713_v15 = vld [vmem:[%s16837_s2 + $0xd8] sm:$0xff]   ;;  %v1632_v51 = vadd.f32 %v13720_v11, %v1565_v19 }
 0x36c   :  { %v11112_v48 = vpack.c.bf16 %v2039_v18, %v2037_v27  ;;  %342 = vadd.xlane.f32.xlu1 %v16821_v4  ;;  %v16818_v55 = vunpack.c.l.bf16 %v13713_v15  ;;  %v1631_v27 = vadd.f32 %v13720_v11, %v1564_v20 }
 0x36d   :  { %338 = vadd.xlane.f32.xlu0 %v16820_v35  ;;  %1886 = vmatmul.bf16.gmra.mxu0 %v1676_v54  ;;  %16911 = vst [vmem:[#allocation24_spill] sm:$0xff] %v13695_v33 }
 0x36e   :  { %11278 = vst [vmem:[#allocation3 + $0x60] sm:$0xff] %v11112_v48   ;;  %2055 = vmatmul.bf16.gmra.mxu1 %v1676_v54  ;;  %v1677_v0 = vpack.c.bf16 %v1632_v51, %v1631_v27 }
 0x370   :  { %v1872_v30 = vpop.f32.mrf.mxu0 }
 0x371   :  { %v2041_v40 = vpop.f32.mrf.mxu1  ;;  %v13698_v41 = vadd.f32 %v1872_v30, %v13194_v34  ;;  %v11627_v30 = vpop.eup %11626 }
 0x372   :  { %v2042_v18 = vadd.f32 %v2041_v40, %v12699_v50  ;;  %v1202_v49 = vmul.f32 %v11627_v30, %v795_v9  ;;  %vm1208_vm4 = vweird.f32 %v11627_v30 }
 0x373   :  { %16912 = vst [vmem:[#allocation25_spill] sm:$0xff] %v13698_v41  ;;  %344 = vadd.xlane.f32.xlu2 %v16819_v36  ;;  %vm1209_vm5 = vmor %vm1207_vm3, %vm1208_vm4 }
 0x374   :  { %v1203_v19 = vmul.f32 %v11627_v30, %v1202_v49 }
 0x376   :  { %v1204_v6 = vmul.f32 0.5, %v1203_v19 }
 0x378   :  { %v1205_v25 = vsub.f32 1.5, %v1204_v6 }
 0x379   :  { %v2043_v37 = vpop.f32.mrf.mxu1 }
 0x37a   :  { %v2044_v54 = vadd.f32 %v2043_v37, %v12699_v50 }
 0x37b   :  { %346 = vadd.xlane.f32.xlu2 %v16818_v55  ;;  %v16915_v55 = vunpack.c.h.bf16 %v13419_v12 }
 0x37c   :  { %v11117_v48 = vpack.c.bf16 %v2044_v54, %v2042_v18  ;;  %v13732_v18 = vpop.f32.mrf.mxu0 }
 0x37d   :  { %1891 = vmatmul.bf16.gmra.mxu0 %v1677_v0  ;;  %16913 = vst [vmem:[#allocation26_spill] sm:$0xff] %v13732_v18 }
 0x37e   :  { %11279 = vst [vmem:[#allocation3 + $0x18] sm:$0xff] %v11117_v48   ;;  %2060 = vmatmul.bf16.gmra.mxu1 %v1677_v0  ;;  %v1206_v0 = vmul.f32 %v11627_v30, %v1205_v25 }
 0x380   :  { %v1210_v49 = vsel %vm1209_vm5, %v11627_v30, %v1206_v0 }
 0x381   :  { %v1499_v25 = vmul.f32 %v1210_v49, %v13363_v26 }
 0x3b6   :  { %v644_v20 = vpop.xlane.xlu2 %643 }
 0x3b7   :  { %v732_v40 = vmul.f32 %v644_v20, %v12207_v17 }
 0x3b9   :  { %v796_v37 = vadd.f32 1e-05, %v732_v40 }
 0x3bb   :  { %11628 = vrsqrt.f32 %v796_v37  ;;  %vm1217_vm7 = vweird.f32 %v796_v37 }
 0x3be   :  { %v646_v51 = vpop.xlane.xlu2 %645 }
 0x3bf   :  { %v733_v27 = vmul.f32 %v646_v51, %v12207_v17 }
 0x3c1   :  { %v11629_v39 = vpop.eup %11628  ;;  %v13734_v54 = vadd.f32 1e-05, %v733_v27  ;;  %v13742_v27 = vadd.f32 %v13158_v21, %v13194_v34 }
 0x3c2   :  { %v1212_v48 = vmul.f32 %v11629_v39, %v796_v37  ;;  %vm1218_vm6 = vweird.f32 %v11629_v39 }
 0x3c3   :  { %11630 = vrsqrt.f32 %v13734_v54  ;;  %16914 = vst [vmem:[#allocation27_spill] sm:$0xff] %v13742_v27  ;;  %vm1219_vm8 = vmor %vm1217_vm7, %vm1218_vm6  ;;  %vm1227_vm10 = vweird.f32 %v13734_v54 }
 0x3c4   :  { %v1213_v3 = vmul.f32 %v11629_v39, %v1212_v48 }
 0x3c6   :  { %v1214_v19 = vmul.f32 0.5, %v1213_v3  ;;  %v333_v20 = vpop.xlane.xlu2 %332  ;;  %v652_v30 = vpop.xlane.xlu1 %651 }
 0x3c7   :  { %v420_v6 = vmul.f32 %v12207_v17, %v333_v20  ;;  %v1877_v9 = vpop.f32.mrf.mxu0  ;;  %v2046_v48 = vpop.f32.mrf.mxu1  ;;  %v736_v20 = vmul.f32 %v652_v30, %v12207_v17 }
 0x3c8   :  { %v1215_v40 = vsub.f32 1.5, %v1214_v19  ;;  %v13750_v0 = vadd.f32 %v1877_v9, %v13194_v34  ;;  %v648_v21 = vpop.xlane.xlu0 %647  ;;  %v1566_v9 = vmul.f32 %v13705_v8, %v1499_v25  ;;  %v2047_v25 = vadd.f32 %v2046_v48, %v12699_v50 }
 0x3c9   :  { %v13738_v51 = vpop.eup %11630  ;;  %v13747_v36 = vsub.f32 %v16915_v55, %v420_v6  ;;  %v13759_v49 = vadd.f32 1e-05, %v736_v20  ;;  %v734_v6 = vmul.f32 %v648_v21, %v12207_v17 }
 0x3ca   :  { %16916 = vst [vmem:[#allocation28_spill] sm:$0xff] %v13750_v0  ;;  %v1216_v3 = vmul.f32 %v11629_v39, %v1215_v40  ;;  %v1222_v19 = vmul.f32 %v13738_v51, %v13734_v54  ;;  %vm1228_vm9 = vweird.f32 %v13738_v51 }
 0x3cb   :  { %v548_v12 = vmul.f32 %v13747_v36, %v13747_v36  ;;  %v798_v30 = vadd.f32 1e-05, %v734_v6  ;;  %11632 = vrsqrt.f32 %v13759_v49  ;;  %vm13792_vm13 = vmor %vm1227_vm10, %vm1228_vm9  ;;  %vm1257_vm1 = vweird.f32 %v13759_v49 }
 0x3cc   :  { %v1220_v55 = vsel %vm1219_vm8, %v11629_v39, %v1216_v3  ;;  %v1223_v40 = vmul.f32 %v13738_v51, %v1222_v19  ;;  %v16917_v3 = vunpack.c.l.bf16 %v13543_v46  ;;  %v1633_v19 = vadd.f32 %v13720_v11, %v1566_v9 }
 0x3cd   :  { %v1500_v37 = vmul.f32 %v1220_v55, %v13457_v16  ;;  %659 = vadd.xlane.f32.xlu0 %v548_v12  ;;  %11634 = vrsqrt.f32 %v798_v30  ;;  %vm1237_vm11 = vweird.f32 %v798_v30 }
 0x3ce   :  { %v335_v35 = vpop.xlane.xlu2 %334  ;;  %v1224_v39 = vmul.f32 0.5, %v1223_v40 }
 0x3cf   :  { %v421_v26 = vmul.f32 %v12207_v17, %v335_v35  ;;  %v1567_v4 = vmul.f32 %v13705_v8, %v1500_v37  ;;  %v2048_v16 = vpop.f32.mrf.mxu1  ;;  %v654_v37 = vpop.xlane.xlu1 %653 }
 0x3d0   :  { %v2049_v12 = vadd.f32 %v2048_v16, %v12699_v50  ;;  %v650_v55 = vpop.xlane.xlu0 %649  ;;  %v737_v16 = vmul.f32 %v654_v37, %v12207_v17 }
 0x3d1   :  { %v13770_v20 = vsub.f32 %v16917_v3, %v421_v26  ;;  %v1634_v21 = vadd.f32 %v13720_v11, %v1567_v4  ;;  %v735_v40 = vmul.f32 %v650_v55, %v12207_v17  ;;  %v13779_v26 = vpop.eup %11632  ;;  %v1225_v3 = vsub.f32 1.5, %v1224_v39 }
 0x3d2   :  { %v11122_v44 = vpack.c.bf16 %v2049_v12, %v2047_v25  ;;  %v1252_v39 = vmul.f32 %v13779_v26, %v13759_v49  ;;  %v13796_v37 = vadd.f32 1e-05, %v737_v16  ;;  %v13811_v16 = vld [vmem:[%s16837_s2 + $0xe0] sm:$0xff]   ;;  %vm1258_vm2 = vweird.f32 %v13779_v26 }
 0x3d3   :  { %v549_v35 = vmul.f32 %v13770_v20, %v13770_v20  ;;  %v1678_v6 = vpack.c.bf16 %v1634_v21, %v1633_v19  ;;  %v11635_v9 = vpop.eup %11634  ;;  %v13781_v4 = vadd.f32 1e-05, %v735_v40  ;;  %v16824_v19 = vunpack.c.h.bf16 %v13713_v15  ;;  %vm13888_vm4 = vmor %vm1257_vm1, %vm1258_vm2 }
 0x3d4   :  { %11280 = vst [vmem:[#allocation3 + $0x68] sm:$0xff] %v11122_v44   ;;  %v1232_v48 = vmul.f32 %v11635_v9, %v798_v30  ;;  %v1226_v21 = vmul.f32 %v13738_v51, %v1225_v3  ;;  %vm1238_vm12 = vweird.f32 %v11635_v9  ;;  %v1253_v54 = vmul.f32 %v13779_v26, %v1252_v39 }
 0x3d5   :  { %661 = vadd.xlane.f32.xlu0 %v549_v35  ;;  %1896 = vmatmul.bf16.gmra.mxu0 %v1678_v6  ;;  %11636 = vrsqrt.f32 %v13781_v4  ;;  %vm13816_vm14 = vmor %vm1237_vm11, %vm1238_vm12  ;;  %v16923_v30 = vunpack.c.h.bf16 %v13630_v23  ;;  %vm1247_vm15 = vweird.f32 %v13781_v4  ;;  %v16931_v49 = vunpack.c.h.bf16 %v13665_v52 }
 0x3d6   :  { %2065 = vmatmul.bf16.gmra.mxu1 %v1678_v6  ;;  %v1233_v25 = vmul.f32 %v11635_v9, %v1232_v48  ;;  %v656_v12 = vpop.xlane.xlu2 %655  ;;  %v1254_v0 = vmul.f32 0.5, %v1253_v54  ;;  %vm1267_vm7 = vweird.f32 %v13796_v37 }
 0x3d7   :  { %v738_v55 = vmul.f32 %v656_v12, %v12207_v17  ;;  %v341_v3 = vpop.xlane.xlu1 %340  ;;  %v1230_v12 = vsel %vm13792_vm13, %v13738_v51, %v1226_v21  ;;  %v16922_v21 = vunpack.c.h.bf16 %v13543_v46 }
 0x3d8   :  { %v1234_v44 = vmul.f32 0.5, %v1233_v25  ;;  %v337_v35 = vpop.xlane.xlu0 %336  ;;  %v424_v43 = vmul.f32 %v12207_v17, %v341_v3  ;;  %v1501_v3 = vmul.f32 %v1230_v12, %v13481_v29 }
 0x3d9   :  { %v13798_v40 = vadd.f32 1e-05, %v738_v55  ;;  %v422_v48 = vmul.f32 %v12207_v17, %v337_v35 }
 0x3da   :  { %v1235_v25 = vsub.f32 1.5, %v1234_v44  ;;  %v1568_v35 = vmul.f32 %v13705_v8, %v1501_v3 }
 0x3db   :  { %v13813_v55 = vpop.eup %11636  ;;  %11638 = vrsqrt.f32 %v13798_v40  ;;  %v2051_v51 = vpop.f32.mrf.mxu1  ;;  %v13823_v39 = vsub.f32 %v16922_v21, %v422_v48  ;;  %vm1277_vm5 = vweird.f32 %v13798_v40 }
 0x3dc   :  { %v1236_v44 = vmul.f32 %v11635_v9, %v1235_v25  ;;  %v1242_v6 = vmul.f32 %v13813_v55, %v13781_v4  ;;  %11640 = vrsqrt.f32 %v13796_v37  ;;  %vm1248_vm0 = vweird.f32 %v13813_v55 }
 0x3dd   :  { %348 = vadd.xlane.f32.xlu0 %v16824_v19  ;;  %v13831_v19 = vsub.f32 %v16923_v30, %v424_v43  ;;  %v550_v25 = vmul.f32 %v13823_v39, %v13823_v39  ;;  %vm13869_vm3 = vmor %vm1247_vm15, %vm1248_vm0 }
 0x3de   :  { %v1240_v46 = vsel %vm13816_vm14, %v11635_v9, %v1236_v44  ;;  %v1243_v48 = vmul.f32 %v13813_v55, %v1242_v6  ;;  %v13839_v21 = vpop.xlane.xlu2 %657  ;;  %v1255_v6 = vsub.f32 1.5, %v1254_v0 }
 0x3df   :  { %v552_v29 = vmul.f32 %v13831_v19, %v13831_v19  ;;  %v1502_v12 = vmul.f32 %v1240_v46, %v13531_v24  ;;  %663 = vadd.xlane.f32.xlu1 %v550_v25  ;;  %v343_v9 = vpop.xlane.xlu1 %342  ;;  %v16924_v46 = vunpack.c.l.bf16 %v13811_v16  ;;  %v2052_v25 = vadd.f32 %v2051_v51, %v12699_v50 }
 0x3e0   :  { %v1244_v43 = vmul.f32 0.5, %v1243_v48  ;;  %v339_v30 = vpop.xlane.xlu0 %338  ;;  %v425_v24 = vmul.f32 %v12207_v17, %v343_v9  ;;  %v1635_v51 = vadd.f32 %v13720_v11, %v1568_v35  ;;  %v1256_v41 = vmul.f32 %v13779_v26, %v1255_v6 }
 0x3e1   :  { %v13844_v27 = vpop.eup %11638  ;;  %667 = vadd.xlane.f32.xlu2 %v552_v29  ;;  %v423_v54 = vmul.f32 %v12207_v17, %v339_v30  ;;  %v1569_v44 = vmul.f32 %v13705_v8, %v1502_v12  ;;  %v16925_v12 = vunpack.c.l.bf16 %v13665_v52 }
 0x3e2   :  { %v1245_v18 = vsub.f32 1.5, %v1244_v43  ;;  %v13854_v48 = vpop.eup %11640  ;;  %v1272_v0 = vmul.f32 %v13844_v27, %v13798_v40  ;;  %vm1278_vm6 = vweird.f32 %v13844_v27 }
 0x3e3   :  { %v2053_v3 = vpop.f32.mrf.mxu1  ;;  %v13864_v43 = vsub.f32 %v16925_v12, %v425_v24  ;;  %v1262_v24 = vmul.f32 %v13854_v48, %v13796_v37  ;;  %vm1268_vm8 = vweird.f32 %v13854_v48  ;;  %vm13944_vm9 = vmor %vm1277_vm5, %vm1278_vm6 }
 0x3e4   :  { %v1246_v29 = vmul.f32 %v13813_v55, %v1245_v18  ;;  %v2054_v30 = vadd.f32 %v2053_v3, %v12699_v50  ;;  %v16928_v18 = vunpack.c.l.bf16 %v13630_v23  ;;  %vm1269_vm10 = vmor %vm1267_vm7, %vm1268_vm8 }
 0x3e5   :  { %350 = vadd.xlane.f32.xlu0 %v16924_v46  ;;  %v1636_v46 = vadd.f32 %v13720_v11, %v1569_v44  ;;  %v553_v4 = vmul.f32 %v13864_v43, %v13864_v43 }
 0x3e6   :  { %v13877_v33 = vsub.f32 %v16928_v18, %v423_v54  ;;  %v11127_v3 = vpack.c.bf16 %v2054_v30, %v2052_v25  ;;  %v345_v12 = vpop.xlane.xlu2 %344  ;;  %v1250_v6 = vsel %vm13869_vm3, %v13813_v55, %v1246_v29  ;;  %v1273_v25 = vmul.f32 %v13844_v27, %v1272_v0  ;;  %v13910_v55 = vld [vmem:[%s16837_s2 + $0xe8] sm:$0xff]  }
 0x3e7   :  { %v1679_v23 = vpack.c.bf16 %v1636_v46, %v1635_v51  ;;  %v426_v44 = vmul.f32 %v12207_v17, %v345_v12  ;;  %v1260_v51 = vsel %vm13888_vm4, %v13779_v26, %v1256_v41  ;;  %v1263_v46 = vmul.f32 %v13854_v48, %v1262_v24 }
 0x3e8   :  { %v551_v54 = vmul.f32 %v13877_v33, %v13877_v33  ;;  %11281 = vst [vmem:[#allocation3 + $0x10] sm:$0xff] %v11127_v3   ;;  %v1503_v52 = vmul.f32 %v1250_v6, %v13579_v14  ;;  %v1274_v9 = vmul.f32 0.5, %v1273_v25  ;;  %v1504_v18 = vmul.f32 %v1260_v51, %v13519_v57 }
 0x3e9   :  { %669 = vadd.xlane.f32.xlu2 %v553_v4  ;;  %1901 = vmatmul.bf16.gmra.mxu0 %v1679_v23  ;;  %v13901_v30 = vsub.f32 %v16931_v49, %v426_v44  ;;  %v10875_v41 = vunpack.c.h.bf16 %v13910_v55  ;;  %v1264_v26 = vmul.f32 0.5, %v1263_v46  ;;  %v10871_v24 = vunpack.c.h.bf16 %v13811_v16  ;;  %v13934_v44 = vld [vmem:[%s16837_s2 + $0xf0] sm:$0xff]  }
 0x3ea   :  { %2070 = vmatmul.bf16.gmra.mxu1 %v1679_v23  ;;  %665 = vadd.xlane.f32.xlu1 %v551_v54  ;;  %v1570_v12 = vmul.f32 %v13705_v8, %v1503_v52  ;;  %v1275_v35 = vsub.f32 1.5, %v1274_v9  ;;  %v16932_v14 = vunpack.c.l.bf16 %v13713_v15  ;;  %v1571_v57 = vmul.f32 %v13705_v8, %v1504_v18 }
 0x3eb   :  { %v2056_v29 = vpop.f32.mrf.mxu1  ;;  %v554_v0 = vmul.f32 %v13901_v30, %v13901_v30  ;;  %v1265_v54 = vsub.f32 1.5, %v1264_v26  ;;  %v10878_v52 = vunpack.c.l.bf16 %v13934_v44 }
 0x3ec   :  { %v1637_v49 = vadd.f32 %v13720_v11, %v1570_v12  ;;  %v1276_v40 = vmul.f32 %v13844_v27, %v1275_v35  ;;  %v2057_v51 = vadd.f32 %v2056_v29, %v12699_v50  ;;  %v1638_v9 = vadd.f32 %v13720_v11, %v1571_v57 }
 0x3ed   :  { %671 = vadd.xlane.f32.xlu0 %v554_v0  ;;  %v1266_v18 = vmul.f32 %v13854_v48, %v1265_v54  ;;  %v16831_v12 = vunpack.c.h.bf16 %v13934_v44  ;;  %v739_v0 = vmul.f32 %v13839_v21, %v12207_v17 }
 0x3ee   :  { %v347_v3 = vpop.xlane.xlu2 %346  ;;  %v1680_v29 = vpack.c.bf16 %v1638_v9, %v1637_v49 }
 0x3ef   :  { %v427_v4 = vmul.f32 %v12207_v17, %v347_v3  ;;  %v10874_v3 = vunpack.c.l.bf16 %v13910_v55  ;;  %v1270_v35 = vsel %vm1269_vm10, %v13854_v48, %v1266_v18  ;;  %v803_v9 = vadd.f32 1e-05, %v739_v0 }
 0x3f0   :  { %v1505_v57 = vmul.f32 %v1270_v35, %v13585_v47 }
 0x3f1   :  { %356 = vadd.xlane.f32.xlu2 %v10875_v41  ;;  %v13924_v23 = vsub.f32 %v16932_v14, %v427_v4  ;;  %v1280_v4 = vsel %vm13944_vm9, %v13844_v27, %v1276_v40  ;;  %v13970_v27 = vld [vmem:[%s16837_s2 + $0xf8] sm:$0xff]   ;;  %11642 = vrsqrt.f32 %v803_v9  ;;  %vm1287_vm11 = vweird.f32 %v803_v9 }
 0x3f2   :  { %352 = vadd.xlane.f32.xlu1 %v10871_v24  ;;  %v1506_v37 = vmul.f32 %v1280_v4, %v13625_v58  ;;  %v16829_v48 = vunpack.c.l.bf16 %v13970_v27 }
 0x3f3   :  { %v2058_v6 = vpop.f32.mrf.mxu1  ;;  %v555_v25 = vmul.f32 %v13924_v23, %v13924_v23 }
 0x3f4   :  { %v2059_v46 = vadd.f32 %v2058_v6, %v12699_v50  ;;  %v1573_v54 = vmul.f32 %v13705_v8, %v1506_v37  ;;  %v1572_v6 = vmul.f32 %v13705_v8, %v1505_v57 }
 0x3f5   :  { %673 = vadd.xlane.f32.xlu0 %v555_v25 }
 0x3f6   :  { %v11132_v26 = vpack.c.bf16 %v2059_v46, %v2057_v51  ;;  %v1640_v58 = vadd.f32 %v13720_v11, %v1573_v54  ;;  %v1639_v40 = vadd.f32 %v13720_v11, %v1572_v6 }
 0x3f7   :  { %v11643_v18 = vpop.eup %11642 }
 0x3f8   :  { %11282 = vst [vmem:[#allocation3 + $0x70] sm:$0xff] %v11132_v26   ;;  %v1681_v46 = vpack.c.bf16 %v1640_v58, %v1639_v40  ;;  %v1282_v26 = vmul.f32 %v11643_v18, %v803_v9  ;;  %vm1288_vm12 = vweird.f32 %v11643_v18 }
 0x3f9   :  { %358 = vadd.xlane.f32.xlu2 %v10878_v52  ;;  %1906 = vmatmul.bf16.gmra.mxu0 %v1680_v29  ;;  %vm1289_vm13 = vmor %vm1287_vm11, %vm1288_vm12 }
 0x3fa   :  { %2075 = vmatmul.bf16.gmra.mxu1 %v1680_v29  ;;  %354 = vadd.xlane.f32.xlu1 %v10874_v3  ;;  %v1283_v35 = vmul.f32 %v11643_v18, %v1282_v26 }
 0x3fb   :  { %v2061_v14 = vpop.f32.mrf.mxu1 }
 0x3fc   :  { %v2062_v49 = vadd.f32 %v2061_v14, %v12699_v50  ;;  %v1284_v14 = vmul.f32 0.5, %v1283_v35  ;;  %v16935_v35 = vunpack.c.h.bf16 %v13713_v15 }
 0x3fd   :  { %360 = vadd.xlane.f32.xlu0 %v16831_v12 }
 0x3fe   :  { %v1285_v6 = vsub.f32 1.5, %v1284_v14 }
 0x403   :  { %v2063_v25 = vpop.f32.mrf.mxu1 }
 0x404   :  { %v2064_v47 = vadd.f32 %v2063_v25, %v12699_v50 }
 0x405   :  { %362 = vadd.xlane.f32.xlu0 %v16829_v48 }
 0x406   :  { %v11137_v51 = vpack.c.bf16 %v2064_v47, %v2062_v49  ;;  %v1286_v49 = vmul.f32 %v11643_v18, %v1285_v6 }
 0x408   :  { %11283 = vst [vmem:[#allocation3 + $0x50] sm:$0xff] %v11137_v51   ;;  %v1290_v0 = vsel %vm1289_vm13, %v11643_v18, %v1286_v49 }
 0x409   :  { %1911 = vmatmul.bf16.gmra.mxu0 %v1681_v46 }
 0x40a   :  { %2080 = vmatmul.bf16.gmra.mxu1 %v1681_v46 }
 0x440   :  { %v660_v29 = vpop.xlane.xlu0 %659 }
 0x441   :  { %v740_v4 = vmul.f32 %v660_v29, %v12207_v17 }
 0x443   :  { %v804_v37 = vadd.f32 1e-05, %v740_v4 }
 0x445   :  { %11644 = vrsqrt.f32 %v804_v37  ;;  %vm1297_vm15 = vweird.f32 %v804_v37 }
 0x448   :  { %v662_v57 = vpop.xlane.xlu0 %661 }
 0x449   :  { %v741_v54 = vmul.f32 %v662_v57, %v12207_v17 }
 0x44b   :  { %v11645_v25 = vpop.eup %11644  ;;  %v13985_v58 = vadd.f32 1e-05, %v741_v54  ;;  %v1507_v54 = vmul.f32 %v1290_v0, %v13652_v63 }
 0x44c   :  { %v1292_v21 = vmul.f32 %v11645_v25, %v804_v37  ;;  %vm1298_vm14 = vweird.f32 %v11645_v25 }
 0x44d   :  { %11646 = vrsqrt.f32 %v13985_v58  ;;  %vm1299_vm0 = vmor %vm1297_vm15, %vm1298_vm14  ;;  %v1574_v0 = vmul.f32 %v13705_v8, %v1507_v54  ;;  %vm1307_vm2 = vweird.f32 %v13985_v58 }
 0x44e   :  { %v1293_v47 = vmul.f32 %v11645_v25, %v1292_v21 }
 0x450   :  { %v1294_v40 = vmul.f32 0.5, %v1293_v47  ;;  %v349_v51 = vpop.xlane.xlu0 %348 }
 0x451   :  { %v428_v46 = vmul.f32 %v12207_v17, %v349_v51 }
 0x452   :  { %v1295_v26 = vsub.f32 1.5, %v1294_v40  ;;  %v664_v21 = vpop.xlane.xlu1 %663 }
 0x453   :  { %v13989_v29 = vpop.eup %11646  ;;  %v2066_v4 = vpop.f32.mrf.mxu1  ;;  %v13993_v9 = vsub.f32 %v16935_v35, %v428_v46  ;;  %v742_v15 = vmul.f32 %v664_v21, %v12207_v17  ;;  %v1641_v21 = vadd.f32 %v13720_v11, %v1574_v0 }
 0x454   :  { %v1296_v14 = vmul.f32 %v11645_v25, %v1295_v26  ;;  %v1302_v57 = vmul.f32 %v13989_v29, %v13985_v58  ;;  %v668_v47 = vpop.xlane.xlu2 %667  ;;  %vm1308_vm1 = vweird.f32 %v13989_v29 }
 0x455   :  { %v556_v18 = vmul.f32 %v13993_v9, %v13993_v9  ;;  %v744_v37 = vmul.f32 %v668_v47, %v12207_v17  ;;  %v806_v46 = vadd.f32 1e-05, %v742_v15  ;;  %vm14031_vm4 = vmor %vm1307_vm2, %vm1308_vm1 }
 0x456   :  { %v1300_v6 = vsel %vm1299_vm0, %v11645_v25, %v1296_v14  ;;  %v1303_v49 = vmul.f32 %v13989_v29, %v1302_v57  ;;  %v16936_v14 = vunpack.c.l.bf16 %v13811_v16 }
 0x457   :  { %675 = vadd.xlane.f32.xlu1 %v556_v18  ;;  %v1508_v40 = vmul.f32 %v1300_v6, %v13747_v36  ;;  %v14007_v25 = vadd.f32 1e-05, %v744_v37  ;;  %11648 = vrsqrt.f32 %v806_v46  ;;  %v2067_v36 = vadd.f32 %v2066_v4, %v12699_v50 }
 0x458   :  { %v351_v51 = vpop.xlane.xlu0 %350  ;;  %v1304_v35 = vmul.f32 0.5, %v1303_v49  ;;  %vm1317_vm3 = vweird.f32 %v806_v46 }
 0x459   :  { %v429_v63 = vmul.f32 %v12207_v17, %v351_v51  ;;  %v1575_v26 = vmul.f32 %v13705_v8, %v1508_v40  ;;  %11650 = vrsqrt.f32 %v14007_v25  ;;  %vm1337_vm7 = vweird.f32 %v14007_v25 }
 0x45a   :  { %v1305_v15 = vsub.f32 1.5, %v1304_v35 }
 0x45b   :  { %v14011_v57 = vsub.f32 %v16936_v14, %v429_v63  ;;  %v2068_v18 = vpop.f32.mrf.mxu1  ;;  %v1642_v54 = vadd.f32 %v13720_v11, %v1575_v26 }
 0x45c   :  { %v2069_v6 = vadd.f32 %v2068_v18, %v12699_v50  ;;  %v670_v40 = vpop.xlane.xlu2 %669  ;;  %v16830_v18 = vunpack.c.h.bf16 %v13970_v27 }
 0x45d   :  { %v557_v47 = vmul.f32 %v14011_v57, %v14011_v57  ;;  %v1682_v37 = vpack.c.bf16 %v1642_v54, %v1641_v21  ;;  %v666_v51 = vpop.xlane.xlu1 %665  ;;  %v11649_v63 = vpop.eup %11648  ;;  %v745_v26 = vmul.f32 %v670_v40, %v12207_v17 }
 0x45e   :  { %v11142_v49 = vpack.c.bf16 %v2069_v6, %v2067_v36  ;;  %v743_v14 = vmul.f32 %v666_v51, %v12207_v17  ;;  %v1312_v0 = vmul.f32 %v11649_v63, %v806_v46  ;;  %v1306_v36 = vmul.f32 %v13989_v29, %v1305_v15 }
 0x45f   :  { %677 = vadd.xlane.f32.xlu1 %v557_v47  ;;  %1916 = vmatmul.bf16.gmra.mxu0 %v1682_v37  ;;  %v14021_v4 = vpop.eup %11650  ;;  %vm1318_vm5 = vweird.f32 %v11649_v63  ;;  %v14035_v15 = vadd.f32 1e-05, %v745_v26 }
 0x460   :  { %11284 = vst [vmem:[#allocation3 + $0xa0] sm:$0xff] %v11142_v49   ;;  %2085 = vmatmul.bf16.gmra.mxu1 %v1682_v37  ;;  %v1332_v35 = vmul.f32 %v14021_v4, %v14007_v25  ;;  %v807_v6 = vadd.f32 1e-05, %v743_v14  ;;  %v672_v21 = vpop.xlane.xlu0 %671  ;;  %v1313_v54 = vmul.f32 %v11649_v63, %v1312_v0  ;;  %v1310_v51 = vsel %vm14031_vm4, %v13989_v29, %v1306_v36  ;;  %vm1319_vm6 = vmor %vm1317_vm3, %vm1318_vm5 }
 0x461   :  { %v746_v47 = vmul.f32 %v672_v21, %v12207_v17  ;;  %vm1338_vm10 = vweird.f32 %v14021_v4  ;;  %vm1347_vm15 = vweird.f32 %v14035_v15 }
 0x462   :  { %11652 = vrsqrt.f32 %v807_v6  ;;  %v1314_v40 = vmul.f32 0.5, %v1313_v54  ;;  %v1333_v14 = vmul.f32 %v14021_v4, %v1332_v35  ;;  %v1509_v35 = vmul.f32 %v1310_v51, %v13770_v20  ;;  %vm14099_vm12 = vmor %vm1337_vm7, %vm1338_vm10 }
 0x463   :  { %v14037_v37 = vadd.f32 1e-05, %v746_v47  ;;  %vm1327_vm8 = vweird.f32 %v807_v6 }
 0x464   :  { %v357_v0 = vpop.xlane.xlu2 %356  ;;  %v1315_v58 = vsub.f32 1.5, %v1314_v40  ;;  %v1334_v49 = vmul.f32 0.5, %v1333_v14  ;;  %v1576_v51 = vmul.f32 %v13705_v8, %v1509_v35 }
 0x465   :  { %v432_v21 = vmul.f32 %v12207_v17, %v357_v0  ;;  %v353_v48 = vpop.xlane.xlu1 %352  ;;  %11654 = vrsqrt.f32 %v14037_v37  ;;  %vm1357_vm13 = vweird.f32 %v14037_v37 }
 0x466   :  { %v430_v26 = vmul.f32 %v12207_v17, %v353_v48  ;;  %v1316_v54 = vmul.f32 %v11649_v63, %v1315_v58  ;;  %11656 = vrsqrt.f32 %v14035_v15  ;;  %v1335_v16 = vsub.f32 1.5, %v1334_v49 }
 0x467   :  { %364 = vadd.xlane.f32.xlu1 %v16830_v18  ;;  %v14052_v29 = vsub.f32 %v10875_v41, %v432_v21  ;;  %v2071_v36 = vpop.f32.mrf.mxu1 }
 0x468   :  { %v11653_v47 = vpop.eup %11652  ;;  %v14057_v40 = vsub.f32 %v10871_v24, %v430_v26  ;;  %v14059_v46 = vpop.xlane.xlu0 %673  ;;  %v1320_v0 = vsel %vm1319_vm6, %v11649_v63, %v1316_v54 }
 0x469   :  { %v1322_v48 = vmul.f32 %v11653_v47, %v807_v6  ;;  %v1510_v58 = vmul.f32 %v1320_v0, %v13823_v39  ;;  %v560_v18 = vmul.f32 %v14052_v29, %v14052_v29  ;;  %vm1328_vm9 = vweird.f32 %v11653_v47 }
 0x46a   :  { %v558_v20 = vmul.f32 %v14057_v40, %v14057_v40  ;;  %vm14088_vm11 = vmor %vm1327_vm8, %vm1328_vm9 }
 0x46b   :  { %v14064_v41 = vpop.eup %11654  ;;  %v1323_v21 = vmul.f32 %v11653_v47, %v1322_v48  ;;  %683 = vadd.xlane.f32.xlu0 %v560_v18  ;;  %v1577_v63 = vmul.f32 %v13705_v8, %v1510_v58 }
 0x46c   :  { %v359_v24 = vpop.xlane.xlu2 %358  ;;  %v14071_v14 = vpop.eup %11656  ;;  %679 = vadd.xlane.f32.xlu2 %v558_v20  ;;  %v1352_v35 = vmul.f32 %v14064_v41, %v14037_v37  ;;  %v1336_v20 = vmul.f32 %v14021_v4, %v1335_v16  ;;  %vm1358_vm14 = vweird.f32 %v14064_v41 }
 0x46d   :  { %v1324_v39 = vmul.f32 0.5, %v1323_v21  ;;  %v433_v26 = vmul.f32 %v12207_v17, %v359_v24  ;;  %v355_v54 = vpop.xlane.xlu1 %354  ;;  %v1644_v18 = vadd.f32 %v13720_v11, %v1577_v63  ;;  %v1643_v21 = vadd.f32 %v13720_v11, %v1576_v51  ;;  %vm14139_vm1 = vmor %vm1357_vm13, %vm1358_vm14 }
 0x46e   :  { %v431_v49 = vmul.f32 %v12207_v17, %v355_v54  ;;  %v1342_v24 = vmul.f32 %v14071_v14, %v14035_v15  ;;  %v2072_v63 = vadd.f32 %v2071_v36, %v12699_v50  ;;  %v1353_v36 = vmul.f32 %v14064_v41, %v1352_v35 }
 0x46f   :  { %v1325_v0 = vsub.f32 1.5, %v1324_v39  ;;  %v14081_v48 = vsub.f32 %v10878_v52, %v433_v26  ;;  %v2073_v58 = vpop.f32.mrf.mxu1  ;;  %v1683_v26 = vpack.c.bf16 %v1644_v18, %v1643_v21  ;;  %v1340_v18 = vsel %vm14099_vm12, %v14021_v4, %v1336_v20 }
 0x470   :  { %v14095_v39 = vsub.f32 %v10874_v3, %v431_v49  ;;  %v361_v52 = vpop.xlane.xlu0 %360  ;;  %v2074_v6 = vadd.f32 %v2073_v58, %v12699_v50  ;;  %v16943_v58 = vunpack.c.h.bf16 %v13934_v44  ;;  %v1354_v12 = vmul.f32 0.5, %v1353_v36 }
 0x471   :  { %v1326_v16 = vmul.f32 %v11653_v47, %v1325_v0  ;;  %v561_v54 = vmul.f32 %v14081_v48, %v14081_v48  ;;  %v434_v3 = vmul.f32 %v12207_v17, %v361_v52  ;;  %1921 = vmatmul.bf16.gmra.mxu0 %v1683_v26  ;;  %2090 = vmatmul.bf16.gmra.mxu1 %v1683_v26  ;;  %v16944_v51 = vunpack.c.l.bf16 %v13970_v27 }
 0x472   :  { %v559_v55 = vmul.f32 %v14095_v39, %v14095_v39  ;;  %v11147_v49 = vpack.c.bf16 %v2074_v6, %v2072_v63  ;;  %v1343_v0 = vmul.f32 %v14071_v14, %v1342_v24  ;;  %vm1348_vm0 = vweird.f32 %v14071_v14 }
 0x473   :  { %v1330_v25 = vsel %vm14088_vm11, %v11653_v47, %v1326_v16  ;;  %685 = vadd.xlane.f32.xlu1 %v561_v54  ;;  %v14119_v21 = vsub.f32 %v16943_v58, %v434_v3  ;;  %v1512_v47 = vmul.f32 %v1340_v18, %v13831_v19  ;;  %vm1349_vm2 = vmor %vm1347_vm15, %vm1348_vm0  ;;  %v14150_v58 = vld [vmem:[#allocation4] sm:$0xff] }
 0x474   :  { %v1511_v35 = vmul.f32 %v1330_v25, %v13877_v33  ;;  %11285 = vst [vmem:[#allocation3 + $0xd8] sm:$0xff] %v11147_v49   ;;  %681 = vadd.xlane.f32.xlu2 %v559_v55  ;;  %v1344_v52 = vmul.f32 0.5, %v1343_v0  ;;  %v1355_v33 = vsub.f32 1.5, %v1354_v12 }
 0x475   :  { %v562_v4 = vmul.f32 %v14119_v21, %v14119_v21  ;;  %v1579_v44 = vmul.f32 %v13705_v8, %v1512_v47  ;;  %v14153_v47 = vld [vmem:[#allocation4 + $0x8] sm:$0xff] }
 0x476   :  { %v1578_v24 = vmul.f32 %v13705_v8, %v1511_v35  ;;  %v1345_v26 = vsub.f32 1.5, %v1344_v52  ;;  %v1356_v36 = vmul.f32 %v14064_v41, %v1355_v33 }
 0x477   :  { %v2076_v63 = vpop.f32.mrf.mxu1  ;;  %v1646_v37 = vadd.f32 %v13720_v11, %v1579_v44 }
 0x478   :  { %v363_v16 = vpop.xlane.xlu0 %362  ;;  %v1645_v19 = vadd.f32 %v13720_v11, %v1578_v24  ;;  %v1346_v25 = vmul.f32 %v14071_v14, %v1345_v26  ;;  %v2077_v49 = vadd.f32 %v2076_v63, %v12699_v50  ;;  %v1360_v0 = vsel %vm14139_vm1, %v14064_v41, %v1356_v36 }
 0x479   :  { %v435_v20 = vmul.f32 %v12207_v17, %v363_v16  ;;  %v1514_v63 = vmul.f32 %v1360_v0, %v13901_v30  ;;  %v747_v26 = vmul.f32 %v14059_v46, %v12207_v17 }
 0x47a   :  { %v1684_v15 = vpack.c.bf16 %v1646_v37, %v1645_v19  ;;  %v1350_v12 = vsel %vm1349_vm2, %v14071_v14, %v1346_v25  ;;  %v14170_v19 = vpop.f32.mrf.mxu0 }
 0x47b   :  { %v14128_v6 = vsub.f32 %v16944_v51, %v435_v20  ;;  %v1513_v52 = vmul.f32 %v1350_v12, %v13864_v43  ;;  %v1581_v41 = vmul.f32 %v13705_v8, %v1514_v63  ;;  %16947 = vst [vmem:[#allocation29_spill] sm:$0xff] %v14170_v19 }
 0x47c   :  { %687 = vadd.xlane.f32.xlu2 %v562_v4  ;;  %v14160_v4 = vld [vmem:[#allocation4 + $0x18] sm:$0xff] }
 0x47d   :  { %v563_v54 = vmul.f32 %v14128_v6, %v14128_v6  ;;  %v1580_v20 = vmul.f32 %v13705_v8, %v1513_v52  ;;  %v1648_v14 = vadd.f32 %v13720_v11, %v1581_v41  ;;  %v811_v8 = vadd.f32 1e-05, %v747_v26 }
 0x47f   :  { %v2078_v3 = vpop.f32.mrf.mxu1  ;;  %689 = vadd.xlane.f32.xlu0 %v563_v54  ;;  %v1647_v30 = vadd.f32 %v13720_v11, %v1580_v20  ;;  %11658 = vrsqrt.f32 %v811_v8  ;;  %vm1367_vm3 = vweird.f32 %v811_v8 }
 0x480   :  { %v2079_v18 = vadd.f32 %v2078_v3, %v12699_v50 }
 0x481   :  { %1926 = vmatmul.bf16.gmra.mxu0 %v1684_v15  ;;  %2095 = vmatmul.bf16.gmra.mxu1 %v1684_v15  ;;  %v1685_v51 = vpack.c.bf16 %v1648_v14, %v1647_v30 }
 0x482   :  { %v11152_v35 = vpack.c.bf16 %v2079_v18, %v2077_v49  ;;  %v14173_v37 = vpop.f32.mrf.mxu0 }
 0x484   :  { %11286 = vst [vmem:[#allocation3 + $0x30] sm:$0xff] %v11152_v35   ;;  %2527 = vadd.xlane.f32.xlu2 %v14150_v58 }
 0x485   :  { %v11659_v54 = vpop.eup %11658 }
 0x486   :  { %v1362_v36 = vmul.f32 %v11659_v54, %v811_v8  ;;  %vm1368_vm4 = vweird.f32 %v11659_v54 }
 0x487   :  { %v2081_v16 = vpop.f32.mrf.mxu1  ;;  %2529 = vadd.xlane.f32.xlu0 %v14153_v47  ;;  %vm1369_vm5 = vmor %vm1367_vm3, %vm1368_vm4 }
 0x488   :  { %v2082_v33 = vadd.f32 %v2081_v16, %v12699_v50  ;;  %v1363_v11 = vmul.f32 %v11659_v54, %v1362_v36 }
 0x48a   :  { %v1364_v49 = vmul.f32 0.5, %v1363_v11  ;;  %v14178_v12 = vpop.f32.mrf.mxu0 }
 0x48c   :  { %2533 = vadd.xlane.f32.xlu2 %v14160_v4  ;;  %v1365_v15 = vsub.f32 1.5, %v1364_v49 }
 0x48e   :  { %v1366_v52 = vmul.f32 %v11659_v54, %v1365_v15 }
 0x48f   :  { %v2083_v24 = vpop.f32.mrf.mxu1 }
 0x490   :  { %v2084_v43 = vadd.f32 %v2083_v24, %v12699_v50  ;;  %v1370_v14 = vsel %vm1369_vm5, %v11659_v54, %v1366_v52 }
 0x491   :  { %1931 = vmatmul.bf16.gmra.mxu0 %v1685_v51  ;;  %2100 = vmatmul.bf16.gmra.mxu1 %v1685_v51 }
 0x492   :  { %v11157_v44 = vpack.c.bf16 %v2084_v43, %v2082_v33  ;;  %v16948_v43 = vunpack.c.h.bf16 %v13970_v27 }
 0x494   :  { %11287 = vst [vmem:[#allocation3 + $0x20] sm:$0xff] %v11157_v44   ;;  %v1515_v44 = vmul.f32 %v1370_v14, %v13924_v23  ;;  %v14199_v23 = vld [vmem:[%s16842_s30] ss:$0 sm:$0xff] }
 0x4ca   :  { %v676_v55 = vpop.xlane.xlu1 %675 }
 0x4cb   :  { %v748_v3 = vmul.f32 %v676_v55, %v12207_v17  ;;  %v14193_v55 = vpop.f32.mrf.mxu0 }
 0x4cd   :  { %v812_v25 = vadd.f32 1e-05, %v748_v3 }
 0x4cf   :  { %11660 = vrsqrt.f32 %v812_v25  ;;  %vm1377_vm7 = vweird.f32 %v812_v25 }
 0x4d2   :  { %v678_v18 = vpop.xlane.xlu1 %677 }
 0x4d3   :  { %v749_v0 = vmul.f32 %v678_v18, %v12207_v17 }
 0x4d5   :  { %v11661_v46 = vpop.eup %11660  ;;  %v14176_v35 = vadd.f32 1e-05, %v749_v0 }
 0x4d6   :  { %v1372_v63 = vmul.f32 %v11661_v46, %v812_v25  ;;  %vm1378_vm6 = vweird.f32 %v11661_v46  ;;  %v1582_v25 = vmul.f32 %v14199_v23, %v1515_v44 }
 0x4d7   :  { %11662 = vrsqrt.f32 %v14176_v35  ;;  %vm1379_vm8 = vmor %vm1377_vm7, %vm1378_vm6  ;;  %vm1387_vm10 = vweird.f32 %v14176_v35 }
 0x4d8   :  { %v1373_v16 = vmul.f32 %v11661_v46, %v1372_v63 }
 0x4da   :  { %v1374_v41 = vmul.f32 0.5, %v1373_v16  ;;  %v365_v20 = vpop.xlane.xlu1 %364 }
 0x4db   :  { %v436_v24 = vmul.f32 %v12207_v17, %v365_v20  ;;  %v14214_v20 = vld [vmem:[#allocation4 + $0x10] sm:$0xff] }
 0x4dc   :  { %v1375_v30 = vsub.f32 1.5, %v1374_v41 }
 0x4dd   :  { %v14182_v33 = vpop.eup %11662  ;;  %v14186_v51 = vsub.f32 %v16948_v43, %v436_v24  ;;  %v2086_v8 = vpop.f32.mrf.mxu1 }
 0x4de   :  { %v1376_v26 = vmul.f32 %v11661_v46, %v1375_v30  ;;  %v1382_v36 = vmul.f32 %v14182_v33, %v14176_v35  ;;  %v684_v27 = vpop.xlane.xlu0 %683  ;;  %v2087_v30 = vadd.f32 %v2086_v8, %v12699_v50  ;;  %vm1388_vm9 = vweird.f32 %v14182_v33 }
 0x4df   :  { %v564_v54 = vmul.f32 %v14186_v51, %v14186_v51  ;;  %v680_v18 = vpop.xlane.xlu2 %679  ;;  %v752_v15 = vmul.f32 %v684_v27, %v12207_v17  ;;  %vm1389_vm11 = vmor %vm1387_vm10, %vm1388_vm9 }
 0x4e0   :  { %v1380_v11 = vsel %vm1379_vm8, %v11661_v46, %v1376_v26  ;;  %v1383_v49 = vmul.f32 %v14182_v33, %v1382_v36  ;;  %v750_v46 = vmul.f32 %v680_v18, %v12207_v17  ;;  %v14221_v36 = vpop.f32.mrf.mxu0 }
 0x4e1   :  { %v1516_v3 = vmul.f32 %v1380_v11, %v13993_v9  ;;  %691 = vadd.xlane.f32.xlu1 %v564_v54  ;;  %v14206_v63 = vadd.f32 1e-05, %v752_v15  ;;  %v14211_v9 = vld [vmem:[%s16843_s23] ss:$0 sm:$0xff] }
 0x4e2   :  { %v814_v16 = vadd.f32 1e-05, %v750_v46  ;;  %v1649_v14 = vadd.f32 %v14211_v9, %v1582_v25  ;;  %v1384_v24 = vmul.f32 0.5, %v1383_v49 }
 0x4e3   :  { %v1583_v0 = vmul.f32 %v14199_v23, %v1516_v3  ;;  %11664 = vrsqrt.f32 %v14206_v63  ;;  %vm1417_vm1 = vweird.f32 %v14206_v63 }
 0x4e4   :  { %11666 = vrsqrt.f32 %v814_v16  ;;  %v1385_v54 = vsub.f32 1.5, %v1384_v24  ;;  %vm1397_vm12 = vweird.f32 %v814_v16 }
 0x4e5   :  { %v1650_v52 = vadd.f32 %v14211_v9, %v1583_v0  ;;  %v2088_v41 = vpop.f32.mrf.mxu1 }
 0x4e6   :  { %v2089_v43 = vadd.f32 %v2088_v41, %v12699_v50  ;;  %v686_v3 = vpop.xlane.xlu1 %685  ;;  %v1386_v0 = vmul.f32 %v14182_v33, %v1385_v54 }
 0x4e7   :  { %v1686_v44 = vpack.c.bf16 %v1650_v52, %v1649_v14  ;;  %v682_v11 = vpop.xlane.xlu2 %681  ;;  %v753_v15 = vmul.f32 %v686_v3, %v12207_v17 }
 0x4e8   :  { %v11162_v26 = vpack.c.bf16 %v2089_v43, %v2087_v30  ;;  %v751_v27 = vmul.f32 %v682_v11, %v12207_v17  ;;  %v1390_v24 = vsel %vm1389_vm11, %v14182_v33, %v1386_v0  ;;  %v14237_v54 = vpop.f32.mrf.mxu0 }
 0x4e9   :  { %2531 = vadd.xlane.f32.xlu1 %v14214_v20  ;;  %1936 = vmatmul.bf16.gmra.mxu0 %v1686_v44  ;;  %v14224_v25 = vpop.eup %11664  ;;  %v14233_v14 = vadd.f32 1e-05, %v753_v15 }
 0x4ea   :  { %2105 = vmatmul.bf16.gmra.mxu1 %v1686_v44  ;;  %11288 = vst [vmem:[#allocation3 + $0xf0] sm:$0xff] %v11162_v26   ;;  %v11667_v8 = vpop.eup %11666  ;;  %v1412_v49 = vmul.f32 %v14224_v25, %v14206_v63  ;;  %v815_v18 = vadd.f32 1e-05, %v751_v27  ;;  %v1517_v27 = vmul.f32 %v1390_v24, %v14011_v57  ;;  %vm1418_vm2 = vweird.f32 %v14224_v25 }
 0x4eb   :  { %v1392_v46 = vmul.f32 %v11667_v8, %v814_v16  ;;  %vm1398_vm13 = vweird.f32 %v11667_v8  ;;  %vm14279_vm4 = vmor %vm1417_vm1, %vm1418_vm2  ;;  %vm1427_vm7 = vweird.f32 %v14233_v14 }
 0x4ec   :  { %11668 = vrsqrt.f32 %v815_v18  ;;  %v1413_v41 = vmul.f32 %v14224_v25, %v1412_v49  ;;  %vm1399_vm14 = vmor %vm1397_vm12, %vm1398_vm13  ;;  %vm1407_vm15 = vweird.f32 %v815_v18 }
 0x4ed   :  { %v1393_v52 = vmul.f32 %v11667_v8, %v1392_v46  ;;  %11670 = vrsqrt.f32 %v14233_v14 }
 0x4ee   :  { %v2091_v26 = vpop.f32.mrf.mxu1  ;;  %v1414_v49 = vmul.f32 0.5, %v1413_v41 }
 0x4ef   :  { %v1394_v30 = vmul.f32 0.5, %v1393_v52  ;;  %v688_v43 = vpop.xlane.xlu2 %687 }
 0x4f0   :  { %v754_v44 = vmul.f32 %v688_v43, %v12207_v17  ;;  %v1584_v43 = vmul.f32 %v14199_v23, %v1517_v27 }
 0x4f1   :  { %v1395_v11 = vsub.f32 1.5, %v1394_v30  ;;  %v1415_v30 = vsub.f32 1.5, %v1414_v49 }
 0x4f2   :  { %v14239_v3 = vpop.xlane.xlu0 %689  ;;  %v11669_v35 = vpop.eup %11668  ;;  %v14243_v33 = vadd.f32 1e-05, %v754_v44 }
 0x4f3   :  { %v1396_v16 = vmul.f32 %v11667_v8, %v1395_v11  ;;  %v1402_v15 = vmul.f32 %v11669_v35, %v815_v18  ;;  %vm1408_vm0 = vweird.f32 %v11669_v35  ;;  %v14248_v41 = vpop.eup %11670 }
 0x4f4   :  { %11672 = vrsqrt.f32 %v14243_v33  ;;  %vm14260_vm3 = vmor %vm1407_vm15, %vm1408_vm0  ;;  %vm1437_vm5 = vweird.f32 %v14243_v33  ;;  %vm1428_vm8 = vweird.f32 %v14248_v41 }
 0x4f5   :  { %v1400_v0 = vsel %vm1399_vm14, %v11667_v8, %v1396_v16  ;;  %v1403_v46 = vmul.f32 %v11669_v35, %v1402_v15  ;;  %v1416_v15 = vmul.f32 %v14224_v25, %v1415_v30  ;;  %vm1429_vm10 = vmor %vm1427_vm7, %vm1428_vm8 }
 0x4f6   :  { %v1518_v52 = vmul.f32 %v1400_v0, %v14057_v40  ;;  %v2093_v24 = vpop.f32.mrf.mxu1  ;;  %v2092_v40 = vadd.f32 %v2091_v26, %v12699_v50  ;;  %v14269_v26 = vpop.f32.mrf.mxu0 }
 0x4f7   :  { %v1404_v19 = vmul.f32 0.5, %v1403_v46  ;;  %v2528_v57 = vpop.xlane.xlu2 %2527  ;;  %v2094_v27 = vadd.f32 %v2093_v24, %v12699_v50  ;;  %v1651_v46 = vadd.f32 %v14211_v9, %v1584_v43  ;;  %16951 = vst [vmem:[#allocation30_spill] sm:$0xff] %v14269_v26  ;;  %v1422_v24 = vmul.f32 %v14248_v41, %v14233_v14 }
 0x4f8   :  { %v1585_v44 = vmul.f32 %v14199_v23, %v1518_v52  ;;  %v2535_v11 = vmul.f32 %v2528_v57, %v12207_v17 }
 0x4f9   :  { %v1405_v8 = vsub.f32 1.5, %v1404_v19  ;;  %v11167_v30 = vpack.c.bf16 %v2094_v27, %v2092_v40  ;;  %v1420_v40 = vsel %vm14279_vm4, %v14224_v25, %v1416_v15  ;;  %v1423_v27 = vmul.f32 %v14248_v41, %v1422_v24 }
 0x4fa   :  { %v2530_v49 = vpop.xlane.xlu0 %2529  ;;  %v14256_v16 = vpop.eup %11672  ;;  %v1652_v52 = vadd.f32 %v14211_v9, %v1585_v44  ;;  %v14267_v19 = vsub.f32 %v14150_v58, %v2535_v11 }
 0x4fb   :  { %v1406_v57 = vmul.f32 %v11669_v35, %v1405_v8  ;;  %v1432_v18 = vmul.f32 %v14256_v16, %v14243_v33  ;;  %v2536_v44 = vmul.f32 %v2530_v49, %v12207_v17  ;;  %11289 = vst [vmem:[#allocation3 + $0x88] sm:$0xff] %v11167_v30   ;;  %v1424_v30 = vmul.f32 0.5, %v1423_v27 }
 0x4fc   :  { %v1687_v58 = vpack.c.bf16 %v1652_v52, %v1651_v46  ;;  %v2543_v11 = vmul.f32 %v14267_v19, %v14267_v19  ;;  %vm1438_vm6 = vweird.f32 %v14256_v16 }
 0x4fd   :  { %v1410_v8 = vsel %vm14260_vm3, %v11669_v35, %v1406_v57  ;;  %v1433_v26 = vmul.f32 %v14256_v16, %v1432_v18  ;;  %v14290_v63 = vsub.f32 %v14153_v47, %v2536_v44  ;;  %v1520_v57 = vmul.f32 %v1420_v40, %v14052_v29  ;;  %vm1439_vm9 = vmor %vm1437_vm5, %vm1438_vm6 }
 0x4fe   :  { %1941 = vmatmul.bf16.gmra.mxu0 %v1687_v58  ;;  %2110 = vmatmul.bf16.gmra.mxu1 %v1687_v58  ;;  %v1519_v46 = vmul.f32 %v1410_v8, %v14095_v39  ;;  %v2096_v0 = vpop.f32.mrf.mxu1  ;;  %v14301_v18 = vpop.f32.mrf.mxu0 }
 0x4ff   :  { %2547 = vadd.xlane.f32.xlu0 %v2543_v11  ;;  %v2534_v49 = vpop.xlane.xlu2 %2533  ;;  %v2544_v35 = vmul.f32 %v14290_v63, %v14290_v63  ;;  %v1434_v52 = vmul.f32 0.5, %v1433_v26  ;;  %v1587_v39 = vmul.f32 %v14199_v23, %v1520_v57  ;;  %v1425_v26 = vsub.f32 1.5, %v1424_v30 }
 0x500   :  { %v2538_v47 = vmul.f32 %v2534_v49, %v12207_v17  ;;  %v1586_v25 = vmul.f32 %v14199_v23, %v1519_v46  ;;  %v2097_v44 = vadd.f32 %v2096_v0, %v12699_v50 }
 0x501   :  { %2549 = vadd.xlane.f32.xlu1 %v2544_v35  ;;  %v1435_v24 = vsub.f32 1.5, %v1434_v52  ;;  %v1654_v8 = vadd.f32 %v14211_v9, %v1587_v39  ;;  %v1426_v33 = vmul.f32 %v14248_v41, %v1425_v26 }
 0x502   :  { %v14305_v15 = vsub.f32 %v14160_v4, %v2538_v47  ;;  %v1653_v58 = vadd.f32 %v14211_v9, %v1586_v25 }
 0x503   :  { %v1436_v4 = vmul.f32 %v14256_v16, %v1435_v24  ;;  %v1430_v46 = vsel %vm1429_vm10, %v14248_v41, %v1426_v33  ;;  %v1805_v33 = vadd.f32 %v12903_v10, %v13194_v34 }
 0x504   :  { %v2546_v43 = vmul.f32 %v14305_v15, %v14305_v15  ;;  %v1688_v14 = vpack.c.bf16 %v1654_v8, %v1653_v58  ;;  %v1521_v52 = vmul.f32 %v1430_v46, %v14081_v48  ;;  %v755_v58 = vmul.f32 %v14239_v3, %v12207_v17 }
 0x505   :  { %v1440_v49 = vsel %vm1439_vm9, %v14256_v16, %v1436_v4  ;;  %v16954_v4 = vpack.i.bf16 %v13245_v38, %v13219_v5  ;;  %v16955_v5 = vpack.i.bf16 %v13344_v32, %v13341_v53  ;;  %v1810_v38 = vadd.f32 %v13035_v28, %v13194_v34  ;;  %v10307_v53 = vld [vmem:[%s16787_s6 + $0x38] sm:$0xff] }
 0x506   :  { %v2098_v29 = vpop.f32.mrf.mxu1  ;;  %v14320_v27 = vpop.f32.mrf.mxu0  ;;  %v1522_v0 = vmul.f32 %v1440_v49, %v14119_v21  ;;  %v1588_v47 = vmul.f32 %v14199_v23, %v1521_v52  ;;  %v819_v8 = vadd.f32 1e-05, %v755_v58  ;;  %2690 = vmatpush.bf16.msra.mxu2 %v10307_v53  ;;  %v1855_v58 = vadd.f32 %v13433_v59, %v13194_v34 }
 0x507   :  { %2553 = vadd.xlane.f32.xlu0 %v2546_v43  ;;  %v2099_v11 = vadd.f32 %v2098_v29, %v12699_v50  ;;  %v16957_v53 = vpack.i.bf16 %v13451_v45, %v13448_v61  ;;  %v10301_v45 = vld [vmem:[%s16787_s6 + $0x8] sm:$0xff] }
 0x508   :  { %v1589_v57 = vmul.f32 %v14199_v23, %v1522_v0  ;;  %v1655_v41 = vadd.f32 %v14211_v9, %v1588_v47  ;;  %11674 = vrsqrt.f32 %v819_v8  ;;  %vm1447_vm11 = vweird.f32 %v819_v8 }
 0x509   :  { %v11172_v40 = vpack.c.bf16 %v2099_v11, %v2097_v44  ;;  %v1845_v44 = vadd.f32 %v13276_v1, %v13194_v34  ;;  %v1850_v1 = vadd.f32 %v13373_v22, %v13194_v34 }
 0x50a   :  { %v1656_v24 = vadd.f32 %v14211_v9, %v1589_v57 }
 0x50b   :  { %11290 = vst [vmem:[#allocation3 + $0x48] sm:$0xff] %v11172_v40   ;;  %v11317_v40 = vpack.i.bf16 %v1845_v44, %v1805_v33  ;;  %v11321_v52 = vpack.i.bf16 %v1850_v1, %v1810_v38  ;;  %v10306_v44 = vld [vmem:[%s16787_s6 + $0x30] sm:$0xff] }
 0x50c   :  { %v1689_v21 = vpack.c.bf16 %v1656_v24, %v1655_v41  ;;  %2691 = vmatpush.bf16.msra.mxu2 %v10306_v44 }
 0x50e   :  { %1946 = vmatmul.bf16.gmra.mxu0 %v1688_v14  ;;  %2115 = vmatmul.bf16.gmra.mxu1 %v1688_v14  ;;  %v2101_v35 = vpop.f32.mrf.mxu1  ;;  %v14328_v30 = vpop.f32.mrf.mxu0 }
 0x50f   :  { %v2102_v16 = vadd.f32 %v2101_v35, %v12699_v50  ;;  %v11675_v14 = vpop.eup %11674 }
 0x510   :  { %v1442_v3 = vmul.f32 %v11675_v14, %v819_v8  ;;  %vm1448_vm12 = vweird.f32 %v11675_v14 }
 0x511   :  { %vm1449_vm13 = vmor %vm1447_vm11, %vm1448_vm12 }
 0x512   :  { %v1443_v46 = vmul.f32 %v11675_v14, %v1442_v3 }
 0x514   :  { %v1444_v47 = vmul.f32 0.5, %v1443_v46 }
 0x516   :  { %v2103_v25 = vpop.f32.mrf.mxu1  ;;  %v14334_v48 = vpop.f32.mrf.mxu0  ;;  %v1445_v32 = vsub.f32 1.5, %v1444_v47 }
 0x517   :  { %v2104_v39 = vadd.f32 %v2103_v25, %v12699_v50 }
 0x519   :  { %v11177_v43 = vpack.c.bf16 %v2104_v39, %v2102_v16  ;;  %v1446_v39 = vmul.f32 %v11675_v14, %v1445_v32 }
 0x51b   :  { %11291 = vst [vmem:[#allocation3 + $0xf8] sm:$0xff] %v11177_v43   ;;  %v16956_v43 = vpack.i.bf16 %v13407_v62, %v13404_v31  ;;  %v1450_v8 = vsel %vm1449_vm13, %v11675_v14, %v1446_v39  ;;  %v10304_v14 = vld [vmem:[%s16787_s6 + $0x20] sm:$0xff] }
 0x51c   :  { %v1523_v59 = vmul.f32 %v1450_v8, %v14128_v6  ;;  %v10303_v6 = vld [vmem:[%s16787_s6 + $0x18] sm:$0xff]  ;;  %v16959_v8 = vld [vmem:[#allocation21_spill] sm:$0xff] }
 0x51e   :  { %1951 = vmatmul.bf16.gmra.mxu0 %v1689_v21  ;;  %2120 = vmatmul.bf16.gmra.mxu1 %v1689_v21  ;;  %v14336_v26 = vpop.f32.mrf.mxu0  ;;  %v1590_v46 = vmul.f32 %v14199_v23, %v1523_v59 }
 0x526   :  { %v14338_v29 = vpop.f32.mrf.mxu0 }
 0x52e   :  { %v14347_v11 = vpop.f32.mrf.mxu0 }
 0x536   :  { %v14351_v49 = vpop.f32.mrf.mxu0 }
 0x53b   :  { %11316 = vxpose.xlu1.b32.start [1/16] %v16954_v4, 128 }
 0x53e   :  { %v14360_v10 = vpop.f32.mrf.mxu0 }
 0x543   :  { %11318 = vxpose.xlu1.b32.cont [2/16] %v11317_v40, 128  ;;  %v10305_v40 = vld [vmem:[%s16787_s6 + $0x28] sm:$0xff] }
 0x544   :  { %2692 = vmatpush.bf16.msra.mxu2 %v10305_v40 }
 0x546   :  { %v14367_v24 = vpop.f32.mrf.mxu0 }
 0x548   :  { %2693 = vmatpush.bf16.msra.mxu2 %v10304_v14 }
 0x54b   :  { %11320 = vxpose.xlu1.b32.cont [3/16] %v16955_v5, 128 }
 0x54c   :  { %2694 = vmatpush.bf16.msra.mxu2 %v10303_v6 }
 0x54e   :  { %v1922_v1 = vpop.f32.mrf.mxu0 }
 0x553   :  { %11322 = vxpose.xlu1.b32.cont [4/16] %v11321_v52, 128  ;;  %v1657_v52 = vadd.f32 %v14211_v9, %v1590_v46 }
 0x554   :  { %v692_v0 = vpop.xlane.xlu1 %691 }
 0x555   :  { %v756_v35 = vmul.f32 %v692_v0, %v12207_v17 }
 0x557   :  { %v820_v57 = vadd.f32 1e-05, %v756_v35 }
 0x559   :  { %11676 = vrsqrt.f32 %v820_v57  ;;  %vm1457_vm15 = vweird.f32 %v820_v57 }
 0x55b   :  { %11324 = vxpose.xlu1.b32.cont [5/16] %v16956_v43, 128 }
 0x55c   :  { %v2532_v22 = vpop.xlane.xlu1 %2531 }
 0x55d   :  { %v2537_v28 = vmul.f32 %v2532_v22, %v12207_v17 }
 0x55f   :  { %v11677_v25 = vpop.eup %11676  ;;  %v14370_v16 = vsub.f32 %v14214_v20, %v2537_v28  ;;  %v1815_v20 = vadd.f32 %v13111_v60, %v13194_v34  ;;  %v10302_v28 = vld [vmem:[%s16787_s6 + $0x10] sm:$0xff] }
 0x560   :  { %v1452_v41 = vmul.f32 %v11677_v25, %v820_v57  ;;  %vm1458_vm14 = vweird.f32 %v11677_v25  ;;  %2695 = vmatpush.bf16.msra.mxu2 %v10302_v28 }
 0x561   :  { %v2545_v21 = vmul.f32 %v14370_v16, %v14370_v16  ;;  %v11325_v31 = vpack.i.bf16 %v1855_v58, %v1815_v20  ;;  %vm1459_vm0 = vmor %vm1457_vm15, %vm1458_vm14  ;;  %v16958_v20 = vld [vmem:[#allocation22_spill] sm:$0xff] }
 0x562   :  { %v1453_v4 = vmul.f32 %v11677_v25, %v1452_v41 }
 0x563   :  { %2551 = vadd.xlane.f32.xlu2 %v2545_v21  ;;  %11326 = vxpose.xlu1.b32.cont [6/16] %v11325_v31, 128 }
 0x564   :  { %v1454_v33 = vmul.f32 0.5, %v1453_v4  ;;  %2696 = vmatpush.bf16.msra.mxu2 %v10301_v45  ;;  %v14434_v45 = vld [vmem:[%s16789_s8] ss:$0 sm:$0xff] }
 0x566   :  { %v1455_v62 = vsub.f32 1.5, %v1454_v33  ;;  %v16960_v33 = vpack.i.bf16 %v16958_v20, %v16959_v8 }
 0x567   :  { %v2106_v3 = vpop.f32.mrf.mxu1 }
 0x568   :  { %v1456_v5 = vmul.f32 %v11677_v25, %v1455_v62  ;;  %v2107_v47 = vadd.f32 %v2106_v3, %v12699_v50  ;;  %v16961_v62 = vld [vmem:[#allocation23_spill] sm:$0xff]  ;;  %v16962_v3 = vld [vmem:[#allocation17_spill] sm:$0xff] }
 0x569   :  { %v1865_v40 = vadd.f32 %v16961_v62, %v13194_v34  ;;  %v16964_v62 = vld [vmem:[#allocation18_spill] sm:$0xff] }
 0x56a   :  { %v1460_v60 = vsel %vm1459_vm0, %v11677_v25, %v1456_v5  ;;  %v1924_v25 = vpop.f32.mrf.mxu0  ;;  %v1825_v5 = vadd.f32 %v16962_v3, %v13194_v34  ;;  %v1888_v3 = vadd.f32 %v14193_v55, %v13194_v34 }
 0x56b   :  { %v1524_v38 = vmul.f32 %v1460_v60, %v14186_v51  ;;  %11328 = vxpose.xlu1.b32.cont [7/16] %v16957_v53, 128 }
 0x56d   :  { %v1591_v0 = vmul.f32 %v14199_v23, %v1524_v38  ;;  %v1860_v23 = vadd.f32 %v13489_v2, %v13194_v34  ;;  %v11333_v38 = vpack.i.bf16 %v1865_v40, %v1825_v5  ;;  %v1830_v40 = vadd.f32 %v16964_v62, %v13194_v34 }
 0x56f   :  { %v2108_v35 = vpop.f32.mrf.mxu1  ;;  %v1658_v57 = vadd.f32 %v14211_v9, %v1591_v0  ;;  %v1820_v9 = vadd.f32 %v13123_v7, %v13194_v34  ;;  %v10300_v7 = vld [vmem:[%s16787_s6] sm:$0xff]  ;;  %v1923_v0 = vadd.f32 %v1922_v1, %v13194_v34 }
 0x570   :  { %v2109_v51 = vadd.f32 %v2108_v35, %v12699_v50  ;;  %2697 = vmatpush.bf16.msra.mxu2 %v10300_v7 }
 0x571   :  { %v1690_v32 = vpack.c.bf16 %v1658_v57, %v1657_v52  ;;  %v11329_v61 = vpack.i.bf16 %v1860_v23, %v1820_v9 }
 0x572   :  { %v11182_v22 = vpack.c.bf16 %v2109_v51, %v2107_v47  ;;  %v2548_v39 = vpop.xlane.xlu0 %2547  ;;  %v1927_v4 = vpop.f32.mrf.mxu0  ;;  %v1883_v47 = vadd.f32 %v14173_v37, %v13194_v34 }
 0x573   :  { %1956 = vmatmul.bf16.gmra.mxu0 %v1690_v32  ;;  %2125 = vmatmul.bf16.gmra.mxu1 %v1690_v32  ;;  %v2555_v2 = vmul.f32 %v2548_v39, %v12207_v17 }
 0x574   :  { %11292 = vst [vmem:[#allocation3 + $0xc0] sm:$0xff] %v11182_v22   ;;  %11330 = vxpose.xlu1.b32.cont [8/16] %v11329_v61, 128  ;;  %v2550_v41 = vpop.xlane.xlu1 %2549  ;;  %v11427_v1 = vpack.i.bf16 %v1923_v0, %v1883_v47 }
 0x575   :  { %v2559_v43 = vadd.f32 1e-05, %v2555_v2  ;;  %v2556_v21 = vmul.f32 %v2550_v41, %v12207_v17  ;;  %v1925_v2 = vadd.f32 %v1924_v25, %v13194_v34  ;;  %v14441_v41 = vld [vmem:[%s16790_s9] ss:$0 sm:$0xff]  ;;  %v1870_v25 = vadd.f32 %v13674_v56, %v13194_v34 }
 0x577   :  { %11678 = vrsqrt.f32 %v2559_v43  ;;  %v2560_v58 = vadd.f32 1e-05, %v2556_v21  ;;  %vm2569_vm1 = vweird.f32 %v2559_v43 }
 0x579   :  { %11680 = vrsqrt.f32 %v2560_v58  ;;  %vm2579_vm3 = vweird.f32 %v2560_v58 }
 0x57a   :  { %v1929_v35 = vpop.f32.mrf.mxu0 }
 0x57b   :  { %v2111_v44 = vpop.f32.mrf.mxu1 }
 0x57c   :  { %11332 = vxpose.xlu1.b32.cont [9/16] %v16960_v33, 128  ;;  %v2112_v51 = vadd.f32 %v2111_v44, %v12699_v50  ;;  %v16963_v44 = vpack.i.bf16 %v13641_v13, %v13638_v42  ;;  %v1928_v42 = vadd.f32 %v1927_v4, %v13194_v34  ;;  %v1890_v4 = vadd.f32 %v14221_v36, %v13194_v34 }
 0x57d   :  { %v11679_v31 = vpop.eup %11678  ;;  %v1893_v36 = vadd.f32 %v14237_v54, %v13194_v34  ;;  %v16974_v54 = vld [vmem:[#allocation29_spill] sm:$0xff] }
 0x57e   :  { %v2564_v59 = vmul.f32 %v11679_v31, %v2559_v43  ;;  %vm2570_vm2 = vweird.f32 %v11679_v31 }
 0x57f   :  { %v11681_v60 = vpop.eup %11680  ;;  %vm2571_vm5 = vmor %vm2569_vm1, %vm2570_vm2 }
 0x580   :  { %v2565_v14 = vmul.f32 %v11679_v31, %v2564_v59  ;;  %v2574_v46 = vmul.f32 %v11681_v60, %v2560_v58  ;;  %vm2580_vm4 = vweird.f32 %v11681_v60  ;;  %v1885_v58 = vadd.f32 %v14178_v12, %v13194_v34 }
 0x581   :  { %vm2581_vm6 = vmor %vm2579_vm3, %vm2580_vm4  ;;  %v11337_v59 = vpack.i.bf16 %v1870_v25, %v1830_v40  ;;  %v16975_v25 = vld [vmem:[#allocation20_spill] sm:$0xff]  ;;  %v1898_v40 = vadd.f32 %v14301_v18, %v13194_v34  ;;  %v1903_v18 = vadd.f32 %v14328_v30, %v13194_v34 }
 0x582   :  { %v2566_v6 = vmul.f32 0.5, %v2565_v14  ;;  %v2575_v52 = vmul.f32 %v11681_v60, %v2574_v46  ;;  %v1932_v20 = vpop.f32.mrf.mxu0  ;;  %v11429_v8 = vpack.i.bf16 %v1925_v2, %v1885_v58  ;;  %v1930_v46 = vadd.f32 %v1929_v35, %v13194_v34  ;;  %v16972_v58 = vld [vmem:[#allocation27_spill] sm:$0xff] }
 0x583   :  { %v2113_v57 = vpop.f32.mrf.mxu1  ;;  %v1933_v35 = vadd.f32 %v1932_v20, %v13194_v34 }
 0x584   :  { %v2567_v53 = vsub.f32 1.5, %v2566_v6  ;;  %v2114_v32 = vadd.f32 %v2113_v57, %v12699_v50  ;;  %11334 = vxpose.xlu1.b32.cont [10/16] %v11333_v38, 128  ;;  %v2576_v23 = vmul.f32 0.5, %v2575_v52  ;;  %v16965_v6 = vld [vmem:[#allocation25_spill] sm:$0xff]  ;;  %v16966_v52 = vld [vmem:[#allocation24_spill] sm:$0xff]  ;;  %v16968_v57 = vld [vmem:[#allocation26_spill] sm:$0xff] }
 0x585   :  { %v16967_v55 = vpack.i.bf16 %v16965_v6, %v16966_v52  ;;  %v1875_v47 = vadd.f32 %v16968_v57, %v13194_v34 }
 0x586   :  { %v2568_v22 = vmul.f32 %v11679_v31, %v2567_v53  ;;  %v11187_v28 = vpack.c.bf16 %v2114_v32, %v2112_v51  ;;  %v2577_v9 = vsub.f32 1.5, %v2576_v23  ;;  %v11433_v53 = vpack.i.bf16 %v1930_v46, %v1890_v4  ;;  %v16969_v32 = vld [vmem:[#allocation19_spill] sm:$0xff] }
 0x587   :  { %v1835_v23 = vadd.f32 %v16969_v32, %v13194_v34 }
 0x588   :  { %11293 = vst [vmem:[#allocation3 + $0xb8] sm:$0xff] %v11187_v28   ;;  %v2572_v37 = vsel %vm2571_vm5, %v11679_v31, %v2568_v22  ;;  %v2578_v61 = vmul.f32 %v11681_v60, %v2577_v9 }
 0x589   :  { %v2603_v39 = vmul.f32 %v2572_v37, %v14267_v19  ;;  %v11435_v37 = vpack.i.bf16 %v1933_v35, %v1893_v36 }
 0x58a   :  { %v2582_v21 = vsel %vm2581_vm6, %v11681_v60, %v2578_v61  ;;  %v11431_v60 = vpack.i.bf16 %v1928_v42, %v1888_v3  ;;  %v1934_v38 = vpop.f32.mrf.mxu0  ;;  %v2554_v42 = vpop.xlane.xlu0 %2553 }
 0x58b   :  { %v2116_v43 = vpop.f32.mrf.mxu1  ;;  %v2610_v7 = vmul.f32 %v14434_v45, %v2603_v39  ;;  %v2604_v19 = vmul.f32 %v2582_v21, %v14290_v63  ;;  %v1935_v2 = vadd.f32 %v1934_v38, %v13194_v34 }
 0x58c   :  { %11428 = vxpose.xlu2.b32.start [1/16] %v11427_v1, 128  ;;  %11336 = vxpose.xlu1.b32.cont [11/16] %v16963_v44, 128  ;;  %v2117_v56 = vadd.f32 %v2116_v43, %v12699_v50  ;;  %v11341_v1 = vpack.i.bf16 %v1875_v47, %v1835_v23  ;;  %v16970_v43 = vld [vmem:[#allocation30_spill] sm:$0xff] }
 0x58d   :  { %v2611_v33 = vmul.f32 %v14434_v45, %v2604_v19  ;;  %v2617_v31 = vadd.f32 %v14441_v41, %v2610_v7  ;;  %v1895_v21 = vadd.f32 %v16970_v43, %v13194_v34  ;;  %v16971_v7 = vld [vmem:[#allocation28_spill] sm:$0xff]  ;;  %v1880_v19 = vadd.f32 %v16974_v54, %v13194_v34 }
 0x58e   :  { %v16973_v44 = vpack.i.bf16 %v16971_v7, %v16972_v58 }
 0x58f   :  { %v2618_v12 = vadd.f32 %v14441_v41, %v2611_v33  ;;  %v11437_v20 = vpack.i.bf16 %v1935_v2, %v1895_v21  ;;  %v1913_v21 = vadd.f32 %v14347_v11, %v13194_v34 }
 0x591   :  { %v2621_v13 = vpack.c.bf16 %v2618_v12, %v2617_v31 }
 0x592   :  { %v1937_v51 = vpop.f32.mrf.mxu0 }
 0x593   :  { %v2118_v63 = vpop.f32.mrf.mxu1  ;;  %2698 = vmatmul.bf16.vlgmr.msra.gmra.mxu2 %v2621_v13  ;;  %v1938_v31 = vadd.f32 %v1937_v51, %v13194_v34  ;;  %v1900_v13 = vadd.f32 %v14320_v27, %v13194_v34  ;;  %v1905_v27 = vadd.f32 %v14334_v48, %v13194_v34 }
 0x594   :  { %11430 = vxpose.xlu2.b32.cont [2/16] %v11429_v8, 128  ;;  %v2119_v5 = vadd.f32 %v2118_v63, %v12699_v50  ;;  %11338 = vxpose.xlu1.b32.cont [12/16] %v11337_v59, 128  ;;  %v1840_v8 = vadd.f32 %v16975_v25, %v13194_v34 }
 0x595   :  { %v11439_v12 = vpack.i.bf16 %v1938_v31, %v1898_v40 }
 0x596   :  { %v11192_v14 = vpack.c.bf16 %v2119_v5, %v2117_v56  ;;  %v11345_v33 = vpack.i.bf16 %v1880_v19, %v1840_v8  ;;  %v2558_v56 = vmul.f32 %v2554_v42, %v12207_v17  ;;  %v1915_v42 = vadd.f32 %v14351_v49, %v13194_v34 }
 0x597   :  { %v1918_v49 = vadd.f32 %v14360_v10, %v13194_v34  ;;  %v1920_v10 = vadd.f32 %v14367_v24, %v13194_v34 }
 0x598   :  { %11294 = vst [vmem:[#allocation3] sm:$0xff] %v11192_v14  }
 0x59a   :  { %v1939_v39 = vpop.f32.mrf.mxu0 }
 0x59b   :  { %v2121_v0 = vpop.f32.mrf.mxu1  ;;  %v1940_v59 = vadd.f32 %v1939_v39, %v13194_v34 }
 0x59c   :  { %11432 = vxpose.xlu2.b32.cont [3/16] %v11431_v60, 128  ;;  %11340 = vxpose.xlu1.b32.cont [13/16] %v16967_v55, 128  ;;  %v2122_v28 = vadd.f32 %v2121_v0, %v12699_v50  ;;  %v2562_v60 = vadd.f32 1e-05, %v2558_v56 }
 0x59d   :  { %v11441_v3 = vpack.i.bf16 %v1940_v59, %v1900_v13 }
 0x59e   :  { %11682 = vrsqrt.f32 %v2562_v60  ;;  %vm2599_vm7 = vweird.f32 %v2562_v60 }
 0x5a2   :  { %v1942_v62 = vpop.f32.mrf.mxu0 }
 0x5a3   :  { %v2123_v22 = vpop.f32.mrf.mxu1  ;;  %v1943_v5 = vadd.f32 %v1942_v62, %v13194_v34 }
 0x5a4   :  { %11434 = vxpose.xlu2.b32.cont [4/16] %v11433_v53, 128  ;;  %v2124_v9 = vadd.f32 %v2123_v22, %v12699_v50  ;;  %11342 = vxpose.xlu1.b32.cont [14/16] %v11341_v1, 128  ;;  %v11683_v0 = vpop.eup %11682  ;;  %v1908_v53 = vadd.f32 %v14336_v26, %v13194_v34  ;;  %v1910_v22 = vadd.f32 %v14338_v29, %v13194_v34 }
 0x5a5   :  { %v11443_v14 = vpack.i.bf16 %v1943_v5, %v1903_v18  ;;  %v2594_v6 = vmul.f32 %v11683_v0, %v2562_v60  ;;  %vm2600_vm8 = vweird.f32 %v11683_v0 }
 0x5a6   :  { %v11197_v61 = vpack.c.bf16 %v2124_v9, %v2122_v28  ;;  %vm2601_vm9 = vmor %vm2599_vm7, %vm2600_vm8 }
 0x5a7   :  { %v2595_v47 = vmul.f32 %v11683_v0, %v2594_v6 }
 0x5a8   :  { %11295 = vst [vmem:[#allocation3 + $0x28] sm:$0xff] %v11197_v61  }
 0x5a9   :  { %v2596_v23 = vmul.f32 0.5, %v2595_v47 }
 0x5aa   :  { %v1944_v63 = vpop.f32.mrf.mxu0 }
 0x5ab   :  { %v1945_v46 = vadd.f32 %v1944_v63, %v13194_v34  ;;  %v2597_v35 = vsub.f32 1.5, %v2596_v23 }
 0x5ac   :  { %11436 = vxpose.xlu2.b32.cont [5/16] %v11435_v37, 128  ;;  %11344 = vxpose.xlu1.b32.cont [15/16] %v16973_v44, 128 }
 0x5ad   :  { %v11445_v4 = vpack.i.bf16 %v1945_v46, %v1905_v27  ;;  %v2598_v37 = vmul.f32 %v11683_v0, %v2597_v35 }
 0x5af   :  { %v2602_v43 = vsel %vm2601_vm9, %v11683_v0, %v2598_v37 }
 0x5b0   :  { %v2606_v54 = vmul.f32 %v2602_v43, %v14305_v15 }
 0x5b2   :  { %v1947_v38 = vpop.f32.mrf.mxu0  ;;  %v2613_v40 = vmul.f32 %v14434_v45, %v2606_v54 }
 0x5b3   :  { %v1948_v55 = vadd.f32 %v1947_v38, %v13194_v34 }
 0x5b4   :  { %11438 = vxpose.xlu2.b32.cont [6/16] %v11437_v20, 128  ;;  %11346 = vxpose.xlu1.b32.end [16/16] %v11345_v33, 128  ;;  %v2620_v5 = vadd.f32 %v14441_v41, %v2613_v40 }
 0x5b5   :  { %v11447_v32 = vpack.i.bf16 %v1948_v55, %v1908_v53 }
 0x5ba   :  { %v1949_v52 = vpop.f32.mrf.mxu0 }
 0x5bb   :  { %v1950_v48 = vadd.f32 %v1949_v52, %v13194_v34 }
 0x5bc   :  { %11440 = vxpose.xlu2.b32.cont [7/16] %v11439_v12, 128 }
 0x5bd   :  { %v11449_v28 = vpack.i.bf16 %v1950_v48, %v1910_v22 }
 0x5c2   :  { %v1952_v1 = vpop.f32.mrf.mxu0 }
 0x5c3   :  { %v1953_v39 = vadd.f32 %v1952_v1, %v13194_v34 }
 0x5c4   :  { %11442 = vxpose.xlu2.b32.cont [8/16] %v11441_v3, 128 }
 0x5c5   :  { %v11451_v58 = vpack.i.bf16 %v1953_v39, %v1913_v21 }
 0x5ca   :  { %v1954_v29 = vpop.f32.mrf.mxu0 }
 0x5cb   :  { %v1955_v62 = vadd.f32 %v1954_v29, %v13194_v34 }
 0x5cc   :  { %11444 = vxpose.xlu2.b32.cont [9/16] %v11443_v14, 128 }
 0x5cd   :  { %v11453_v3 = vpack.i.bf16 %v1955_v62, %v1915_v42 }
 0x5d4   :  { %11446 = vxpose.xlu2.b32.cont [10/16] %v11445_v4, 128 }
 0x5d6   :  { %v2552_v57 = vpop.xlane.xlu2 %2551 }
 0x5d7   :  { %v2557_v30 = vmul.f32 %v2552_v57, %v12207_v17 }
 0x5d9   :  { %v2561_v51 = vadd.f32 1e-05, %v2557_v30 }
 0x5db   :  { %11684 = vrsqrt.f32 %v2561_v51  ;;  %vm2589_vm11 = vweird.f32 %v2561_v51 }
 0x5dc   :  { %11448 = vxpose.xlu2.b32.cont [11/16] %v11447_v32, 128 }
 0x5e0   :  { %v11347_v61 = vpop.trf.xlu1 }
 0x5e1   :  { %v11685_v36 = vpop.eup %11684  ;;  %v11351_v19 = vunpack.i.h.bf16 %v11347_v61  ;;  %v11348_v20 = vunpack.i.l.bf16 %v11347_v61 }
 0x5e2   :  { %v2584_v9 = vmul.f32 %v11685_v36, %v2561_v51  ;;  %vm2590_vm10 = vweird.f32 %v11685_v36 }
 0x5e3   :  { %vm2591_vm12 = vmor %vm2589_vm11, %vm2590_vm10 }
 0x5e4   :  { %v2585_v26 = vmul.f32 %v11685_v36, %v2584_v9  ;;  %11450 = vxpose.xlu2.b32.cont [12/16] %v11449_v28, 128 }
 0x5e6   :  { %v2586_v2 = vmul.f32 0.5, %v2585_v26 }
 0x5e8   :  { %v2587_v7 = vsub.f32 1.5, %v2586_v2  ;;  %v11352_v25 = vpop.trf.xlu1 }
 0x5e9   :  { %v11356_v33 = vunpack.i.h.bf16 %v11352_v25  ;;  %v11353_v31 = vunpack.i.l.bf16 %v11352_v25 }
 0x5ea   :  { %v2588_v44 = vmul.f32 %v11685_v36, %v2587_v7 }
 0x5eb   :  { %v10887_v12 = vpack.c.bf16 %v11353_v31, %v11348_v20  ;;  %v10927_v59 = vpack.c.bf16 %v11356_v33, %v11351_v19 }
 0x5ec   :  { %11452 = vxpose.xlu2.b32.cont [13/16] %v11451_v58, 128  ;;  %v2592_v8 = vsel %vm2591_vm12, %v11685_v36, %v2588_v44 }
 0x5ed   :  { %v2605_v11 = vmul.f32 %v2592_v8, %v14370_v16  ;;  %10888 = vst [vmem:[#allocation2 + $0xb0] sm:$0xff] %v10887_v12  }
 0x5ee   :  { %11242 = vst [vmem:[#allocation2 + $0x80] sm:$0xff] %v10927_v59  }
 0x5ef   :  { %v2612_v13 = vmul.f32 %v14434_v45, %v2605_v11 }
 0x5f0   :  { %v2126_v15 = vpop.f32.mrf.mxu1  ;;  %v1957_v63 = vpop.f32.mrf.mxu0 }
 0x5f1   :  { %v2619_v56 = vadd.f32 %v14441_v41, %v2612_v13  ;;  %v11357_v60 = vpop.trf.xlu1  ;;  %v1958_v18 = vadd.f32 %v1957_v63, %v13194_v34  ;;  %v2127_v45 = vadd.f32 %v2126_v15, %v12699_v50 }
 0x5f2   :  { %v11361_v0 = vunpack.i.h.bf16 %v11357_v60  ;;  %v11358_v27 = vunpack.i.l.bf16 %v11357_v60 }
 0x5f3   :  { %v2622_v16 = vpack.c.bf16 %v2620_v5, %v2619_v56  ;;  %v11455_v46 = vpack.i.bf16 %v1958_v18, %v1918_v49 }
 0x5f4   :  { %11454 = vxpose.xlu2.b32.cont [14/16] %v11453_v3, 128 }
 0x5f5   :  { %2703 = vmatmul.bf16.gmra.mxu2 %v2622_v16 }
 0x5f8   :  { %v2128_v14 = vpop.f32.mrf.mxu1  ;;  %v1959_v4 = vpop.f32.mrf.mxu0 }
 0x5f9   :  { %v2129_v38 = vadd.f32 %v2128_v14, %v12699_v50  ;;  %v11362_v41 = vpop.trf.xlu1  ;;  %v1960_v57 = vadd.f32 %v1959_v4, %v13194_v34 }
 0x5fa   :  { %v11366_v52 = vunpack.i.h.bf16 %v11362_v41  ;;  %v11363_v55 = vunpack.i.l.bf16 %v11362_v41 }
 0x5fb   :  { %v11202_v6 = vpack.c.bf16 %v2129_v38, %v2127_v45  ;;  %v11457_v50 = vpack.i.bf16 %v1960_v57, %v1920_v10 }
 0x5fc   :  { %11456 = vxpose.xlu2.b32.cont [15/16] %v11455_v46, 128  ;;  %v10892_v47 = vpack.c.bf16 %v11363_v55, %v11358_v27  ;;  %v10932_v30 = vpack.c.bf16 %v11366_v52, %v11361_v0 }
 0x5fd   :  { %11296 = vst [vmem:[#allocation3 + $0x98] sm:$0xff] %v11202_v6  }
 0x5fe   :  { %11235 = vst [vmem:[#allocation2] sm:$0xff] %v10892_v47  }
 0x5ff   :  { %11243 = vst [vmem:[#allocation2 + $0x88] sm:$0xff] %v10932_v30  }
 0x601   :  { %v11367_v53 = vpop.trf.xlu1 }
 0x602   :  { %v11371_v51 = vunpack.i.h.bf16 %v11367_v53  ;;  %v11368_v32 = vunpack.i.l.bf16 %v11367_v53 }
 0x604   :  { %11458 = vxpose.xlu2.b32.end [16/16] %v11457_v50, 128 }
 0x609   :  { %v11372_v23 = vpop.trf.xlu1 }
 0x60a   :  { %v11376_v48 = vunpack.i.h.bf16 %v11372_v23  ;;  %v11373_v1 = vunpack.i.l.bf16 %v11372_v23 }
 0x60c   :  { %v10897_v35 = vpack.c.bf16 %v11373_v1, %v11368_v32  ;;  %v10937_v22 = vpack.c.bf16 %v11376_v48, %v11371_v51 }
 0x60e   :  { %11236 = vst [vmem:[#allocation2 + $0xd8] sm:$0xff] %v10897_v35  }
 0x60f   :  { %11244 = vst [vmem:[#allocation2 + $0xe8] sm:$0xff] %v10937_v22  }
 0x611   :  { %v11377_v36 = vpop.trf.xlu1 }
 0x612   :  { %v11381_v28 = vunpack.i.h.bf16 %v11377_v36  ;;  %v11378_v9 = vunpack.i.l.bf16 %v11377_v36 }
 0x619   :  { %v11382_v37 = vpop.trf.xlu1 }
 0x61a   :  { %v11386_v26 = vunpack.i.h.bf16 %v11382_v37  ;;  %v11383_v34 = vunpack.i.l.bf16 %v11382_v37 }
 0x61c   :  { %v10902_v24 = vpack.c.bf16 %v11383_v34, %v11378_v9  ;;  %v10942_v61 = vpack.c.bf16 %v11386_v26, %v11381_v28 }
 0x61e   :  { %11237 = vst [vmem:[#allocation2 + $0x18] sm:$0xff] %v10902_v24  }
 0x61f   :  { %11245 = vst [vmem:[#allocation2 + $0xb8] sm:$0xff] %v10942_v61  }
 0x621   :  { %v11387_v39 = vpop.trf.xlu1 }
 0x622   :  { %v11391_v43 = vunpack.i.h.bf16 %v11387_v39  ;;  %v11388_v21 = vunpack.i.l.bf16 %v11387_v39 }
 0x625   :  { %v11459_v2 = vpop.trf.xlu2 }
 0x626   :  { %v11463_v7 = vunpack.i.h.bf16 %v11459_v2  ;;  %v11460_v29 = vunpack.i.l.bf16 %v11459_v2 }
 0x629   :  { %v11392_v58 = vpop.trf.xlu1 }
 0x62a   :  { %v11396_v44 = vunpack.i.h.bf16 %v11392_v58  ;;  %v11393_v54 = vunpack.i.l.bf16 %v11392_v58 }
 0x62c   :  { %v10907_v8 = vpack.c.bf16 %v11393_v54, %v11388_v21  ;;  %v10947_v33 = vpack.c.bf16 %v11396_v44, %v11391_v43 }
 0x62d   :  { %v11464_v19 = vpop.trf.xlu2 }
 0x62e   :  { %v11468_v20 = vunpack.i.h.bf16 %v11464_v19  ;;  %v11465_v25 = vunpack.i.l.bf16 %v11464_v19  ;;  %11238 = vst [vmem:[#allocation2 + $0x50] sm:$0xff] %v10907_v8  }
 0x62f   :  { %11246 = vst [vmem:[#allocation2 + $0x60] sm:$0xff] %v10947_v33  }
 0x630   :  { %v10967_v31 = vpack.c.bf16 %v11465_v25, %v11460_v29  ;;  %v11007_v62 = vpack.c.bf16 %v11468_v20, %v11463_v7 }
 0x631   :  { %v11397_v11 = vpop.trf.xlu1 }
 0x632   :  { %11250 = vst [vmem:[#allocation2 + $0x38] sm:$0xff] %v10967_v31   ;;  %v11401_v12 = vunpack.i.h.bf16 %v11397_v11  ;;  %v11398_v59 = vunpack.i.l.bf16 %v11397_v11 }
 0x633   :  { %11258 = vst [vmem:[#allocation2 + $0xa8] sm:$0xff] %v11007_v62  }
 0x635   :  { %v11469_v40 = vpop.trf.xlu2  ;;  %v10312_v62 = vld [vmem:[#allocation2 + $0x50] sm:$0xff] }
 0x636   :  { %v11473_v42 = vunpack.i.h.bf16 %v11469_v40  ;;  %v11470_v15 = vunpack.i.l.bf16 %v11469_v40  ;;  %v10320_v11 = vld [vmem:[#allocation2 + $0x60] sm:$0xff] }
 0x639   :  { %v11402_v13 = vpop.trf.xlu1 }
 0x63a   :  { %v11406_v63 = vunpack.i.h.bf16 %v11402_v13  ;;  %v11403_v3 = vunpack.i.l.bf16 %v11402_v13 }
 0x63c   :  { %v10912_v16 = vpack.c.bf16 %v11403_v3, %v11398_v59  ;;  %v10952_v18 = vpack.c.bf16 %v11406_v63, %v11401_v12  ;;  %v2699_v12 = vpop.f32.mrf.mxu2  ;;  %v10311_v59 = vld [vmem:[#allocation2 + $0x18] sm:$0xff]  ;;  %v10318_v3 = vld [vmem:[#allocation2 + $0xe8] sm:$0xff] }
 0x63d   :  { %v11474_v56 = vpop.trf.xlu2 }
 0x63e   :  { %v11478_v5 = vunpack.i.h.bf16 %v11474_v56  ;;  %v11475_v60 = vunpack.i.l.bf16 %v11474_v56  ;;  %11239 = vst [vmem:[#allocation2 + $0x68] sm:$0xff] %v10912_v16   ;;  %v14530_v16 = vld [vmem:[%s16788_s7] ss:$0 sm:$0xff] }
 0x63f   :  { %11247 = vst [vmem:[#allocation2 + $0xf0] sm:$0xff] %v10952_v18  }
 0x640   :  { %v10972_v49 = vpack.c.bf16 %v11475_v60, %v11470_v15  ;;  %v11012_v14 = vpack.c.bf16 %v11478_v5, %v11473_v42  ;;  %v10319_v42 = vld [vmem:[#allocation2 + $0xb8] sm:$0xff] }
 0x641   :  { %v11407_v45 = vpop.trf.xlu1  ;;  %v10310_v15 = vld [vmem:[#allocation2 + $0xd8] sm:$0xff] }
 0x642   :  { %11251 = vst [vmem:[#allocation2 + $0x58] sm:$0xff] %v10972_v49   ;;  %v11411_v46 = vunpack.i.h.bf16 %v11407_v45  ;;  %v11408_v0 = vunpack.i.l.bf16 %v11407_v45 }
 0x643   :  { %11259 = vst [vmem:[#allocation2 + $0xd0] sm:$0xff] %v11012_v14   ;;  %v10309_v14 = vld [vmem:[#allocation2] sm:$0xff] }
 0x644   :  { %v2701_v45 = vpop.f32.mrf.mxu2 }
 0x645   :  { %v11479_v38 = vpop.trf.xlu2  ;;  %v10313_v33 = vld [vmem:[#allocation2 + $0x68] sm:$0xff] }
 0x646   :  { %v11483_v27 = vunpack.i.h.bf16 %v11479_v38  ;;  %v11480_v4 = vunpack.i.l.bf16 %v11479_v38  ;;  %v10321_v31 = vld [vmem:[#allocation2 + $0xf0] sm:$0xff]  ;;  %v10317_v38 = vld [vmem:[#allocation2 + $0x88] sm:$0xff] }
 0x649   :  { %v11412_v6 = vpop.trf.xlu1 }
 0x64a   :  { %v11416_v41 = vunpack.i.h.bf16 %v11412_v6  ;;  %v11413_v52 = vunpack.i.l.bf16 %v11412_v6 }
 0x64c   :  { %v10917_v30 = vpack.c.bf16 %v11413_v52, %v11408_v0  ;;  %v10957_v10 = vpack.c.bf16 %v11416_v41, %v11411_v46  ;;  %v2700_v46 = vadd.f32 %v14530_v16, %v2699_v12  ;;  %v2702_v0 = vadd.f32 %v14530_v16, %v2701_v45  ;;  %v10354_v12 = vld [vmem:[#allocation3 + $0x18] sm:$0xff] }
 0x64d   :  { %v11484_v55 = vpop.trf.xlu2  ;;  %v10371_v45 = vld [vmem:[#allocation3 + $0x98] sm:$0xff] }
 0x64e   :  { %v11488_v57 = vunpack.i.h.bf16 %v11484_v55  ;;  %v11485_v47 = vunpack.i.l.bf16 %v11484_v55  ;;  %11240 = vst [vmem:[#allocation2 + $0x30] sm:$0xff] %v10917_v30   ;;  %v2709_v41 = vpack.c.bf16 %v2700_v46, %v2700_v46  ;;  %v2710_v52 = vpack.c.bf16 %v2702_v0, %v2702_v0  ;;  %v10370_v46 = vld [vmem:[#allocation3 + $0x28] sm:$0xff]  ;;  %v10361_v0 = vld [vmem:[#allocation3 + $0x30] sm:$0xff] }
 0x64f   :  { %11248 = vst [vmem:[#allocation2 + $0x8] sm:$0xff] %v10957_v10  }
 0x650   :  { %v10977_v50 = vpack.c.bf16 %v11485_v47, %v11480_v4  ;;  %v11017_v53 = vpack.c.bf16 %v11488_v57, %v11483_v27  ;;  %v10308_v27 = vld [vmem:[#allocation2 + $0xb0] sm:$0xff]  ;;  %v10316_v4 = vld [vmem:[#allocation2 + $0x80] sm:$0xff] }
 0x651   :  { %v11417_v51 = vpop.trf.xlu1 }
 0x652   :  { %11252 = vst [vmem:[#allocation2 + $0x40] sm:$0xff] %v10977_v50   ;;  %v11421_v23 = vunpack.i.h.bf16 %v11417_v51  ;;  %v11418_v48 = vunpack.i.l.bf16 %v11417_v51 }
 0x653   :  { %11260 = vst [vmem:[#allocation2 + $0x10] sm:$0xff] %v11017_v53  }
 0x655   :  { %v11489_v32 = vpop.trf.xlu2  ;;  %v10314_v7 = vld [vmem:[#allocation2 + $0x30] sm:$0xff] }
 0x656   :  { %v11493_v1 = vunpack.i.h.bf16 %v11489_v32  ;;  %v11490_v35 = vunpack.i.l.bf16 %v11489_v32  ;;  %v10322_v29 = vld [vmem:[#allocation2 + $0x8] sm:$0xff] }
 0x659   :  { %v11422_v22 = vpop.trf.xlu1 }
 0x65a   :  { %v11426_v36 = vunpack.i.h.bf16 %v11422_v22  ;;  %v11423_v28 = vunpack.i.l.bf16 %v11422_v22 }
 0x65c   :  { %v10922_v34 = vpack.c.bf16 %v11423_v28, %v11418_v48  ;;  %v10962_v24 = vpack.c.bf16 %v11426_v36, %v11421_v23 }
 0x65d   :  { %v11494_v9 = vpop.trf.xlu2 }
 0x65e   :  { %v11498_v37 = vunpack.i.h.bf16 %v11494_v9  ;;  %v11495_v26 = vunpack.i.l.bf16 %v11494_v9  ;;  %11241 = vst [vmem:[#allocation2 + $0x48] sm:$0xff] %v10922_v34  }
 0x65f   :  { %11249 = vst [vmem:[#allocation2 + $0x78] sm:$0xff] %v10962_v24  }
 0x660   :  { %v10982_v61 = vpack.c.bf16 %v11495_v26, %v11490_v35  ;;  %v11022_v39 = vpack.c.bf16 %v11498_v37, %v11493_v1 }
 0x662   :  { %11253 = vst [vmem:[#allocation2 + $0xc8] sm:$0xff] %v10982_v61  }
 0x663   :  { %11261 = vst [vmem:[#allocation2 + $0x28] sm:$0xff] %v11022_v39  }
 0x665   :  { %v11499_v2 = vpop.trf.xlu2  ;;  %v10315_v43 = vld [vmem:[#allocation2 + $0x48] sm:$0xff] }
 0x666   :  { %v10323_v21 = vld [vmem:[#allocation2 + $0x78] sm:$0xff]  ;;  %2825 = vmatpush.bf16.msra.mxu3 %v10315_v43  ;;  %v11503_v58 = vunpack.i.h.bf16 %v11499_v2  ;;  %v11500_v44 = vunpack.i.l.bf16 %v11499_v2 }
 0x667   :  { %2886 = vmatpush.bf16.msrb.mxu2 %v10323_v21 }
 0x669   :  { %v10327_v43 = vld [vmem:[#allocation2 + $0xc8] sm:$0xff] }
 0x66a   :  { %2826 = vmatpush.bf16.msra.mxu3 %v10314_v7  ;;  %v10335_v21 = vld [vmem:[#allocation2 + $0x28] sm:$0xff]  ;;  %v10326_v7 = vld [vmem:[#allocation2 + $0x40] sm:$0xff] }
 0x66b   :  { %2887 = vmatpush.bf16.msrb.mxu2 %v10322_v29  ;;  %v10334_v29 = vld [vmem:[#allocation2 + $0x10] sm:$0xff] }
 0x66d   :  { %v11504_v54 = vpop.trf.xlu2 }
 0x66e   :  { %v11508_v19 = vunpack.i.h.bf16 %v11504_v54  ;;  %v11505_v20 = vunpack.i.l.bf16 %v11504_v54  ;;  %2827 = vmatpush.bf16.msra.mxu3 %v10313_v33  ;;  %v10333_v54 = vld [vmem:[#allocation2 + $0xd0] sm:$0xff]  ;;  %v10347_v33 = vld [vmem:[#allocation3 + $0xa8] sm:$0xff] }
 0x66f   :  { %2888 = vmatpush.bf16.msrb.mxu2 %v10321_v31  ;;  %v10355_v31 = vld [vmem:[#allocation3 + $0x68] sm:$0xff] }
 0x670   :  { %v10987_v25 = vpack.c.bf16 %v11505_v20, %v11500_v44  ;;  %v11027_v8 = vpack.c.bf16 %v11508_v19, %v11503_v58  ;;  %v10325_v58 = vld [vmem:[#allocation2 + $0x58] sm:$0xff] }
 0x672   :  { %11254 = vst [vmem:[#allocation2 + $0xe0] sm:$0xff] %v10987_v25   ;;  %2828 = vmatpush.bf16.msra.mxu3 %v10312_v62  ;;  %v10324_v25 = vld [vmem:[#allocation2 + $0x38] sm:$0xff] }
 0x673   :  { %11262 = vst [vmem:[#allocation2 + $0xa0] sm:$0xff] %v11027_v8   ;;  %2889 = vmatpush.bf16.msrb.mxu2 %v10320_v11  ;;  %v10332_v8 = vld [vmem:[#allocation2 + $0xa8] sm:$0xff] }
 0x675   :  { %v11509_v40 = vpop.trf.xlu2 }
 0x676   :  { %2829 = vmatpush.bf16.msra.mxu3 %v10311_v59  ;;  %v11513_v13 = vunpack.i.h.bf16 %v11509_v40  ;;  %v11510_v63 = vunpack.i.l.bf16 %v11509_v40  ;;  %v10346_v40 = vld [vmem:[#allocation3 + $0x58] sm:$0xff]  ;;  %v10345_v59 = vld [vmem:[#allocation3 + $0x90] sm:$0xff] }
 0x677   :  { %2890 = vmatpush.bf16.msrb.mxu2 %v10319_v42  ;;  %v10353_v42 = vld [vmem:[#allocation3 + $0x60] sm:$0xff] }
 0x678   :  { %v2704_v2 = vpop.f32.mrf.mxu2 }
 0x679   :  { %v10328_v61 = vld [vmem:[#allocation2 + $0xe0] sm:$0xff]  ;;  %v2705_v19 = vadd.f32 %v14530_v16, %v2704_v2 }
 0x67a   :  { %2830 = vmatpush.bf16.msra.mxu3 %v10310_v15  ;;  %v10336_v39 = vld [vmem:[#allocation2 + $0xa0] sm:$0xff]  ;;  %v10344_v15 = vld [vmem:[#allocation3 + $0x8] sm:$0xff] }
 0x67b   :  { %2891 = vmatpush.bf16.msrb.mxu2 %v10318_v3  ;;  %v2711_v62 = vpack.c.bf16 %v2705_v19, %v2705_v19  ;;  %v10351_v3 = vld [vmem:[#allocation3 + $0x40] sm:$0xff] }
 0x67d   :  { %v11514_v56 = vpop.trf.xlu2 }
 0x67e   :  { %v11518_v5 = vunpack.i.h.bf16 %v11514_v56  ;;  %v11515_v60 = vunpack.i.l.bf16 %v11514_v56  ;;  %2831 = vmatpush.bf16.msra.mxu3 %v10309_v14  ;;  %v10342_v56 = vld [vmem:[#allocation3 + $0xe8] sm:$0xff]  ;;  %v10363_v14 = vld [vmem:[#allocation3 + $0xf0] sm:$0xff] }
 0x67f   :  { %2892 = vmatpush.bf16.msrb.mxu2 %v10317_v38  ;;  %v10362_v38 = vld [vmem:[#allocation3 + $0x20] sm:$0xff] }
 0x680   :  { %v10992_v18 = vpack.c.bf16 %v11515_v60, %v11510_v63  ;;  %v11032_v49 = vpack.c.bf16 %v11518_v5, %v11513_v13  ;;  %v2706_v44 = vpop.f32.mrf.mxu2  ;;  %v10352_v13 = vld [vmem:[#allocation3 + $0xe0] sm:$0xff]  ;;  %v10343_v63 = vld [vmem:[#allocation3 + $0x78] sm:$0xff]  ;;  %v10341_v60 = vld [vmem:[#allocation3 + $0xc8] sm:$0xff] }
 0x681   :  { %v2707_v20 = vadd.f32 %v14530_v16, %v2706_v44  ;;  %v10350_v5 = vld [vmem:[#allocation3 + $0x38] sm:$0xff]  ;;  %v10349_v16 = vld [vmem:[#allocation3 + $0xb0] sm:$0xff] }
 0x682   :  { %11255 = vst [vmem:[#allocation2 + $0x90] sm:$0xff] %v10992_v18   ;;  %2832 = vmatpush.bf16.msra.mxu3 %v10308_v27  ;;  %v10340_v18 = vld [vmem:[#allocation3 + $0x80] sm:$0xff] }
 0x683   :  { %11263 = vst [vmem:[#allocation2 + $0xf8] sm:$0xff] %v11032_v49   ;;  %2893 = vmatpush.bf16.msrb.mxu2 %v10316_v4  ;;  %v2712_v11 = vpack.c.bf16 %v2707_v20, %v2707_v20  ;;  %v10348_v49 = vld [vmem:[#allocation3 + $0xd0] sm:$0xff]  ;;  %v10369_v27 = vld [vmem:[#allocation3] sm:$0xff]  ;;  %v10360_v4 = vld [vmem:[#allocation3 + $0xd8] sm:$0xff] }
 0x685   :  { %v11519_v6 = vpop.trf.xlu2  ;;  %2833 = vmatmul.bf16.vlgmr.msra.gmra.mxu3 %v2709_v41  ;;  %v10359_v41 = vld [vmem:[#allocation3 + $0xa0] sm:$0xff] }
 0x686   :  { %2894 = vmatmul.bf16.vlgmr.msrb.gmra.mxu2 %v2710_v52  ;;  %v11523_v55 = vunpack.i.h.bf16 %v11519_v6  ;;  %v11520_v57 = vunpack.i.l.bf16 %v11519_v6  ;;  %v10368_v6 = vld [vmem:[#allocation3 + $0xb8] sm:$0xff]  ;;  %v10367_v52 = vld [vmem:[#allocation3 + $0xc0] sm:$0xff] }
 0x689   :  { %v10329_v34 = vld [vmem:[#allocation2 + $0x90] sm:$0xff] }
 0x68a   :  { %v10337_v24 = vld [vmem:[#allocation2 + $0xf8] sm:$0xff] }
 0x68d   :  { %v11524_v47 = vpop.trf.xlu2 }
 0x68e   :  { %v11528_v30 = vunpack.i.h.bf16 %v11524_v47  ;;  %v11525_v10 = vunpack.i.l.bf16 %v11524_v47  ;;  %v10357_v47 = vld [vmem:[#allocation3 + $0x70] sm:$0xff] }
 0x690   :  { %v10997_v50 = vpack.c.bf16 %v11525_v10, %v11520_v57  ;;  %v11037_v53 = vpack.c.bf16 %v11528_v30, %v11523_v55  ;;  %v10358_v55 = vld [vmem:[#allocation3 + $0x50] sm:$0xff]  ;;  %v10366_v57 = vld [vmem:[#allocation3 + $0xf8] sm:$0xff]  ;;  %v10365_v30 = vld [vmem:[#allocation3 + $0x48] sm:$0xff] }
 0x691   :  { %v10356_v10 = vld [vmem:[#allocation3 + $0x10] sm:$0xff] }
 0x692   :  { %11256 = vst [vmem:[#allocation2 + $0x70] sm:$0xff] %v10997_v50   ;;  %v10364_v50 = vld [vmem:[#allocation3 + $0x88] sm:$0xff] }
 0x693   :  { %11264 = vst [vmem:[#allocation2 + $0x20] sm:$0xff] %v11037_v53  }
 0x695   :  { %v11529_v51 = vpop.trf.xlu2 }
 0x696   :  { %v11533_v32 = vunpack.i.h.bf16 %v11529_v51  ;;  %v11530_v23 = vunpack.i.l.bf16 %v11529_v51 }
 0x699   :  { %v10330_v37 = vld [vmem:[#allocation2 + $0x70] sm:$0xff] }
 0x69a   :  { %v10338_v26 = vld [vmem:[#allocation2 + $0x20] sm:$0xff] }
 0x69d   :  { %v11534_v48 = vpop.trf.xlu2 }
 0x69e   :  { %v11538_v1 = vunpack.i.h.bf16 %v11534_v48  ;;  %v11535_v35 = vunpack.i.l.bf16 %v11534_v48 }
 0x6a0   :  { %v11002_v22 = vpack.c.bf16 %v11535_v35, %v11530_v23  ;;  %v11042_v36 = vpack.c.bf16 %v11538_v1, %v11533_v32 }
 0x6a2   :  { %11257 = vst [vmem:[#allocation2 + $0xc0] sm:$0xff] %v11002_v22  }
 0x6a3   :  { %11265 = vst [vmem:[#allocation2 + $0x98] sm:$0xff] %v11042_v36  }
 0x6a9   :  { %v10331_v28 = vld [vmem:[#allocation2 + $0xc0] sm:$0xff] }
 0x6aa   :  { %v10339_v9 = vld [vmem:[#allocation2 + $0x98] sm:$0xff]  ;;  %2947 = vmatpush.bf16.msrb.mxu3 %v10331_v28 }
 0x6ab   :  { %3008 = vmatpush.bf16.msra.mxu2 %v10339_v9 }
 0x6ae   :  { %2948 = vmatpush.bf16.msrb.mxu3 %v10330_v37 }
 0x6af   :  { %3009 = vmatpush.bf16.msra.mxu2 %v10338_v26 }
 0x6b2   :  { %2949 = vmatpush.bf16.msrb.mxu3 %v10329_v34 }
 0x6b3   :  { %3010 = vmatpush.bf16.msra.mxu2 %v10337_v24 }
 0x6b6   :  { %2950 = vmatpush.bf16.msrb.mxu3 %v10328_v61 }
 0x6b7   :  { %3011 = vmatpush.bf16.msra.mxu2 %v10336_v39 }
 0x6ba   :  { %2951 = vmatpush.bf16.msrb.mxu3 %v10327_v43 }
 0x6bb   :  { %3012 = vmatpush.bf16.msra.mxu2 %v10335_v21 }
 0x6be   :  { %2952 = vmatpush.bf16.msrb.mxu3 %v10326_v7 }
 0x6bf   :  { %3013 = vmatpush.bf16.msra.mxu2 %v10334_v29 }
 0x6c2   :  { %2953 = vmatpush.bf16.msrb.mxu3 %v10325_v58 }
 0x6c3   :  { %3014 = vmatpush.bf16.msra.mxu2 %v10333_v54 }
 0x6c6   :  { %2954 = vmatpush.bf16.msrb.mxu3 %v10324_v25 }
 0x6c7   :  { %3015 = vmatpush.bf16.msra.mxu2 %v10332_v8 }
 0x6c9   :  { %2955 = vmatmul.bf16.vlgmr.msrb.gmra.mxu3 %v2711_v62 }
 0x6ca   :  { %3277 = vmatpush.bf16.msra.mxu3 %v10347_v33  ;;  %3016 = vmatmul.bf16.vlgmr.msra.gmra.mxu2 %v2712_v11 }
 0x6cb   :  { %3338 = vmatpush.bf16.msrb.mxu2 %v10355_v31 }
 0x6ce   :  { %3278 = vmatpush.bf16.msra.mxu3 %v10346_v40 }
 0x6cf   :  { %3339 = vmatpush.bf16.msrb.mxu2 %v10354_v12 }
 0x6d2   :  { %3279 = vmatpush.bf16.msra.mxu3 %v10345_v59 }
 0x6d3   :  { %3340 = vmatpush.bf16.msrb.mxu2 %v10353_v42 }
 0x6d6   :  { %3280 = vmatpush.bf16.msra.mxu3 %v10344_v15 }
 0x6d7   :  { %3341 = vmatpush.bf16.msrb.mxu2 %v10352_v13 }
 0x6da   :  { %3281 = vmatpush.bf16.msra.mxu3 %v10343_v63 }
 0x6db   :  { %3342 = vmatpush.bf16.msrb.mxu2 %v10351_v3 }
 0x6de   :  { %3282 = vmatpush.bf16.msra.mxu3 %v10342_v56 }
 0x6df   :  { %3343 = vmatpush.bf16.msrb.mxu2 %v10350_v5 }
 0x6e2   :  { %3283 = vmatpush.bf16.msra.mxu3 %v10341_v60 }
 0x6e3   :  { %3344 = vmatpush.bf16.msrb.mxu2 %v10349_v16 }
 0x6e6   :  { %3284 = vmatpush.bf16.msra.mxu3 %v10340_v18 }
 0x6e7   :  { %3345 = vmatpush.bf16.msrb.mxu2 %v10348_v49 }
 0x6ea   :  { %3399 = vmatpush.bf16.msrb.mxu3 %v10363_v14 }
 0x6eb   :  { %3460 = vmatpush.bf16.msra.mxu2 %v10371_v45 }
 0x6ee   :  { %3400 = vmatpush.bf16.msrb.mxu3 %v10362_v38 }
 0x6ef   :  { %3461 = vmatpush.bf16.msra.mxu2 %v10370_v46 }
 0x6f2   :  { %3401 = vmatpush.bf16.msrb.mxu3 %v10361_v0 }
 0x6f3   :  { %3462 = vmatpush.bf16.msra.mxu2 %v10369_v27 }
 0x6f6   :  { %3402 = vmatpush.bf16.msrb.mxu3 %v10360_v4 }
 0x6f7   :  { %3463 = vmatpush.bf16.msra.mxu2 %v10368_v6 }
 0x6fa   :  { %3403 = vmatpush.bf16.msrb.mxu3 %v10359_v41 }
 0x6fb   :  { %3464 = vmatpush.bf16.msra.mxu2 %v10367_v52 }
 0x6fe   :  { %3404 = vmatpush.bf16.msrb.mxu3 %v10358_v55 }
 0x6ff   :  { %3465 = vmatpush.bf16.msra.mxu2 %v10366_v57 }
 0x702   :  { %3405 = vmatpush.bf16.msrb.mxu3 %v10357_v47 }
 0x703   :  { %3466 = vmatpush.bf16.msra.mxu2 %v10365_v30 }
 0x706   :  { %3406 = vmatpush.bf16.msrb.mxu3 %v10356_v10 }
 0x707   :  { %3467 = vmatpush.bf16.msra.mxu2 %v10364_v50 }
 0x708   :  { %v2834_v53 = vpop.f32.mrf.mxu3 }
 0x709   :  { %v3021_v51 = vrot.slane %v2834_v53, 4  ;;  %v2895_v32 = vpop.f32.mrf.mxu2 }
 0x70a   :  { %v3027_v23 = vrot.slane %v2895_v32, 4 }
 0x70b   :  { %v3022_v48 = vmax.f32 %v2834_v53, %v3021_v51 }
 0x70c   :  { %v3028_v1 = vmax.f32 %v2895_v32, %v3027_v23 }
 0x70d   :  { %v3023_v35 = vrot.slane %v3022_v48, 2 }
 0x70e   :  { %v3029_v22 = vrot.slane %v3028_v1, 2 }
 0x70f   :  { %v3024_v36 = vmax.f32 %v3022_v48, %v3023_v35 }
 0x710   :  { %v3030_v28 = vmax.f32 %v3028_v1, %v3029_v22  ;;  %v2836_v9 = vpop.f32.mrf.mxu3 }
 0x711   :  { %v3025_v37 = vrot.slane %v3024_v36, 1  ;;  %v2897_v26 = vpop.f32.mrf.mxu2 }
 0x712   :  { %v3031_v34 = vrot.slane %v3030_v28, 1 }
 0x713   :  { %v3026_v24 = vmax.f32 %v3024_v36, %v3025_v37 }
 0x714   :  { %v3032_v61 = vmax.f32 %v3030_v28, %v3031_v34 }
 0x715   :  { %v3045_v39 = vsub.f32 %v2834_v53, %v3026_v24 }
 0x716   :  { %v3046_v2 = vsub.f32 %v2895_v32, %v3032_v61 }
 0x717   :  { %v3049_v43 = vmul.f32 1.442695, %v3045_v39 }
 0x718   :  { %v3051_v21 = vmul.f32 1.442695, %v3046_v2 }
 0x719   :  { %11686 = vpow2.f32 %v3049_v43 }
 0x71a   :  { %11688 = vpow2.f32 %v3051_v21 }
 0x71f   :  { %v11687_v7 = vpop.eup %11686 }
 0x720   :  { %v11689_v29 = vpop.eup %11688  ;;  %v3057_v58 = vrot.slane %v11687_v7, 4 }
 0x721   :  { %v3063_v44 = vrot.slane %v11689_v29, 4 }
 0x722   :  { %v3058_v54 = vadd.f32 %v11687_v7, %v3057_v58 }
 0x723   :  { %v3064_v19 = vadd.f32 %v11689_v29, %v3063_v44 }
 0x724   :  { %v3059_v20 = vrot.slane %v3058_v54, 2 }
 0x725   :  { %v3065_v25 = vrot.slane %v3064_v19, 2 }
 0x726   :  { %v3060_v8 = vadd.f32 %v3059_v20, %v3058_v54 }
 0x727   :  { %v3066_v33 = vadd.f32 %v3065_v25, %v3064_v19 }
 0x728   :  { %v3061_v31 = vrot.slane %v3060_v8, 1 }
 0x729   :  { %v3067_v62 = vrot.slane %v3066_v33, 1 }
 0x72a   :  { %v3062_v11 = vadd.f32 %v3061_v31, %v3060_v8 }
 0x72b   :  { %v3068_v40 = vadd.f32 %v3067_v62, %v3066_v33 }
 0x72c   :  { %11690 = vrcp.f32 %v3062_v11 }
 0x72d   :  { %11692 = vrcp.f32 %v3068_v40 }
 0x732   :  { %v11691_v12 = vpop.eup %11690 }
 0x733   :  { %v3085_v59 = vmul.f32 %v11691_v12, %v11687_v7  ;;  %v11693_v15 = vpop.eup %11692 }
 0x734   :  { %v3086_v13 = vmul.f32 %v11693_v15, %v11689_v29 }
 0x735   :  { %v14536_v42 = vadd.f32 1e-08, %v3085_v59 }
 0x736   :  { %v14539_v63 = vadd.f32 1e-08, %v3086_v13 }
 0x737   :  { %3093 = vadd.xlane.f32.xlu0 %v14536_v42 }
 0x73f   :  { %3095 = vadd.xlane.f32.xlu0 %v14539_v63 }
 0x74c   :  { %v2956_v3 = vpop.f32.mrf.mxu3 }
 0x74d   :  { %v3033_v56 = vrot.slane %v2956_v3, 4  ;;  %v3017_v5 = vpop.f32.mrf.mxu2 }
 0x74e   :  { %v3039_v60 = vrot.slane %v3017_v5, 4 }
 0x74f   :  { %v3034_v16 = vmax.f32 %v2956_v3, %v3033_v56 }
 0x750   :  { %v3040_v18 = vmax.f32 %v3017_v5, %v3039_v60 }
 0x751   :  { %v3035_v49 = vrot.slane %v3034_v16, 2 }
 0x752   :  { %v3041_v14 = vrot.slane %v3040_v18, 2 }
 0x753   :  { %v3036_v45 = vmax.f32 %v3034_v16, %v3035_v49 }
 0x754   :  { %v3042_v38 = vmax.f32 %v3040_v18, %v3041_v14  ;;  %v2958_v46 = vpop.f32.mrf.mxu3  ;;  %v10434_v18 = vld [vmem:[%s16791_s10 + $0x1ec] sm:$0xf0]  ;;  %v8950_v14 = vld [vmem:[%s16791_s10 + $0x1c0] sm:$0xf] }
 0x755   :  { %v3037_v0 = vrot.slane %v3036_v45, 1  ;;  %v3019_v27 = vpop.f32.mrf.mxu2  ;;  %v10426_v46 = vld [vmem:[%s16791_s10 + $0x1ac] sm:$0xf0] }
 0x756   :  { %v3043_v4 = vrot.slane %v3042_v38, 1  ;;  %v8918_v27 = vld [vmem:[%s16791_s10 + $0x180] sm:$0xf] }
 0x757   :  { %v3038_v6 = vmax.f32 %v3036_v45, %v3037_v0 }
 0x758   :  { %v3044_v41 = vmax.f32 %v3042_v38, %v3043_v4  ;;  %v8934_v38 = vld [vmem:[%s16791_s10 + $0x1a0] sm:$0xf]  ;;  %v10422_v4 = vld [vmem:[%s16791_s10 + $0x18c] sm:$0xf0] }
 0x759   :  { %v3047_v52 = vsub.f32 %v2956_v3, %v3038_v6  ;;  %v8935_v0 = vor.u32 %v10426_v46, %v8934_v38  ;;  %v8902_v6 = vld [vmem:[%s16791_s10 + $0x160] sm:$0xf] }
 0x75a   :  { %v3048_v55 = vsub.f32 %v3017_v5, %v3044_v41  ;;  %v8919_v41 = vor.u32 %v10422_v4, %v8918_v27  ;;  %v8904_v27 = vld [vmem:[%s16791_s10 + $0x170] sm:$0xf0]  ;;  %v8790_v4 = vld [vmem:[%s16791_s10 + $0x80] sm:$0xf] }
 0x75b   :  { %v3053_v57 = vmul.f32 1.442695, %v3047_v52  ;;  %v10418_v52 = vld [vmem:[%s16791_s10 + $0x16c] sm:$0xf0] }
 0x75c   :  { %v3055_v47 = vmul.f32 1.442695, %v3048_v55  ;;  %v8903_v55 = vor.u32 %v10418_v52, %v8902_v6  ;;  %v10390_v6 = vld [vmem:[%s16791_s10 + $0x8c] sm:$0xf0]  ;;  %v14654_v52 = vld [vmem:[#allocation4] sm:$0xff] }
 0x75d   :  { %11694 = vpow2.f32 %v3053_v57  ;;  %v8886_v57 = vld [vmem:[%s16791_s10 + $0x140] sm:$0xf] }
 0x75e   :  { %11696 = vpow2.f32 %v3055_v47  ;;  %v10414_v47 = vld [vmem:[%s16791_s10 + $0x14c] sm:$0xf0] }
 0x763   :  { %v11695_v30 = vpop.eup %11694 }
 0x764   :  { %v11697_v10 = vpop.eup %11696  ;;  %v3069_v50 = vrot.slane %v11695_v30, 4 }
 0x765   :  { %v3075_v53 = vrot.slane %v11697_v10, 4 }
 0x766   :  { %v3070_v51 = vadd.f32 %v11695_v30, %v3069_v50  ;;  %v10410_v50 = vld [vmem:[%s16791_s10 + $0x12c] sm:$0xf0] }
 0x767   :  { %v3076_v32 = vadd.f32 %v11697_v10, %v3075_v53 }
 0x768   :  { %v3071_v23 = vrot.slane %v3070_v51, 2 }
 0x769   :  { %v3077_v48 = vrot.slane %v3076_v32, 2 }
 0x76a   :  { %v3072_v1 = vadd.f32 %v3071_v23, %v3070_v51  ;;  %v10406_v23 = vld [vmem:[%s16791_s10 + $0x10c] sm:$0xf0] }
 0x76b   :  { %v3078_v35 = vadd.f32 %v3077_v48, %v3076_v32  ;;  %v8854_v32 = vld [vmem:[%s16791_s10 + $0x100] sm:$0xf] }
 0x76c   :  { %v3073_v22 = vrot.slane %v3072_v1, 1  ;;  %v8855_v48 = vor.u32 %v10406_v23, %v8854_v32  ;;  %v10408_v23 = vld [vmem:[%s16791_s10 + $0x124] sm:$0xf] }
 0x76d   :  { %v3079_v36 = vrot.slane %v3078_v35, 1 }
 0x76e   :  { %v3074_v28 = vadd.f32 %v3073_v22, %v3072_v1 }
 0x76f   :  { %v3080_v9 = vadd.f32 %v3079_v36, %v3078_v35 }
 0x770   :  { %11698 = vrcp.f32 %v3074_v28 }
 0x771   :  { %11700 = vrcp.f32 %v3080_v9 }
 0x776   :  { %v11699_v37 = vpop.eup %11698 }
 0x777   :  { %v3087_v26 = vmul.f32 %v11699_v37, %v11695_v30  ;;  %v11701_v24 = vpop.eup %11700  ;;  %v8887_v30 = vor.u32 %v10414_v47, %v8886_v57 }
 0x778   :  { %v3088_v61 = vmul.f32 %v11701_v24, %v11697_v10  ;;  %v8870_v10 = vld [vmem:[%s16791_s10 + $0x120] sm:$0xf] }
 0x779   :  { %v14542_v34 = vadd.f32 1e-08, %v3087_v26  ;;  %v8871_v51 = vor.u32 %v10410_v50, %v8870_v10  ;;  %v8888_v10 = vld [vmem:[%s16791_s10 + $0x150] sm:$0xf0]  ;;  %v8774_v50 = vld [vmem:[%s16791_s10 + $0x60] sm:$0xf] }
 0x77a   :  { %v14545_v39 = vadd.f32 1e-08, %v3088_v61 }
 0x77b   :  { %3097 = vadd.xlane.f32.xlu0 %v14542_v34 }
 0x783   :  { %3099 = vadd.xlane.f32.xlu0 %v14545_v39 }
 0x7aa   :  { %v3094_v2 = vpop.xlane.xlu0 %3093 }
 0x7ab   :  { %11702 = vrcp.f32 %v3094_v2  ;;  %v3112_v58 = vand.u32 2147483648, %v3094_v2  ;;  %v3110_v54 = vand.u32 2147483647, %v3094_v2  ;;  %vm3106_vm14 = vweird.f32 %v3094_v2 }
 0x7ad   :  { %v3113_v25 = vor.u32 1.1754944e-38, %v3112_v58  ;;  %vm3111_vm0 = vcmp.eq.f32.partialorder %v3110_v54, 8.507059e+37 }
 0x7b1   :  { %v11703_v43 = vpop.eup %11702 }
 0x7b2   :  { %v3102_v21 = vmul.f32 %v11703_v43, %v3094_v2  ;;  %v3096_v7 = vpop.xlane.xlu0 %3095  ;;  %vm3107_vm13 = vweird.f32 %v11703_v43 }
 0x7b3   :  { %11704 = vrcp.f32 %v3096_v7  ;;  %vm3108_vm15 = vmor %vm3106_vm14, %vm3107_vm13  ;;  %v3126_v40 = vand.u32 2147483648, %v3096_v7  ;;  %v3124_v59 = vand.u32 2147483647, %v3096_v7  ;;  %vm3120_vm2 = vweird.f32 %v3096_v7 }
 0x7b4   :  { %v3103_v29 = vsub.f32 1.0, %v3102_v21 }
 0x7b5   :  { %v3127_v3 = vor.u32 1.1754944e-38, %v3126_v40  ;;  %vm3125_vm4 = vcmp.eq.f32.partialorder %v3124_v59, 8.507059e+37  ;;  %v10428_v40 = vld [vmem:[%s16791_s10 + $0x1c4] sm:$0xf]  ;;  %v8952_v59 = vld [vmem:[%s16791_s10 + $0x1d0] sm:$0xf0] }
 0x7b6   :  { %v3104_v44 = vmul.f32 %v11703_v43, %v3103_v29 }
 0x7b8   :  { %v3105_v19 = vadd.f32 %v11703_v43, %v3104_v44 }
 0x7b9   :  { %v11705_v20 = vpop.eup %11704 }
 0x7ba   :  { %v3116_v8 = vmul.f32 %v11705_v20, %v3096_v7  ;;  %v3109_v33 = vsel %vm3108_vm15, %v11703_v43, %v3105_v19  ;;  %vm3121_vm1 = vweird.f32 %v11705_v20 }
 0x7bb   :  { %v3114_v31 = vsel %vm3111_vm0, %v3113_v25, %v3109_v33  ;;  %vm3122_vm3 = vmor %vm3120_vm2, %vm3121_vm1  ;;  %v10432_v33 = vld [vmem:[%s16791_s10 + $0x1e4] sm:$0xf] }
 0x7bc   :  { %v3117_v62 = vsub.f32 1.0, %v3116_v8  ;;  %v3157_v11 = vmul.f32 %v3114_v31, %v14536_v42  ;;  %v8966_v42 = vld [vmem:[%s16791_s10 + $0x1e0] sm:$0xf] }
 0x7bd   :  { %v8967_v49 = vor.u32 %v10434_v18, %v8966_v42 }
 0x7be   :  { %v3118_v12 = vmul.f32 %v11705_v20, %v3117_v62  ;;  %v3161_v15 = vpack.c.bf16 %v3157_v11, %v3157_v11 }
 0x7c0   :  { %v3119_v13 = vadd.f32 %v11705_v20, %v3118_v12  ;;  %3285 = vmatmul.bf16.vlgmr.msra.gmra.mxu3 %v3161_v15  ;;  %v8838_v15 = vld [vmem:[%s16791_s10 + $0xe0] sm:$0xf] }
 0x7c2   :  { %v3123_v56 = vsel %vm3122_vm3, %v11705_v20, %v3119_v13  ;;  %v10402_v13 = vld [vmem:[%s16791_s10 + $0xec] sm:$0xf0] }
 0x7c3   :  { %v3128_v5 = vsel %vm3125_vm4, %v3127_v3, %v3123_v56  ;;  %v8839_v3 = vor.u32 %v10402_v13, %v8838_v15  ;;  %v10424_v56 = vld [vmem:[%s16791_s10 + $0x1a4] sm:$0xf]  ;;  %v8894_v13 = vld [vmem:[%s16791_s10 + $0x148] sm:$0xf] }
 0x7c4   :  { %v3158_v60 = vmul.f32 %v3128_v5, %v14539_v63  ;;  %v10430_v63 = vld [vmem:[%s16791_s10 + $0x1cc] sm:$0xf0]  ;;  %v8936_v5 = vld [vmem:[%s16791_s10 + $0x1b0] sm:$0xf0] }
 0x7c5   :  { %v8951_v45 = vor.u32 %v10430_v63, %v8950_v14  ;;  %3870 = vmatpush.bf16.msra.mxu3 %v8839_v3  ;;  %v8939_v18 = vor.u32 %v10424_v56, %v8936_v5  ;;  %v8920_v14 = vld [vmem:[%s16791_s10 + $0x190] sm:$0xf0]  ;;  %v8806_v63 = vld [vmem:[%s16791_s10 + $0xa0] sm:$0xf]  ;;  %v10415_v3 = vld [vmem:[%s16791_s10 + $0x154] sm:$0xf0] }
 0x7c6   :  { %v3162_v16 = vpack.c.bf16 %v3158_v60, %v3158_v60  ;;  %v8822_v60 = vld [vmem:[%s16791_s10 + $0xc0] sm:$0xf]  ;;  %v8878_v56 = vld [vmem:[%s16791_s10 + $0x128] sm:$0xf]  ;;  %v10411_v5 = vld [vmem:[%s16791_s10 + $0x134] sm:$0xf0] }
 0x7c8   :  { %3346 = vmatmul.bf16.vlgmr.msrb.gmra.mxu2 %v3162_v16  ;;  %v10398_v16 = vld [vmem:[%s16791_s10 + $0xcc] sm:$0xf0] }
 0x7c9   :  { %3889 = vmatpush.bf16.msrb.mxu2 %v8967_v49  ;;  %v8823_v42 = vor.u32 %v10398_v16, %v8822_v60  ;;  %v10420_v49 = vld [vmem:[%s16791_s10 + $0x184] sm:$0xf]  ;;  %v8879_v60 = vor.u32 %v10411_v5, %v8878_v56  ;;  %v8862_v16 = vld [vmem:[%s16791_s10 + $0x108] sm:$0xf]  ;;  %v8760_v56 = vld [vmem:[%s16791_s10 + $0x50] sm:$0xf0] }
 0x7ca   :  { %v8923_v46 = vor.u32 %v10420_v49, %v8920_v14  ;;  %v8976_v49 = vld [vmem:[%s16791_s10 + $0x1f8] sm:$0xf0] }
 0x7cb   :  { %3871 = vmatpush.bf16.msra.mxu3 %v8823_v42  ;;  %v10407_v42 = vld [vmem:[%s16791_s10 + $0x114] sm:$0xf0] }
 0x7cc   :  { %v8863_v14 = vor.u32 %v10407_v42, %v8862_v16  ;;  %v10376_v16 = vld [vmem:[%s16791_s10 + $0x24] sm:$0xf]  ;;  %v8744_v42 = vld [vmem:[%s16791_s10 + $0x30] sm:$0xf0] }
 0x7cd   :  { %3890 = vmatpush.bf16.msrb.mxu2 %v8951_v45  ;;  %v10394_v45 = vld [vmem:[%s16791_s10 + $0xac] sm:$0xf0] }
 0x7ce   :  { %v8807_v38 = vor.u32 %v10394_v45, %v8806_v63  ;;  %v10429_v45 = vld [vmem:[%s16791_s10 + $0x1cc] sm:$0xf] }
 0x7d0   :  { %3872 = vmatpush.bf16.msra.mxu3 %v8807_v38  ;;  %v8960_v38 = vld [vmem:[%s16791_s10 + $0x1d8] sm:$0xf0] }
 0x7d1   :  { %3891 = vmatpush.bf16.msrb.mxu2 %v8935_v0  ;;  %v10416_v0 = vld [vmem:[%s16791_s10 + $0x164] sm:$0xf] }
 0x7d2   :  { %v8907_v47 = vor.u32 %v10416_v0, %v8904_v27  ;;  %v8963_v0 = vor.u32 %v10429_v45, %v8960_v38  ;;  %v10425_v27 = vld [vmem:[%s16791_s10 + $0x1ac] sm:$0xf] }
 0x7d3   :  { %v10467_v38 = vld [vmem:[#allocation2 + $0x48] sm:$0xff] }
 0x7d5   :  { %3892 = vmatpush.bf16.msrb.mxu2 %v8919_v41  ;;  %v8791_v41 = vor.u32 %v10390_v6, %v8790_v4  ;;  %v8944_v4 = vld [vmem:[%s16791_s10 + $0x1b8] sm:$0xf0] }
 0x7d6   :  { %v8947_v6 = vor.u32 %v10425_v27, %v8944_v4  ;;  %v10466_v27 = vld [vmem:[#allocation2 + $0x30] sm:$0xff] }
 0x7d7   :  { %3873 = vmatpush.bf16.msra.mxu3 %v8791_v41  ;;  %v10421_v41 = vld [vmem:[%s16791_s10 + $0x18c] sm:$0xf] }
 0x7d9   :  { %3893 = vmatpush.bf16.msrb.mxu2 %v8903_v55  ;;  %v14656_v55 = vld [vmem:[#allocation4 + $0x8] sm:$0xff] }
 0x7da   :  { %v14660_v57 = vpack.c.bf16 %v14656_v55, %v14654_v52 }
 0x7dd   :  { %3894 = vmatpush.bf16.msrb.mxu2 %v8887_v30  ;;  %v10412_v30 = vld [vmem:[%s16791_s10 + $0x144] sm:$0xf] }
 0x7de   :  { %v8891_v32 = vor.u32 %v10412_v30, %v8888_v10 }
 0x7e1   :  { %3895 = vmatpush.bf16.msrb.mxu2 %v8871_v51 }
 0x7e5   :  { %3896 = vmatpush.bf16.msrb.mxu2 %v8855_v48  ;;  %v8872_v48 = vld [vmem:[%s16791_s10 + $0x130] sm:$0xf0] }
 0x7ee   :  { %v3098_v53 = vpop.xlane.xlu0 %3097 }
 0x7ef   :  { %11706 = vrcp.f32 %v3098_v53  ;;  %v3140_v28 = vand.u32 2147483648, %v3098_v53  ;;  %v3138_v37 = vand.u32 2147483647, %v3098_v53  ;;  %vm3134_vm6 = vweird.f32 %v3098_v53 }
 0x7f1   :  { %v3141_v61 = vor.u32 1.1754944e-38, %v3140_v28  ;;  %vm3139_vm8 = vcmp.eq.f32.partialorder %v3138_v37, 8.507059e+37  ;;  %v10435_v28 = vld [vmem:[%s16791_s10 + $0x1f4] sm:$0xf0] }
 0x7f5   :  { %v11707_v1 = vpop.eup %11706 }
 0x7f6   :  { %v3130_v35 = vmul.f32 %v11707_v1, %v3098_v53  ;;  %v3100_v22 = vpop.xlane.xlu0 %3099  ;;  %vm3135_vm5 = vweird.f32 %v11707_v1  ;;  %v10386_v53 = vld [vmem:[%s16791_s10 + $0x6c] sm:$0xf0] }
 0x7f7   :  { %11708 = vrcp.f32 %v3100_v22  ;;  %vm3136_vm7 = vmor %vm3134_vm6, %vm3135_vm5  ;;  %v3154_v58 = vand.u32 2147483648, %v3100_v22  ;;  %v3152_v54 = vand.u32 2147483647, %v3100_v22  ;;  %vm3148_vm10 = vweird.f32 %v3100_v22 }
 0x7f8   :  { %v3131_v36 = vsub.f32 1.0, %v3130_v35  ;;  %v8775_v51 = vor.u32 %v10386_v53, %v8774_v50  ;;  %v10404_v35 = vld [vmem:[%s16791_s10 + $0x104] sm:$0xf] }
 0x7f9   :  { %v3155_v25 = vor.u32 1.1754944e-38, %v3154_v58  ;;  %vm3153_vm12 = vcmp.eq.f32.partialorder %v3152_v54, 8.507059e+37  ;;  %v14713_v58 = vld [vmem:[#allocation4 + $0x10] sm:$0xff] }
 0x7fa   :  { %v3132_v9 = vmul.f32 %v11707_v1, %v3131_v36  ;;  %3874 = vmatpush.bf16.msra.mxu3 %v8775_v51  ;;  %v8974_v36 = vld [vmem:[%s16791_s10 + $0x1e8] sm:$0xf]  ;;  %v10417_v51 = vld [vmem:[%s16791_s10 + $0x16c] sm:$0xf] }
 0x7fb   :  { %v8975_v37 = vor.u32 %v10435_v28, %v8974_v36  ;;  %v10409_v36 = vld [vmem:[%s16791_s10 + $0x12c] sm:$0xf]  ;;  %v8880_v28 = vld [vmem:[%s16791_s10 + $0x138] sm:$0xf0] }
 0x7fc   :  { %v3133_v26 = vadd.f32 %v11707_v1, %v3132_v9 }
 0x7fd   :  { %v11709_v24 = vpop.eup %11708 }
 0x7fe   :  { %v3144_v2 = vmul.f32 %v11709_v24, %v3100_v22  ;;  %v3137_v43 = vsel %vm3136_vm7, %v11707_v1, %v3133_v26  ;;  %vm3149_vm9 = vweird.f32 %v11709_v24  ;;  %v8875_v1 = vor.u32 %v10408_v23, %v8872_v48  ;;  %v8856_v22 = vld [vmem:[%s16791_s10 + $0x110] sm:$0xf0]  ;;  %v8958_v26 = vld [vmem:[%s16791_s10 + $0x1c8] sm:$0xf]  ;;  %v10413_v48 = vld [vmem:[%s16791_s10 + $0x14c] sm:$0xf] }
 0x7ff   :  { %v3142_v21 = vsel %vm3139_vm8, %v3141_v61, %v3137_v43  ;;  %vm3150_vm11 = vmor %vm3148_vm10, %vm3149_vm9  ;;  %v8859_v9 = vor.u32 %v10404_v35, %v8856_v22  ;;  %v10382_v61 = vld [vmem:[%s16791_s10 + $0x4c] sm:$0xf0] }
 0x800   :  { %v3145_v7 = vsub.f32 1.0, %v3144_v2  ;;  %v3159_v29 = vmul.f32 %v3142_v21, %v14542_v34  ;;  %v8968_v34 = vld [vmem:[%s16791_s10 + $0x1f0] sm:$0xf0]  ;;  %v10431_v2 = vld [vmem:[%s16791_s10 + $0x1d4] sm:$0xf0] }
 0x801   :  { %v8971_v11 = vor.u32 %v10432_v33, %v8968_v34  ;;  %v8742_v21 = vld [vmem:[%s16791_s10 + $0x20] sm:$0xf]  ;;  %v8926_v33 = vld [vmem:[%s16791_s10 + $0x188] sm:$0xf]  ;;  %v10423_v34 = vld [vmem:[%s16791_s10 + $0x194] sm:$0xf0] }
 0x802   :  { %v3146_v44 = vmul.f32 %v11709_v24, %v3145_v7  ;;  %v3163_v19 = vpack.c.bf16 %v3159_v29, %v3159_v29  ;;  %v10378_v7 = vld [vmem:[%s16791_s10 + $0x2c] sm:$0xf0]  ;;  %v14711_v29 = vld [vmem:[#allocation4 + $0x18] sm:$0xff] }
 0x803   :  { %v8743_v54 = vor.u32 %v10378_v7, %v8742_v21  ;;  %v10450_v7 = vld [vmem:[#allocation7 + $0x30] sm:$0xff] }
 0x804   :  { %v3147_v20 = vadd.f32 %v11709_v24, %v3146_v44  ;;  %3407 = vmatmul.bf16.vlgmr.msrb.gmra.mxu3 %v3163_v19  ;;  %v14717_v44 = vpack.c.bf16 %v14711_v29, %v14713_v58  ;;  %v8959_v19 = vor.u32 %v10431_v2, %v8958_v26  ;;  %v8864_v26 = vld [vmem:[%s16791_s10 + $0x118] sm:$0xf0]  ;;  %v10400_v2 = vld [vmem:[%s16791_s10 + $0xe4] sm:$0xf] }
 0x806   :  { %v3151_v8 = vsel %vm3150_vm11, %v11709_v24, %v3147_v20  ;;  %v8758_v24 = vld [vmem:[%s16791_s10 + $0x40] sm:$0xf]  ;;  %v8942_v20 = vld [vmem:[%s16791_s10 + $0x1a8] sm:$0xf] }
 0x807   :  { %v3156_v31 = vsel %vm3153_vm12, %v3155_v25, %v3151_v8  ;;  %v8759_v43 = vor.u32 %v10382_v61, %v8758_v24  ;;  %v10427_v25 = vld [vmem:[%s16791_s10 + $0x1b4] sm:$0xf0] }
 0x808   :  { %v3160_v62 = vmul.f32 %v3156_v31, %v14545_v39  ;;  %v8955_v39 = vor.u32 %v10428_v40, %v8952_v59  ;;  %v8943_v8 = vor.u32 %v10427_v25, %v8942_v20  ;;  %v8726_v31 = vld [vmem:[%s16791_s10] sm:$0xf]  ;;  %v8927_v40 = vor.u32 %v10423_v34, %v8926_v33  ;;  %v10419_v59 = vld [vmem:[%s16791_s10 + $0x174] sm:$0xf0]  ;;  %v10449_v25 = vld [vmem:[#allocation7 + $0x28] sm:$0xff] }
 0x809   :  { %3875 = vmatpush.bf16.msra.mxu3 %v8759_v43  ;;  %v10451_v61 = vld [vmem:[#allocation7 + $0x38] sm:$0xff]  ;;  %v8840_v43 = vld [vmem:[%s16791_s10 + $0xf0] sm:$0xf0] }
 0x80a   :  { %v3164_v12 = vpack.c.bf16 %v3160_v62, %v3160_v62  ;;  %v10374_v62 = vld [vmem:[%s16791_s10 + $0xc] sm:$0xf0]  ;;  %v8843_v21 = vor.u32 %v10400_v2, %v8840_v43  ;;  %v8808_v33 = vld [vmem:[%s16791_s10 + $0xb0] sm:$0xf0]  ;;  %v8750_v43 = vld [vmem:[%s16791_s10 + $0x28] sm:$0xf] }
 0x80c   :  { %3468 = vmatmul.bf16.vlgmr.msra.gmra.mxu2 %v3164_v12  ;;  %v8910_v12 = vld [vmem:[%s16791_s10 + $0x168] sm:$0xf] }
 0x80d   :  { %3927 = vmatpush.bf16.msra.mxu2 %v8971_v11  ;;  %3876 = vmatpush.bf16.msra.mxu3 %v8743_v54  ;;  %v8727_v11 = vor.u32 %v10374_v62, %v8726_v31  ;;  %v8911_v15 = vor.u32 %v10419_v59, %v8910_v12  ;;  %v10396_v54 = vld [vmem:[%s16791_s10 + $0xc4] sm:$0xf]  ;;  %v10447_v12 = vld [vmem:[#allocation7 + $0x18] sm:$0xff] }
 0x80e   :  { %v10448_v31 = vld [vmem:[#allocation7 + $0x20] sm:$0xff] }
 0x80f   :  { %v10388_v62 = vld [vmem:[%s16791_s10 + $0x84] sm:$0xf] }
 0x810   :  { %v10384_v59 = vld [vmem:[%s16791_s10 + $0x64] sm:$0xf] }
 0x811   :  { %3928 = vmatpush.bf16.msra.mxu2 %v8955_v39  ;;  %3877 = vmatpush.bf16.msra.mxu3 %v8727_v11  ;;  %v8895_v39 = vor.u32 %v10415_v3, %v8894_v13  ;;  %v8792_v11 = vld [vmem:[%s16791_s10 + $0x90] sm:$0xf0] }
 0x812   :  { %v10446_v3 = vld [vmem:[#allocation7 + $0x10] sm:$0xff] }
 0x815   :  { %3929 = vmatpush.bf16.msra.mxu2 %v8939_v18  ;;  %v10433_v18 = vld [vmem:[%s16791_s10 + $0x1ec] sm:$0xf]  ;;  %3908 = vmatpush.bf16.msrb.mxu3 %v8843_v21  ;;  %v10379_v21 = vld [vmem:[%s16791_s10 + $0x34] sm:$0xf0] }
 0x816   :  { %v8979_v63 = vor.u32 %v10433_v18, %v8976_v49  ;;  %v8747_v18 = vor.u32 %v10376_v16, %v8744_v42  ;;  %v10444_v49 = vld [vmem:[#allocation7] sm:$0xff]  ;;  %v10381_v42 = vld [vmem:[%s16791_s10 + $0x4c] sm:$0xf] }
 0x819   :  { %3930 = vmatpush.bf16.msra.mxu2 %v8923_v46 }
 0x81c   :  { %3897 = vmatmul.bf16.vlgmr.msrb.gmra.mxu2 %v14660_v57 }
 0x81d   :  { %3931 = vmatpush.bf16.msra.mxu2 %v8907_v47  ;;  %v8928_v47 = vld [vmem:[%s16791_s10 + $0x198] sm:$0xf0] }
 0x81e   :  { %v8931_v53 = vor.u32 %v10421_v41, %v8928_v47  ;;  %v8814_v47 = vld [vmem:[%s16791_s10 + $0xa8] sm:$0xf] }
 0x821   :  { %3932 = vmatpush.bf16.msra.mxu2 %v8891_v32  ;;  %v8912_v32 = vld [vmem:[%s16791_s10 + $0x178] sm:$0xf0] }
 0x822   :  { %v8915_v23 = vor.u32 %v10417_v51, %v8912_v32  ;;  %v8798_v32 = vld [vmem:[%s16791_s10 + $0x88] sm:$0xf] }
 0x825   :  { %3933 = vmatpush.bf16.msra.mxu2 %v8875_v1  ;;  %v8896_v1 = vld [vmem:[%s16791_s10 + $0x158] sm:$0xf0] }
 0x826   :  { %v8899_v22 = vor.u32 %v10413_v48, %v8896_v1  ;;  %v10464_v48 = vld [vmem:[#allocation2 + $0x50] sm:$0xff] }
 0x829   :  { %3934 = vmatpush.bf16.msra.mxu2 %v8859_v9  ;;  %v8883_v9 = vor.u32 %v10409_v36, %v8880_v28  ;;  %v10463_v36 = vld [vmem:[#allocation2 + $0x18] sm:$0xff] }
 0x82c   :  { %3902 = vmatmul.bf16.gmra.mxu2 %v14717_v44 }
 0x82d   :  { %3965 = vmatpush.bf16.msrb.mxu2 %v8975_v37  ;;  %v10405_v37 = vld [vmem:[%s16791_s10 + $0x10c] sm:$0xf] }
 0x82e   :  { %v8867_v24 = vor.u32 %v10405_v37, %v8864_v26  ;;  %v10387_v37 = vld [vmem:[%s16791_s10 + $0x74] sm:$0xf0] }
 0x82f   :  { %v10462_v26 = vld [vmem:[#allocation2 + $0xd8] sm:$0xff] }
 0x831   :  { %3966 = vmatpush.bf16.msrb.mxu2 %v8959_v19  ;;  %v8824_v19 = vld [vmem:[%s16791_s10 + $0xd0] sm:$0xf0] }
 0x832   :  { %v8827_v20 = vor.u32 %v10396_v54, %v8824_v19  ;;  %v10461_v54 = vld [vmem:[#allocation2] sm:$0xff]  ;;  %v8751_v19 = vor.u32 %v10379_v21, %v8750_v43 }
 0x834   :  { %3909 = vmatpush.bf16.msrb.mxu3 %v8827_v20  ;;  %v8734_v20 = vld [vmem:[%s16791_s10 + $0x8] sm:$0xf] }
 0x835   :  { %3967 = vmatpush.bf16.msrb.mxu2 %v8943_v8  ;;  %v10392_v8 = vld [vmem:[%s16791_s10 + $0xa4] sm:$0xf] }
 0x836   :  { %v8811_v34 = vor.u32 %v10392_v8, %v8808_v33  ;;  %v10460_v8 = vld [vmem:[#allocation2 + $0xb0] sm:$0xff] }
 0x838   :  { %3910 = vmatpush.bf16.msrb.mxu3 %v8811_v34  ;;  %v10401_v34 = vld [vmem:[%s16791_s10 + $0xec] sm:$0xf] }
 0x839   :  { %3968 = vmatpush.bf16.msrb.mxu2 %v8927_v40  ;;  %v8795_v40 = vor.u32 %v10388_v62, %v8792_v11  ;;  %v10397_v62 = vld [vmem:[%s16791_s10 + $0xcc] sm:$0xf] }
 0x83c   :  { %3935 = vmatmul.bf16.vlgmr.msra.gmra.mxu2 %v14660_v57  ;;  %3911 = vmatpush.bf16.msrb.mxu3 %v8795_v40  ;;  %v8832_v40 = vld [vmem:[%s16791_s10 + $0xd8] sm:$0xf0] }
 0x83d   :  { %3969 = vmatpush.bf16.msrb.mxu2 %v8911_v15  ;;  %v8776_v15 = vld [vmem:[%s16791_s10 + $0x70] sm:$0xf0] }
 0x83e   :  { %v8779_v13 = vor.u32 %v10384_v59, %v8776_v15  ;;  %v10393_v59 = vld [vmem:[%s16791_s10 + $0xac] sm:$0xf]  ;;  %v8816_v15 = vld [vmem:[%s16791_s10 + $0xb8] sm:$0xf0] }
 0x840   :  { %3912 = vmatpush.bf16.msrb.mxu3 %v8779_v13  ;;  %v8819_v13 = vor.u32 %v10393_v59, %v8816_v15 }
 0x841   :  { %3970 = vmatpush.bf16.msrb.mxu2 %v8895_v39  ;;  %v10380_v39 = vld [vmem:[%s16791_s10 + $0x44] sm:$0xf] }
 0x842   :  { %v8763_v5 = vor.u32 %v10380_v39, %v8760_v56  ;;  %v8800_v39 = vld [vmem:[%s16791_s10 + $0x98] sm:$0xf0] }
 0x843   :  { %v3286_v46 = vpop.f32.mrf.mxu3 }
 0x844   :  { %3913 = vmatpush.bf16.msrb.mxu3 %v8763_v5  ;;  %v10385_v5 = vld [vmem:[%s16791_s10 + $0x6c] sm:$0xf] }
 0x845   :  { %3971 = vmatpush.bf16.msrb.mxu2 %v8879_v60  ;;  %v10445_v60 = vld [vmem:[#allocation7 + $0x8] sm:$0xff] }
 0x848   :  { %3914 = vmatpush.bf16.msrb.mxu3 %v8747_v18  ;;  %v8768_v18 = vld [vmem:[%s16791_s10 + $0x58] sm:$0xf0] }
 0x849   :  { %3972 = vmatpush.bf16.msrb.mxu2 %v8863_v14  ;;  %v10372_v14 = vld [vmem:[%s16791_s10 + $0x4] sm:$0xf] }
 0x84b   :  { %v3288_v30 = vpop.f32.mrf.mxu3  ;;  %v3347_v10 = vpop.f32.mrf.mxu2 }
 0x84c   :  { %3940 = vmatmul.bf16.gmra.mxu2 %v14717_v44  ;;  %v14788_v50 = vpack.c.bf16 %v3347_v10, %v3286_v46  ;;  %v8846_v46 = vld [vmem:[%s16791_s10 + $0xe8] sm:$0xf]  ;;  %v10395_v30 = vld [vmem:[%s16791_s10 + $0xb4] sm:$0xf0] }
 0x84d   :  { %4003 = vmatpush.bf16.msra.mxu2 %v8979_v63  ;;  %v8728_v63 = vld [vmem:[%s16791_s10 + $0x10] sm:$0xf0]  ;;  %v8815_v51 = vor.u32 %v10395_v30, %v8814_v47 }
 0x84e   :  { %3878 = vmatmul.bf16.vlgmr.msra.gmra.mxu3 %v14788_v50  ;;  %v8731_v45 = vor.u32 %v10372_v14, %v8728_v63  ;;  %v10377_v14 = vld [vmem:[%s16791_s10 + $0x2c] sm:$0xf]  ;;  %v8752_v63 = vld [vmem:[%s16791_s10 + $0x38] sm:$0xf0] }
 0x850   :  { %3915 = vmatpush.bf16.msrb.mxu3 %v8731_v45  ;;  %v8755_v45 = vor.u32 %v10377_v14, %v8752_v63 }
 0x851   :  { %4004 = vmatpush.bf16.msra.mxu2 %v8963_v0  ;;  %v8830_v0 = vld [vmem:[%s16791_s10 + $0xc8] sm:$0xf] }
 0x853   :  { %v3349_v35 = vpop.f32.mrf.mxu2 }
 0x855   :  { %4005 = vmatpush.bf16.msra.mxu2 %v8947_v6  ;;  %v10399_v6 = vld [vmem:[%s16791_s10 + $0xd4] sm:$0xf0] }
 0x856   :  { %v8831_v41 = vor.u32 %v10399_v6, %v8830_v0  ;;  %v14972_v0 = vld [vmem:[%s16792_s11] sm:$0xf] }
 0x859   :  { %4006 = vmatpush.bf16.msra.mxu2 %v8931_v53  ;;  %v10465_v53 = vld [vmem:[#allocation2 + $0x68] sm:$0xff] }
 0x85c   :  { %3973 = vmatmul.bf16.vlgmr.msrb.gmra.mxu2 %v14660_v57 }
 0x85d   :  { %4007 = vmatpush.bf16.msra.mxu2 %v8915_v23  ;;  %v10391_v23 = vld [vmem:[%s16791_s10 + $0x94] sm:$0xf0] }
 0x85e   :  { %v8799_v1 = vor.u32 %v10391_v23, %v8798_v32 }
 0x861   :  { %4008 = vmatpush.bf16.msra.mxu2 %v8899_v22 }
 0x865   :  { %4009 = vmatpush.bf16.msra.mxu2 %v8883_v9  ;;  %v8782_v9 = vld [vmem:[%s16791_s10 + $0x68] sm:$0xf] }
 0x869   :  { %4010 = vmatpush.bf16.msra.mxu2 %v8867_v24  ;;  %v8783_v24 = vor.u32 %v10387_v37, %v8782_v9 }
 0x86c   :  { %3978 = vmatmul.bf16.gmra.mxu2 %v14717_v44 }
 0x86d   :  { %4457 = vmatpush.bf16.msrb.mxu2 %v10451_v61  ;;  %v10383_v61 = vld [vmem:[%s16791_s10 + $0x54] sm:$0xf0] }
 0x871   :  { %4458 = vmatpush.bf16.msrb.mxu2 %v10450_v7 }
 0x875   :  { %4459 = vmatpush.bf16.msrb.mxu2 %v10449_v25  ;;  %v10375_v25 = vld [vmem:[%s16791_s10 + $0x14] sm:$0xf0] }
 0x876   :  { %v8735_v33 = vor.u32 %v10375_v25, %v8734_v20 }
 0x879   :  { %4460 = vmatpush.bf16.msrb.mxu2 %v10448_v31  ;;  %v8848_v31 = vld [vmem:[%s16791_s10 + $0xf8] sm:$0xf0] }
 0x87a   :  { %v8851_v11 = vor.u32 %v10401_v34, %v8848_v31 }
 0x87c   :  { %4011 = vmatmul.bf16.vlgmr.msra.gmra.mxu2 %v14660_v57  ;;  %v10403_v57 = vld [vmem:[%s16791_s10 + $0xf4] sm:$0xf0] }
 0x87d   :  { %4461 = vmatpush.bf16.msrb.mxu2 %v10447_v12  ;;  %v8847_v4 = vor.u32 %v10403_v57, %v8846_v46  ;;  %v8835_v12 = vor.u32 %v10397_v62, %v8832_v40  ;;  %v8736_v46 = vld [vmem:[%s16791_s10 + $0x18] sm:$0xf0] }
 0x87f   :  { %3946 = vmatpush.bf16.msra.mxu3 %v8847_v4 }
 0x881   :  { %4462 = vmatpush.bf16.msrb.mxu2 %v10446_v3  ;;  %v10389_v3 = vld [vmem:[%s16791_s10 + $0x8c] sm:$0xf] }
 0x882   :  { %v8803_v56 = vor.u32 %v10389_v3, %v8800_v39 }
 0x883   :  { %3947 = vmatpush.bf16.msra.mxu3 %v8831_v41 }
 0x885   :  { %4463 = vmatpush.bf16.msrb.mxu2 %v10445_v60  ;;  %v8784_v60 = vld [vmem:[%s16791_s10 + $0x78] sm:$0xf0] }
 0x886   :  { %v8787_v16 = vor.u32 %v10385_v5, %v8784_v60 }
 0x887   :  { %v3408_v10 = vpop.f32.mrf.mxu3  ;;  %3948 = vmatpush.bf16.msra.mxu3 %v8815_v51 }
 0x889   :  { %4464 = vmatpush.bf16.msrb.mxu2 %v10444_v49  ;;  %v8771_v49 = vor.u32 %v10381_v42, %v8768_v18 }
 0x88b   :  { %3949 = vmatpush.bf16.msra.mxu3 %v8799_v1 }
 0x88c   :  { %4016 = vmatmul.bf16.gmra.mxu2 %v14717_v44  ;;  %v8766_v44 = vld [vmem:[%s16791_s10 + $0x48] sm:$0xf] }
 0x88d   :  { %4769 = vmatpush.bf16.msra.mxu2 %v10467_v38  ;;  %v8767_v2 = vor.u32 %v10383_v61, %v8766_v44  ;;  %v10373_v38 = vld [vmem:[%s16791_s10 + $0xc] sm:$0xf] }
 0x88e   :  { %v8739_v57 = vor.u32 %v10373_v38, %v8736_v46 }
 0x88f   :  { %v3410_v35 = vpop.f32.mrf.mxu3  ;;  %v3469_v22 = vpop.f32.mrf.mxu2  ;;  %3950 = vmatpush.bf16.msra.mxu3 %v8783_v24 }
 0x890   :  { %v14891_v28 = vpack.c.bf16 %v3469_v22, %v3408_v10 }
 0x891   :  { %4770 = vmatpush.bf16.msra.mxu2 %v10466_v27  ;;  %v14975_v27 = vperm.slane %v14972_v0, 0 }
 0x892   :  { %3883 = vmatmul.bf16.gmra.mxu3 %v14891_v28 }
 0x893   :  { %3951 = vmatpush.bf16.msra.mxu3 %v8767_v2 }
 0x895   :  { %4771 = vmatpush.bf16.msra.mxu2 %v10465_v53 }
 0x897   :  { %v3471_v7 = vpop.f32.mrf.mxu2  ;;  %3952 = vmatpush.bf16.msra.mxu3 %v8751_v19 }
 0x899   :  { %4772 = vmatpush.bf16.msra.mxu2 %v10464_v48 }
 0x89b   :  { %3953 = vmatpush.bf16.msra.mxu3 %v8735_v33 }
 0x89d   :  { %4773 = vmatpush.bf16.msra.mxu2 %v10463_v36 }
 0x89f   :  { %v3898_v6 = vpop.f32.mrf.mxu2 }
 0x8a1   :  { %4774 = vmatpush.bf16.msra.mxu2 %v10462_v26 }
 0x8a2   :  { %3916 = vmatmul.bf16.vlgmr.msrb.gmra.mxu3 %v14788_v50 }
 0x8a3   :  { %3984 = vmatpush.bf16.msrb.mxu3 %v8851_v11 }
 0x8a5   :  { %4775 = vmatpush.bf16.msra.mxu2 %v10461_v54 }
 0x8a7   :  { %3985 = vmatpush.bf16.msrb.mxu3 %v8835_v12  ;;  %v3900_v30 = vpop.f32.mrf.mxu2 }
 0x8a9   :  { %4776 = vmatpush.bf16.msra.mxu2 %v10460_v8 }
 0x8ab   :  { %3986 = vmatpush.bf16.msrb.mxu3 %v8819_v13 }
 0x8af   :  { %3987 = vmatpush.bf16.msrb.mxu3 %v8803_v56  ;;  %v3903_v10 = vpop.f32.mrf.mxu2 }
 0x8b2   :  { %3921 = vmatmul.bf16.gmra.mxu3 %v14891_v28 }
 0x8b3   :  { %3988 = vmatpush.bf16.msrb.mxu3 %v8787_v16 }
 0x8b7   :  { %3989 = vmatpush.bf16.msrb.mxu3 %v8771_v49  ;;  %v3905_v53 = vpop.f32.mrf.mxu2 }
 0x8bb   :  { %3990 = vmatpush.bf16.msrb.mxu3 %v8755_v45 }
 0x8bf   :  { %3991 = vmatpush.bf16.msrb.mxu3 %v8739_v57  ;;  %v3936_v32 = vpop.f32.mrf.mxu2 }
 0x8c2   :  { %3954 = vmatmul.bf16.vlgmr.msra.gmra.mxu3 %v14788_v50 }
 0x8c7   :  { %v3938_v35 = vpop.f32.mrf.mxu2 }
 0x8cf   :  { %v3941_v9 = vpop.f32.mrf.mxu2 }
 0x8d1   :  { %v3879_v4 = vpop.f32.mrf.mxu3 }
 0x8d2   :  { %3959 = vmatmul.bf16.gmra.mxu3 %v14891_v28  ;;  %v3880_v41 = vadd.f32 %v3879_v4, %v14975_v27 }
 0x8d4   :  { %v3899_v47 = vadd.f32 %v3898_v6, %v3880_v41 }
 0x8d6   :  { %v8980_v2 = vmul.f32 -1.442695, %v3899_v47 }
 0x8d7   :  { %v3943_v44 = vpop.f32.mrf.mxu2 }
 0x8d8   :  { %11710 = vpow2.f32 %v8980_v2  ;;  %v15046_v2 = vperm.slane %v14972_v0, 2 }
 0x8d9   :  { %v3881_v51 = vpop.f32.mrf.mxu3 }
 0x8de   :  { %v11711_v33 = vpop.eup %11710 }
 0x8df   :  { %v14986_v24 = vpop.f32.mrf.mxu2  ;;  %v14994_v31 = vadd.f32 1.0, %v11711_v33 }
 0x8e1   :  { %vm4043_vm14 = vweird.f32 %v14994_v31 }
 0x8e2   :  { %3992 = vmatmul.bf16.vlgmr.msrb.gmra.mxu3 %v14788_v50  ;;  %v14983_v50 = vperm.slane %v14972_v0, 1 }
 0x8e7   :  { %v14990_v25 = vpop.f32.mrf.mxu2 }
 0x8ef   :  { %v15001_v3 = vpop.f32.mrf.mxu2 }
 0x8f2   :  { %3997 = vmatmul.bf16.gmra.mxu3 %v14891_v28  ;;  %v3882_v28 = vadd.f32 %v3881_v51, %v14975_v27 }
 0x8f4   :  { %v3901_v43 = vadd.f32 %v3900_v30, %v3882_v28 }
 0x8f6   :  { %v8981_v54 = vmul.f32 -1.442695, %v3901_v43  ;;  %v15049_v43 = vperm.slane %v14972_v0, 3 }
 0x8f7   :  { %v15018_v4 = vpop.f32.mrf.mxu2 }
 0x8f8   :  { %11712 = vpow2.f32 %v8981_v54 }
 0x8fe   :  { %v11713_v40 = vpop.eup %11712 }
 0x8ff   :  { %v15003_v39 = vadd.f32 1.0, %v11713_v40 }
 0x901   :  { %vm4058_vm1 = vweird.f32 %v15003_v39 }
 0x915   :  { %v3884_v23 = vpop.f32.mrf.mxu3 }
 0x916   :  { %v3885_v48 = vadd.f32 %v3884_v23, %v14975_v27 }
 0x918   :  { %v3904_v1 = vadd.f32 %v3903_v10, %v3885_v48 }
 0x91a   :  { %v8982_v62 = vmul.f32 -1.442695, %v3904_v1 }
 0x91d   :  { %v3886_v22 = vpop.f32.mrf.mxu3 }
 0x91e   :  { %v3887_v11 = vadd.f32 %v3886_v22, %v14975_v27 }
 0x920   :  { %v3906_v56 = vadd.f32 %v3905_v53, %v3887_v11 }
 0x922   :  { %v8983_v16 = vmul.f32 -1.442695, %v3906_v56 }
 0x925   :  { %v3917_v36 = vpop.f32.mrf.mxu3 }
 0x926   :  { %v3918_v61 = vadd.f32 %v3917_v36, %v14983_v50 }
 0x928   :  { %v3937_v7 = vadd.f32 %v3936_v32, %v3918_v61 }
 0x92a   :  { %v8984_v19 = vmul.f32 -1.442695, %v3937_v7 }
 0x92c   :  { %11714 = vpow2.f32 %v8984_v19 }
 0x92d   :  { %v3919_v37 = vpop.f32.mrf.mxu3  ;;  %11716 = vrcp.f32 %v14994_v31 }
 0x92e   :  { %v3920_v20 = vadd.f32 %v3919_v37, %v14983_v50  ;;  %11718 = vpow2.f32 %v8982_v62  ;;  %v4012_v37 = vpop.f32.mrf.mxu2 }
 0x930   :  { %v3939_v34 = vadd.f32 %v3938_v35, %v3920_v20 }
 0x932   :  { %v8985_v12 = vmul.f32 -1.442695, %v3939_v34  ;;  %v11715_v15 = vpop.eup %11714 }
 0x933   :  { %v15005_v60 = vadd.f32 1.0, %v11715_v15  ;;  %v15008_v42 = vpop.eup %11716  ;;  %v4062_v15 = vand.u32 2147483647, %v15003_v39 }
 0x934   :  { %11720 = vpow2.f32 %v8985_v12  ;;  %v11719_v14 = vpop.eup %11718  ;;  %v4039_v38 = vmul.f32 %v15008_v42, %v14994_v31  ;;  %vm4044_vm13 = vweird.f32 %v15008_v42 }
 0x935   :  { %v3922_v26 = vpop.f32.mrf.mxu3  ;;  %11722 = vrcp.f32 %v15003_v39  ;;  %v15016_v46 = vadd.f32 1.0, %v11719_v14  ;;  %vm15059_vm15 = vmor %vm4043_vm14, %vm4044_vm13  ;;  %vm15102_vm5 = vcmp.eq.f32.partialorder %v4062_v15, 8.507059e+37  ;;  %vm4119_vm6 = vweird.f32 %v15005_v60 }
 0x936   :  { %v3923_v59 = vadd.f32 %v3922_v26, %v14983_v50  ;;  %11724 = vrcp.f32 %v15005_v60  ;;  %v4040_v30 = vsub.f32 1.0, %v4039_v38  ;;  %v4049_v26 = vand.u32 2147483648, %v14994_v31 }
 0x937   :  { %11726 = vpow2.f32 %v8983_v16  ;;  %vm4073_vm10 = vweird.f32 %v15016_v46 }
 0x938   :  { %v3942_v5 = vadd.f32 %v3941_v9, %v3923_v59  ;;  %v4041_v1 = vmul.f32 %v15008_v42, %v4040_v30  ;;  %v4050_v12 = vor.u32 1.1754944e-38, %v4049_v26 }
 0x93a   :  { %v8986_v18 = vmul.f32 -1.442695, %v3942_v5  ;;  %v11721_v63 = vpop.eup %11720 }
 0x93b   :  { %v15020_v6 = vpop.eup %11722  ;;  %v15022_v41 = vadd.f32 1.0, %v11721_v63 }
 0x93c   :  { %11728 = vpow2.f32 %v8986_v18  ;;  %v15024_v47 = vpop.eup %11724  ;;  %v4054_v10 = vmul.f32 %v15020_v6, %v15003_v39  ;;  %vm4059_vm2 = vweird.f32 %v15020_v6 }
 0x93d   :  { %v3924_v21 = vpop.f32.mrf.mxu3  ;;  %11730 = vrcp.f32 %v15016_v46  ;;  %v11727_v51 = vpop.eup %11726  ;;  %v4115_v23 = vmul.f32 %v15024_v47, %v15005_v60  ;;  %vm4120_vm3 = vweird.f32 %v15024_v47  ;;  %vm15094_vm4 = vmor %vm4058_vm1, %vm4059_vm2  ;;  %vm4134_vm13 = vweird.f32 %v15022_v41 }
 0x93e   :  { %v3925_v49 = vadd.f32 %v3924_v21, %v14983_v50  ;;  %11732 = vrcp.f32 %v15022_v41  ;;  %v15035_v35 = vadd.f32 1.0, %v11727_v51  ;;  %v4055_v22 = vsub.f32 1.0, %v4054_v10  ;;  %vm15112_vm7 = vmor %vm4119_vm6, %vm4120_vm3 }
 0x93f   :  { %v4116_v28 = vsub.f32 1.0, %v4115_v23  ;;  %v4042_v21 = vadd.f32 %v15008_v42, %v4041_v1  ;;  %v4125_v10 = vand.u32 2147483648, %v15005_v60 }
 0x940   :  { %v3944_v57 = vadd.f32 %v3943_v44, %v3925_v49  ;;  %v4047_v44 = vand.u32 2147483647, %v14994_v31  ;;  %v4056_v7 = vmul.f32 %v15020_v6, %v4055_v22  ;;  %vm4088_vm3 = vweird.f32 %v15035_v35 }
 0x941   :  { %v4117_v34 = vmul.f32 %v15024_v47, %v4116_v28  ;;  %v4046_v40 = vsel %vm15059_vm15, %v15008_v42, %v4042_v21 }
 0x942   :  { %v8987_v53 = vmul.f32 -1.442695, %v3944_v57  ;;  %v11729_v32 = vpop.eup %11728  ;;  %vm15063_vm0 = vcmp.eq.f32.partialorder %v4047_v44, 8.507059e+37  ;;  %v4057_v59 = vadd.f32 %v15020_v6, %v4056_v7  ;;  %v4126_v7 = vor.u32 1.1754944e-38, %v4125_v10 }
 0x943   :  { %v15037_v36 = vadd.f32 1.0, %v11729_v32  ;;  %v15039_v9 = vpop.eup %11730  ;;  %v4051_v42 = vsel %vm15063_vm0, %v4050_v12, %v4046_v40  ;;  %v4118_v49 = vadd.f32 %v15024_v47, %v4117_v34  ;;  %v4140_v40 = vand.u32 2147483648, %v15022_v41 }
 0x944   :  { %11734 = vpow2.f32 %v8987_v53  ;;  %v15043_v61 = vpop.eup %11732  ;;  %v4069_v54 = vmul.f32 %v15039_v9, %v15016_v46  ;;  %v4014_v53 = vpop.f32.mrf.mxu2  ;;  %v4061_v51 = vsel %vm15094_vm4, %v15020_v6, %v4057_v59  ;;  %vm4074_vm8 = vweird.f32 %v15039_v9 }
 0x945   :  { %v14992_v8 = vpop.f32.mrf.mxu3  ;;  %11736 = vrcp.f32 %v15035_v35  ;;  %v4130_v62 = vmul.f32 %v15043_v61, %v15022_v41  ;;  %vm4135_vm11 = vweird.f32 %v15043_v61  ;;  %vm15141_vm12 = vmor %vm4073_vm10, %vm4074_vm8  ;;  %v4079_v59 = vand.u32 2147483648, %v15016_v46 }
 0x946   :  { %11738 = vrcp.f32 %v15037_v36  ;;  %v3956_v31 = vadd.f32 %v14992_v8, %v15046_v2  ;;  %v4064_v8 = vand.u32 2147483648, %v15003_v39  ;;  %v4070_v16 = vsub.f32 1.0, %v4069_v54  ;;  %vm15155_vm14 = vmor %vm4134_vm13, %vm4135_vm11 }
 0x947   :  { %v4131_v14 = vsub.f32 1.0, %v4130_v62 }
 0x948   :  { %v3975_v38 = vadd.f32 %v14986_v24, %v3956_v31  ;;  %v4123_v24 = vand.u32 2147483647, %v15005_v60  ;;  %v4071_v23 = vmul.f32 %v15039_v9, %v4070_v16  ;;  %v4065_v44 = vor.u32 1.1754944e-38, %v4064_v8 }
 0x949   :  { %v4122_v60 = vsel %vm15112_vm7, %v15024_v47, %v4118_v49  ;;  %v4132_v26 = vmul.f32 %v15043_v61, %v4131_v14 }
 0x94a   :  { %v11735_v19 = vpop.eup %11734  ;;  %v4066_v54 = vsel %vm15102_vm5, %v4065_v44, %v4061_v51  ;;  %vm4124_vm9 = vcmp.eq.f32.partialorder %v4123_v24, 8.507059e+37  ;;  %v4080_v51 = vor.u32 1.1754944e-38, %v4079_v59  ;;  %vm4149_vm5 = vweird.f32 %v15037_v36 }
 0x94b   :  { %v15080_v56 = vadd.f32 1.0, %v11735_v19  ;;  %v15083_v18 = vpop.eup %11736  ;;  %v4127_v0 = vsel %vm4124_vm9, %v4126_v7, %v4122_v60  ;;  %v4133_v33 = vadd.f32 %v15043_v61, %v4132_v26  ;;  %v4094_v60 = vand.u32 2147483648, %v15035_v35 }
 0x94c   :  { %v15089_v63 = vpop.eup %11738  ;;  %v4084_v6 = vmul.f32 %v15083_v18, %v15035_v35  ;;  %v4186_v15 = vsub.f32 1.0, %v4127_v0  ;;  %vm4089_vm1 = vweird.f32 %v15083_v18 }
 0x94d   :  { %v14999_v13 = vpop.f32.mrf.mxu3  ;;  %11740 = vrcp.f32 %v15080_v56  ;;  %v4145_v22 = vmul.f32 %v15089_v63, %v15037_v36  ;;  %vm4150_vm2 = vweird.f32 %v15089_v63  ;;  %vm15178_vm4 = vmor %vm4088_vm3, %vm4089_vm1  ;;  %vm4164_vm10 = vweird.f32 %v15080_v56 }
 0x94e   :  { %v3958_v28 = vadd.f32 %v14999_v13, %v15046_v2  ;;  %v4085_v47 = vsub.f32 1.0, %v4084_v6  ;;  %vm15191_vm6 = vmor %vm4149_vm5, %vm4150_vm2 }
 0x94f   :  { %v4146_v13 = vsub.f32 1.0, %v4145_v22 }
 0x950   :  { %v3977_v62 = vadd.f32 %v14990_v25, %v3958_v28  ;;  %v4086_v49 = vmul.f32 %v15083_v18, %v4085_v47  ;;  %v4153_v28 = vand.u32 2147483647, %v15037_v36 }
 0x951   :  { %v4147_v30 = vmul.f32 %v15089_v63, %v4146_v13 }
 0x952   :  { %vm4154_vm7 = vcmp.eq.f32.partialorder %v4153_v28, 8.507059e+37 }
 0x953   :  { %v15134_v34 = vpop.eup %11740 }
 0x954   :  { %vm4165_vm9 = vweird.f32 %v15134_v34 }
 0x955   :  { %v15012_v45 = vpop.f32.mrf.mxu3  ;;  %vm4166_vm11 = vmor %vm4164_vm10, %vm4165_vm9 }
 0x95d   :  { %v15032_v48 = vpop.f32.mrf.mxu3 }
 0x965   :  { %v3993_v20 = vpop.f32.mrf.mxu3 }
 0x966   :  { %v3994_v11 = vadd.f32 %v3993_v20, %v15049_v43  ;;  %v4072_v20 = vadd.f32 %v15039_v9, %v4071_v23 }
 0x968   :  { %v4013_v5 = vadd.f32 %v4012_v37, %v3994_v11  ;;  %v4077_v11 = vand.u32 2147483647, %v15016_v46  ;;  %v4076_v16 = vsel %vm15141_vm12, %v15039_v9, %v4072_v20  ;;  %v4017_v46 = vpop.f32.mrf.mxu2  ;;  %v3961_v9 = vadd.f32 %v15012_v45, %v15046_v2 }
 0x969   :  { %v4148_v45 = vadd.f32 %v15089_v63, %v4147_v30 }
 0x96a   :  { %v4174_v57 = vmul.f32 %v4051_v42, %v4013_v5  ;;  %v4138_v5 = vand.u32 2147483647, %v15022_v41  ;;  %v4194_v42 = vmul.f32 %v14654_v52, %v4127_v0  ;;  %v4137_v41 = vsel %vm15155_vm14, %v15043_v61, %v4133_v33 }
 0x96b   :  { %v4160_v52 = vmul.f32 %v15134_v34, %v15080_v56  ;;  %vm4078_vm15 = vcmp.eq.f32.partialorder %v4077_v11, 8.507059e+37  ;;  %v4087_v61 = vadd.f32 %v15083_v18, %v4086_v49  ;;  %v3980_v6 = vadd.f32 %v15001_v3, %v3961_v9 }
 0x96c   :  { %v4178_v39 = vadd.f32 %v4174_v57, %v3975_v38  ;;  %vm4139_vm0 = vcmp.eq.f32.partialorder %v4138_v5, 8.507059e+37  ;;  %v4081_v23 = vsel %vm4078_vm15, %v4080_v51, %v4076_v16  ;;  %v10441_v51 = vld [vmem:[%s16795_s14 + $0x28] sm:$0xff] }
 0x96d   :  { %v3995_v37 = vpop.f32.mrf.mxu3  ;;  %v4161_v1 = vsub.f32 1.0, %v4160_v52  ;;  %v4091_v3 = vsel %vm15178_vm4, %v15083_v18, %v4087_v61  ;;  %v3963_v18 = vadd.f32 %v15032_v48, %v15046_v2 }
 0x96e   :  { %11742 = vtanh.f32 %v4178_v39  ;;  %v3996_v21 = vadd.f32 %v3995_v37, %v15049_v43  ;;  %v4155_v37 = vand.u32 2147483648, %v15037_v36  ;;  %v4152_v36 = vsel %vm15191_vm6, %v15089_v63, %v4148_v45 }
 0x96f   :  { %v4162_v33 = vmul.f32 %v15134_v34, %v4161_v1  ;;  %v3982_v48 = vadd.f32 %v15018_v4, %v3963_v18  ;;  %v10439_v1 = vld [vmem:[%s16795_s14 + $0x18] sm:$0xff] }
 0x970   :  { %v4015_v19 = vadd.f32 %v4014_v53, %v3996_v21  ;;  %v4141_v53 = vor.u32 1.1754944e-38, %v4140_v40  ;;  %v4156_v13 = vor.u32 1.1754944e-38, %v4155_v37 }
 0x971   :  { %v4163_v63 = vadd.f32 %v15134_v34, %v4162_v33 }
 0x972   :  { %v4175_v31 = vmul.f32 %v4066_v54, %v4015_v19  ;;  %v4142_v39 = vsel %vm4139_vm0, %v4141_v53, %v4137_v41  ;;  %v4092_v54 = vand.u32 2147483647, %v15035_v35  ;;  %v10459_v19 = vld [vmem:[%s16787_s6 + $0x38] sm:$0xff] }
 0x973   :  { %v4187_v26 = vsub.f32 1.0, %v4142_v39  ;;  %v4195_v47 = vmul.f32 %v14656_v55, %v4142_v39  ;;  %v4157_v55 = vsel %vm4154_vm7, %v4156_v13, %v4152_v36  ;;  %v4167_v14 = vsel %vm4166_vm11, %v15134_v34, %v4163_v63  ;;  %v10440_v39 = vld [vmem:[%s16795_s14 + $0x20] sm:$0xff]  ;;  %v10453_v63 = vld [vmem:[%s16787_s6 + $0x8] sm:$0xff] }
 0x974   :  { %v11743_v8 = vpop.eup %11742  ;;  %v4179_v25 = vadd.f32 %v4175_v31, %v3977_v62  ;;  %v4019_v62 = vpop.f32.mrf.mxu2  ;;  %v4095_v31 = vor.u32 1.1754944e-38, %v4094_v60  ;;  %vm4093_vm8 = vcmp.eq.f32.partialorder %v4092_v54, 8.507059e+37  ;;  %v4188_v5 = vsub.f32 1.0, %v4157_v55  ;;  %v10436_v54 = vld [vmem:[%s16795_s14] sm:$0xff] }
 0x975   :  { %v3998_v38 = vpop.f32.mrf.mxu3  ;;  %v4190_v57 = vmul.f32 %v11743_v8, %v4186_v15  ;;  %v4170_v15 = vand.u32 2147483648, %v15080_v56  ;;  %v4168_v8 = vand.u32 2147483647, %v15080_v56  ;;  %v4196_v49 = vmul.f32 %v14713_v58, %v4157_v55  ;;  %v10443_v58 = vld [vmem:[%s16795_s14 + $0x38] sm:$0xff]  ;;  %v10456_v36 = vld [vmem:[%s16787_s6 + $0x20] sm:$0xff] }
 0x976   :  { %11744 = vtanh.f32 %v4179_v25  ;;  %v3999_v10 = vadd.f32 %v3998_v38, %v15049_v43  ;;  %v4096_v12 = vsel %vm4093_vm8, %v4095_v31, %v4091_v3  ;;  %4365 = vmatpush.bf16.msra.mxu3 %v10443_v58  ;;  %v10437_v3 = vld [vmem:[%s16795_s14 + $0x8] sm:$0xff] }
 0x977   :  { %v15168_v32 = vadd.f32 %v4194_v42, %v4190_v57  ;;  %vm4169_vm12 = vcmp.eq.f32.partialorder %v4168_v8, 8.507059e+37 }
 0x978   :  { %v4018_v24 = vadd.f32 %v4017_v46, %v3999_v10  ;;  %v4171_v46 = vor.u32 1.1754944e-38, %v4170_v15  ;;  %v10442_v10 = vld [vmem:[%s16795_s14 + $0x30] sm:$0xff] }
 0x979   :  { %4202 = vadd.xlane.f32.xlu0 %v15168_v32 }
 0x97a   :  { %v4176_v22 = vmul.f32 %v4081_v23, %v4018_v24  ;;  %v4172_v4 = vsel %vm4169_vm12, %v4171_v46, %v4167_v14  ;;  %4366 = vmatpush.bf16.msra.mxu3 %v10442_v10 }
 0x97b   :  { %v4189_v57 = vsub.f32 1.0, %v4172_v4  ;;  %v4197_v56 = vmul.f32 %v14711_v29, %v4172_v4 }
 0x97c   :  { %v11745_v21 = vpop.eup %11744  ;;  %v4180_v7 = vadd.f32 %v4176_v22, %v3980_v6 }
 0x97d   :  { %v4000_v20 = vpop.f32.mrf.mxu3  ;;  %v4191_v0 = vmul.f32 %v11745_v21, %v4187_v26 }
 0x97e   :  { %11746 = vtanh.f32 %v4180_v7  ;;  %v4001_v35 = vadd.f32 %v4000_v20, %v15049_v43  ;;  %4367 = vmatpush.bf16.msra.mxu3 %v10441_v51  ;;  %v10438_v7 = vld [vmem:[%s16795_s14 + $0x10] sm:$0xff] }
 0x97f   :  { %v15203_v11 = vadd.f32 %v4195_v47, %v4191_v0  ;;  %v10458_v20 = vld [vmem:[%s16787_s6 + $0x30] sm:$0xff]  ;;  %v10457_v0 = vld [vmem:[%s16787_s6 + $0x28] sm:$0xff] }
 0x980   :  { %v4020_v40 = vadd.f32 %v4019_v62, %v4001_v35  ;;  %v10455_v35 = vld [vmem:[%s16787_s6 + $0x18] sm:$0xff]  ;;  %v10454_v62 = vld [vmem:[%s16787_s6 + $0x10] sm:$0xff] }
 0x981   :  { %4204 = vadd.xlane.f32.xlu0 %v15203_v11 }
 0x982   :  { %v4177_v59 = vmul.f32 %v4096_v12, %v4020_v40  ;;  %4368 = vmatpush.bf16.msra.mxu3 %v10440_v39  ;;  %v11545_v39 = vld [vmem:[%s16794_s13] ss:$0 sm:$0xff] }
 0x984   :  { %v11747_v25 = vpop.eup %11746  ;;  %v4181_v16 = vadd.f32 %v4177_v59, %v3982_v48  ;;  %v10452_v59 = vld [vmem:[%s16787_s6] sm:$0xff] }
 0x985   :  { %v4192_v42 = vmul.f32 %v11747_v25, %v4188_v5 }
 0x986   :  { %11748 = vtanh.f32 %v4181_v16  ;;  %4369 = vmatpush.bf16.msra.mxu3 %v10439_v1 }
 0x987   :  { %v15214_v38 = vadd.f32 %v4196_v49, %v4192_v42 }
 0x989   :  { %4206 = vadd.xlane.f32.xlu0 %v15214_v38 }
 0x98a   :  { %4370 = vmatpush.bf16.msra.mxu3 %v10438_v7 }
 0x98c   :  { %v11749_v41 = vpop.eup %11748 }
 0x98d   :  { %v4193_v30 = vmul.f32 %v11749_v41, %v4189_v57 }
 0x98e   :  { %4371 = vmatpush.bf16.msra.mxu3 %v10437_v3 }
 0x98f   :  { %v15218_v52 = vadd.f32 %v4197_v56, %v4193_v30 }
 0x991   :  { %4208 = vadd.xlane.f32.xlu0 %v15218_v52 }
 0x992   :  { %4372 = vmatpush.bf16.msra.mxu3 %v10436_v54 }
 0x996   :  { %4634 = vmatpush.bf16.msrb.mxu3 %v10459_v19  ;;  %v10475_v19 = vld [vmem:[#allocation2 + $0x78] sm:$0xff] }
 0x99a   :  { %4635 = vmatpush.bf16.msrb.mxu3 %v10458_v20 }
 0x99e   :  { %4636 = vmatpush.bf16.msrb.mxu3 %v10457_v0 }
 0x9a2   :  { %4637 = vmatpush.bf16.msrb.mxu3 %v10456_v36 }
 0x9a6   :  { %4638 = vmatpush.bf16.msrb.mxu3 %v10455_v35  ;;  %v10473_v35 = vld [vmem:[#allocation2 + $0xf0] sm:$0xff] }
 0x9aa   :  { %4639 = vmatpush.bf16.msrb.mxu3 %v10454_v62 }
 0x9ae   :  { %4640 = vmatpush.bf16.msrb.mxu3 %v10453_v63 }
 0x9b2   :  { %4641 = vmatpush.bf16.msrb.mxu3 %v10452_v59  ;;  %v10469_v59 = vld [vmem:[#allocation2 + $0x88] sm:$0xff] }
 0x9ec   :  { %v4203_v34 = vpop.xlane.xlu0 %4202 }
 0x9ed   :  { %v4210_v9 = vmul.f32 %v4203_v34, %v12207_v17  ;;  %v11544_v34 = vld [vmem:[%s16793_s12] ss:$0 sm:$0xff] }
 0x9ef   :  { %v15229_v53 = vsub.f32 %v15168_v32, %v4210_v9 }
 0x9f1   :  { %v4218_v29 = vmul.f32 %v15229_v53, %v15229_v53 }
 0x9f3   :  { %4222 = vadd.xlane.f32.xlu0 %v4218_v29 }
 0x9f4   :  { %v4205_v24 = vpop.xlane.xlu0 %4204 }
 0x9f5   :  { %v4211_v61 = vmul.f32 %v4205_v24, %v12207_v17 }
 0x9f7   :  { %v15241_v23 = vsub.f32 %v15203_v11, %v4211_v61 }
 0x9f9   :  { %v4219_v45 = vmul.f32 %v15241_v23, %v15241_v23 }
 0x9fb   :  { %4224 = vadd.xlane.f32.xlu0 %v4219_v45 }
 0x9fc   :  { %v4207_v6 = vpop.xlane.xlu0 %4206 }
 0x9fd   :  { %v4212_v22 = vmul.f32 %v4207_v6, %v12207_v17 }
 0x9ff   :  { %v15250_v37 = vsub.f32 %v15214_v38, %v4212_v22 }
 0xa01   :  { %v4220_v44 = vmul.f32 %v15250_v37, %v15250_v37 }
 0xa03   :  { %4226 = vadd.xlane.f32.xlu0 %v4220_v44 }
 0xa04   :  { %v4209_v60 = vpop.xlane.xlu0 %4208 }
 0xa05   :  { %v4213_v26 = vmul.f32 %v4209_v60, %v12207_v17 }
 0xa07   :  { %v15256_v28 = vsub.f32 %v15218_v52, %v4213_v26 }
 0xa09   :  { %v4221_v21 = vmul.f32 %v15256_v28, %v15256_v28 }
 0xa0b   :  { %4228 = vadd.xlane.f32.xlu0 %v4221_v21 }
 0xa66   :  { %v4223_v47 = vpop.xlane.xlu0 %4222 }
 0xa67   :  { %v4230_v33 = vmul.f32 %v4223_v47, %v12207_v17 }
 0xa69   :  { %v4234_v18 = vadd.f32 1e-05, %v4230_v33 }
 0xa6b   :  { %11750 = vrsqrt.f32 %v4234_v18  ;;  %vm4244_vm14 = vweird.f32 %v4234_v18 }
 0xa6e   :  { %v4225_v13 = vpop.xlane.xlu0 %4224 }
 0xa6f   :  { %v4231_v31 = vmul.f32 %v4225_v13, %v12207_v17 }
 0xa71   :  { %v11751_v40 = vpop.eup %11750  ;;  %v4235_v55 = vadd.f32 1e-05, %v4231_v31 }
 0xa72   :  { %v4239_v12 = vmul.f32 %v11751_v40, %v4234_v18  ;;  %vm4245_vm13 = vweird.f32 %v11751_v40 }
 0xa73   :  { %11752 = vrsqrt.f32 %v4235_v55  ;;  %vm4246_vm15 = vmor %vm4244_vm14, %vm4245_vm13  ;;  %vm4254_vm1 = vweird.f32 %v4235_v55 }
 0xa74   :  { %v4240_v48 = vmul.f32 %v11751_v40, %v4239_v12 }
 0xa76   :  { %v4241_v15 = vmul.f32 0.5, %v4240_v48  ;;  %v4227_v5 = vpop.xlane.xlu0 %4226  ;;  %v10471_v48 = vld [vmem:[#allocation2 + $0xb8] sm:$0xff] }
 0xa77   :  { %v4232_v8 = vmul.f32 %v4227_v5, %v12207_v17 }
 0xa78   :  { %v4242_v25 = vsub.f32 1.5, %v4241_v15  ;;  %v10468_v15 = vld [vmem:[#allocation2 + $0x80] sm:$0xff] }
 0xa79   :  { %v11753_v16 = vpop.eup %11752  ;;  %v4236_v42 = vadd.f32 1e-05, %v4232_v8 }
 0xa7a   :  { %v4243_v49 = vmul.f32 %v11751_v40, %v4242_v25  ;;  %v4249_v14 = vmul.f32 %v11753_v16, %v4235_v55  ;;  %vm4255_vm0 = vweird.f32 %v11753_v16 }
 0xa7b   :  { %11754 = vrsqrt.f32 %v4236_v42  ;;  %vm4256_vm2 = vmor %vm4254_vm1, %vm4255_vm0  ;;  %vm4264_vm4 = vweird.f32 %v4236_v42 }
 0xa7c   :  { %v4250_v46 = vmul.f32 %v11753_v16, %v4249_v14  ;;  %v4247_v4 = vsel %vm4246_vm15, %v11751_v40, %v4243_v49  ;;  %v10472_v40 = vld [vmem:[#allocation2 + $0x60] sm:$0xff]  ;;  %v9590_v14 = vld [vmem:[%s16791_s10 + $0x1e8] sm:$0xf] }
 0xa7d   :  { %v4278_v9 = vmul.f32 %v4247_v4, %v15229_v53  ;;  %v9574_v4 = vld [vmem:[%s16791_s10 + $0x1c8] sm:$0xf] }
 0xa7e   :  { %v4251_v57 = vmul.f32 0.5, %v4250_v46  ;;  %v4229_v41 = vpop.xlane.xlu0 %4228  ;;  %v10587_v46 = vld [vmem:[%s16791_s10 + $0x1f4] sm:$0xf0] }
 0xa7f   :  { %v4233_v30 = vmul.f32 %v4229_v41, %v12207_v17  ;;  %v4285_v45 = vmul.f32 %v11544_v34, %v4278_v9  ;;  %v9591_v41 = vor.u32 %v10587_v46, %v9590_v14  ;;  %v9558_v9 = vld [vmem:[%s16791_s10 + $0x1a8] sm:$0xf]  ;;  %v10635_v46 = vld [vmem:[#allocation2 + $0xc0] sm:$0xff] }
 0xa80   :  { %v4252_v56 = vsub.f32 1.5, %v4251_v57 }
 0xa81   :  { %v11755_v58 = vpop.eup %11754  ;;  %v4237_v10 = vadd.f32 1e-05, %v4233_v30  ;;  %v4292_v53 = vadd.f32 %v11545_v39, %v4285_v45  ;;  %v10583_v30 = vld [vmem:[%s16791_s10 + $0x1d4] sm:$0xf0]  ;;  %5900 = vmatpush.bf16.msrb.mxu1 %v9591_v41 }
 0xa82   :  { %v4253_v29 = vmul.f32 %v11753_v16, %v4252_v56  ;;  %v4259_v51 = vmul.f32 %v11755_v58, %v4236_v42  ;;  %vm4265_vm3 = vweird.f32 %v11755_v58  ;;  %v10483_v56 = vld [vmem:[#allocation2 + $0xc0] sm:$0xff] }
 0xa83   :  { %11756 = vrsqrt.f32 %v4237_v10  ;;  %vm4266_vm5 = vmor %vm4264_vm4, %vm4265_vm3  ;;  %vm4274_vm7 = vweird.f32 %v4237_v10 }
 0xa84   :  { %v4257_v24 = vsel %vm4256_vm2, %v11753_v16, %v4253_v29  ;;  %v4260_v61 = vmul.f32 %v11755_v58, %v4259_v51  ;;  %v10482_v29 = vld [vmem:[#allocation2 + $0x70] sm:$0xff] }
 0xa85   :  { %v4279_v1 = vmul.f32 %v4257_v24, %v15241_v23  ;;  %v10474_v23 = vld [vmem:[#allocation2 + $0x8] sm:$0xff] }
 0xa86   :  { %v4261_v6 = vmul.f32 0.5, %v4260_v61  ;;  %v9542_v24 = vld [vmem:[%s16791_s10 + $0x188] sm:$0xf]  ;;  %v10575_v61 = vld [vmem:[%s16791_s10 + $0x194] sm:$0xf0] }
 0xa87   :  { %v4286_v22 = vmul.f32 %v11544_v34, %v4279_v1  ;;  %v9543_v1 = vor.u32 %v10575_v61, %v9542_v24 }
 0xa88   :  { %v4262_v44 = vsub.f32 1.5, %v4261_v6 }
 0xa89   :  { %v11757_v60 = vpop.eup %11756  ;;  %v4293_v26 = vadd.f32 %v11545_v39, %v4286_v22  ;;  %v9526_v22 = vld [vmem:[%s16791_s10 + $0x168] sm:$0xf] }
 0xa8a   :  { %v4263_v21 = vmul.f32 %v11755_v58, %v4262_v44  ;;  %v4269_v7 = vmul.f32 %v11757_v60, %v4237_v10  ;;  %vm4275_vm6 = vweird.f32 %v11757_v60  ;;  %v10579_v10 = vld [vmem:[%s16791_s10 + $0x1b4] sm:$0xf0] }
 0xa8b   :  { %v4296_v3 = vpack.c.bf16 %v4293_v26, %v4292_v53  ;;  %vm4276_vm8 = vmor %vm4274_vm7, %vm4275_vm6  ;;  %v9559_v51 = vor.u32 %v10579_v10, %v9558_v9  ;;  %v10571_v44 = vld [vmem:[%s16791_s10 + $0x174] sm:$0xf0]  ;;  %v10480_v53 = vld [vmem:[#allocation2 + $0xe0] sm:$0xff] }
 0xa8c   :  { %v4270_v54 = vmul.f32 %v11757_v60, %v4269_v7  ;;  %v4267_v20 = vsel %vm4266_vm5, %v11755_v58, %v4263_v21  ;;  %v9575_v58 = vor.u32 %v10583_v30, %v9574_v4  ;;  %v9527_v7 = vor.u32 %v10571_v44, %v9526_v22  ;;  %v10630_v10 = vld [vmem:[#allocation2 + $0x40] sm:$0xff] }
 0xa8d   :  { %4373 = vmatmul.bf16.vlgmr.msra.gmra.mxu3 %v4296_v3  ;;  %v4280_v36 = vmul.f32 %v4267_v20, %v15250_v37  ;;  %v10470_v37 = vld [vmem:[#allocation2 + $0xe8] sm:$0xff] }
 0xa8e   :  { %v4271_v0 = vmul.f32 0.5, %v4270_v54  ;;  %4830 = vmatpush.bf16.msra.mxu3 %v10475_v19  ;;  %5901 = vmatpush.bf16.msrb.mxu1 %v9575_v58  ;;  %v9510_v3 = vld [vmem:[%s16791_s10 + $0x148] sm:$0xf]  ;;  %v10567_v54 = vld [vmem:[%s16791_s10 + $0x154] sm:$0xf0]  ;;  %v10632_v58 = vld [vmem:[#allocation2 + $0xe0] sm:$0xff] }
 0xa8f   :  { %v4287_v62 = vmul.f32 %v11544_v34, %v4280_v36  ;;  %v10479_v20 = vld [vmem:[#allocation2 + $0xc8] sm:$0xff]  ;;  %v10478_v36 = vld [vmem:[#allocation2 + $0x40] sm:$0xff] }
 0xa90   :  { %v4272_v47 = vsub.f32 1.5, %v4271_v0  ;;  %v9511_v0 = vor.u32 %v10567_v54, %v9510_v3 }
 0xa91   :  { %v4294_v55 = vadd.f32 %v11545_v39, %v4287_v62 }
 0xa92   :  { %v4273_v33 = vmul.f32 %v11757_v60, %v4272_v47  ;;  %4831 = vmatpush.bf16.msra.mxu3 %v10474_v23  ;;  %5902 = vmatpush.bf16.msrb.mxu1 %v9559_v51  ;;  %v9494_v47 = vld [vmem:[%s16791_s10 + $0x128] sm:$0xf]  ;;  %v10563_v23 = vld [vmem:[%s16791_s10 + $0x134] sm:$0xf0] }
 0xa93   :  { %v10628_v51 = vld [vmem:[#allocation2 + $0x38] sm:$0xff] }
 0xa94   :  { %v4277_v18 = vsel %vm4276_vm8, %v11757_v60, %v4273_v33  ;;  %v9495_v33 = vor.u32 %v10563_v23, %v9494_v47 }
 0xa95   :  { %v4281_v13 = vmul.f32 %v4277_v18, %v15256_v28  ;;  %v11546_v28 = vld [vmem:[%s16796_s15] ss:$0 sm:$0xff]  ;;  %v9478_v18 = vld [vmem:[%s16791_s10 + $0x108] sm:$0xf] }
 0xa96   :  { %4832 = vmatpush.bf16.msra.mxu3 %v10473_v35  ;;  %5903 = vmatpush.bf16.msrb.mxu1 %v9543_v1  ;;  %v10559_v35 = vld [vmem:[%s16791_s10 + $0x114] sm:$0xf0] }
 0xa97   :  { %v4288_v31 = vmul.f32 %v11544_v34, %v4281_v13  ;;  %v10477_v13 = vld [vmem:[#allocation2 + $0x58] sm:$0xff]  ;;  %v9479_v62 = vor.u32 %v10559_v35, %v9478_v18 }
 0xa99   :  { %v4295_v12 = vadd.f32 %v11545_v39, %v4288_v31  ;;  %v10481_v39 = vld [vmem:[#allocation2 + $0x90] sm:$0xff]  ;;  %v10603_v31 = vld [vmem:[#allocation7 + $0x38] sm:$0xff] }
 0xa9a   :  { %4833 = vmatpush.bf16.msra.mxu3 %v10472_v40  ;;  %5904 = vmatpush.bf16.msrb.mxu1 %v9527_v7  ;;  %v10476_v40 = vld [vmem:[#allocation2 + $0x38] sm:$0xff] }
 0xa9b   :  { %v4297_v63 = vpack.c.bf16 %v4295_v12, %v4294_v55  ;;  %v10602_v55 = vld [vmem:[#allocation7 + $0x30] sm:$0xff]  ;;  %v10601_v12 = vld [vmem:[#allocation7 + $0x28] sm:$0xff] }
 0xa9d   :  { %4378 = vmatmul.bf16.gmra.mxu3 %v4297_v63  ;;  %v10600_v63 = vld [vmem:[#allocation7 + $0x20] sm:$0xff] }
 0xa9e   :  { %4834 = vmatpush.bf16.msra.mxu3 %v10471_v48  ;;  %5905 = vmatpush.bf16.msrb.mxu1 %v9511_v0  ;;  %v10599_v48 = vld [vmem:[#allocation7 + $0x18] sm:$0xff] }
 0xaa2   :  { %4835 = vmatpush.bf16.msra.mxu3 %v10470_v37  ;;  %5906 = vmatpush.bf16.msrb.mxu1 %v9495_v33  ;;  %v10598_v37 = vld [vmem:[#allocation7 + $0x10] sm:$0xff] }
 0xaa6   :  { %4836 = vmatpush.bf16.msra.mxu3 %v10469_v59  ;;  %5907 = vmatpush.bf16.msrb.mxu1 %v9479_v62  ;;  %v10597_v59 = vld [vmem:[#allocation7 + $0x8] sm:$0xff] }
 0xaaa   :  { %4837 = vmatpush.bf16.msra.mxu3 %v10468_v15  ;;  %6380 = vmatpush.bf16.msra.mxu1 %v10603_v31  ;;  %v10596_v15 = vld [vmem:[#allocation7] sm:$0xff] }
 0xaae   :  { %6381 = vmatpush.bf16.msra.mxu1 %v10602_v55 }
 0xab2   :  { %6382 = vmatpush.bf16.msra.mxu1 %v10601_v12 }
 0xab6   :  { %6383 = vmatpush.bf16.msra.mxu1 %v10600_v63 }
 0xaba   :  { %6384 = vmatpush.bf16.msra.mxu1 %v10599_v48 }
 0xabe   :  { %6385 = vmatpush.bf16.msra.mxu1 %v10598_v37 }
 0xac2   :  { %6386 = vmatpush.bf16.msra.mxu1 %v10597_v59 }
 0xac6   :  { %6387 = vmatpush.bf16.msra.mxu1 %v10596_v15 }
 0xb10   :  { %v4374_v5 = vpop.f32.mrf.mxu3 }
 0xb11   :  { %v4375_v8 = vadd.f32 %v11546_v28, %v4374_v5  ;;  %v11547_v5 = vld [vmem:[#allocation9] ss:$0 sm:$0xff] }
 0xb13   :  { %v4384_v42 = vmax.f32 %v4375_v8, 0.0 }
 0xb18   :  { %v4376_v25 = vpop.f32.mrf.mxu3 }
 0xb19   :  { %v4377_v16 = vadd.f32 %v11546_v28, %v4376_v25 }
 0xb1b   :  { %v4385_v49 = vmax.f32 %v4377_v16, 0.0 }
 0xb1d   :  { %v4388_v57 = vpack.c.bf16 %v4385_v49, %v4384_v42 }
 0xb1f   :  { %4465 = vmatmul.bf16.vlgmr.msrb.gmra.mxu2 %v4388_v57  ;;  %v10634_v57 = vld [vmem:[#allocation2 + $0x70] sm:$0xff] }
 0xb20   :  { %4891 = vmatpush.bf16.msrb.mxu2 %v10483_v56  ;;  %v4379_v34 = vpop.f32.mrf.mxu3 }
 0xb21   :  { %v4380_v45 = vadd.f32 %v11546_v28, %v4379_v34 }
 0xb23   :  { %v4386_v26 = vmax.f32 %v4380_v45, 0.0 }
 0xb24   :  { %4892 = vmatpush.bf16.msrb.mxu2 %v10482_v29  ;;  %v10629_v29 = vld [vmem:[#allocation2 + $0x58] sm:$0xff] }
 0xb28   :  { %4893 = vmatpush.bf16.msrb.mxu2 %v10481_v39  ;;  %v4381_v6 = vpop.f32.mrf.mxu3 }
 0xb29   :  { %v4382_v60 = vadd.f32 %v11546_v28, %v4381_v6 }
 0xb2b   :  { %v4387_v21 = vmax.f32 %v4382_v60, 0.0 }
 0xb2c   :  { %4894 = vmatpush.bf16.msrb.mxu2 %v10480_v53 }
 0xb2d   :  { %v4389_v19 = vpack.c.bf16 %v4387_v21, %v4386_v26 }
 0xb2f   :  { %4470 = vmatmul.bf16.gmra.mxu2 %v4389_v19 }
 0xb30   :  { %4895 = vmatpush.bf16.msrb.mxu2 %v10479_v20 }
 0xb34   :  { %4896 = vmatpush.bf16.msrb.mxu2 %v10478_v36 }
 0xb38   :  { %4897 = vmatpush.bf16.msrb.mxu2 %v10477_v13 }
 0xb3c   :  { %4898 = vmatpush.bf16.msrb.mxu2 %v10476_v40 }
 0xba2   :  { %v4466_v28 = vpop.f32.mrf.mxu2 }
 0xba3   :  { %v4467_v8 = vadd.f32 %v11547_v5, %v4466_v28 }
 0xba5   :  { %v15359_v25 = vadd.f32 %v4467_v8, %v15168_v32 }
 0xba7   :  { %4480 = vadd.xlane.f32.xlu0 %v15359_v25 }
 0xbaa   :  { %v4468_v16 = vpop.f32.mrf.mxu2 }
 0xbab   :  { %v4469_v42 = vadd.f32 %v11547_v5, %v4468_v16 }
 0xbad   :  { %v15363_v49 = vadd.f32 %v4469_v42, %v15203_v11  ;;  %v10633_v11 = vld [vmem:[#allocation2 + $0x90] sm:$0xff] }
 0xbaf   :  { %4482 = vadd.xlane.f32.xlu0 %v15363_v49  ;;  %v15368_v14 = vpack.c.bf16 %v15363_v49, %v15359_v25 }
 0xbb1   :  { %5908 = vmatmul.bf16.vlgmr.msrb.gmra.mxu1 %v15368_v14 }
 0xbb2   :  { %6814 = vmatpush.bf16.msrb.mxu1 %v10635_v46  ;;  %v4471_v4 = vpop.f32.mrf.mxu2 }
 0xbb3   :  { %v4472_v32 = vadd.f32 %v11547_v5, %v4471_v4 }
 0xbb5   :  { %v15372_v41 = vadd.f32 %v4472_v32, %v15214_v38  ;;  %v10631_v38 = vld [vmem:[#allocation2 + $0xc8] sm:$0xff] }
 0xbb6   :  { %6815 = vmatpush.bf16.msrb.mxu1 %v10634_v57 }
 0xbb7   :  { %4484 = vadd.xlane.f32.xlu0 %v15372_v41 }
 0xbba   :  { %6816 = vmatpush.bf16.msrb.mxu1 %v10633_v11  ;;  %v4473_v30 = vpop.f32.mrf.mxu2 }
 0xbbb   :  { %v4474_v56 = vadd.f32 %v11547_v5, %v4473_v30  ;;  %v11928_v30 = vld [vmem:[%s16789_s8] ss:$0 sm:$0xff] }
 0xbbd   :  { %v15376_v34 = vadd.f32 %v4474_v56, %v15218_v52 }
 0xbbe   :  { %6817 = vmatpush.bf16.msrb.mxu1 %v10632_v58 }
 0xbbf   :  { %4486 = vadd.xlane.f32.xlu0 %v15376_v34  ;;  %v15381_v9 = vpack.c.bf16 %v15376_v34, %v15372_v41 }
 0xbc1   :  { %5913 = vmatmul.bf16.gmra.mxu1 %v15381_v9 }
 0xbc2   :  { %6818 = vmatpush.bf16.msrb.mxu1 %v10631_v38 }
 0xbc6   :  { %6819 = vmatpush.bf16.msrb.mxu1 %v10630_v10 }
 0xbca   :  { %6820 = vmatpush.bf16.msrb.mxu1 %v10629_v29 }
 0xbce   :  { %6821 = vmatpush.bf16.msrb.mxu1 %v10628_v51 }
 0xc1a   :  { %v4481_v24 = vpop.xlane.xlu0 %4480 }
 0xc1b   :  { %v4488_v52 = vmul.f32 %v4481_v24, %v12207_v17  ;;  %v11929_v24 = vld [vmem:[%s16790_s9] ss:$0 sm:$0xff] }
 0xc1d   :  { %v4492_v61 = vsub.f32 %v15359_v25, %v4488_v52 }
 0xc1f   :  { %v4496_v39 = vmul.f32 %v4492_v61, %v4492_v61 }
 0xc21   :  { %4500 = vadd.xlane.f32.xlu0 %v4496_v39 }
 0xc22   :  { %v4483_v45 = vpop.xlane.xlu0 %4482 }
 0xc23   :  { %v4489_v1 = vmul.f32 %v4483_v45, %v12207_v17 }
 0xc25   :  { %v4493_v6 = vsub.f32 %v15363_v49, %v4489_v1 }
 0xc27   :  { %v4497_v22 = vmul.f32 %v4493_v6, %v4493_v6 }
 0xc29   :  { %4502 = vadd.xlane.f32.xlu0 %v4497_v22 }
 0xc2a   :  { %v4485_v44 = vpop.xlane.xlu0 %4484 }
 0xc2b   :  { %v4490_v60 = vmul.f32 %v4485_v44, %v12207_v17  ;;  %v10491_v44 = vld [vmem:[#allocation2 + $0x98] sm:$0xff] }
 0xc2d   :  { %v15390_v53 = vsub.f32 %v15372_v41, %v4490_v60 }
 0xc2f   :  { %v4498_v26 = vmul.f32 %v15390_v53, %v15390_v53 }
 0xc31   :  { %4504 = vadd.xlane.f32.xlu0 %v4498_v26 }
 0xc32   :  { %v4487_v21 = vpop.xlane.xlu0 %4486 }
 0xc33   :  { %v4491_v7 = vmul.f32 %v4487_v21, %v12207_v17  ;;  %v10490_v21 = vld [vmem:[#allocation2 + $0x20] sm:$0xff] }
 0xc35   :  { %v15396_v3 = vsub.f32 %v15376_v34, %v4491_v7 }
 0xc37   :  { %v4499_v54 = vmul.f32 %v15396_v3, %v15396_v3 }
 0xc39   :  { %4506 = vadd.xlane.f32.xlu0 %v4499_v54 }
 0xc94   :  { %v4501_v19 = vpop.xlane.xlu0 %4500 }
 0xc95   :  { %v4508_v20 = vmul.f32 %v4501_v19, %v12207_v17 }
 0xc97   :  { %v4512_v0 = vadd.f32 1e-05, %v4508_v20  ;;  %v10489_v20 = vld [vmem:[#allocation2 + $0xf8] sm:$0xff] }
 0xc99   :  { %11758 = vrsqrt.f32 %v4512_v0  ;;  %vm4522_vm10 = vweird.f32 %v4512_v0 }
 0xc9c   :  { %v4503_v47 = vpop.xlane.xlu0 %4502 }
 0xc9d   :  { %v4509_v23 = vmul.f32 %v4503_v47, %v12207_v17 }
 0xc9f   :  { %v11759_v36 = vpop.eup %11758  ;;  %v4513_v33 = vadd.f32 1e-05, %v4509_v23 }
 0xca0   :  { %v4517_v18 = vmul.f32 %v11759_v36, %v4512_v0  ;;  %vm4523_vm9 = vweird.f32 %v11759_v36 }
 0xca1   :  { %11760 = vrsqrt.f32 %v4513_v33  ;;  %vm4524_vm11 = vmor %vm4522_vm10, %vm4523_vm9  ;;  %vm4532_vm13 = vweird.f32 %v4513_v33 }
 0xca2   :  { %v4518_v35 = vmul.f32 %v11759_v36, %v4517_v18 }
 0xca4   :  { %v4519_v13 = vmul.f32 0.5, %v4518_v35  ;;  %v4505_v62 = vpop.xlane.xlu0 %4504 }
 0xca5   :  { %v4510_v31 = vmul.f32 %v4505_v62, %v12207_v17  ;;  %v10485_v62 = vld [vmem:[#allocation2 + $0xd0] sm:$0xff] }
 0xca6   :  { %v4520_v40 = vsub.f32 1.5, %v4519_v13  ;;  %v10487_v13 = vld [vmem:[#allocation2 + $0x28] sm:$0xff] }
 0xca7   :  { %v11761_v55 = vpop.eup %11760  ;;  %v4514_v12 = vadd.f32 1e-05, %v4510_v31  ;;  %v10484_v31 = vld [vmem:[#allocation2 + $0xa8] sm:$0xff] }
 0xca8   :  { %v4521_v63 = vmul.f32 %v11759_v36, %v4520_v40  ;;  %v4527_v48 = vmul.f32 %v11761_v55, %v4513_v33  ;;  %vm4533_vm12 = vweird.f32 %v11761_v55  ;;  %v10555_v40 = vld [vmem:[%s16791_s10 + $0xf4] sm:$0xf0] }
 0xca9   :  { %11762 = vrsqrt.f32 %v4514_v12  ;;  %vm4534_vm14 = vmor %vm4532_vm13, %vm4533_vm12  ;;  %vm4542_vm0 = vweird.f32 %v4514_v12 }
 0xcaa   :  { %v4528_v37 = vmul.f32 %v11761_v55, %v4527_v48  ;;  %v4525_v59 = vsel %vm4524_vm11, %v11759_v36, %v4521_v63  ;;  %v10488_v36 = vld [vmem:[#allocation2 + $0xa0] sm:$0xff] }
 0xcab   :  { %v4556_v42 = vmul.f32 %v4525_v59, %v4492_v61  ;;  %v11930_v63 = vld [vmem:[%s16788_s7] ss:$0 sm:$0xff]  ;;  %v10499_v59 = vld [vmem:[#allocation3 + $0xa8] sm:$0xff] }
 0xcac   :  { %v4529_v15 = vmul.f32 0.5, %v4528_v37  ;;  %v4507_v5 = vpop.xlane.xlu0 %4506 }
 0xcad   :  { %v4511_v28 = vmul.f32 %v4507_v5, %v12207_v17  ;;  %v4560_v56 = vmul.f32 %v11928_v30, %v4556_v42  ;;  %v10498_v5 = vld [vmem:[#allocation3 + $0x58] sm:$0xff]  ;;  %v10507_v42 = vld [vmem:[#allocation3 + $0x68] sm:$0xff] }
 0xcae   :  { %v4530_v8 = vsub.f32 1.5, %v4529_v15 }
 0xcaf   :  { %v11763_v16 = vpop.eup %11762  ;;  %v4515_v46 = vadd.f32 1e-05, %v4511_v28  ;;  %v4564_v52 = vadd.f32 %v11929_v24, %v4560_v56  ;;  %v10505_v56 = vld [vmem:[#allocation3 + $0x60] sm:$0xff] }
 0xcb0   :  { %v4531_v4 = vmul.f32 %v11761_v55, %v4530_v8  ;;  %v4537_v32 = vmul.f32 %v11763_v16, %v4514_v12  ;;  %vm4543_vm15 = vweird.f32 %v11763_v16 }
 0xcb1   :  { %11764 = vrsqrt.f32 %v4515_v46  ;;  %vm4544_vm1 = vmor %vm4542_vm0, %vm4543_vm15  ;;  %vm4552_vm3 = vweird.f32 %v4515_v46 }
 0xcb2   :  { %v4535_v57 = vsel %vm4534_vm14, %v11761_v55, %v4531_v4  ;;  %v4538_v11 = vmul.f32 %v11763_v16, %v4537_v32  ;;  %v10496_v4 = vld [vmem:[#allocation3 + $0x8] sm:$0xff]  ;;  %v10506_v32 = vld [vmem:[#allocation3 + $0x18] sm:$0xff] }
 0xcb3   :  { %v4557_v58 = vmul.f32 %v4535_v57, %v4493_v6 }
 0xcb4   :  { %v4539_v38 = vmul.f32 0.5, %v4538_v11 }
 0xcb5   :  { %v4561_v10 = vmul.f32 %v11928_v30, %v4557_v58 }
 0xcb6   :  { %v4540_v29 = vsub.f32 1.5, %v4539_v38  ;;  %v10494_v38 = vld [vmem:[#allocation3 + $0xe8] sm:$0xff] }
 0xcb7   :  { %v11765_v51 = vpop.eup %11764  ;;  %v4565_v61 = vadd.f32 %v11929_v24, %v4561_v10  ;;  %v10504_v10 = vld [vmem:[#allocation3 + $0xe0] sm:$0xff] }
 0xcb8   :  { %v4541_v39 = vmul.f32 %v11763_v16, %v4540_v29  ;;  %v4547_v45 = vmul.f32 %v11765_v51, %v4515_v46  ;;  %vm4553_vm2 = vweird.f32 %v11765_v51 }
 0xcb9   :  { %v4568_v1 = vpack.c.bf16 %v4565_v61, %v4564_v52  ;;  %vm4554_vm4 = vmor %vm4552_vm3, %vm4553_vm2  ;;  %v10503_v52 = vld [vmem:[#allocation3 + $0x40] sm:$0xff] }
 0xcba   :  { %v4548_v22 = vmul.f32 %v11765_v51, %v4547_v45  ;;  %v4545_v6 = vsel %vm4544_vm1, %v11763_v16, %v4541_v39  ;;  %v10497_v16 = vld [vmem:[#allocation3 + $0x90] sm:$0xff]  ;;  %v10492_v61 = vld [vmem:[#allocation3 + $0x80] sm:$0xff]  ;;  %v10502_v39 = vld [vmem:[#allocation3 + $0x38] sm:$0xff] }
 0xcbb   :  { %4642 = vmatmul.bf16.vlgmr.msrb.gmra.mxu3 %v4568_v1  ;;  %v4558_v7 = vmul.f32 %v4545_v6, %v15390_v53  ;;  %v10486_v53 = vld [vmem:[#allocation2 + $0x10] sm:$0xff]  ;;  %v10551_v6 = vld [vmem:[%s16791_s10 + $0xd4] sm:$0xf0] }
 0xcbc   :  { %v4549_v60 = vmul.f32 0.5, %v4548_v22  ;;  %4952 = vmatpush.bf16.msrb.mxu3 %v10491_v44  ;;  %v10515_v45 = vld [vmem:[#allocation3 + $0xf0] sm:$0xff]  ;;  %v10514_v22 = vld [vmem:[#allocation3 + $0x20] sm:$0xff]  ;;  %v9446_v44 = vld [vmem:[%s16791_s10 + $0xc8] sm:$0xf] }
 0xcbd   :  { %v4562_v47 = vmul.f32 %v11928_v30, %v4558_v7  ;;  %v10501_v1 = vld [vmem:[#allocation3 + $0xb0] sm:$0xff]  ;;  %v10523_v7 = vld [vmem:[#allocation3 + $0x98] sm:$0xff] }
 0xcbe   :  { %v4550_v26 = vsub.f32 1.5, %v4549_v60  ;;  %v10500_v60 = vld [vmem:[#allocation3 + $0xd0] sm:$0xff] }
 0xcbf   :  { %v4566_v33 = vadd.f32 %v11929_v24, %v4562_v47  ;;  %v10510_v47 = vld [vmem:[#allocation3 + $0x50] sm:$0xff] }
 0xcc0   :  { %v4551_v54 = vmul.f32 %v11765_v51, %v4550_v26  ;;  %4953 = vmatpush.bf16.msrb.mxu3 %v10490_v21  ;;  %v9447_v26 = vor.u32 %v10551_v6, %v9446_v44  ;;  %v10513_v21 = vld [vmem:[#allocation3 + $0x30] sm:$0xff] }
 0xcc2   :  { %v4555_v19 = vsel %vm4554_vm4, %v11765_v51, %v4551_v54  ;;  %v10512_v54 = vld [vmem:[#allocation3 + $0xd8] sm:$0xff] }
 0xcc3   :  { %v4559_v0 = vmul.f32 %v4555_v19, %v15396_v3  ;;  %v9462_v3 = vld [vmem:[%s16791_s10 + $0xe8] sm:$0xf] }
 0xcc4   :  { %4954 = vmatpush.bf16.msrb.mxu3 %v10489_v20  ;;  %v9463_v55 = vor.u32 %v10555_v40, %v9462_v3  ;;  %v10522_v19 = vld [vmem:[#allocation3 + $0x28] sm:$0xff]  ;;  %v10511_v20 = vld [vmem:[#allocation3 + $0xa0] sm:$0xff] }
 0xcc5   :  { %v4563_v23 = vmul.f32 %v11928_v30, %v4559_v0  ;;  %v10495_v30 = vld [vmem:[#allocation3 + $0x78] sm:$0xff]  ;;  %v10521_v0 = vld [vmem:[#allocation3] sm:$0xff] }
 0xcc6   :  { %5881 = vmatpush.bf16.msrb.mxu0 %v9463_v55 }
 0xcc7   :  { %v4567_v18 = vadd.f32 %v11929_v24, %v4563_v23  ;;  %v10493_v24 = vld [vmem:[#allocation3 + $0xc8] sm:$0xff]  ;;  %v10520_v23 = vld [vmem:[#allocation3 + $0xb8] sm:$0xff] }
 0xcc8   :  { %4955 = vmatpush.bf16.msrb.mxu3 %v10488_v36  ;;  %v10509_v36 = vld [vmem:[#allocation3 + $0x70] sm:$0xff] }
 0xcc9   :  { %v4569_v35 = vpack.c.bf16 %v4567_v18, %v4566_v33  ;;  %v10519_v33 = vld [vmem:[#allocation3 + $0xc0] sm:$0xff]  ;;  %v10508_v18 = vld [vmem:[#allocation3 + $0x10] sm:$0xff] }
 0xcca   :  { %5882 = vmatpush.bf16.msrb.mxu0 %v9447_v26 }
 0xccb   :  { %4647 = vmatmul.bf16.gmra.mxu3 %v4569_v35  ;;  %v10518_v35 = vld [vmem:[#allocation3 + $0xf8] sm:$0xff] }
 0xccc   :  { %4956 = vmatpush.bf16.msrb.mxu3 %v10487_v13  ;;  %v10517_v13 = vld [vmem:[#allocation3 + $0x48] sm:$0xff] }
 0xcd0   :  { %4957 = vmatpush.bf16.msrb.mxu3 %v10486_v53  ;;  %v10516_v53 = vld [vmem:[#allocation3 + $0x88] sm:$0xff] }
 0xcd4   :  { %4958 = vmatpush.bf16.msrb.mxu3 %v10485_v62  ;;  %v9430_v62 = vld [vmem:[%s16791_s10 + $0xa8] sm:$0xf] }
 0xcd8   :  { %4959 = vmatpush.bf16.msrb.mxu3 %v10484_v31  ;;  %v10547_v31 = vld [vmem:[%s16791_s10 + $0xb4] sm:$0xf0] }
 0xcd9   :  { %v9431_v3 = vor.u32 %v10547_v31, %v9430_v62 }
 0xcdb   :  { %5883 = vmatpush.bf16.msrb.mxu0 %v9431_v3 }
 0xd3e   :  { %v4643_v12 = vpop.f32.mrf.mxu3 }
 0xd3f   :  { %v4644_v48 = vadd.f32 %v11930_v63, %v4643_v12 }
 0xd41   :  { %v4653_v37 = vpack.c.bf16 %v4644_v48, %v4644_v48 }
 0xd43   :  { %4777 = vmatmul.bf16.vlgmr.msra.gmra.mxu2 %v4653_v37 }
 0xd44   :  { %5221 = vmatpush.bf16.msra.mxu2 %v10499_v59 }
 0xd46   :  { %v4645_v15 = vpop.f32.mrf.mxu3 }
 0xd47   :  { %v4646_v28 = vadd.f32 %v11930_v63, %v4645_v15 }
 0xd48   :  { %5222 = vmatpush.bf16.msra.mxu2 %v10498_v5 }
 0xd49   :  { %v4654_v8 = vpack.c.bf16 %v4646_v28, %v4646_v28 }
 0xd4b   :  { %4838 = vmatmul.bf16.vlgmr.msra.gmra.mxu3 %v4654_v8 }
 0xd4c   :  { %5223 = vmatpush.bf16.msra.mxu2 %v10497_v16  ;;  %5282 = vmatpush.bf16.msra.mxu3 %v10507_v42 }
 0xd4e   :  { %v4648_v46 = vpop.f32.mrf.mxu3 }
 0xd4f   :  { %v4649_v57 = vadd.f32 %v11930_v63, %v4648_v46 }
 0xd50   :  { %5224 = vmatpush.bf16.msra.mxu2 %v10496_v4  ;;  %5283 = vmatpush.bf16.msra.mxu3 %v10506_v32 }
 0xd51   :  { %v4655_v11 = vpack.c.bf16 %v4649_v57, %v4649_v57 }
 0xd53   :  { %4899 = vmatmul.bf16.vlgmr.msrb.gmra.mxu2 %v4655_v11 }
 0xd54   :  { %5225 = vmatpush.bf16.msra.mxu2 %v10495_v30  ;;  %5284 = vmatpush.bf16.msra.mxu3 %v10505_v56 }
 0xd56   :  { %v4650_v58 = vpop.f32.mrf.mxu3 }
 0xd57   :  { %v4651_v29 = vadd.f32 %v11930_v63, %v4650_v58 }
 0xd58   :  { %5226 = vmatpush.bf16.msra.mxu2 %v10494_v38  ;;  %5285 = vmatpush.bf16.msra.mxu3 %v10504_v10 }
 0xd59   :  { %v4656_v51 = vpack.c.bf16 %v4651_v29, %v4651_v29 }
 0xd5b   :  { %4960 = vmatmul.bf16.vlgmr.msrb.gmra.mxu3 %v4656_v51 }
 0xd5c   :  { %5227 = vmatpush.bf16.msra.mxu2 %v10493_v24  ;;  %5286 = vmatpush.bf16.msra.mxu3 %v10503_v52 }
 0xd60   :  { %5228 = vmatpush.bf16.msra.mxu2 %v10492_v61  ;;  %5287 = vmatpush.bf16.msra.mxu3 %v10502_v39 }
 0xd64   :  { %5343 = vmatpush.bf16.msrb.mxu2 %v10515_v45  ;;  %5288 = vmatpush.bf16.msra.mxu3 %v10501_v1 }
 0xd68   :  { %5344 = vmatpush.bf16.msrb.mxu2 %v10514_v22  ;;  %5289 = vmatpush.bf16.msra.mxu3 %v10500_v60 }
 0xd6c   :  { %5345 = vmatpush.bf16.msrb.mxu2 %v10513_v21  ;;  %5404 = vmatpush.bf16.msrb.mxu3 %v10523_v7 }
 0xd70   :  { %5346 = vmatpush.bf16.msrb.mxu2 %v10512_v54  ;;  %5405 = vmatpush.bf16.msrb.mxu3 %v10522_v19 }
 0xd74   :  { %5347 = vmatpush.bf16.msrb.mxu2 %v10511_v20  ;;  %5406 = vmatpush.bf16.msrb.mxu3 %v10521_v0 }
 0xd78   :  { %5348 = vmatpush.bf16.msrb.mxu2 %v10510_v47  ;;  %5407 = vmatpush.bf16.msrb.mxu3 %v10520_v23 }
 0xd7c   :  { %5349 = vmatpush.bf16.msrb.mxu2 %v10509_v36  ;;  %5408 = vmatpush.bf16.msrb.mxu3 %v10519_v33 }
 0xd80   :  { %5350 = vmatpush.bf16.msrb.mxu2 %v10508_v18  ;;  %5409 = vmatpush.bf16.msrb.mxu3 %v10518_v35 }
 0xd84   :  { %5410 = vmatpush.bf16.msrb.mxu3 %v10517_v13 }
 0xd88   :  { %5411 = vmatpush.bf16.msrb.mxu3 %v10516_v53 }
 0xdc6   :  { %v4778_v40 = vpop.f32.mrf.mxu2 }
 0xdc7   :  { %v4965_v55 = vrot.slane %v4778_v40, 4 }
 0xdc9   :  { %v4966_v12 = vmax.f32 %v4778_v40, %v4965_v55  ;;  %v10543_v55 = vld [vmem:[%s16791_s10 + $0x94] sm:$0xf0] }
 0xdcb   :  { %v4967_v63 = vrot.slane %v4966_v12, 2 }
 0xdcd   :  { %v4968_v48 = vmax.f32 %v4966_v12, %v4967_v63 }
 0xdce   :  { %v4780_v37 = vpop.f32.mrf.mxu2  ;;  %v4839_v59 = vpop.f32.mrf.mxu3 }
 0xdcf   :  { %v4969_v15 = vrot.slane %v4968_v48, 1  ;;  %v4971_v5 = vrot.slane %v4839_v59, 4  ;;  %v9398_v37 = vld [vmem:[%s16791_s10 + $0x68] sm:$0xf] }
 0xdd1   :  { %v4970_v28 = vmax.f32 %v4968_v48, %v4969_v15  ;;  %v4972_v8 = vmax.f32 %v4839_v59, %v4971_v5 }
 0xdd3   :  { %v4989_v16 = vsub.f32 %v4778_v40, %v4970_v28  ;;  %v4973_v42 = vrot.slane %v4972_v8, 2  ;;  %v9414_v40 = vld [vmem:[%s16791_s10 + $0x88] sm:$0xf] }
 0xdd4   :  { %v9415_v48 = vor.u32 %v10543_v55, %v9414_v40 }
 0xdd5   :  { %v4993_v46 = vmul.f32 1.442695, %v4989_v16  ;;  %v4974_v4 = vmax.f32 %v4972_v8, %v4973_v42 }
 0xdd6   :  { %v4841_v32 = vpop.f32.mrf.mxu3  ;;  %v4900_v57 = vpop.f32.mrf.mxu2  ;;  %5884 = vmatpush.bf16.msrb.mxu0 %v9415_v48 }
 0xdd7   :  { %11766 = vpow2.f32 %v4993_v46  ;;  %v4975_v11 = vrot.slane %v4974_v4, 1  ;;  %v4977_v30 = vrot.slane %v4900_v57, 4 }
 0xdd9   :  { %v4976_v56 = vmax.f32 %v4974_v4, %v4975_v11  ;;  %v4978_v58 = vmax.f32 %v4900_v57, %v4977_v30 }
 0xddb   :  { %v4990_v38 = vsub.f32 %v4839_v59, %v4976_v56  ;;  %v4979_v10 = vrot.slane %v4978_v58, 2  ;;  %v10539_v59 = vld [vmem:[%s16791_s10 + $0x74] sm:$0xf0] }
 0xddc   :  { %v9399_v8 = vor.u32 %v10539_v59, %v9398_v37 }
 0xddd   :  { %v11767_v29 = vpop.eup %11766  ;;  %v4995_v51 = vmul.f32 1.442695, %v4990_v38  ;;  %v4980_v24 = vmax.f32 %v4978_v58, %v4979_v10 }
 0xdde   :  { %v4902_v52 = vpop.f32.mrf.mxu2  ;;  %v4961_v61 = vpop.f32.mrf.mxu3  ;;  %v5001_v39 = vrot.slane %v11767_v29, 4  ;;  %5885 = vmatpush.bf16.msrb.mxu0 %v9399_v8  ;;  %v9582_v8 = vld [vmem:[%s16791_s10 + $0x1e0] sm:$0xf] }
 0xddf   :  { %11768 = vpow2.f32 %v4995_v51  ;;  %v4981_v45 = vrot.slane %v4980_v24, 1  ;;  %v4983_v1 = vrot.slane %v4961_v61, 4 }
 0xde0   :  { %v5002_v22 = vadd.f32 %v11767_v29, %v5001_v39 }
 0xde1   :  { %v4982_v44 = vmax.f32 %v4980_v24, %v4981_v45  ;;  %v4984_v6 = vmax.f32 %v4961_v61, %v4983_v1 }
 0xde2   :  { %v5003_v60 = vrot.slane %v5002_v22, 2 }
 0xde3   :  { %v4991_v26 = vsub.f32 %v4900_v57, %v4982_v44  ;;  %v4985_v21 = vrot.slane %v4984_v6, 2 }
 0xde4   :  { %v5004_v7 = vadd.f32 %v5003_v60, %v5002_v22 }
 0xde5   :  { %v11769_v54 = vpop.eup %11768  ;;  %v4997_v19 = vmul.f32 1.442695, %v4991_v26  ;;  %v4986_v20 = vmax.f32 %v4984_v6, %v4985_v21 }
 0xde6   :  { %v4963_v0 = vpop.f32.mrf.mxu3  ;;  %v5005_v47 = vrot.slane %v5004_v7, 1  ;;  %v5007_v23 = vrot.slane %v11769_v54, 4 }
 0xde7   :  { %11770 = vpow2.f32 %v4997_v19  ;;  %v4987_v36 = vrot.slane %v4986_v20, 1  ;;  %v9382_v0 = vld [vmem:[%s16791_s10 + $0x48] sm:$0xf] }
 0xde8   :  { %v5006_v33 = vadd.f32 %v5005_v47, %v5004_v7  ;;  %v5008_v18 = vadd.f32 %v11769_v54, %v5007_v23  ;;  %v10535_v47 = vld [vmem:[%s16791_s10 + $0x54] sm:$0xf0] }
 0xde9   :  { %v4988_v35 = vmax.f32 %v4986_v20, %v4987_v36  ;;  %v9383_v36 = vor.u32 %v10535_v47, %v9382_v0  ;;  %v10574_v0 = vld [vmem:[%s16791_s10 + $0x18c] sm:$0xf0] }
 0xdea   :  { %11772 = vrcp.f32 %v5006_v33  ;;  %v5009_v13 = vrot.slane %v5008_v18, 2 }
 0xdeb   :  { %v4992_v53 = vsub.f32 %v4961_v61, %v4988_v35  ;;  %5886 = vmatpush.bf16.msrb.mxu0 %v9383_v36 }
 0xdec   :  { %v5010_v62 = vadd.f32 %v5009_v13, %v5008_v18 }
 0xded   :  { %v11771_v31 = vpop.eup %11770  ;;  %v4999_v3 = vmul.f32 1.442695, %v4992_v53 }
 0xdee   :  { %v5011_v12 = vrot.slane %v5010_v62, 1  ;;  %v5013_v63 = vrot.slane %v11771_v31, 4 }
 0xdef   :  { %11774 = vpow2.f32 %v4999_v3 }
 0xdf0   :  { %v11773_v15 = vpop.eup %11772  ;;  %v5012_v5 = vadd.f32 %v5011_v12, %v5010_v62  ;;  %v5014_v28 = vadd.f32 %v11771_v31, %v5013_v63 }
 0xdf1   :  { %v5029_v16 = vmul.f32 %v11773_v15, %v11767_v29 }
 0xdf2   :  { %11776 = vrcp.f32 %v5012_v5  ;;  %v5015_v42 = vrot.slane %v5014_v28, 2 }
 0xdf3   :  { %v5033_v46 = vadd.f32 1e-08, %v5029_v16  ;;  %v10586_v16 = vld [vmem:[%s16791_s10 + $0x1ec] sm:$0xf0] }
 0xdf4   :  { %v5016_v4 = vadd.f32 %v5015_v42, %v5014_v28 }
 0xdf5   :  { %v11775_v32 = vpop.eup %11774  ;;  %5037 = vadd.xlane.f32.xlu2 %v5033_v46 }
 0xdf6   :  { %v5017_v57 = vrot.slane %v5016_v4, 1  ;;  %v5019_v11 = vrot.slane %v11775_v32, 4 }
 0xdf8   :  { %v11777_v30 = vpop.eup %11776  ;;  %v5018_v56 = vadd.f32 %v5017_v57, %v5016_v4  ;;  %v5020_v58 = vadd.f32 %v11775_v32, %v5019_v11  ;;  %v9583_v57 = vor.u32 %v10586_v16, %v9582_v8  ;;  %v9568_v8 = vld [vmem:[%s16791_s10 + $0x1d0] sm:$0xf0] }
 0xdf9   :  { %v5030_v38 = vmul.f32 %v11777_v30, %v11769_v54 }
 0xdfa   :  { %11778 = vrcp.f32 %v5018_v56  ;;  %v5021_v10 = vrot.slane %v5020_v58, 2 }
 0xdfb   :  { %v5034_v51 = vadd.f32 1e-08, %v5030_v38  ;;  %v10582_v38 = vld [vmem:[%s16791_s10 + $0x1cc] sm:$0xf0] }
 0xdfc   :  { %v5022_v24 = vadd.f32 %v5021_v10, %v5020_v58  ;;  %v9566_v58 = vld [vmem:[%s16791_s10 + $0x1c0] sm:$0xf] }
 0xdfd   :  { %5039 = vadd.xlane.f32.xlu0 %v5034_v51 }
 0xdfe   :  { %v5023_v52 = vrot.slane %v5022_v24, 1 }
 0xe00   :  { %v11779_v29 = vpop.eup %11778  ;;  %v5024_v61 = vadd.f32 %v5023_v52, %v5022_v24  ;;  %v9567_v52 = vor.u32 %v10582_v38, %v9566_v58  ;;  %v10564_v38 = vld [vmem:[%s16791_s10 + $0x144] sm:$0xf] }
 0xe01   :  { %v5031_v39 = vmul.f32 %v11779_v29, %v11771_v31 }
 0xe02   :  { %11780 = vrcp.f32 %v5024_v61 }
 0xe03   :  { %v15445_v45 = vadd.f32 1e-08, %v5031_v39  ;;  %v9550_v39 = vld [vmem:[%s16791_s10 + $0x1a0] sm:$0xf] }
 0xe05   :  { %5041 = vadd.xlane.f32.xlu0 %v15445_v45 }
 0xe08   :  { %v11781_v1 = vpop.eup %11780 }
 0xe09   :  { %v5032_v22 = vmul.f32 %v11781_v1, %v11775_v32  ;;  %v10578_v1 = vld [vmem:[%s16791_s10 + $0x1ac] sm:$0xf0] }
 0xe0b   :  { %v15448_v44 = vadd.f32 1e-08, %v5032_v22 }
 0xe0d   :  { %5043 = vadd.xlane.f32.xlu1 %v15448_v44 }
 0xe68   :  { %v5038_v6 = vpop.xlane.xlu2 %5037 }
 0xe69   :  { %11782 = vrcp.f32 %v5038_v6  ;;  %v5056_v54 = vand.u32 2147483648, %v5038_v6  ;;  %v5054_v20 = vand.u32 2147483647, %v5038_v6  ;;  %vm5050_vm6 = vweird.f32 %v5038_v6 }
 0xe6b   :  { %v5057_v18 = vor.u32 1.1754944e-38, %v5056_v54  ;;  %vm5055_vm8 = vcmp.eq.f32.partialorder %v5054_v20, 8.507059e+37  ;;  %v9534_v20 = vld [vmem:[%s16791_s10 + $0x180] sm:$0xf] }
 0xe6f   :  { %v11783_v60 = vpop.eup %11782 }
 0xe70   :  { %v5046_v26 = vmul.f32 %v11783_v60, %v5038_v6  ;;  %v5040_v21 = vpop.xlane.xlu0 %5039  ;;  %vm5051_vm5 = vweird.f32 %v11783_v60 }
 0xe71   :  { %11784 = vrcp.f32 %v5040_v21  ;;  %vm5052_vm7 = vmor %vm5050_vm6, %vm5051_vm5  ;;  %v5070_v40 = vand.u32 2147483648, %v5040_v21  ;;  %v5068_v12 = vand.u32 2147483647, %v5040_v21  ;;  %vm5064_vm10 = vweird.f32 %v5040_v21 }
 0xe72   :  { %v5047_v7 = vsub.f32 1.0, %v5046_v26 }
 0xe73   :  { %v5071_v59 = vor.u32 1.1754944e-38, %v5070_v40  ;;  %vm5069_vm12 = vcmp.eq.f32.partialorder %v5068_v12, 8.507059e+37 }
 0xe74   :  { %v5048_v19 = vmul.f32 %v11783_v60, %v5047_v7 }
 0xe76   :  { %v5049_v23 = vadd.f32 %v11783_v60, %v5048_v19 }
 0xe77   :  { %v11785_v33 = vpop.eup %11784 }
 0xe78   :  { %v5053_v35 = vsel %vm5052_vm7, %v11783_v60, %v5049_v23  ;;  %v5060_v13 = vmul.f32 %v11785_v33, %v5040_v21  ;;  %v5042_v53 = vpop.xlane.xlu0 %5041  ;;  %vm5065_vm9 = vweird.f32 %v11785_v33  ;;  %v9551_v21 = vor.u32 %v10578_v1, %v9550_v39  ;;  %v9488_v39 = vld [vmem:[%s16791_s10 + $0x130] sm:$0xf0]  ;;  %v9454_v1 = vld [vmem:[%s16791_s10 + $0xe0] sm:$0xf] }
 0xe79   :  { %v5058_v62 = vsel %vm5055_vm8, %v5057_v18, %v5053_v35  ;;  %11786 = vrcp.f32 %v5042_v53  ;;  %vm5066_vm11 = vmor %vm5064_vm10, %vm5065_vm9  ;;  %v5084_v32 = vand.u32 2147483648, %v5042_v53  ;;  %v5082_v30 = vand.u32 2147483647, %v5042_v53  ;;  %v10570_v18 = vld [vmem:[%s16791_s10 + $0x16c] sm:$0xf0] }
 0xe7a   :  { %v5101_v31 = vmul.f32 %v5058_v62, %v5033_v46  ;;  %v5061_v3 = vsub.f32 1.0, %v5060_v13  ;;  %vm5078_vm14 = vweird.f32 %v5042_v53  ;;  %v9535_v23 = vor.u32 %v10574_v0, %v9534_v20  ;;  %v9592_v20 = vld [vmem:[%s16791_s10 + $0x1f8] sm:$0xf0] }
 0xe7b   :  { %vm5083_vm0 = vcmp.eq.f32.partialorder %v5082_v30, 8.507059e+37  ;;  %v10568_v30 = vld [vmem:[%s16791_s10 + $0x164] sm:$0xf] }
 0xe7c   :  { %v5062_v55 = vmul.f32 %v11785_v33, %v5061_v3  ;;  %v5105_v63 = vpack.c.bf16 %v5101_v31, %v5101_v31  ;;  %v9502_v31 = vld [vmem:[%s16791_s10 + $0x140] sm:$0xf]  ;;  %v10566_v3 = vld [vmem:[%s16791_s10 + $0x14c] sm:$0xf0] }
 0xe7d   :  { %v9503_v40 = vor.u32 %v10566_v3, %v9502_v31  ;;  %v9406_v31 = vld [vmem:[%s16791_s10 + $0x80] sm:$0xf]  ;;  %v10542_v3 = vld [vmem:[%s16791_s10 + $0x8c] sm:$0xf0] }
 0xe7e   :  { %v5063_v48 = vadd.f32 %v11785_v33, %v5062_v55  ;;  %5229 = vmatmul.bf16.vlgmr.msra.gmra.mxu2 %v5105_v63  ;;  %v9486_v55 = vld [vmem:[%s16791_s10 + $0x120] sm:$0xf] }
 0xe7f   :  { %v11787_v37 = vpop.eup %11786  ;;  %v9470_v63 = vld [vmem:[%s16791_s10 + $0x100] sm:$0xf] }
 0xe80   :  { %v5067_v15 = vsel %vm5066_vm11, %v11785_v33, %v5063_v48  ;;  %v5074_v5 = vmul.f32 %v11787_v37, %v5042_v53  ;;  %v5044_v28 = vpop.xlane.xlu1 %5043  ;;  %vm5079_vm13 = vweird.f32 %v11787_v37  ;;  %v9518_v33 = vld [vmem:[%s16791_s10 + $0x160] sm:$0xf]  ;;  %v10558_v48 = vld [vmem:[%s16791_s10 + $0x10c] sm:$0xf0] }
 0xe81   :  { %v5072_v42 = vsel %vm5069_vm12, %v5071_v59, %v5067_v15  ;;  %11788 = vrcp.f32 %v5044_v28  ;;  %vm5080_vm15 = vmor %vm5078_vm14, %vm5079_vm13  ;;  %v5098_v26 = vand.u32 2147483648, %v5044_v28  ;;  %v5096_v54 = vand.u32 2147483647, %v5044_v28  ;;  %v9584_v59 = vld [vmem:[%s16791_s10 + $0x1f0] sm:$0xf0] }
 0xe82   :  { %v5102_v46 = vmul.f32 %v5072_v42, %v5034_v51  ;;  %v5075_v4 = vsub.f32 1.0, %v5074_v5  ;;  %v5085_v51 = vor.u32 1.1754944e-38, %v5084_v32  ;;  %vm5092_vm2 = vweird.f32 %v5044_v28  ;;  %v10576_v42 = vld [vmem:[%s16791_s10 + $0x1a4] sm:$0xf] }
 0xe83   :  { %vm5097_vm4 = vcmp.eq.f32.partialorder %v5096_v54, 8.507059e+37  ;;  %v9519_v53 = vor.u32 %v10570_v18, %v9518_v33  ;;  %v9471_v15 = vor.u32 %v10558_v48, %v9470_v63  ;;  %v10572_v32 = vld [vmem:[%s16791_s10 + $0x184] sm:$0xf]  ;;  %v10550_v54 = vld [vmem:[%s16791_s10 + $0xcc] sm:$0xf0] }
 0xe84   :  { %v5076_v11 = vmul.f32 %v11787_v37, %v5075_v4  ;;  %v5106_v56 = vpack.c.bf16 %v5102_v46, %v5102_v46  ;;  %v9552_v46 = vld [vmem:[%s16791_s10 + $0x1b0] sm:$0xf0]  ;;  %v9422_v33 = vld [vmem:[%s16791_s10 + $0xa0] sm:$0xf]  ;;  %v10546_v18 = vld [vmem:[%s16791_s10 + $0xac] sm:$0xf0] }
 0xe85   :  { %v9555_v4 = vor.u32 %v10576_v42, %v9552_v46  ;;  %v9390_v63 = vld [vmem:[%s16791_s10 + $0x60] sm:$0xf]  ;;  %v10538_v48 = vld [vmem:[%s16791_s10 + $0x6c] sm:$0xf0]  ;;  %v10565_v46 = vld [vmem:[%s16791_s10 + $0x14c] sm:$0xf] }
 0xe86   :  { %v5077_v10 = vadd.f32 %v11787_v37, %v5076_v11  ;;  %5290 = vmatmul.bf16.vlgmr.msra.gmra.mxu3 %v5106_v56  ;;  %v9520_v56 = vld [vmem:[%s16791_s10 + $0x170] sm:$0xf0] }
 0xe87   :  { %v11789_v24 = vpop.eup %11788  ;;  %5824 = vmatpush.bf16.msra.mxu3 %v9583_v57  ;;  %v9536_v57 = vld [vmem:[%s16791_s10 + $0x190] sm:$0xf0]  ;;  %v9523_v58 = vor.u32 %v10568_v30, %v9520_v56  ;;  %v9358_v56 = vld [vmem:[%s16791_s10 + $0x20] sm:$0xf] }
 0xe88   :  { %v5081_v29 = vsel %vm5080_vm15, %v11787_v37, %v5077_v10  ;;  %v5088_v61 = vmul.f32 %v11789_v24, %v5044_v28  ;;  %vm5093_vm1 = vweird.f32 %v11789_v24  ;;  %v10584_v37 = vld [vmem:[%s16791_s10 + $0x1e4] sm:$0xf]  ;;  %v9539_v11 = vor.u32 %v10572_v32, %v9536_v57  ;;  %v9504_v10 = vld [vmem:[%s16791_s10 + $0x150] sm:$0xf0]  ;;  %v9350_v32 = vld [vmem:[%s16791_s10 + $0x8] sm:$0xf] }
 0xe89   :  { %v5086_v22 = vsel %vm5083_vm0, %v5085_v51, %v5081_v29  ;;  %vm5094_vm3 = vmor %vm5092_vm2, %vm5093_vm1  ;;  %v9587_v5 = vor.u32 %v10584_v37, %v9584_v59  ;;  %v10580_v28 = vld [vmem:[%s16791_s10 + $0x1c4] sm:$0xf]  ;;  %v10531_v51 = vld [vmem:[%s16791_s10 + $0x34] sm:$0xf0]  ;;  %v9507_v29 = vor.u32 %v10564_v38, %v9504_v10  ;;  %v9391_v37 = vor.u32 %v10538_v48, %v9390_v63 }
 0xe8a   :  { %v5103_v6 = vmul.f32 %v5086_v22, %v15445_v45  ;;  %v5089_v60 = vsub.f32 1.0, %v5088_v61  ;;  %v5099_v45 = vor.u32 1.1754944e-38, %v5098_v26  ;;  %v9571_v16 = vor.u32 %v10580_v28, %v9568_v8  ;;  %v10560_v61 = vld [vmem:[%s16791_s10 + $0x124] sm:$0xf]  ;;  %v10554_v22 = vld [vmem:[%s16791_s10 + $0xec] sm:$0xf0] }
 0xe8b   :  { %5825 = vmatpush.bf16.msra.mxu3 %v9567_v52  ;;  %v10556_v26 = vld [vmem:[%s16791_s10 + $0x104] sm:$0xf]  ;;  %v9374_v28 = vld [vmem:[%s16791_s10 + $0x40] sm:$0xf]  ;;  %v10534_v8 = vld [vmem:[%s16791_s10 + $0x4c] sm:$0xf0] }
 0xe8c   :  { %v5090_v7 = vmul.f32 %v11789_v24, %v5089_v60  ;;  %v5107_v19 = vpack.c.bf16 %v5103_v6, %v5103_v6  ;;  %v9455_v6 = vor.u32 %v10554_v22, %v9454_v1  ;;  %v9491_v60 = vor.u32 %v10560_v61, %v9488_v39  ;;  %v10527_v57 = vld [vmem:[%s16791_s10 + $0x14] sm:$0xf0]  ;;  %v10526_v61 = vld [vmem:[%s16791_s10 + $0xc] sm:$0xf0]  ;;  %v10552_v1 = vld [vmem:[%s16791_s10 + $0xe4] sm:$0xf] }
 0xe8d   :  { %v9351_v30 = vor.u32 %v10527_v57, %v9350_v32  ;;  %v9456_v22 = vld [vmem:[%s16791_s10 + $0xf0] sm:$0xf0]  ;;  %v10532_v48 = vld [vmem:[%s16791_s10 + $0x44] sm:$0xf] }
 0xe8e   :  { %v5091_v47 = vadd.f32 %v11789_v24, %v5090_v7  ;;  %5351 = vmatmul.bf16.vlgmr.msrb.gmra.mxu2 %v5107_v19  ;;  %v9438_v7 = vld [vmem:[%s16791_s10 + $0xc0] sm:$0xf]  ;;  %v10585_v19 = vld [vmem:[%s16791_s10 + $0x1ec] sm:$0xf]  ;;  %v10616_v63 = vld [vmem:[#allocation2 + $0x50] sm:$0xff] }
 0xe8f   :  { %5826 = vmatpush.bf16.msra.mxu3 %v9551_v21  ;;  %v9472_v21 = vld [vmem:[%s16791_s10 + $0x110] sm:$0xf0]  ;;  %5805 = vmatpush.bf16.msra.mxu2 %v9455_v6  ;;  %v9439_v0 = vor.u32 %v10550_v54, %v9438_v7  ;;  %v9459_v6 = vor.u32 %v10552_v1, %v9456_v22  ;;  %v10593_v7 = vld [vmem:[%s16795_s14 + $0x28] sm:$0xff]  ;;  %v10548_v54 = vld [vmem:[%s16791_s10 + $0xc4] sm:$0xf] }
 0xe90   :  { %v5095_v36 = vsel %vm5094_vm3, %v11789_v24, %v5091_v47  ;;  %v9366_v24 = vld [vmem:[%s16791_s10 + $0x28] sm:$0xf]  ;;  %v9475_v47 = vor.u32 %v10556_v26, %v9472_v21  ;;  %v10557_v26 = vld [vmem:[%s16791_s10 + $0x10c] sm:$0xf]  ;;  %v9480_v21 = vld [vmem:[%s16791_s10 + $0x118] sm:$0xf0] }
 0xe91   :  { %v5100_v35 = vsel %vm5097_vm4, %v5099_v45, %v5095_v36  ;;  %v9367_v52 = vor.u32 %v10531_v51, %v9366_v24  ;;  %v9595_v45 = vor.u32 %v10585_v19, %v9592_v20  ;;  %v9576_v36 = vld [vmem:[%s16791_s10 + $0x1d8] sm:$0xf0]  ;;  %v10561_v24 = vld [vmem:[%s16791_s10 + $0x12c] sm:$0xf]  ;;  %v9440_v19 = vld [vmem:[%s16791_s10 + $0xd0] sm:$0xf0] }
 0xe92   :  { %v5104_v13 = vmul.f32 %v5100_v35, %v15448_v44  ;;  %v10562_v44 = vld [vmem:[%s16791_s10 + $0x12c] sm:$0xf0]  ;;  %v9423_v35 = vor.u32 %v10546_v18, %v9422_v33  ;;  %v9496_v51 = vld [vmem:[%s16791_s10 + $0x138] sm:$0xf0]  ;;  %v9443_v20 = vor.u32 %v10548_v54, %v9440_v19  ;;  %v10613_v32 = vld [vmem:[#allocation2] sm:$0xff] }
 0xe93   :  { %5827 = vmatpush.bf16.msra.mxu3 %v9535_v23  ;;  %v9487_v12 = vor.u32 %v10562_v44, %v9486_v55  ;;  %5887 = vmatpush.bf16.msrb.mxu0 %v9367_v52  ;;  %v10581_v23 = vld [vmem:[%s16791_s10 + $0x1cc] sm:$0xf]  ;;  %v10594_v52 = vld [vmem:[%s16795_s14 + $0x30] sm:$0xff]  ;;  %v10591_v18 = vld [vmem:[%s16795_s14 + $0x18] sm:$0xff] }
 0xe94   :  { %v5108_v62 = vpack.c.bf16 %v5104_v13, %v5104_v13  ;;  %5806 = vmatpush.bf16.msra.mxu2 %v9439_v0  ;;  %v9579_v13 = vor.u32 %v10581_v23, %v9576_v36  ;;  %v10573_v44 = vld [vmem:[%s16791_s10 + $0x18c] sm:$0xf]  ;;  %v9483_v0 = vor.u32 %v10557_v26, %v9480_v21  ;;  %v9424_v23 = vld [vmem:[%s16791_s10 + $0xb0] sm:$0xf0]  ;;  %v9448_v1 = vld [vmem:[%s16791_s10 + $0xd8] sm:$0xf0] }
 0xe95   :  { %v10619_v36 = vld [vmem:[#allocation2 + $0x48] sm:$0xff]  ;;  %v10612_v57 = vld [vmem:[#allocation2 + $0xb0] sm:$0xff]  ;;  %v10627_v22 = vld [vmem:[#allocation2 + $0x78] sm:$0xff] }
 0xe96   :  { %5412 = vmatmul.bf16.vlgmr.msrb.gmra.mxu3 %v5108_v62  ;;  %v9560_v62 = vld [vmem:[%s16791_s10 + $0x1b8] sm:$0xf0]  ;;  %v10545_v26 = vld [vmem:[%s16791_s10 + $0xac] sm:$0xf] }
 0xe97   :  { %5828 = vmatpush.bf16.msra.mxu3 %v9519_v53  ;;  %v10577_v53 = vld [vmem:[%s16791_s10 + $0x1ac] sm:$0xf]  ;;  %5888 = vmatpush.bf16.msrb.mxu0 %v9351_v30  ;;  %v10650_v30 = vld [vmem:[#allocation3 + $0x58] sm:$0xff] }
 0xe98   :  { %5807 = vmatpush.bf16.msra.mxu2 %v9423_v35  ;;  %v9563_v55 = vor.u32 %v10577_v53, %v9560_v62  ;;  %v10618_v35 = vld [vmem:[#allocation2 + $0x30] sm:$0xff]  ;;  %v9432_v21 = vld [vmem:[%s16791_s10 + $0xb8] sm:$0xf0] }
 0xe99   :  { %v9408_v53 = vld [vmem:[%s16791_s10 + $0x90] sm:$0xf0] }
 0xe9b   :  { %5829 = vmatpush.bf16.msra.mxu3 %v9503_v40  ;;  %v9407_v40 = vor.u32 %v10542_v3, %v9406_v31  ;;  %v10590_v31 = vld [vmem:[%s16795_s14 + $0x10] sm:$0xff]  ;;  %v10536_v3 = vld [vmem:[%s16791_s10 + $0x64] sm:$0xf] }
 0xe9d   :  { %5808 = vmatpush.bf16.msra.mxu2 %v9407_v40  ;;  %v9392_v40 = vld [vmem:[%s16791_s10 + $0x70] sm:$0xf0] }
 0xe9f   :  { %5830 = vmatpush.bf16.msra.mxu3 %v9487_v12  ;;  %v9544_v12 = vld [vmem:[%s16791_s10 + $0x198] sm:$0xf0] }
 0xea0   :  { %v9547_v59 = vor.u32 %v10573_v44, %v9544_v12  ;;  %v9395_v44 = vor.u32 %v10536_v3, %v9392_v40  ;;  %v10589_v12 = vld [vmem:[%s16795_s14 + $0x8] sm:$0xff] }
 0xea1   :  { %5809 = vmatpush.bf16.msra.mxu2 %v9391_v37  ;;  %v9376_v37 = vld [vmem:[%s16791_s10 + $0x50] sm:$0xf0]  ;;  %v10533_v40 = vld [vmem:[%s16791_s10 + $0x4c] sm:$0xf] }
 0xea3   :  { %5831 = vmatpush.bf16.msra.mxu3 %v9471_v15  ;;  %v10569_v15 = vld [vmem:[%s16791_s10 + $0x16c] sm:$0xf] }
 0xea6   :  { %5832 = vmatmul.bf16.vlgmr.msra.gmra.mxu3 %v15368_v14 }
 0xea7   :  { %5862 = vmatpush.bf16.msrb.mxu3 %v9587_v5  ;;  %v9528_v5 = vld [vmem:[%s16791_s10 + $0x178] sm:$0xf0] }
 0xea8   :  { %v9531_v42 = vor.u32 %v10569_v15, %v9528_v5  ;;  %v10615_v15 = vld [vmem:[#allocation2 + $0x18] sm:$0xff]  ;;  %v10528_v5 = vld [vmem:[%s16791_s10 + $0x24] sm:$0xf] }
 0xeab   :  { %5863 = vmatpush.bf16.msrb.mxu3 %v9571_v16  ;;  %v9375_v16 = vor.u32 %v10534_v8, %v9374_v28  ;;  %v9360_v28 = vld [vmem:[%s16791_s10 + $0x30] sm:$0xf0] }
 0xeac   :  { %v9363_v8 = vor.u32 %v10528_v5, %v9360_v28  ;;  %v9352_v5 = vld [vmem:[%s16791_s10 + $0x18] sm:$0xf0]  ;;  %v10621_v28 = vld [vmem:[#allocation2 + $0x88] sm:$0xff] }
 0xead   :  { %5810 = vmatpush.bf16.msra.mxu2 %v9375_v16  ;;  %v10614_v16 = vld [vmem:[#allocation2 + $0xd8] sm:$0xff] }
 0xeaf   :  { %5864 = vmatpush.bf16.msrb.mxu3 %v9555_v4  ;;  %v9512_v4 = vld [vmem:[%s16791_s10 + $0x158] sm:$0xf0] }
 0xeb0   :  { %v9515_v10 = vor.u32 %v10565_v46, %v9512_v4  ;;  %v9344_v46 = vld [vmem:[%s16791_s10 + $0x10] sm:$0xf0] }
 0xeb3   :  { %5865 = vmatpush.bf16.msrb.mxu3 %v9539_v11  ;;  %v10595_v11 = vld [vmem:[%s16795_s14 + $0x38] sm:$0xff] }
 0xeb4   :  { %6291 = vmatpush.bf16.msra.mxu0 %v10595_v11  ;;  %v10651_v11 = vld [vmem:[#allocation3 + $0xa8] sm:$0xff] }
 0xeb6   :  { %5837 = vmatmul.bf16.gmra.mxu3 %v15381_v9 }
 0xeb7   :  { %5866 = vmatpush.bf16.msrb.mxu3 %v9523_v58  ;;  %v10530_v58 = vld [vmem:[%s16791_s10 + $0x2c] sm:$0xf0] }
 0xeb8   :  { %v9359_v38 = vor.u32 %v10530_v58, %v9358_v56  ;;  %6292 = vmatpush.bf16.msra.mxu0 %v10594_v52  ;;  %v10649_v58 = vld [vmem:[#allocation3 + $0x90] sm:$0xff]  ;;  %v10647_v52 = vld [vmem:[#allocation3 + $0x78] sm:$0xff] }
 0xeba   :  { %5811 = vmatpush.bf16.msra.mxu2 %v9359_v38  ;;  %v10648_v38 = vld [vmem:[#allocation3 + $0x8] sm:$0xff] }
 0xebb   :  { %5867 = vmatpush.bf16.msrb.mxu3 %v9507_v29  ;;  %v9342_v29 = vld [vmem:[%s16791_s10] sm:$0xf] }
 0xebc   :  { %v9343_v39 = vor.u32 %v10526_v61, %v9342_v29  ;;  %6293 = vmatpush.bf16.msra.mxu0 %v10593_v7  ;;  %v10626_v7 = vld [vmem:[#allocation2 + $0x8] sm:$0xff] }
 0xebe   :  { %5812 = vmatpush.bf16.msra.mxu2 %v9343_v39  ;;  %v10549_v39 = vld [vmem:[%s16791_s10 + $0xcc] sm:$0xf] }
 0xebf   :  { %5868 = vmatpush.bf16.msrb.mxu3 %v9491_v60  ;;  %v9499_v60 = vor.u32 %v10561_v24, %v9496_v51  ;;  %v9464_v24 = vld [vmem:[%s16791_s10 + $0xf8] sm:$0xf0] }
 0xec2   :  { %5843 = vmatpush.bf16.msrb.mxu2 %v9459_v6  ;;  %v10646_v6 = vld [vmem:[#allocation3 + $0xe8] sm:$0xff] }
 0xec3   :  { %5869 = vmatpush.bf16.msrb.mxu3 %v9475_v47  ;;  %v10592_v47 = vld [vmem:[%s16795_s14 + $0x20] sm:$0xff] }
 0xec4   :  { %6294 = vmatpush.bf16.msra.mxu0 %v10592_v47  ;;  %v10541_v47 = vld [vmem:[%s16791_s10 + $0x8c] sm:$0xf] }
 0xec6   :  { %5870 = vmatmul.bf16.vlgmr.msrb.gmra.mxu3 %v15368_v14  ;;  %5844 = vmatpush.bf16.msrb.mxu2 %v9443_v20  ;;  %v10645_v20 = vld [vmem:[#allocation3 + $0xc8] sm:$0xff] }
 0xec7   :  { %5938 = vmatpush.bf16.msra.mxu3 %v9595_v45  ;;  %v10544_v45 = vld [vmem:[%s16791_s10 + $0xa4] sm:$0xf] }
 0xec8   :  { %v9427_v33 = vor.u32 %v10544_v45, %v9424_v23  ;;  %6295 = vmatpush.bf16.msra.mxu0 %v10591_v18  ;;  %v9416_v45 = vld [vmem:[%s16791_s10 + $0x98] sm:$0xf0]  ;;  %v10625_v23 = vld [vmem:[#allocation2 + $0xf0] sm:$0xff]  ;;  %v10537_v18 = vld [vmem:[%s16791_s10 + $0x6c] sm:$0xf] }
 0xeca   :  { %5845 = vmatpush.bf16.msrb.mxu2 %v9427_v33  ;;  %v9419_v33 = vor.u32 %v10541_v47, %v9416_v45 }
 0xecb   :  { %5939 = vmatpush.bf16.msra.mxu3 %v9579_v13  ;;  %v10540_v13 = vld [vmem:[%s16791_s10 + $0x84] sm:$0xf] }
 0xecc   :  { %v9411_v62 = vor.u32 %v10540_v13, %v9408_v53  ;;  %6296 = vmatpush.bf16.msra.mxu0 %v10590_v31  ;;  %v10624_v13 = vld [vmem:[#allocation2 + $0x60] sm:$0xff] }
 0xece   :  { %5846 = vmatpush.bf16.msrb.mxu2 %v9411_v62 }
 0xecf   :  { %5940 = vmatpush.bf16.msra.mxu3 %v9563_v55  ;;  %v10617_v55 = vld [vmem:[#allocation2 + $0x68] sm:$0xff] }
 0xed0   :  { %6297 = vmatpush.bf16.msra.mxu0 %v10589_v12 }
 0xed2   :  { %5847 = vmatpush.bf16.msrb.mxu2 %v9395_v44  ;;  %v10623_v44 = vld [vmem:[#allocation2 + $0xb8] sm:$0xff] }
 0xed3   :  { %5941 = vmatpush.bf16.msra.mxu3 %v9547_v59  ;;  %v9379_v59 = vor.u32 %v10532_v48, %v9376_v37  ;;  %v9368_v48 = vld [vmem:[%s16791_s10 + $0x38] sm:$0xf0]  ;;  %v10622_v37 = vld [vmem:[#allocation2 + $0xe8] sm:$0xff] }
 0xed6   :  { %5875 = vmatmul.bf16.gmra.mxu3 %v15381_v9  ;;  %5848 = vmatpush.bf16.msrb.mxu2 %v9379_v59 }
 0xed7   :  { %5942 = vmatpush.bf16.msra.mxu3 %v9531_v42  ;;  %v10524_v42 = vld [vmem:[%s16791_s10 + $0x4] sm:$0xf] }
 0xed8   :  { %v9347_v4 = vor.u32 %v10524_v42, %v9344_v46  ;;  %v10611_v42 = vld [vmem:[%s16787_s6 + $0x38] sm:$0xff]  ;;  %v10610_v46 = vld [vmem:[%s16787_s6 + $0x30] sm:$0xff] }
 0xeda   :  { %5849 = vmatpush.bf16.msrb.mxu2 %v9363_v8 }
 0xedb   :  { %5943 = vmatpush.bf16.msra.mxu3 %v9515_v10  ;;  %v10553_v10 = vld [vmem:[%s16791_s10 + $0xec] sm:$0xf] }
 0xedc   :  { %v9467_v29 = vor.u32 %v10553_v10, %v9464_v24  ;;  %v10641_v10 = vld [vmem:[#allocation2 + $0xf8] sm:$0xff]  ;;  %v10640_v24 = vld [vmem:[#allocation2 + $0xa0] sm:$0xff] }
 0xede   :  { %5850 = vmatpush.bf16.msrb.mxu2 %v9347_v4  ;;  %v10609_v4 = vld [vmem:[%s16787_s6 + $0x28] sm:$0xff] }
 0xedf   :  { %5944 = vmatpush.bf16.msra.mxu3 %v9499_v60  ;;  %v9451_v60 = vor.u32 %v10549_v39, %v9448_v1 }
 0xee3   :  { %5945 = vmatpush.bf16.msra.mxu3 %v9483_v0  ;;  %v9435_v0 = vor.u32 %v10545_v26, %v9432_v21 }
 0xee6   :  { %5946 = vmatmul.bf16.vlgmr.msra.gmra.mxu3 %v15368_v14  ;;  %v10588_v14 = vld [vmem:[%s16795_s14] sm:$0xff] }
 0xee7   :  { %6692 = vmatpush.bf16.msrb.mxu3 %v10619_v36  ;;  %6298 = vmatpush.bf16.msra.mxu0 %v10588_v14  ;;  %v10644_v36 = vld [vmem:[#allocation3 + $0x80] sm:$0xff] }
 0xeeb   :  { %6693 = vmatpush.bf16.msrb.mxu3 %v10618_v35  ;;  %v9400_v35 = vld [vmem:[%s16791_s10 + $0x78] sm:$0xf0] }
 0xeec   :  { %v9403_v31 = vor.u32 %v10537_v18, %v9400_v35 }
 0xeef   :  { %6694 = vmatpush.bf16.msrb.mxu3 %v10617_v55  ;;  %v9384_v55 = vld [vmem:[%s16791_s10 + $0x58] sm:$0xf0] }
 0xef0   :  { %v9387_v12 = vor.u32 %v10533_v40, %v9384_v55 }
 0xef3   :  { %6695 = vmatpush.bf16.msrb.mxu3 %v10616_v63  ;;  %v10529_v63 = vld [vmem:[%s16791_s10 + $0x2c] sm:$0xf] }
 0xef4   :  { %v9371_v14 = vor.u32 %v10529_v63, %v9368_v48 }
 0xef6   :  { %5951 = vmatmul.bf16.gmra.mxu3 %v15381_v9 }
 0xef7   :  { %6696 = vmatpush.bf16.msrb.mxu3 %v10615_v15  ;;  %v10525_v15 = vld [vmem:[%s16791_s10 + $0xc] sm:$0xf] }
 0xef8   :  { %v9355_v8 = vor.u32 %v10525_v15, %v9352_v5 }
 0xefb   :  { %6697 = vmatpush.bf16.msrb.mxu3 %v10614_v16  ;;  %v10620_v16 = vld [vmem:[#allocation2 + $0x80] sm:$0xff] }
 0xeff   :  { %6698 = vmatpush.bf16.msrb.mxu3 %v10613_v32  ;;  %v10608_v32 = vld [vmem:[%s16787_s6 + $0x20] sm:$0xff] }
 0xf01   :  { %v5230_v56 = vpop.f32.mrf.mxu2 }
 0xf03   :  { %6699 = vmatpush.bf16.msrb.mxu3 %v10612_v57  ;;  %v10607_v57 = vld [vmem:[%s16787_s6 + $0x18] sm:$0xff] }
 0xf07   :  { %7144 = vmatpush.bf16.msra.mxu3 %v10651_v11  ;;  %v10606_v11 = vld [vmem:[%s16787_s6 + $0x10] sm:$0xff] }
 0xf09   :  { %v5232_v9 = vpop.f32.mrf.mxu2  ;;  %v5291_v51 = vpop.f32.mrf.mxu3 }
 0xf0a   :  { %v15747_v61 = vpack.c.bf16 %v5291_v51, %v5230_v56  ;;  %v10604_v56 = vld [vmem:[%s16787_s6] sm:$0xff]  ;;  %v10639_v9 = vld [vmem:[#allocation2 + $0x28] sm:$0xff]  ;;  %v10638_v51 = vld [vmem:[#allocation2 + $0x10] sm:$0xff] }
 0xf0b   :  { %7145 = vmatpush.bf16.msra.mxu3 %v10650_v30  ;;  %v10605_v30 = vld [vmem:[%s16787_s6 + $0x8] sm:$0xff]  ;;  %s12078_s6 = smov [#allocation11]  }
 0xf0c   :  { %5813 = vmatmul.bf16.vlgmr.msra.gmra.mxu2 %v15747_v61  ;;  %5889 = vmatmul.bf16.vlgmr.msrb.gmra.mxu0 %v15747_v61  ;;  %s8351_s24 = sshll.u32 %s12078_s6, 4  ;;  %s8352_s24 = int_to_ptr.vmem [resolvable:$true] %s8351_s24 }
 0xf0d   :  { %6753 = vmatpush.bf16.msrb.mxu0 %v10627_v22  ;;  %5919 = vmatpush.bf16.msra.mxu2 %v9467_v29  ;;  %v10636_v29 = vld [vmem:[#allocation2 + $0xa8] sm:$0xff] }
 0xf0f   :  { %7146 = vmatpush.bf16.msra.mxu3 %v10649_v58  ;;  %v10643_v58 = vld [vmem:[#allocation2 + $0x98] sm:$0xff] }
 0xf11   :  { %6754 = vmatpush.bf16.msrb.mxu0 %v10626_v7  ;;  %v5293_v54 = vpop.f32.mrf.mxu3  ;;  %v5352_v19 = vpop.f32.mrf.mxu2  ;;  %5920 = vmatpush.bf16.msra.mxu2 %v9451_v60 }
 0xf13   :  { %7147 = vmatpush.bf16.msra.mxu3 %v10648_v38  ;;  %v10642_v38 = vld [vmem:[#allocation2 + $0x20] sm:$0xff] }
 0xf15   :  { %6755 = vmatpush.bf16.msrb.mxu0 %v10625_v23  ;;  %5921 = vmatpush.bf16.msra.mxu2 %v9435_v0 }
 0xf17   :  { %7148 = vmatpush.bf16.msra.mxu3 %v10647_v52  ;;  %v10637_v52 = vld [vmem:[#allocation2 + $0xd0] sm:$0xff] }
 0xf19   :  { %6756 = vmatpush.bf16.msrb.mxu0 %v10624_v13  ;;  %v5354_v53 = vpop.f32.mrf.mxu2  ;;  %v5413_v62 = vpop.f32.mrf.mxu3  ;;  %5922 = vmatpush.bf16.msra.mxu2 %v9419_v33 }
 0xf1a   :  { %v5419_v3 = vpack.c.bf16 %v5413_v62, %v5352_v19 }
 0xf1b   :  { %7149 = vmatpush.bf16.msra.mxu3 %v10646_v6 }
 0xf1c   :  { %5818 = vmatmul.bf16.gmra.mxu2 %v5419_v3  ;;  %5894 = vmatmul.bf16.gmra.mxu0 %v5419_v3 }
 0xf1d   :  { %6757 = vmatpush.bf16.msrb.mxu0 %v10623_v44  ;;  %5923 = vmatpush.bf16.msra.mxu2 %v9403_v31 }
 0xf1f   :  { %7150 = vmatpush.bf16.msra.mxu3 %v10645_v20 }
 0xf21   :  { %6758 = vmatpush.bf16.msrb.mxu0 %v10622_v37  ;;  %v5415_v59 = vpop.f32.mrf.mxu3  ;;  %5924 = vmatpush.bf16.msra.mxu2 %v9387_v12 }
 0xf23   :  { %7151 = vmatpush.bf16.msra.mxu3 %v10644_v36 }
 0xf25   :  { %6759 = vmatpush.bf16.msrb.mxu0 %v10621_v28  ;;  %5925 = vmatpush.bf16.msra.mxu2 %v9371_v14 }
 0xf29   :  { %6760 = vmatpush.bf16.msrb.mxu0 %v10620_v16  ;;  %5926 = vmatpush.bf16.msra.mxu2 %v9355_v8  ;;  %v5833_v39 = vpop.f32.mrf.mxu3 }
 0xf2c   :  { %5851 = vmatmul.bf16.vlgmr.msrb.gmra.mxu2 %v15747_v61 }
 0xf2d   :  { %6557 = vmatpush.bf16.msrb.mxu2 %v10611_v42 }
 0xf31   :  { %6558 = vmatpush.bf16.msrb.mxu2 %v10610_v46  ;;  %v5835_v1 = vpop.f32.mrf.mxu3 }
 0xf35   :  { %6559 = vmatpush.bf16.msrb.mxu2 %v10609_v4 }
 0xf39   :  { %6560 = vmatpush.bf16.msrb.mxu2 %v10608_v32  ;;  %v5838_v22 = vpop.f32.mrf.mxu3 }
 0xf3c   :  { %5856 = vmatmul.bf16.gmra.mxu2 %v5419_v3 }
 0xf3d   :  { %6561 = vmatpush.bf16.msrb.mxu2 %v10607_v57 }
 0xf41   :  { %6562 = vmatpush.bf16.msrb.mxu2 %v10606_v11  ;;  %v5840_v60 = vpop.f32.mrf.mxu3 }
 0xf45   :  { %6563 = vmatpush.bf16.msrb.mxu2 %v10605_v30 }
 0xf49   :  { %6564 = vmatpush.bf16.msrb.mxu2 %v10604_v56  ;;  %v5871_v54 = vpop.f32.mrf.mxu3 }
 0xf4c   :  { %5927 = vmatmul.bf16.vlgmr.msra.gmra.mxu2 %v15747_v61 }
 0xf4d   :  { %6875 = vmatpush.bf16.msra.mxu2 %v10643_v58 }
 0xf51   :  { %6876 = vmatpush.bf16.msra.mxu2 %v10642_v38  ;;  %v5873_v36 = vpop.f32.mrf.mxu3 }
 0xf55   :  { %6877 = vmatpush.bf16.msra.mxu2 %v10641_v10 }
 0xf59   :  { %6878 = vmatpush.bf16.msra.mxu2 %v10640_v24  ;;  %v5876_v44 = vpop.f32.mrf.mxu3 }
 0xf5c   :  { %5932 = vmatmul.bf16.gmra.mxu2 %v5419_v3 }
 0xf5d   :  { %6879 = vmatpush.bf16.msra.mxu2 %v10639_v9 }
 0xf61   :  { %6880 = vmatpush.bf16.msra.mxu2 %v10638_v51  ;;  %v5878_v32 = vpop.f32.mrf.mxu3 }
 0xf65   :  { %6881 = vmatpush.bf16.msra.mxu2 %v10637_v52 }
 0xf69   :  { %6882 = vmatpush.bf16.msra.mxu2 %v10636_v29 }
 0xf89   :  { %v5890_v11 = vpop.f32.mrf.mxu0 }
 0xf8f   :  { %v5814_v61 = vpop.f32.mrf.mxu2 }
 0xf90   :  { %v5815_v26 = vadd.f32 %v5814_v61, %v14975_v27 }
 0xf92   :  { %v5834_v7 = vadd.f32 %v5833_v39, %v5815_v26 }
 0xf94   :  { %v9596_v20 = vmul.f32 -1.442695, %v5834_v7  ;;  %v5947_v7 = vpop.f32.mrf.mxu3 }
 0xf96   :  { %11790 = vpow2.f32 %v9596_v20  ;;  %v5891_v20 = vadd.f32 %v5890_v11, %v15046_v2 }
 0xf97   :  { %v5816_v6 = vpop.f32.mrf.mxu2 }
 0xf98   :  { %v5817_v19 = vadd.f32 %v5816_v6, %v14975_v27 }
 0xf9a   :  { %v5836_v47 = vadd.f32 %v5835_v1, %v5817_v19 }
 0xf9c   :  { %v9597_v45 = vmul.f32 -1.442695, %v5836_v47  ;;  %v11791_v18 = vpop.eup %11790 }
 0xf9d   :  { %v15823_v62 = vadd.f32 1.0, %v11791_v18 }
 0xf9e   :  { %11792 = vpow2.f32 %v9597_v45 }
 0xf9f   :  { %v5819_v21 = vpop.f32.mrf.mxu2  ;;  %v5984_v18 = vand.u32 2147483648, %v15823_v62  ;;  %vm5978_vm6 = vweird.f32 %v15823_v62 }
 0xfa0   :  { %v5820_v23 = vadd.f32 %v5819_v21, %v14975_v27  ;;  %v5909_v21 = vpop.f32.mrf.mxu1 }
 0xfa2   :  { %v5839_v35 = vadd.f32 %v5838_v22, %v5820_v23 }
 0xfa4   :  { %v9598_v31 = vmul.f32 -1.442695, %v5839_v35  ;;  %v11793_v55 = vpop.eup %11792 }
 0xfa5   :  { %v15828_v37 = vadd.f32 1.0, %v11793_v55 }
 0xfa7   :  { %v5821_v0 = vpop.f32.mrf.mxu2  ;;  %vm5993_vm11 = vweird.f32 %v15828_v37 }
 0xfa8   :  { %v5822_v3 = vadd.f32 %v5821_v0, %v14975_v27  ;;  %v5892_v0 = vpop.f32.mrf.mxu0  ;;  %v5911_v11 = vpop.f32.mrf.mxu1 }
 0xfaa   :  { %v5841_v63 = vadd.f32 %v5840_v60, %v5822_v3 }
 0xfac   :  { %v9599_v15 = vmul.f32 -1.442695, %v5841_v63 }
 0xfaf   :  { %v5852_v33 = vpop.f32.mrf.mxu2 }
 0xfb0   :  { %v5853_v13 = vadd.f32 %v5852_v33, %v14983_v50  ;;  %v5982_v33 = vand.u32 2147483647, %v15823_v62 }
 0xfb2   :  { %v5872_v53 = vadd.f32 %v5871_v54, %v5853_v13  ;;  %vm5983_vm8 = vcmp.eq.f32.partialorder %v5982_v33, 8.507059e+37 }
 0xfb4   :  { %v9600_v40 = vmul.f32 -1.442695, %v5872_v53 }
 0xfb6   :  { %11794 = vpow2.f32 %v9600_v40 }
 0xfb7   :  { %11796 = vrcp.f32 %v15823_v62  ;;  %v5854_v12 = vpop.f32.mrf.mxu2 }
 0xfb8   :  { %11798 = vpow2.f32 %v9598_v31  ;;  %v5855_v48 = vadd.f32 %v5854_v12, %v14983_v50  ;;  %v5985_v12 = vor.u32 1.1754944e-38, %v5984_v18 }
 0xfb9   :  { %11800 = vrcp.f32 %v15828_v37 }
 0xfba   :  { %v5874_v59 = vadd.f32 %v5873_v36, %v5855_v48 }
 0xfbc   :  { %v11795_v14 = vpop.eup %11794  ;;  %v9601_v5 = vmul.f32 -1.442695, %v5874_v59 }
 0xfbd   :  { %v15830_v28 = vpop.eup %11796  ;;  %v15833_v8 = vadd.f32 1.0, %v11795_v14 }
 0xfbe   :  { %v11799_v16 = vpop.eup %11798  ;;  %11802 = vpow2.f32 %v9601_v5  ;;  %v5974_v4 = vmul.f32 %v15830_v28, %v15823_v62  ;;  %vm5979_vm5 = vweird.f32 %v15830_v28  ;;  %v5893_v62 = vadd.f32 %v5892_v0, %v15046_v2 }
 0xfbf   :  { %11804 = vrcp.f32 %v15833_v8  ;;  %v5857_v42 = vpop.f32.mrf.mxu2  ;;  %v15839_v57 = vadd.f32 1.0, %v11799_v16  ;;  %v15841_v56 = vpop.eup %11800  ;;  %vm5980_vm7 = vmor %vm5978_vm6, %vm5979_vm5  ;;  %vm6054_vm13 = vweird.f32 %v15833_v8 }
 0xfc0   :  { %11806 = vpow2.f32 %v9599_v15  ;;  %v5858_v46 = vadd.f32 %v5857_v42, %v14983_v50  ;;  %v5975_v10 = vsub.f32 1.0, %v5974_v4  ;;  %v5989_v52 = vmul.f32 %v15841_v56, %v15828_v37 }
 0xfc1   :  { %11808 = vrcp.f32 %v15839_v57  ;;  %vm5994_vm9 = vweird.f32 %v15841_v56  ;;  %v6060_v4 = vand.u32 2147483648, %v15833_v8  ;;  %vm6008_vm3 = vweird.f32 %v15839_v57 }
 0xfc2   :  { %v5877_v30 = vadd.f32 %v5876_v44, %v5858_v46  ;;  %v5976_v22 = vmul.f32 %v15830_v28, %v5975_v10  ;;  %v5990_v60 = vsub.f32 1.0, %v5989_v52  ;;  %v5910_v44 = vadd.f32 %v5909_v21, %v5891_v20  ;;  %vm15895_vm12 = vmor %vm5993_vm11, %vm5994_vm9 }
 0xfc3   :  { %v5997_v46 = vand.u32 2147483647, %v15828_v37  ;;  %v5999_v10 = vand.u32 2147483648, %v15828_v37  ;;  %v5912_v52 = vadd.f32 %v5911_v11, %v5893_v62 }
 0xfc4   :  { %v11803_v58 = vpop.eup %11802  ;;  %v9602_v38 = vmul.f32 -1.442695, %v5877_v30  ;;  %v5977_v45 = vadd.f32 %v15830_v28, %v5976_v22  ;;  %v5991_v35 = vmul.f32 %v15841_v56, %v5990_v60  ;;  %v5949_v30 = vpop.f32.mrf.mxu3 }
 0xfc5   :  { %v15843_v24 = vpop.eup %11804  ;;  %v15846_v9 = vadd.f32 1.0, %v11803_v58  ;;  %vm5998_vm15 = vcmp.eq.f32.partialorder %v5997_v46, 8.507059e+37  ;;  %v6000_v20 = vor.u32 1.1754944e-38, %v5999_v10 }
 0xfc6   :  { %v11807_v51 = vpop.eup %11806  ;;  %11810 = vpow2.f32 %v9602_v38  ;;  %v6050_v29 = vmul.f32 %v15843_v24, %v15833_v8  ;;  %v5981_v55 = vsel %vm5980_vm7, %v15830_v28, %v5977_v45  ;;  %v5992_v48 = vadd.f32 %v15841_v56, %v5991_v35 }
 0xfc7   :  { %11812 = vrcp.f32 %v15846_v9  ;;  %v5859_v39 = vpop.f32.mrf.mxu2  ;;  %v15855_v61 = vadd.f32 1.0, %v11807_v51  ;;  %v15857_v26 = vpop.eup %11808  ;;  %v5986_v15 = vsel %vm5983_vm8, %v5985_v12, %v5981_v55  ;;  %vm6055_vm10 = vweird.f32 %v15843_v24 }
 0xfc8   :  { %v5860_v1 = vadd.f32 %v5859_v39, %v14983_v50  ;;  %v6051_v54 = vsub.f32 1.0, %v6050_v29  ;;  %v6004_v13 = vmul.f32 %v15857_v26, %v15839_v57  ;;  %v6058_v51 = vand.u32 2147483647, %v15833_v8  ;;  %v5895_v29 = vpop.f32.mrf.mxu0  ;;  %vm15908_vm14 = vmor %vm6054_vm13, %vm6055_vm10 }
 0xfc9   :  { %11814 = vrcp.f32 %v15855_v61  ;;  %vm6009_vm1 = vweird.f32 %v15857_v26  ;;  %vm6069_vm5 = vweird.f32 %v15846_v9 }
 0xfca   :  { %v5879_v6 = vadd.f32 %v5878_v32, %v5860_v1  ;;  %v6052_v3 = vmul.f32 %v15843_v24, %v6051_v54  ;;  %v6005_v59 = vsub.f32 1.0, %v6004_v13  ;;  %v5996_v1 = vsel %vm15895_vm12, %v15841_v56, %v5992_v48  ;;  %vm15931_vm4 = vmor %vm6008_vm3, %vm6009_vm1 }
 0xfcb   :  { %vm6059_vm0 = vcmp.eq.f32.partialorder %v6058_v51, 8.507059e+37  ;;  %v6001_v45 = vsel %vm5998_vm15, %v6000_v20, %v5996_v1  ;;  %v6012_v48 = vand.u32 2147483647, %v15839_v57  ;;  %vm6023_vm12 = vweird.f32 %v15855_v61 }
 0xfcc   :  { %v11811_v19 = vpop.eup %11810  ;;  %v9603_v47 = vmul.f32 -1.442695, %v5879_v6  ;;  %v6053_v5 = vadd.f32 %v15843_v24, %v6052_v3  ;;  %v6006_v22 = vmul.f32 %v15857_v26, %v6005_v59 }
 0xfcd   :  { %v15862_v23 = vpop.eup %11812  ;;  %v15865_v36 = vadd.f32 1.0, %v11811_v19  ;;  %v5896_v19 = vadd.f32 %v5895_v29, %v15046_v2  ;;  %vm6013_vm8 = vcmp.eq.f32.partialorder %v6012_v48, 8.507059e+37 }
 0xfce   :  { %11816 = vpow2.f32 %v9603_v47  ;;  %v6065_v53 = vmul.f32 %v15862_v23, %v15846_v9  ;;  %v6057_v60 = vsel %vm15908_vm14, %v15843_v24, %v6053_v5  ;;  %v6007_v47 = vadd.f32 %v15857_v26, %v6006_v22  ;;  %v5952_v5 = vpop.f32.mrf.mxu3 }
 0xfcf   :  { %11818 = vrcp.f32 %v15865_v36  ;;  %v5928_v31 = vpop.f32.mrf.mxu2  ;;  %v15882_v14 = vpop.eup %11814  ;;  %vm6070_vm2 = vweird.f32 %v15862_v23  ;;  %v6090_v6 = vand.u32 2147483648, %v15865_v36  ;;  %vm6084_vm11 = vweird.f32 %v15865_v36 }
 0xfd0   :  { %v5929_v40 = vadd.f32 %v5928_v31, %v15049_v43  ;;  %v6066_v16 = vsub.f32 1.0, %v6065_v53  ;;  %v6019_v54 = vmul.f32 %v15882_v14, %v15855_v61  ;;  %v6075_v53 = vand.u32 2147483648, %v15846_v9  ;;  %vm15945_vm6 = vmor %vm6069_vm5, %vm6070_vm2 }
 0xfd1   :  { %vm6024_vm10 = vweird.f32 %v15882_v14 }
 0xfd2   :  { %v5948_v63 = vadd.f32 %v5947_v7, %v5929_v40  ;;  %v6067_v56 = vmul.f32 %v15862_v23, %v6066_v16  ;;  %v6061_v7 = vor.u32 1.1754944e-38, %v6060_v4  ;;  %v6020_v13 = vsub.f32 1.0, %v6019_v54  ;;  %v5914_v4 = vpop.f32.mrf.mxu1  ;;  %vm15977_vm14 = vmor %vm6023_vm12, %vm6024_vm10 }
 0xfd3   :  { %v6014_v40 = vand.u32 2147483648, %v15839_v57  ;;  %v6076_v46 = vor.u32 1.1754944e-38, %v6075_v53  ;;  %v5915_v38 = vadd.f32 %v5914_v4, %v5896_v19  ;;  %v6027_v54 = vand.u32 2147483647, %v15855_v61 }
 0xfd4   :  { %v11817_v28 = vpop.eup %11816  ;;  %v6109_v42 = vmul.f32 %v5986_v15, %v5948_v63  ;;  %v6062_v24 = vsel %vm6059_vm0, %v6061_v7, %v6057_v60  ;;  %v6068_v33 = vadd.f32 %v15862_v23, %v6067_v56  ;;  %v6011_v63 = vsel %vm15931_vm4, %v15857_v26, %v6007_v47 }
 0xfd5   :  { %v15889_v32 = vpop.eup %11818  ;;  %v15891_v58 = vadd.f32 1.0, %v11817_v28  ;;  %v6121_v55 = vsub.f32 1.0, %v6062_v24  ;;  %v6129_v59 = vmul.f32 %v6062_v24, %v15359_v25  ;;  %v6015_v11 = vor.u32 1.1754944e-38, %v6014_v40 }
 0xfd6   :  { %v6113_v39 = vadd.f32 %v6109_v42, %v5910_v44  ;;  %v6080_v37 = vmul.f32 %v15889_v32, %v15865_v36  ;;  %v6073_v44 = vand.u32 2147483647, %v15846_v9  ;;  %v6072_v26 = vsel %vm15945_vm6, %v15862_v23, %v6068_v33 }
 0xfd7   :  { %11820 = vrcp.f32 %v15891_v58  ;;  %v5930_v8 = vpop.f32.mrf.mxu2  ;;  %v6021_v42 = vmul.f32 %v15882_v14, %v6020_v13  ;;  %v6016_v29 = vsel %vm6013_vm8, %v6015_v11, %v6011_v63  ;;  %vm6085_vm9 = vweird.f32 %v15889_v32 }
 0xfd8   :  { %11822 = vtanh.f32 %v6113_v39  ;;  %v5931_v21 = vadd.f32 %v5930_v8, %v15049_v43  ;;  %v6081_v18 = vsub.f32 1.0, %v6080_v37  ;;  %vm6074_vm7 = vcmp.eq.f32.partialorder %v6073_v44, 8.507059e+37  ;;  %vm15973_vm13 = vmor %vm6084_vm11, %vm6085_vm9 }
 0xfd9   :  { %v6077_v51 = vsel %vm6074_vm7, %v6076_v46, %v6072_v26  ;;  %v6022_v22 = vadd.f32 %v15882_v14, %v6021_v42  ;;  %v6029_v37 = vand.u32 2147483648, %v15855_v61  ;;  %v6088_v60 = vand.u32 2147483647, %v15865_v36 }
 0xfda   :  { %v5950_v0 = vadd.f32 %v5949_v30, %v5931_v21  ;;  %v6082_v57 = vmul.f32 %v15889_v32, %v6081_v18  ;;  %v6122_v8 = vsub.f32 1.0, %v6077_v51  ;;  %v6130_v47 = vmul.f32 %v6077_v51, %v15363_v49  ;;  %v5916_v40 = vpop.f32.mrf.mxu1 }
 0xfdb   :  { %v6026_v33 = vsel %vm15977_vm14, %v15882_v14, %v6022_v22  ;;  %v6091_v18 = vor.u32 1.1754944e-38, %v6090_v6  ;;  %v6030_v13 = vor.u32 1.1754944e-38, %v6029_v37  ;;  %vm6089_vm15 = vcmp.eq.f32.partialorder %v6088_v60, 8.507059e+37 }
 0xfdc   :  { %v6110_v35 = vmul.f32 %v6001_v45, %v5950_v0  ;;  %v6083_v23 = vadd.f32 %v15889_v32, %v6082_v57  ;;  %vm6028_vm0 = vcmp.eq.f32.partialorder %v6027_v54, 8.507059e+37  ;;  %v6105_v14 = vand.u32 2147483648, %v15891_v58 }
 0xfdd   :  { %v15929_v31 = vpop.eup %11820  ;;  %vm6099_vm2 = vweird.f32 %v15891_v58  ;;  %v6103_v63 = vand.u32 2147483647, %v15891_v58 }
 0xfde   :  { %v11823_v62 = vpop.eup %11822  ;;  %v6114_v12 = vadd.f32 %v6110_v35, %v5912_v52  ;;  %v6095_v9 = vmul.f32 %v15929_v31, %v15891_v58  ;;  %v5897_v52 = vpop.f32.mrf.mxu0  ;;  %v6087_v24 = vsel %vm15973_vm13, %v15889_v32, %v6083_v23  ;;  %v6031_v32 = vsel %vm6028_vm0, %v6030_v13, %v6026_v33 }
 0xfdf   :  { %v5933_v16 = vpop.f32.mrf.mxu2  ;;  %v6125_v28 = vmul.f32 %v11823_v62, %v6121_v55  ;;  %v5898_v21 = vadd.f32 %v5897_v52, %v15046_v2  ;;  %v5954_v35 = vpop.f32.mrf.mxu3  ;;  %v6092_v3 = vsel %vm6089_vm15, %v6091_v18, %v6087_v24  ;;  %vm6100_vm1 = vweird.f32 %v15929_v31 }
 0xfe0   :  { %11824 = vtanh.f32 %v6114_v12  ;;  %v5934_v25 = vadd.f32 %v5933_v16, %v15049_v43  ;;  %v6096_v39 = vsub.f32 1.0, %v6095_v9  ;;  %v6123_v12 = vsub.f32 1.0, %v6092_v3  ;;  %vm6101_vm3 = vmor %vm6099_vm2, %vm6100_vm1 }
 0xfe1   :  { %v15957_v30 = vadd.f32 %v6129_v59, %v6125_v28  ;;  %v5917_v44 = vadd.f32 %v5916_v40, %v5898_v21  ;;  %v6106_v16 = vor.u32 1.1754944e-38, %v6105_v14  ;;  %vm6104_vm4 = vcmp.eq.f32.partialorder %v6103_v63, 8.507059e+37 }
 0xfe2   :  { %v5953_v10 = vadd.f32 %v5952_v5, %v5934_v25  ;;  %v6097_v61 = vmul.f32 %v15929_v31, %v6096_v39  ;;  %v6131_v5 = vmul.f32 %v6092_v3, %v15372_v41 }
 0xfe3   :  { %6137 = vadd.xlane.f32.xlu0 %v15957_v30 }
 0xfe4   :  { %v6111_v1 = vmul.f32 %v6016_v29, %v5953_v10  ;;  %v6098_v55 = vadd.f32 %v15929_v31, %v6097_v61 }
 0xfe6   :  { %v11825_v56 = vpop.eup %11824  ;;  %v6115_v7 = vadd.f32 %v6111_v1, %v5915_v38  ;;  %v6102_v9 = vsel %vm6101_vm3, %v15929_v31, %v6098_v55 }
 0xfe7   :  { %v5935_v20 = vpop.f32.mrf.mxu2  ;;  %v6126_v36 = vmul.f32 %v11825_v56, %v6122_v8  ;;  %v6107_v26 = vsel %vm6104_vm4, %v6106_v16, %v6102_v9 }
 0xfe8   :  { %11826 = vtanh.f32 %v6115_v7  ;;  %v5936_v45 = vadd.f32 %v5935_v20, %v15049_v43  ;;  %v6124_v57 = vsub.f32 1.0, %v6107_v26  ;;  %v6132_v58 = vmul.f32 %v6107_v26, %v15376_v34 }
 0xfe9   :  { %v15990_v53 = vadd.f32 %v6130_v47, %v6126_v36 }
 0xfea   :  { %v5955_v49 = vadd.f32 %v5954_v35, %v5936_v45 }
 0xfeb   :  { %6139 = vadd.xlane.f32.xlu0 %v15990_v53 }
 0xfec   :  { %v6112_v62 = vmul.f32 %v6031_v32, %v5955_v49 }
 0xfee   :  { %v11827_v48 = vpop.eup %11826  ;;  %v6116_v59 = vadd.f32 %v6112_v62, %v5917_v44 }
 0xfef   :  { %v6127_v15 = vmul.f32 %v11827_v48, %v6123_v12 }
 0xff0   :  { %11828 = vtanh.f32 %v6116_v59 }
 0xff1   :  { %v16000_v28 = vadd.f32 %v6131_v5, %v6127_v15  ;;  %v11931_v15 = vld [vmem:[%s16793_s12] ss:$0 sm:$0xff] }
 0xff3   :  { %6141 = vadd.xlane.f32.xlu0 %v16000_v28 }
 0xff6   :  { %v11829_v25 = vpop.eup %11828 }
 0xff7   :  { %v6128_v42 = vmul.f32 %v11829_v25, %v6124_v57 }
 0xff9   :  { %v16004_v46 = vadd.f32 %v6132_v58, %v6128_v42  ;;  %v11932_v42 = vld [vmem:[%s16794_s13] ss:$0 sm:$0xff] }
 0xffb   :  { %6143 = vadd.xlane.f32.xlu0 %v16004_v46 }
0x1056   :  { %v6138_v41 = vpop.xlane.xlu0 %6137 }
0x1057   :  { %v6145_v31 = vmul.f32 %v6138_v41, %v12207_v17 }
0x1059   :  { %v6149_v4 = vsub.f32 %v15957_v30, %v6145_v31 }
0x105b   :  { %v6153_v11 = vmul.f32 %v6149_v4, %v6149_v4 }
0x105d   :  { %6157 = vadd.xlane.f32.xlu0 %v6153_v11 }
0x105e   :  { %v6140_v38 = vpop.xlane.xlu0 %6139 }
0x105f   :  { %v6146_v10 = vmul.f32 %v6140_v38, %v12207_v17 }
0x1061   :  { %v6150_v51 = vsub.f32 %v15990_v53, %v6146_v10  ;;  %v10659_v10 = vld [vmem:[#allocation3 + $0x68] sm:$0xff] }
0x1063   :  { %v6154_v52 = vmul.f32 %v6150_v51, %v6150_v51 }
0x1065   :  { %6159 = vadd.xlane.f32.xlu0 %v6154_v52 }
0x1066   :  { %v6142_v29 = vpop.xlane.xlu0 %6141 }
0x1067   :  { %v6147_v34 = vmul.f32 %v6142_v29, %v12207_v17 }
0x1069   :  { %v16013_v23 = vsub.f32 %v16000_v28, %v6147_v34  ;;  %v10658_v34 = vld [vmem:[#allocation3 + $0x18] sm:$0xff] }
0x106b   :  { %v6155_v39 = vmul.f32 %v16013_v23, %v16013_v23 }
0x106d   :  { %6161 = vadd.xlane.f32.xlu0 %v6155_v39 }
0x106e   :  { %v6144_v1 = vpop.xlane.xlu0 %6143 }
0x106f   :  { %v6148_v22 = vmul.f32 %v6144_v1, %v12207_v17 }
0x1071   :  { %v16019_v6 = vsub.f32 %v16004_v46, %v6148_v22 }
0x1073   :  { %v6156_v37 = vmul.f32 %v16019_v6, %v16019_v6 }
0x1075   :  { %6163 = vadd.xlane.f32.xlu0 %v6156_v37  ;;  %v10657_v37 = vld [vmem:[#allocation3 + $0x60] sm:$0xff] }
0x10d0   :  { %v6158_v8 = vpop.xlane.xlu0 %6157 }
0x10d1   :  { %v6165_v60 = vmul.f32 %v6158_v8, %v12207_v17 }
0x10d3   :  { %v6169_v56 = vadd.f32 1e-05, %v6165_v60 }
0x10d5   :  { %11830 = vrsqrt.f32 %v6169_v56  ;;  %vm6179_vm6 = vweird.f32 %v6169_v56 }
0x10d8   :  { %v6160_v21 = vpop.xlane.xlu0 %6159 }
0x10d9   :  { %v6166_v7 = vmul.f32 %v6160_v21, %v12207_v17  ;;  %v10656_v21 = vld [vmem:[#allocation3 + $0xe0] sm:$0xff] }
0x10db   :  { %v11831_v54 = vpop.eup %11830  ;;  %v6170_v19 = vadd.f32 1e-05, %v6166_v7 }
0x10dc   :  { %v6174_v20 = vmul.f32 %v11831_v54, %v6169_v56  ;;  %vm6180_vm5 = vweird.f32 %v11831_v54 }
0x10dd   :  { %11832 = vrsqrt.f32 %v6170_v19  ;;  %vm6181_vm7 = vmor %vm6179_vm6, %vm6180_vm5  ;;  %vm6189_vm9 = vweird.f32 %v6170_v19 }
0x10de   :  { %v6175_v0 = vmul.f32 %v11831_v54, %v6174_v20  ;;  %v10655_v20 = vld [vmem:[#allocation3 + $0x40] sm:$0xff] }
0x10e0   :  { %v6176_v36 = vmul.f32 0.5, %v6175_v0  ;;  %v6162_v47 = vpop.xlane.xlu0 %6161  ;;  %v10653_v0 = vld [vmem:[#allocation3 + $0xb0] sm:$0xff] }
0x10e1   :  { %v6167_v24 = vmul.f32 %v6162_v47, %v12207_v17 }
0x10e2   :  { %v6177_v61 = vsub.f32 1.5, %v6176_v36  ;;  %v10652_v36 = vld [vmem:[#allocation3 + $0xd0] sm:$0xff] }
0x10e3   :  { %v11833_v45 = vpop.eup %11832  ;;  %v6171_v33 = vadd.f32 1e-05, %v6167_v24 }
0x10e4   :  { %v6178_v18 = vmul.f32 %v11831_v54, %v6177_v61  ;;  %v6184_v35 = vmul.f32 %v11833_v45, %v6170_v19  ;;  %vm6190_vm8 = vweird.f32 %v11833_v45 }
0x10e5   :  { %11834 = vrsqrt.f32 %v6171_v33  ;;  %vm6191_vm10 = vmor %vm6189_vm9, %vm6190_vm8  ;;  %vm6199_vm12 = vweird.f32 %v6171_v33 }
0x10e6   :  { %v6185_v13 = vmul.f32 %v11833_v45, %v6184_v35  ;;  %v6182_v49 = vsel %vm6181_vm7, %v11831_v54, %v6178_v18 }
0x10e7   :  { %v6213_v62 = vmul.f32 %v6182_v49, %v6149_v4 }
0x10e8   :  { %v6186_v3 = vmul.f32 0.5, %v6185_v13  ;;  %v6164_v40 = vpop.xlane.xlu0 %6163  ;;  %v10667_v13 = vld [vmem:[#allocation3 + $0xf0] sm:$0xff] }
0x10e9   :  { %v6168_v32 = vmul.f32 %v6164_v40, %v12207_v17  ;;  %v6217_v5 = vmul.f32 %v11931_v15, %v6213_v62  ;;  %v10665_v40 = vld [vmem:[#allocation3 + $0x30] sm:$0xff]  ;;  %v10664_v62 = vld [vmem:[#allocation3 + $0xd8] sm:$0xff] }
0x10ea   :  { %v6187_v55 = vsub.f32 1.5, %v6186_v3  ;;  %v10666_v3 = vld [vmem:[#allocation3 + $0x20] sm:$0xff] }
0x10eb   :  { %v11835_v44 = vpop.eup %11834  ;;  %v6172_v14 = vadd.f32 1e-05, %v6168_v32  ;;  %v6221_v58 = vadd.f32 %v11932_v42, %v6217_v5  ;;  %v10660_v5 = vld [vmem:[#allocation3 + $0x10] sm:$0xff] }
0x10ec   :  { %v6188_v12 = vmul.f32 %v11833_v45, %v6187_v55  ;;  %v6194_v63 = vmul.f32 %v11835_v44, %v6171_v33  ;;  %vm6200_vm11 = vweird.f32 %v11835_v44 }
0x10ed   :  { %11836 = vrsqrt.f32 %v6172_v14  ;;  %vm6201_vm13 = vmor %vm6199_vm12, %vm6200_vm11  ;;  %vm6209_vm15 = vweird.f32 %v6172_v14 }
0x10ee   :  { %v6192_v48 = vsel %vm6191_vm10, %v11833_v45, %v6188_v12  ;;  %v6195_v59 = vmul.f32 %v11835_v44, %v6194_v63 }
0x10ef   :  { %v6214_v9 = vmul.f32 %v6192_v48, %v6150_v51  ;;  %v10663_v48 = vld [vmem:[#allocation3 + $0xa0] sm:$0xff] }
0x10f0   :  { %v6196_v16 = vmul.f32 0.5, %v6195_v59  ;;  %v10662_v59 = vld [vmem:[#allocation3 + $0x50] sm:$0xff] }
0x10f1   :  { %v6218_v26 = vmul.f32 %v11931_v15, %v6214_v9 }
0x10f2   :  { %v6197_v57 = vsub.f32 1.5, %v6196_v16  ;;  %v11934_v16 = vld [vmem:[#allocation9] ss:$0 sm:$0xff] }
0x10f3   :  { %v11837_v25 = vpop.eup %11836  ;;  %v6222_v41 = vadd.f32 %v11932_v42, %v6218_v26 }
0x10f4   :  { %v6198_v31 = vmul.f32 %v11835_v44, %v6197_v57  ;;  %v6204_v4 = vmul.f32 %v11837_v25, %v6172_v14  ;;  %vm6210_vm14 = vweird.f32 %v11837_v25 }
0x10f5   :  { %v6225_v11 = vpack.c.bf16 %v6222_v41, %v6221_v58  ;;  %vm6211_vm0 = vmor %vm6209_vm15, %vm6210_vm14 }
0x10f6   :  { %v6205_v38 = vmul.f32 %v11837_v25, %v6204_v4  ;;  %v6202_v51 = vsel %vm6201_vm13, %v11835_v44, %v6198_v31 }
0x10f7   :  { %6299 = vmatmul.bf16.vlgmr.msra.gmra.mxu0 %v6225_v11  ;;  %v6215_v39 = vmul.f32 %v6202_v51, %v16013_v23  ;;  %v10654_v23 = vld [vmem:[#allocation3 + $0x38] sm:$0xff] }
0x10f8   :  { %v6206_v52 = vmul.f32 0.5, %v6205_v38  ;;  %7205 = vmatpush.bf16.msra.mxu0 %v10659_v10 }
0x10f9   :  { %v6219_v60 = vmul.f32 %v11931_v15, %v6215_v39 }
0x10fa   :  { %v6207_v29 = vsub.f32 1.5, %v6206_v52 }
0x10fb   :  { %v6223_v7 = vadd.f32 %v11932_v42, %v6219_v60 }
0x10fc   :  { %v6208_v1 = vmul.f32 %v11837_v25, %v6207_v29  ;;  %7206 = vmatpush.bf16.msra.mxu0 %v10658_v34 }
0x10fe   :  { %v6212_v22 = vsel %vm6211_vm0, %v11837_v25, %v6208_v1 }
0x10ff   :  { %v6216_v8 = vmul.f32 %v6212_v22, %v16019_v6  ;;  %v11933_v6 = vld [vmem:[%s16796_s15] ss:$0 sm:$0xff] }
0x1100   :  { %7207 = vmatpush.bf16.msra.mxu0 %v10657_v37 }
0x1101   :  { %v6220_v56 = vmul.f32 %v11931_v15, %v6216_v8  ;;  %v10661_v15 = vld [vmem:[#allocation3 + $0x70] sm:$0xff] }
0x1103   :  { %v6224_v54 = vadd.f32 %v11932_v42, %v6220_v56 }
0x1104   :  { %7208 = vmatpush.bf16.msra.mxu0 %v10656_v21 }
0x1105   :  { %v6226_v19 = vpack.c.bf16 %v6224_v54, %v6223_v7 }
0x1107   :  { %6304 = vmatmul.bf16.gmra.mxu0 %v6226_v19 }
0x1108   :  { %7209 = vmatpush.bf16.msra.mxu0 %v10655_v20 }
0x110c   :  { %7210 = vmatpush.bf16.msra.mxu0 %v10654_v23 }
0x1110   :  { %7211 = vmatpush.bf16.msra.mxu0 %v10653_v0 }
0x1114   :  { %7212 = vmatpush.bf16.msra.mxu0 %v10652_v36 }
0x1174   :  { %v6300_v47 = vpop.f32.mrf.mxu0 }
0x1175   :  { %v6301_v24 = vadd.f32 %v11933_v6, %v6300_v47 }
0x1177   :  { %v6310_v33 = vmax.f32 %v6301_v24, 0.0 }
0x117c   :  { %v6302_v61 = vpop.f32.mrf.mxu0 }
0x117d   :  { %v6303_v45 = vadd.f32 %v11933_v6, %v6302_v61 }
0x117f   :  { %v6311_v18 = vmax.f32 %v6303_v45, 0.0 }
0x1181   :  { %v6314_v35 = vpack.c.bf16 %v6311_v18, %v6310_v33 }
0x1183   :  { %6388 = vmatmul.bf16.vlgmr.msra.gmra.mxu1 %v6314_v35 }
0x1184   :  { %7266 = vmatpush.bf16.msra.mxu1 %v10667_v13  ;;  %v6305_v49 = vpop.f32.mrf.mxu0 }
0x1185   :  { %v6306_v32 = vadd.f32 %v11933_v6, %v6305_v49 }
0x1187   :  { %v6312_v14 = vmax.f32 %v6306_v32, 0.0 }
0x1188   :  { %7267 = vmatpush.bf16.msra.mxu1 %v10666_v3 }
0x118c   :  { %7268 = vmatpush.bf16.msra.mxu1 %v10665_v40  ;;  %v6307_v55 = vpop.f32.mrf.mxu0 }
0x118d   :  { %v6308_v44 = vadd.f32 %v11933_v6, %v6307_v55 }
0x118f   :  { %v6313_v12 = vmax.f32 %v6308_v44, 0.0 }
0x1190   :  { %7269 = vmatpush.bf16.msra.mxu1 %v10664_v62 }
0x1191   :  { %v6315_v63 = vpack.c.bf16 %v6313_v12, %v6312_v14 }
0x1193   :  { %6393 = vmatmul.bf16.gmra.mxu1 %v6315_v63 }
0x1194   :  { %7270 = vmatpush.bf16.msra.mxu1 %v10663_v48 }
0x1198   :  { %7271 = vmatpush.bf16.msra.mxu1 %v10662_v59 }
0x119c   :  { %7272 = vmatpush.bf16.msra.mxu1 %v10661_v15 }
0x11a0   :  { %7273 = vmatpush.bf16.msra.mxu1 %v10660_v5 }
0x1200   :  { %v6389_v9 = vpop.f32.mrf.mxu1 }
0x1201   :  { %v6390_v26 = vadd.f32 %v11934_v16, %v6389_v9  ;;  %v11935_v9 = vld [vmem:[%s16789_s8] ss:$0 sm:$0xff] }
0x1203   :  { %v16039_v57 = vadd.f32 %v6390_v26, %v15957_v30 }
0x1205   :  { %6403 = vadd.xlane.f32.xlu0 %v16039_v57 }
0x1208   :  { %v6391_v25 = vpop.f32.mrf.mxu1 }
0x1209   :  { %v6392_v42 = vadd.f32 %v11934_v16, %v6391_v25 }
0x120b   :  { %v16043_v58 = vadd.f32 %v6392_v42, %v15990_v53 }
0x120d   :  { %6405 = vadd.xlane.f32.xlu0 %v16043_v58 }
0x1210   :  { %v6394_v41 = vpop.f32.mrf.mxu1 }
0x1211   :  { %v6395_v31 = vadd.f32 %v11934_v16, %v6394_v41 }
0x1213   :  { %v16047_v4 = vadd.f32 %v6395_v31, %v16000_v28 }
0x1215   :  { %6407 = vadd.xlane.f32.xlu0 %v16047_v4 }
0x1218   :  { %v6396_v11 = vpop.f32.mrf.mxu1 }
0x1219   :  { %v6397_v38 = vadd.f32 %v11934_v16, %v6396_v11  ;;  %v11936_v11 = vld [vmem:[%s16790_s9] ss:$0 sm:$0xff] }
0x121b   :  { %v16051_v30 = vadd.f32 %v6397_v38, %v16004_v46 }
0x121d   :  { %6409 = vadd.xlane.f32.xlu0 %v16051_v30 }
0x1278   :  { %v6404_v10 = vpop.xlane.xlu0 %6403 }
0x1279   :  { %v6411_v53 = vmul.f32 %v6404_v10, %v12207_v17 }
0x127b   :  { %v6415_v51 = vsub.f32 %v16039_v57, %v6411_v53 }
0x127d   :  { %v6419_v52 = vmul.f32 %v6415_v51, %v6415_v51 }
0x127f   :  { %6423 = vadd.xlane.f32.xlu1 %v6419_v52 }
0x1280   :  { %v6406_v29 = vpop.xlane.xlu0 %6405 }
0x1281   :  { %v6412_v28 = vmul.f32 %v6406_v29, %v12207_v17 }
0x1283   :  { %v6416_v34 = vsub.f32 %v16043_v58, %v6412_v28  ;;  %v10675_v28 = vld [vmem:[#allocation3 + $0x98] sm:$0xff] }
0x1285   :  { %v6420_v39 = vmul.f32 %v6416_v34, %v6416_v34 }
0x1287   :  { %6425 = vadd.xlane.f32.xlu2 %v6420_v39 }
0x1288   :  { %v6408_v1 = vpop.xlane.xlu0 %6407 }
0x1289   :  { %v6413_v46 = vmul.f32 %v6408_v1, %v12207_v17 }
0x128b   :  { %v16060_v22 = vsub.f32 %v16047_v4, %v6413_v46  ;;  %v10674_v46 = vld [vmem:[#allocation3 + $0x28] sm:$0xff] }
0x128d   :  { %v6421_v37 = vmul.f32 %v16060_v22, %v16060_v22 }
0x128f   :  { %6427 = vadd.xlane.f32.xlu0 %v6421_v37 }
0x1290   :  { %v6410_v8 = vpop.xlane.xlu0 %6409 }
0x1291   :  { %v6414_v60 = vmul.f32 %v6410_v8, %v12207_v17 }
0x1293   :  { %v16066_v56 = vsub.f32 %v16051_v30, %v6414_v60 }
0x1295   :  { %v6422_v21 = vmul.f32 %v16066_v56, %v16066_v56 }
0x1297   :  { %6429 = vadd.xlane.f32.xlu1 %v6422_v21  ;;  %v10673_v21 = vld [vmem:[#allocation3] sm:$0xff] }
0x12f2   :  { %v6424_v7 = vpop.xlane.xlu1 %6423 }
0x12f3   :  { %v6431_v54 = vmul.f32 %v6424_v7, %v12207_v17 }
0x12f5   :  { %v6435_v19 = vadd.f32 1e-05, %v6431_v54 }
0x12f7   :  { %11838 = vrsqrt.f32 %v6435_v19  ;;  %vm6445_vm2 = vweird.f32 %v6435_v19 }
0x12fa   :  { %v6426_v20 = vpop.xlane.xlu2 %6425 }
0x12fb   :  { %v6432_v23 = vmul.f32 %v6426_v20, %v12207_v17  ;;  %v10672_v20 = vld [vmem:[#allocation3 + $0xb8] sm:$0xff] }
0x12fd   :  { %v11839_v0 = vpop.eup %11838  ;;  %v6436_v36 = vadd.f32 1e-05, %v6432_v23 }
0x12fe   :  { %v6440_v47 = vmul.f32 %v11839_v0, %v6435_v19  ;;  %vm6446_vm1 = vweird.f32 %v11839_v0 }
0x12ff   :  { %11840 = vrsqrt.f32 %v6436_v36  ;;  %vm6447_vm3 = vmor %vm6445_vm2, %vm6446_vm1  ;;  %vm6455_vm5 = vweird.f32 %v6436_v36 }
0x1300   :  { %v6441_v6 = vmul.f32 %v11839_v0, %v6440_v47  ;;  %v10671_v47 = vld [vmem:[#allocation3 + $0xc0] sm:$0xff] }
0x1302   :  { %v6442_v24 = vmul.f32 0.5, %v6441_v6  ;;  %v6428_v61 = vpop.xlane.xlu0 %6427  ;;  %v10669_v6 = vld [vmem:[#allocation3 + $0x48] sm:$0xff] }
0x1303   :  { %v6433_v45 = vmul.f32 %v6428_v61, %v12207_v17 }
0x1304   :  { %v6443_v33 = vsub.f32 1.5, %v6442_v24  ;;  %v10668_v24 = vld [vmem:[#allocation3 + $0x88] sm:$0xff] }
0x1305   :  { %v11841_v18 = vpop.eup %11840  ;;  %v6437_v35 = vadd.f32 1e-05, %v6433_v45 }
0x1306   :  { %v6444_v13 = vmul.f32 %v11839_v0, %v6443_v33  ;;  %v6450_v49 = vmul.f32 %v11841_v18, %v6436_v36  ;;  %vm6456_vm4 = vweird.f32 %v11841_v18 }
0x1307   :  { %11842 = vrsqrt.f32 %v6437_v35  ;;  %vm6457_vm6 = vmor %vm6455_vm5, %vm6456_vm4  ;;  %vm6465_vm8 = vweird.f32 %v6437_v35 }
0x1308   :  { %v6451_v3 = vmul.f32 %v11841_v18, %v6450_v49  ;;  %v6448_v40 = vsel %vm6447_vm3, %v11839_v0, %v6444_v13 }
0x1309   :  { %v6479_v12 = vmul.f32 %v6448_v40, %v6415_v51 }
0x130a   :  { %v6452_v32 = vmul.f32 0.5, %v6451_v3  ;;  %v6430_v55 = vpop.xlane.xlu1 %6429 }
0x130b   :  { %v6434_v44 = vmul.f32 %v6430_v55, %v12207_v17  ;;  %v6483_v16 = vmul.f32 %v11935_v9, %v6479_v12 }
0x130c   :  { %v6453_v62 = vsub.f32 1.5, %v6452_v32 }
0x130d   :  { %v11843_v14 = vpop.eup %11842  ;;  %v6438_v63 = vadd.f32 1e-05, %v6434_v44  ;;  %v6487_v38 = vadd.f32 %v11936_v11, %v6483_v16 }
0x130e   :  { %v6454_v48 = vmul.f32 %v11841_v18, %v6453_v62  ;;  %v6460_v59 = vmul.f32 %v11843_v14, %v6437_v35  ;;  %vm6466_vm7 = vweird.f32 %v11843_v14 }
0x130f   :  { %11844 = vrsqrt.f32 %v6438_v63  ;;  %vm6467_vm9 = vmor %vm6465_vm8, %vm6466_vm7  ;;  %vm6475_vm11 = vweird.f32 %v6438_v63 }
0x1310   :  { %v6458_v15 = vsel %vm6457_vm6, %v11841_v18, %v6454_v48  ;;  %v6461_v5 = vmul.f32 %v11843_v14, %v6460_v59 }
0x1311   :  { %v6480_v26 = vmul.f32 %v6458_v15, %v6416_v34 }
0x1312   :  { %v6462_v25 = vmul.f32 0.5, %v6461_v5 }
0x1313   :  { %v6484_v42 = vmul.f32 %v11935_v9, %v6480_v26 }
0x1314   :  { %v6463_v41 = vsub.f32 1.5, %v6462_v25 }
0x1315   :  { %v11845_v31 = vpop.eup %11844  ;;  %v6488_v10 = vadd.f32 %v11936_v11, %v6484_v42 }
0x1316   :  { %v6464_v53 = vmul.f32 %v11843_v14, %v6463_v41  ;;  %v6470_v51 = vmul.f32 %v11845_v31, %v6438_v63  ;;  %vm6476_vm10 = vweird.f32 %v11845_v31 }
0x1317   :  { %v6491_v52 = vpack.c.bf16 %v6488_v10, %v6487_v38  ;;  %vm6477_vm12 = vmor %vm6475_vm11, %vm6476_vm10 }
0x1318   :  { %v6471_v29 = vmul.f32 %v11845_v31, %v6470_v51  ;;  %v6468_v34 = vsel %vm6467_vm9, %v11843_v14, %v6464_v53 }
0x1319   :  { %6565 = vmatmul.bf16.vlgmr.msrb.gmra.mxu2 %v6491_v52  ;;  %v6481_v37 = vmul.f32 %v6468_v34, %v16060_v22  ;;  %v10670_v22 = vld [vmem:[#allocation3 + $0xf8] sm:$0xff] }
0x131a   :  { %v6472_v39 = vmul.f32 0.5, %v6471_v29  ;;  %7327 = vmatpush.bf16.msrb.mxu2 %v10675_v28 }
0x131b   :  { %v6485_v54 = vmul.f32 %v11935_v9, %v6481_v37 }
0x131c   :  { %v6473_v1 = vsub.f32 1.5, %v6472_v39 }
0x131d   :  { %v6489_v23 = vadd.f32 %v11936_v11, %v6485_v54 }
0x131e   :  { %v6474_v8 = vmul.f32 %v11845_v31, %v6473_v1  ;;  %7328 = vmatpush.bf16.msrb.mxu2 %v10674_v46 }
0x1320   :  { %v6478_v60 = vsel %vm6477_vm12, %v11845_v31, %v6474_v8 }
0x1321   :  { %v6482_v7 = vmul.f32 %v6478_v60, %v16066_v56  ;;  %v11937_v56 = vld [vmem:[%s16788_s7] ss:$0 sm:$0xff] }
0x1322   :  { %7329 = vmatpush.bf16.msrb.mxu2 %v10673_v21 }
0x1323   :  { %v6486_v19 = vmul.f32 %v11935_v9, %v6482_v7 }
0x1325   :  { %v6490_v0 = vadd.f32 %v11936_v11, %v6486_v19 }
0x1326   :  { %7330 = vmatpush.bf16.msrb.mxu2 %v10672_v20 }
0x1327   :  { %v6492_v36 = vpack.c.bf16 %v6490_v0, %v6489_v23 }
0x1329   :  { %6570 = vmatmul.bf16.gmra.mxu2 %v6492_v36 }
0x132a   :  { %7331 = vmatpush.bf16.msrb.mxu2 %v10671_v47 }
0x132e   :  { %7332 = vmatpush.bf16.msrb.mxu2 %v10670_v22 }
0x1332   :  { %7333 = vmatpush.bf16.msrb.mxu2 %v10669_v6 }
0x1336   :  { %7334 = vmatpush.bf16.msrb.mxu2 %v10668_v24 }
0x139c   :  { %v6566_v61 = vpop.f32.mrf.mxu2 }
0x139d   :  { %v6567_v45 = vadd.f32 %v11937_v56, %v6566_v61 }
0x139f   :  { %v6576_v33 = vpack.c.bf16 %v6567_v45, %v6567_v45 }
0x13a1   :  { %6700 = vmatmul.bf16.vlgmr.msrb.gmra.mxu3 %v6576_v33 }
0x13a4   :  { %v6568_v18 = vpop.f32.mrf.mxu2 }
0x13a5   :  { %v6569_v35 = vadd.f32 %v11937_v56, %v6568_v18 }
0x13a7   :  { %v6577_v13 = vpack.c.bf16 %v6569_v35, %v6569_v35 }
0x13a9   :  { %6761 = vmatmul.bf16.vlgmr.msrb.gmra.mxu0 %v6577_v13 }
0x13ac   :  { %v6571_v49 = vpop.f32.mrf.mxu2 }
0x13ad   :  { %v6572_v3 = vadd.f32 %v11937_v56, %v6571_v49 }
0x13af   :  { %v6578_v40 = vpack.c.bf16 %v6572_v3, %v6572_v3 }
0x13b1   :  { %6822 = vmatmul.bf16.vlgmr.msrb.gmra.mxu1 %v6578_v40 }
0x13b4   :  { %v6573_v32 = vpop.f32.mrf.mxu2 }
0x13b5   :  { %v6574_v55 = vadd.f32 %v11937_v56, %v6573_v32 }
0x13b7   :  { %v6579_v44 = vpack.c.bf16 %v6574_v55, %v6574_v55 }
0x13b9   :  { %6883 = vmatmul.bf16.vlgmr.msra.gmra.mxu2 %v6579_v44 }
0x1424   :  { %v6701_v62 = vpop.f32.mrf.mxu3 }
0x1425   :  { %v6888_v14 = vrot.slane %v6701_v62, 4 }
0x1426   :  { %v6762_v12 = vpop.f32.mrf.mxu0 }
0x1427   :  { %v6889_v63 = vmax.f32 %v6701_v62, %v6888_v14  ;;  %v6894_v48 = vrot.slane %v6762_v12, 4 }
0x1429   :  { %v6890_v59 = vrot.slane %v6889_v63, 2  ;;  %v6895_v15 = vmax.f32 %v6762_v12, %v6894_v48 }
0x142b   :  { %v6891_v5 = vmax.f32 %v6889_v63, %v6890_v59  ;;  %v6896_v9 = vrot.slane %v6895_v15, 2 }
0x142c   :  { %v6703_v16 = vpop.f32.mrf.mxu3 }
0x142d   :  { %v6892_v26 = vrot.slane %v6891_v5, 1  ;;  %v6897_v25 = vmax.f32 %v6895_v15, %v6896_v9 }
0x142e   :  { %v6764_v42 = vpop.f32.mrf.mxu0  ;;  %v6823_v41 = vpop.f32.mrf.mxu1 }
0x142f   :  { %v6893_v31 = vmax.f32 %v6891_v5, %v6892_v26  ;;  %v6898_v11 = vrot.slane %v6897_v25, 1  ;;  %v6900_v38 = vrot.slane %v6823_v41, 4 }
0x1431   :  { %v6912_v10 = vsub.f32 %v6701_v62, %v6893_v31  ;;  %v6899_v53 = vmax.f32 %v6897_v25, %v6898_v11  ;;  %v6901_v51 = vmax.f32 %v6823_v41, %v6900_v38 }
0x1433   :  { %v6916_v52 = vmul.f32 1.442695, %v6912_v10  ;;  %v6913_v29 = vsub.f32 %v6762_v12, %v6899_v53  ;;  %v6902_v28 = vrot.slane %v6901_v51, 2 }
0x1435   :  { %11846 = vpow2.f32 %v6916_v52  ;;  %v6918_v34 = vmul.f32 1.442695, %v6913_v29  ;;  %v6903_v39 = vmax.f32 %v6901_v51, %v6902_v28 }
0x1436   :  { %v6825_v1 = vpop.f32.mrf.mxu1 }
0x1437   :  { %11848 = vpow2.f32 %v6918_v34  ;;  %v6904_v46 = vrot.slane %v6903_v39, 1  ;;  %v10198_v1 = vld [vmem:[%s16791_s10 + $0x1e0] sm:$0xf] }
0x1439   :  { %v6905_v37 = vmax.f32 %v6903_v39, %v6904_v46  ;;  %v10738_v46 = vld [vmem:[%s16791_s10 + $0x1ec] sm:$0xf0] }
0x143b   :  { %v11847_v8 = vpop.eup %11846  ;;  %v6914_v60 = vsub.f32 %v6823_v41, %v6905_v37  ;;  %v10199_v37 = vor.u32 %v10738_v46, %v10198_v1  ;;  %v10724_v46 = vld [vmem:[%s16791_s10 + $0x184] sm:$0xf] }
0x143c   :  { %v6884_v21 = vpop.f32.mrf.mxu2  ;;  %v6924_v7 = vrot.slane %v11847_v8, 4 }
0x143d   :  { %v11849_v54 = vpop.eup %11848  ;;  %v6920_v19 = vmul.f32 1.442695, %v6914_v60  ;;  %v6906_v20 = vrot.slane %v6884_v21, 4  ;;  %7747 = vmatpush.bf16.msrb.mxu0 %v10199_v37  ;;  %v10734_v60 = vld [vmem:[%s16791_s10 + $0x1cc] sm:$0xf0] }
0x143e   :  { %v6925_v23 = vadd.f32 %v11847_v8, %v6924_v7  ;;  %v6930_v0 = vrot.slane %v11849_v54, 4  ;;  %v10166_v7 = vld [vmem:[%s16791_s10 + $0x1a0] sm:$0xf]  ;;  %v10152_v37 = vld [vmem:[%s16791_s10 + $0x190] sm:$0xf0] }
0x143f   :  { %11850 = vpow2.f32 %v6920_v19  ;;  %v6907_v36 = vmax.f32 %v6884_v21, %v6906_v20  ;;  %v10150_v20 = vld [vmem:[%s16791_s10 + $0x180] sm:$0xf] }
0x1440   :  { %v6926_v47 = vrot.slane %v6925_v23, 2  ;;  %v6931_v22 = vadd.f32 %v11849_v54, %v6930_v0 }
0x1441   :  { %v6908_v6 = vrot.slane %v6907_v36, 2 }
0x1442   :  { %v6927_v24 = vadd.f32 %v6926_v47, %v6925_v23  ;;  %v6932_v61 = vrot.slane %v6931_v22, 2  ;;  %v10726_v23 = vld [vmem:[%s16791_s10 + $0x18c] sm:$0xf0] }
0x1443   :  { %v6909_v56 = vmax.f32 %v6907_v36, %v6908_v6  ;;  %v10151_v0 = vor.u32 %v10726_v23, %v10150_v20  ;;  %v10722_v6 = vld [vmem:[%s16791_s10 + $0x16c] sm:$0xf0]  ;;  %v10206_v20 = vld [vmem:[%s16791_s10 + $0x1e8] sm:$0xf]  ;;  %v10739_v23 = vld [vmem:[%s16791_s10 + $0x1f4] sm:$0xf0] }
0x1444   :  { %v6886_v45 = vpop.f32.mrf.mxu2  ;;  %v6928_v33 = vrot.slane %v6927_v24, 1  ;;  %v6933_v18 = vadd.f32 %v6932_v61, %v6931_v22  ;;  %v10134_v22 = vld [vmem:[%s16791_s10 + $0x160] sm:$0xf] }
0x1445   :  { %v11851_v35 = vpop.eup %11850  ;;  %v6910_v13 = vrot.slane %v6909_v56, 1  ;;  %v10118_v61 = vld [vmem:[%s16791_s10 + $0x140] sm:$0xf] }
0x1446   :  { %v6929_v49 = vadd.f32 %v6928_v33, %v6927_v24  ;;  %v6934_v3 = vrot.slane %v6933_v18, 1  ;;  %v6936_v40 = vrot.slane %v11851_v35, 4  ;;  %v10135_v24 = vor.u32 %v10722_v6, %v10134_v22  ;;  %v10720_v6 = vld [vmem:[%s16791_s10 + $0x164] sm:$0xf] }
0x1447   :  { %v6911_v32 = vmax.f32 %v6909_v56, %v6910_v13  ;;  %v10718_v56 = vld [vmem:[%s16791_s10 + $0x14c] sm:$0xf0]  ;;  %v10200_v13 = vld [vmem:[%s16791_s10 + $0x1f0] sm:$0xf0] }
0x1448   :  { %11852 = vrcp.f32 %v6929_v49  ;;  %v6935_v55 = vadd.f32 %v6934_v3, %v6933_v18  ;;  %v6937_v44 = vadd.f32 %v11851_v35, %v6936_v40  ;;  %v10119_v33 = vor.u32 %v10718_v56, %v10118_v61 }
0x1449   :  { %v6915_v62 = vsub.f32 %v6884_v21, %v6911_v32  ;;  %v10207_v56 = vor.u32 %v10739_v23, %v10206_v20  ;;  %v10737_v23 = vld [vmem:[%s16791_s10 + $0x1ec] sm:$0xf] }
0x144a   :  { %11854 = vrcp.f32 %v6935_v55  ;;  %v6938_v14 = vrot.slane %v6937_v44, 2 }
0x144b   :  { %v6922_v12 = vmul.f32 1.442695, %v6915_v62  ;;  %v10102_v62 = vld [vmem:[%s16791_s10 + $0x120] sm:$0xf] }
0x144c   :  { %v6939_v63 = vadd.f32 %v6938_v14, %v6937_v44  ;;  %v10714_v14 = vld [vmem:[%s16791_s10 + $0x12c] sm:$0xf0] }
0x144d   :  { %11856 = vpow2.f32 %v6922_v12 }
0x144e   :  { %v11853_v48 = vpop.eup %11852  ;;  %v6940_v59 = vrot.slane %v6939_v63, 1 }
0x144f   :  { %v6952_v15 = vmul.f32 %v11853_v48, %v11847_v8  ;;  %v10182_v8 = vld [vmem:[%s16791_s10 + $0x1c0] sm:$0xf]  ;;  %v10732_v48 = vld [vmem:[%s16791_s10 + $0x1c4] sm:$0xf] }
0x1450   :  { %v11855_v5 = vpop.eup %11854  ;;  %v6941_v9 = vadd.f32 %v6940_v59, %v6939_v63  ;;  %v10183_v21 = vor.u32 %v10734_v60, %v10182_v8 }
0x1451   :  { %v16085_v16 = vadd.f32 1e-08, %v6952_v15  ;;  %v6953_v26 = vmul.f32 %v11855_v5, %v11849_v54  ;;  %v10730_v54 = vld [vmem:[%s16791_s10 + $0x1ac] sm:$0xf0]  ;;  %v10103_v5 = vor.u32 %v10714_v14, %v10102_v62 }
0x1452   :  { %11858 = vrcp.f32 %v6941_v9  ;;  %7748 = vmatpush.bf16.msrb.mxu0 %v10183_v21  ;;  %v10167_v19 = vor.u32 %v10730_v54, %v10166_v7  ;;  %v10184_v9 = vld [vmem:[%s16791_s10 + $0x1d0] sm:$0xf0] }
0x1453   :  { %v11857_v25 = vpop.eup %11856  ;;  %6960 = vadd.xlane.f32.xlu2 %v16085_v16  ;;  %8330 = vst [vmem:[#allocation11] sm:$0xff] %v16085_v16  ;;  %v16089_v42 = vadd.f32 1e-08, %v6953_v26  ;;  %v10086_v26 = vld [vmem:[%s16791_s10 + $0x100] sm:$0xf] }
0x1454   :  { %v6942_v41 = vrot.slane %v11857_v25, 4 }
0x1455   :  { %8331 = vst [vmem:[#allocation11 + $0x8] sm:$0xff] %v16089_v42  ;;  %6962 = vadd.xlane.f32.xlu0 %v16089_v42 }
0x1456   :  { %v6943_v31 = vadd.f32 %v11857_v25, %v6942_v41  ;;  %7749 = vmatpush.bf16.msrb.mxu0 %v10167_v19  ;;  %v10187_v41 = vor.u32 %v10732_v48, %v10184_v9 }
0x1458   :  { %v11859_v11 = vpop.eup %11858  ;;  %v6944_v38 = vrot.slane %v6943_v31, 2 }
0x1459   :  { %v6954_v10 = vmul.f32 %v11859_v11, %v11851_v35  ;;  %v10736_v35 = vld [vmem:[%s16791_s10 + $0x1e4] sm:$0xf] }
0x145a   :  { %v6945_v53 = vadd.f32 %v6944_v38, %v6943_v31  ;;  %7750 = vmatpush.bf16.msrb.mxu0 %v10151_v0  ;;  %v10203_v40 = vor.u32 %v10736_v35, %v10200_v13  ;;  %v10710_v31 = vld [vmem:[%s16791_s10 + $0x10c] sm:$0xf0]  ;;  %v10728_v11 = vld [vmem:[%s16791_s10 + $0x1a4] sm:$0xf]  ;;  %v10735_v35 = vld [vmem:[%s16791_s10 + $0x1d4] sm:$0xf0] }
0x145b   :  { %v16093_v51 = vadd.f32 1e-08, %v6954_v10 }
0x145c   :  { %v6946_v52 = vrot.slane %v6945_v53, 1  ;;  %7785 = vmatpush.bf16.msra.mxu2 %v10203_v40  ;;  %v10716_v40 = vld [vmem:[%s16791_s10 + $0x144] sm:$0xf] }
0x145d   :  { %6964 = vadd.xlane.f32.xlu2 %v16093_v51  ;;  %8332 = vst [vmem:[#allocation11 + $0x10] sm:$0xff] %v16093_v51 }
0x145e   :  { %v6947_v29 = vadd.f32 %v6946_v52, %v6945_v53  ;;  %7751 = vmatpush.bf16.msrb.mxu0 %v10135_v24  ;;  %v10087_v53 = vor.u32 %v10710_v31, %v10086_v26  ;;  %v10168_v52 = vld [vmem:[%s16791_s10 + $0x1b0] sm:$0xf0] }
0x145f   :  { %v10136_v24 = vld [vmem:[%s16791_s10 + $0x170] sm:$0xf0] }
0x1460   :  { %11860 = vrcp.f32 %v6947_v29  ;;  %7786 = vmatpush.bf16.msra.mxu2 %v10187_v41  ;;  %v10139_v13 = vor.u32 %v10720_v6, %v10136_v24  ;;  %v10727_v41 = vld [vmem:[%s16791_s10 + $0x194] sm:$0xf0] }
0x1461   :  { %v10715_v6 = vld [vmem:[%s16791_s10 + $0x134] sm:$0xf0] }
0x1462   :  { %7752 = vmatpush.bf16.msrb.mxu0 %v10119_v33 }
0x1466   :  { %v11861_v28 = vpop.eup %11860  ;;  %7753 = vmatpush.bf16.msrb.mxu0 %v10103_v5  ;;  %v10104_v5 = vld [vmem:[%s16791_s10 + $0x130] sm:$0xf0] }
0x1467   :  { %v6955_v34 = vmul.f32 %v11861_v28, %v11857_v25  ;;  %v10171_v28 = vor.u32 %v10728_v11, %v10168_v52 }
0x1469   :  { %v16097_v39 = vadd.f32 1e-08, %v6955_v34  ;;  %7787 = vmatpush.bf16.msra.mxu2 %v10171_v28  ;;  %v10723_v28 = vld [vmem:[%s16791_s10 + $0x174] sm:$0xf0] }
0x146a   :  { %7754 = vmatpush.bf16.msrb.mxu0 %v10087_v53 }
0x146b   :  { %6966 = vadd.xlane.f32.xlu1 %v16097_v39  ;;  %8333 = vst [vmem:[#allocation11 + $0x18] sm:$0xff] %v16097_v39 }
0x14c6   :  { %v6961_v36 = vpop.xlane.xlu2 %6960 }
0x14c7   :  { %11862 = vrcp.f32 %v6961_v36  ;;  %v6977_v3 = vand.u32 2147483647, %v6961_v36  ;;  %v6979_v12 = vand.u32 2147483648, %v6961_v36  ;;  %vm6973_vm14 = vweird.f32 %v6961_v36 }
0x14c8   :  { %v6963_v47 = vpop.xlane.xlu0 %6962 }
0x14c9   :  { %11864 = vrcp.f32 %v6963_v47  ;;  %v6991_v63 = vand.u32 2147483647, %v6963_v47  ;;  %v6993_v25 = vand.u32 2147483648, %v6963_v47  ;;  %v6980_v29 = vor.u32 1.1754944e-38, %v6979_v12  ;;  %v10731_v12 = vld [vmem:[%s16791_s10 + $0x1b4] sm:$0xf0] }
0x14ca   :  { %vm6978_vm1 = vcmp.eq.f32.partialorder %v6977_v3, 8.507059e+37  ;;  %vm6987_vm2 = vweird.f32 %v6963_v47 }
0x14cb   :  { %v6994_v21 = vor.u32 1.1754944e-38, %v6993_v25  ;;  %vm6992_vm4 = vcmp.eq.f32.partialorder %v6991_v63, 8.507059e+37  ;;  %v10158_v25 = vld [vmem:[%s16791_s10 + $0x188] sm:$0xf] }
0x14cc   :  { %v10159_v53 = vor.u32 %v10727_v41, %v10158_v25  ;;  %v10096_v25 = vld [vmem:[%s16791_s10 + $0x118] sm:$0xf0] }
0x14cd   :  { %v11863_v45 = vpop.eup %11862 }
0x14ce   :  { %v6969_v18 = vmul.f32 %v11863_v45, %v6961_v36  ;;  %vm6974_vm13 = vweird.f32 %v11863_v45  ;;  %v10155_v36 = vor.u32 %v10724_v46, %v10152_v37 }
0x14cf   :  { %v11865_v49 = vpop.eup %11864  ;;  %vm6975_vm0 = vmor %vm6973_vm14, %vm6974_vm13 }
0x14d0   :  { %v6970_v32 = vsub.f32 1.0, %v6969_v18  ;;  %v6983_v55 = vmul.f32 %v11865_v49, %v6963_v47  ;;  %v16143_v44 = vpop.xlane.xlu2 %6964  ;;  %vm6988_vm15 = vweird.f32 %v11865_v49  ;;  %7788 = vmatpush.bf16.msra.mxu2 %v10155_v36 }
0x14d1   :  { %11866 = vrcp.f32 %v16143_v44  ;;  %vm6989_vm3 = vmor %vm6987_vm2, %vm6988_vm15  ;;  %v7007_v61 = vand.u32 2147483648, %v16143_v44  ;;  %v7005_v33 = vand.u32 2147483647, %v16143_v44  ;;  %vm7001_vm6 = vweird.f32 %v16143_v44 }
0x14d2   :  { %v6971_v59 = vmul.f32 %v11863_v45, %v6970_v32  ;;  %v6984_v15 = vsub.f32 1.0, %v6983_v55  ;;  %v10120_v32 = vld [vmem:[%s16791_s10 + $0x150] sm:$0xf0] }
0x14d3   :  { %v7008_v55 = vor.u32 1.1754944e-38, %v7007_v61  ;;  %vm7006_vm8 = vcmp.eq.f32.partialorder %v7005_v33, 8.507059e+37  ;;  %v10123_v48 = vor.u32 %v10716_v40, %v10120_v32  ;;  %v10094_v33 = vld [vmem:[%s16791_s10 + $0x108] sm:$0xf]  ;;  %v10725_v40 = vld [vmem:[%s16791_s10 + $0x18c] sm:$0xf] }
0x14d4   :  { %v6972_v38 = vadd.f32 %v11863_v45, %v6971_v59  ;;  %v6985_v10 = vmul.f32 %v11865_v49, %v6984_v15  ;;  %7789 = vmatpush.bf16.msra.mxu2 %v10139_v13  ;;  %v10712_v15 = vld [vmem:[%s16791_s10 + $0x124] sm:$0xf]  ;;  %v10176_v13 = vld [vmem:[%s16791_s10 + $0x1b8] sm:$0xf0] }
0x14d5   :  { %v10107_v31 = vor.u32 %v10712_v15, %v10104_v5  ;;  %v10160_v32 = vld [vmem:[%s16791_s10 + $0x198] sm:$0xf0]  ;;  %v10713_v15 = vld [vmem:[%s16791_s10 + $0x12c] sm:$0xf] }
0x14d6   :  { %v6976_v34 = vsel %vm6975_vm0, %v11863_v45, %v6972_v38  ;;  %v6986_v1 = vadd.f32 %v11865_v49, %v6985_v10  ;;  %v10708_v38 = vld [vmem:[%s16791_s10 + $0x104] sm:$0xf]  ;;  %v10088_v10 = vld [vmem:[%s16791_s10 + $0x110] sm:$0xf0]  ;;  %v10112_v5 = vld [vmem:[%s16791_s10 + $0x138] sm:$0xf0] }
0x14d7   :  { %v11867_v8 = vpop.eup %11866  ;;  %v6981_v60 = vsel %vm6978_vm1, %v6980_v29, %v6976_v34  ;;  %v10142_v29 = vld [vmem:[%s16791_s10 + $0x168] sm:$0xf] }
0x14d8   :  { %v7024_v7 = vmul.f32 %v6981_v60, %v16085_v16  ;;  %v6990_v54 = vsel %vm6989_vm3, %v11865_v49, %v6986_v1  ;;  %v6997_v19 = vmul.f32 %v11867_v8, %v16143_v44  ;;  %vm7002_vm5 = vweird.f32 %v11867_v8  ;;  %v10174_v44 = vld [vmem:[%s16791_s10 + $0x1a8] sm:$0xf]  ;;  %7790 = vmatpush.bf16.msra.mxu2 %v10123_v48  ;;  %v10128_v48 = vld [vmem:[%s16791_s10 + $0x158] sm:$0xf0] }
0x14d9   :  { %v6995_v0 = vsel %vm6992_vm4, %v6994_v21, %v6990_v54  ;;  %vm7003_vm7 = vmor %vm7001_vm6, %vm7002_vm5  ;;  %v10175_v9 = vor.u32 %v10731_v12, %v10174_v44  ;;  %v10091_v1 = vor.u32 %v10708_v38, %v10088_v10  ;;  %v16241_v60 = vpack.c.bf16 %v16043_v58, %v16039_v57  ;;  %v10719_v54 = vld [vmem:[%s16791_s10 + $0x154] sm:$0xf0]  ;;  %v10144_v44 = vld [vmem:[%s16791_s10 + $0x178] sm:$0xf0] }
0x14da   :  { %v7025_v47 = vmul.f32 %v6995_v0, %v16089_v42  ;;  %v6998_v22 = vsub.f32 1.0, %v6997_v19  ;;  %v7028_v16 = vpack.c.bf16 %v7024_v7, %v7024_v7  ;;  %v10190_v42 = vld [vmem:[%s16791_s10 + $0x1c8] sm:$0xf]  ;;  %v10208_v0 = vld [vmem:[%s16791_s10 + $0x1f8] sm:$0xf0] }
0x14db   :  { %v10191_v62 = vor.u32 %v10735_v35, %v10190_v42  ;;  %v10126_v7 = vld [vmem:[%s16791_s10 + $0x148] sm:$0xf]  ;;  %v10211_v24 = vor.u32 %v10737_v23, %v10208_v0  ;;  %v10729_v35 = vld [vmem:[%s16791_s10 + $0x1ac] sm:$0xf]  ;;  %v10072_v10 = vld [vmem:[%s16791_s10 + $0xf0] sm:$0xf0] }
0x14dc   :  { %v6999_v45 = vmul.f32 %v11867_v8, %v6998_v22  ;;  %7152 = vmatmul.bf16.vlgmr.msra.gmra.mxu3 %v7028_v16  ;;  %v7029_v18 = vpack.c.bf16 %v7025_v47, %v7025_v47  ;;  %7791 = vmatpush.bf16.msra.mxu2 %v10107_v31  ;;  %v10127_v47 = vor.u32 %v10719_v54, %v10126_v7  ;;  %v10110_v16 = vld [vmem:[%s16791_s10 + $0x128] sm:$0xf]  ;;  %v10706_v31 = vld [vmem:[%s16791_s10 + $0xec] sm:$0xf0]  ;;  %v10040_v7 = vld [vmem:[%s16791_s10 + $0xb0] sm:$0xf0] }
0x14dd   :  { %v10694_v23 = vld [vmem:[%s16791_s10 + $0x8c] sm:$0xf0]  ;;  %v10692_v0 = vld [vmem:[%s16791_s10 + $0x84] sm:$0xf] }
0x14de   :  { %v7000_v49 = vadd.f32 %v11867_v8, %v6999_v45  ;;  %v6967_v3 = vpop.xlane.xlu1 %6966  ;;  %7213 = vmatmul.bf16.vlgmr.msra.gmra.mxu0 %v7029_v18  ;;  %v10192_v45 = vld [vmem:[%s16791_s10 + $0x1d8] sm:$0xf0]  ;;  %v10711_v18 = vld [vmem:[%s16791_s10 + $0x114] sm:$0xf0] }
0x14df   :  { %11868 = vrcp.f32 %v6967_v3  ;;  %7823 = vmatpush.bf16.msra.mxu0 %v10207_v56  ;;  %v7021_v34 = vand.u32 2147483648, %v6967_v3  ;;  %v7019_v37 = vand.u32 2147483647, %v6967_v3  ;;  %vm7015_vm10 = vweird.f32 %v6967_v3  ;;  %v10733_v56 = vld [vmem:[%s16791_s10 + $0x1cc] sm:$0xf] }
0x14e0   :  { %v7004_v14 = vsel %vm7003_vm7, %v11867_v8, %v7000_v49  ;;  %v10143_v8 = vor.u32 %v10723_v28, %v10142_v29  ;;  %7792 = vmatpush.bf16.msra.mxu2 %v10091_v1  ;;  %v10195_v42 = vor.u32 %v10733_v56, %v10192_v45  ;;  %v10095_v49 = vor.u32 %v10711_v18, %v10094_v33  ;;  %v10700_v28 = vld [vmem:[%s16791_s10 + $0xc4] sm:$0xf]  ;;  %v10686_v33 = vld [vmem:[%s16791_s10 + $0x4c] sm:$0xf0] }
0x14e1   :  { %v7009_v63 = vsel %vm7006_vm8, %v7008_v55, %v7004_v14  ;;  %v7022_v19 = vor.u32 1.1754944e-38, %v7021_v34  ;;  %vm7020_vm12 = vcmp.eq.f32.partialorder %v7019_v37, 8.507059e+37  ;;  %v16289_v55 = vpack.c.bf16 %v16051_v30, %v16047_v4  ;;  %v10721_v14 = vld [vmem:[%s16791_s10 + $0x16c] sm:$0xf]  ;;  %v10056_v34 = vld [vmem:[%s16791_s10 + $0xd0] sm:$0xf0] }
0x14e2   :  { %v7026_v59 = vmul.f32 %v7009_v63, %v16093_v51  ;;  %v10147_v12 = vor.u32 %v10721_v14, %v10144_v44  ;;  %v10717_v63 = vld [vmem:[%s16791_s10 + $0x14c] sm:$0xf]  ;;  %v10038_v37 = vld [vmem:[%s16791_s10 + $0xa0] sm:$0xf]  ;;  %v10684_v18 = vld [vmem:[%s16791_s10 + $0x44] sm:$0xf] }
0x14e3   :  { %7824 = vmatpush.bf16.msra.mxu0 %v10191_v62  ;;  %v10163_v62 = vor.u32 %v10725_v40, %v10160_v32  ;;  %v9976_v32 = vld [vmem:[%s16791_s10 + $0x30] sm:$0xf0]  ;;  %v10678_v14 = vld [vmem:[%s16791_s10 + $0xc] sm:$0xf0]  ;;  %v10676_v44 = vld [vmem:[%s16791_s10 + $0x4] sm:$0xf] }
0x14e4   :  { %v7030_v26 = vpack.c.bf16 %v7026_v59, %v7026_v59  ;;  %v10131_v59 = vor.u32 %v10717_v63, %v10128_v48  ;;  %v9960_v63 = vld [vmem:[%s16791_s10 + $0x10] sm:$0xf0] }
0x14e5   :  { %v11869_v51 = vpop.eup %11868  ;;  %v9963_v48 = vor.u32 %v10676_v44, %v9960_v63  ;;  %v10677_v44 = vld [vmem:[%s16791_s10 + $0xc] sm:$0xf] }
0x14e6   :  { %v7011_v11 = vmul.f32 %v11869_v51, %v6967_v3  ;;  %7274 = vmatmul.bf16.vlgmr.msra.gmra.mxu1 %v7030_v26  ;;  %vm7016_vm9 = vweird.f32 %v11869_v51  ;;  %v10179_v3 = vor.u32 %v10729_v35, %v10176_v13  ;;  %v10709_v26 = vld [vmem:[%s16791_s10 + $0x10c] sm:$0xf]  ;;  %v9974_v13 = vld [vmem:[%s16791_s10 + $0x20] sm:$0xf] }
0x14e7   :  { %7825 = vmatpush.bf16.msra.mxu0 %v10175_v9  ;;  %vm7017_vm11 = vmor %vm7015_vm10, %vm7016_vm9  ;;  %v10115_v9 = vor.u32 %v10713_v15, %v10112_v5  ;;  %v10099_v41 = vor.u32 %v10709_v26, %v10096_v25  ;;  %v10707_v15 = vld [vmem:[%s16791_s10 + $0xf4] sm:$0xf0]  ;;  %v10080_v26 = vld [vmem:[%s16791_s10 + $0xf8] sm:$0xf0] }
0x14e8   :  { %v7012_v52 = vsub.f32 1.0, %v7011_v11  ;;  %v10704_v11 = vld [vmem:[%s16791_s10 + $0xe4] sm:$0xf]  ;;  %v10062_v25 = vld [vmem:[%s16791_s10 + $0xc8] sm:$0xf] }
0x14e9   :  { %v10075_v29 = vor.u32 %v10704_v11, %v10072_v10  ;;  %v10064_v11 = vld [vmem:[%s16791_s10 + $0xd8] sm:$0xf0]  ;;  %v10046_v10 = vld [vmem:[%s16791_s10 + $0xa8] sm:$0xf] }
0x14ea   :  { %v7013_v46 = vmul.f32 %v11869_v51, %v7012_v52  ;;  %v10702_v52 = vld [vmem:[%s16791_s10 + $0xcc] sm:$0xf0] }
0x14eb   :  { %7826 = vmatpush.bf16.msra.mxu0 %v10159_v53  ;;  %v10054_v53 = vld [vmem:[%s16791_s10 + $0xc0] sm:$0xf]  ;;  %7766 = vmatpush.bf16.msrb.mxu1 %v10075_v29 }
0x14ec   :  { %v7014_v21 = vadd.f32 %v11869_v51, %v7013_v46  ;;  %v10055_v1 = vor.u32 %v10702_v52, %v10054_v53  ;;  %v10059_v46 = vor.u32 %v10700_v28, %v10056_v34  ;;  %v10699_v53 = vld [vmem:[%s16791_s10 + $0xb4] sm:$0xf0]  ;;  %v10697_v28 = vld [vmem:[%s16791_s10 + $0xac] sm:$0xf]  ;;  %v10048_v34 = vld [vmem:[%s16791_s10 + $0xb8] sm:$0xf0] }
0x14ed   :  { %v10047_v29 = vor.u32 %v10699_v53, %v10046_v10 }
0x14ee   :  { %v7018_v20 = vsel %vm7017_vm11, %v11869_v51, %v7014_v21  ;;  %7755 = vmatmul.bf16.vlgmr.msrb.gmra.mxu0 %v16241_v60  ;;  %v10070_v51 = vld [vmem:[%s16791_s10 + $0xe0] sm:$0xf]  ;;  %v10696_v21 = vld [vmem:[%s16791_s10 + $0xa4] sm:$0xf] }
0x14ef   :  { %v7023_v36 = vsel %vm7020_vm12, %v7022_v19, %v7018_v20  ;;  %7827 = vmatpush.bf16.msra.mxu0 %v10143_v8  ;;  %v10071_v38 = vor.u32 %v10706_v31, %v10070_v51  ;;  %v10698_v8 = vld [vmem:[%s16791_s10 + $0xac] sm:$0xf0]  ;;  %7767 = vmatpush.bf16.msrb.mxu1 %v10059_v46  ;;  %v10043_v19 = vor.u32 %v10696_v21, %v10040_v7  ;;  %v10022_v20 = vld [vmem:[%s16791_s10 + $0x80] sm:$0xf]  ;;  %v10703_v51 = vld [vmem:[%s16791_s10 + $0xd4] sm:$0xf0] }
0x14f0   :  { %v7027_v22 = vmul.f32 %v7023_v36, %v16097_v39  ;;  %v10111_v39 = vor.u32 %v10715_v6, %v10110_v16  ;;  %v10039_v54 = vor.u32 %v10698_v8, %v10038_v37  ;;  %v10024_v36 = vld [vmem:[%s16791_s10 + $0x90] sm:$0xf0]  ;;  %v10006_v16 = vld [vmem:[%s16791_s10 + $0x60] sm:$0xf]  ;;  %v10690_v6 = vld [vmem:[%s16791_s10 + $0x6c] sm:$0xf0]  ;;  %v10051_v46 = vor.u32 %v10697_v28, %v10048_v34 }
0x14f1   :  { %7728 = vmatpush.bf16.msrb.mxu3 %v10071_v38  ;;  %v10007_v56 = vor.u32 %v10690_v6, %v10006_v16  ;;  %v10701_v31 = vld [vmem:[%s16791_s10 + $0xcc] sm:$0xf]  ;;  %v10063_v38 = vor.u32 %v10703_v51, %v10062_v25  ;;  %v10695_v37 = vld [vmem:[%s16791_s10 + $0x94] sm:$0xf0]  ;;  %v10032_v7 = vld [vmem:[%s16791_s10 + $0x98] sm:$0xf0] }
0x14f2   :  { %v7031_v61 = vpack.c.bf16 %v7027_v22, %v7027_v22  ;;  %v10027_v22 = vor.u32 %v10692_v0, %v10024_v36  ;;  %v10067_v52 = vor.u32 %v10701_v31, %v10064_v11  ;;  %v10693_v21 = vld [vmem:[%s16791_s10 + $0x8c] sm:$0xf]  ;;  %v10687_v6 = vld [vmem:[%s16791_s10 + $0x54] sm:$0xf0] }
0x14f3   :  { %7828 = vmatpush.bf16.msra.mxu0 %v10127_v47  ;;  %v10023_v47 = vor.u32 %v10694_v23, %v10022_v20  ;;  %7768 = vmatpush.bf16.msrb.mxu1 %v10043_v19  ;;  %v10014_v19 = vld [vmem:[%s16791_s10 + $0x68] sm:$0xf]  ;;  %v10691_v20 = vld [vmem:[%s16791_s10 + $0x74] sm:$0xf0]  ;;  %v10689_v36 = vld [vmem:[%s16791_s10 + $0x6c] sm:$0xf] }
0x14f4   :  { %7335 = vmatmul.bf16.vlgmr.msrb.gmra.mxu2 %v7031_v61  ;;  %v10008_v61 = vld [vmem:[%s16791_s10 + $0x70] sm:$0xf0]  ;;  %v10015_v0 = vor.u32 %v10691_v20, %v10014_v19 }
0x14f5   :  { %7861 = vmatpush.bf16.msrb.mxu2 %v10211_v24  ;;  %7729 = vmatpush.bf16.msrb.mxu3 %v10055_v1  ;;  %v10688_v24 = vld [vmem:[%s16791_s10 + $0x64] sm:$0xf]  ;;  %v10030_v1 = vld [vmem:[%s16791_s10 + $0x88] sm:$0xf] }
0x14f6   :  { %v10011_v45 = vor.u32 %v10688_v24, %v10008_v61  ;;  %v10031_v8 = vor.u32 %v10695_v37, %v10030_v1 }
0x14f7   :  { %7829 = vmatpush.bf16.msra.mxu0 %v10111_v39  ;;  %7769 = vmatpush.bf16.msrb.mxu1 %v10027_v22  ;;  %v9990_v39 = vld [vmem:[%s16791_s10 + $0x40] sm:$0xf]  ;;  %v9998_v22 = vld [vmem:[%s16791_s10 + $0x48] sm:$0xf] }
0x14f8   :  { %v9999_v24 = vor.u32 %v10687_v6, %v9998_v22 }
0x14f9   :  { %7862 = vmatpush.bf16.msrb.mxu2 %v10195_v42  ;;  %7730 = vmatpush.bf16.msrb.mxu3 %v10039_v54  ;;  %v9992_v42 = vld [vmem:[%s16791_s10 + $0x50] sm:$0xf0]  ;;  %v10035_v54 = vor.u32 %v10693_v21, %v10032_v7 }
0x14fa   :  { %v9995_v35 = vor.u32 %v10684_v18, %v9992_v42  ;;  %v10683_v42 = vld [vmem:[%s16791_s10 + $0x34] sm:$0xf0] }
0x14fb   :  { %7830 = vmatpush.bf16.msra.mxu0 %v10095_v49  ;;  %7770 = vmatpush.bf16.msrb.mxu1 %v10011_v45  ;;  %v10682_v49 = vld [vmem:[%s16791_s10 + $0x2c] sm:$0xf0]  ;;  %v10000_v45 = vld [vmem:[%s16791_s10 + $0x58] sm:$0xf0] }
0x14fc   :  { %v9975_v40 = vor.u32 %v10682_v49, %v9974_v13  ;;  %v10681_v49 = vld [vmem:[%s16791_s10 + $0x2c] sm:$0xf] }
0x14fd   :  { %7863 = vmatpush.bf16.msrb.mxu2 %v10179_v3  ;;  %7731 = vmatpush.bf16.msrb.mxu3 %v10023_v47  ;;  %v10680_v3 = vld [vmem:[%s16791_s10 + $0x24] sm:$0xf]  ;;  %v10016_v47 = vld [vmem:[%s16791_s10 + $0x78] sm:$0xf0] }
0x14fe   :  { %7760 = vmatmul.bf16.gmra.mxu0 %v16289_v55  ;;  %v10019_v16 = vor.u32 %v10689_v36, %v10016_v47 }
0x14ff   :  { %7771 = vmatpush.bf16.msrb.mxu1 %v9995_v35 }
0x1501   :  { %7864 = vmatpush.bf16.msrb.mxu2 %v10163_v62  ;;  %7732 = vmatpush.bf16.msrb.mxu3 %v10007_v56  ;;  %v9979_v62 = vor.u32 %v10680_v3, %v9976_v32  ;;  %v10685_v56 = vld [vmem:[%s16791_s10 + $0x4c] sm:$0xf]  ;;  %v9984_v3 = vld [vmem:[%s16791_s10 + $0x38] sm:$0xf0] }
0x1502   :  { %v10003_v18 = vor.u32 %v10685_v56, %v10000_v45  ;;  %v9987_v32 = vor.u32 %v10681_v49, %v9984_v3 }
0x1503   :  { %7772 = vmatpush.bf16.msrb.mxu1 %v9979_v62  ;;  %v10679_v62 = vld [vmem:[%s16791_s10 + $0x14] sm:$0xf0] }
0x1504   :  { %7793 = vmatmul.bf16.vlgmr.msra.gmra.mxu2 %v16241_v60 }
0x1505   :  { %7865 = vmatpush.bf16.msrb.mxu2 %v10147_v12 }
0x1507   :  { %7773 = vmatpush.bf16.msrb.mxu1 %v9963_v48 }
0x1509   :  { %7866 = vmatpush.bf16.msrb.mxu2 %v10131_v59  ;;  %v10078_v59 = vld [vmem:[%s16791_s10 + $0xe8] sm:$0xf] }
0x150a   :  { %v10079_v5 = vor.u32 %v10707_v15, %v10078_v59 }
0x150d   :  { %7867 = vmatpush.bf16.msrb.mxu2 %v10115_v9  ;;  %v10705_v9 = vld [vmem:[%s16791_s10 + $0xec] sm:$0xf] }
0x150e   :  { %7831 = vmatmul.bf16.vlgmr.msra.gmra.mxu0 %v16241_v60 }
0x1511   :  { %7868 = vmatpush.bf16.msrb.mxu2 %v10099_v41  ;;  %v10083_v41 = vor.u32 %v10705_v9, %v10080_v26 }
0x1513   :  { %7842 = vmatpush.bf16.msra.mxu1 %v10083_v41 }
0x1514   :  { %7798 = vmatmul.bf16.gmra.mxu2 %v16289_v55 }
0x1517   :  { %7843 = vmatpush.bf16.msra.mxu1 %v10067_v52 }
0x151b   :  { %7844 = vmatpush.bf16.msra.mxu1 %v10051_v46 }
0x151e   :  { %7836 = vmatmul.bf16.gmra.mxu0 %v16289_v55 }
0x151f   :  { %7845 = vmatpush.bf16.msra.mxu1 %v10035_v54 }
0x1523   :  { %7846 = vmatpush.bf16.msra.mxu1 %v10019_v16 }
0x1524   :  { %7869 = vmatmul.bf16.vlgmr.msrb.gmra.mxu2 %v16241_v60  ;;  %v9991_v60 = vor.u32 %v10686_v33, %v9990_v39  ;;  %v9982_v39 = vld [vmem:[%s16791_s10 + $0x28] sm:$0xf] }
0x1526   :  { %7733 = vmatpush.bf16.msrb.mxu3 %v9991_v60  ;;  %v9983_v60 = vor.u32 %v10683_v42, %v9982_v39 }
0x1527   :  { %7847 = vmatpush.bf16.msra.mxu1 %v10003_v18 }
0x152a   :  { %7734 = vmatpush.bf16.msrb.mxu3 %v9975_v40  ;;  %v9966_v40 = vld [vmem:[%s16791_s10 + $0x8] sm:$0xf] }
0x152b   :  { %7848 = vmatpush.bf16.msra.mxu1 %v9987_v32 }
0x1534   :  { %7874 = vmatmul.bf16.gmra.mxu2 %v16289_v55  ;;  %v9958_v55 = vld [vmem:[%s16791_s10] sm:$0xf] }
0x1535   :  { %v9959_v12 = vor.u32 %v10678_v14, %v9958_v55  ;;  %v9967_v55 = vor.u32 %v10679_v62, %v9966_v40 }
0x1537   :  { %7735 = vmatpush.bf16.msrb.mxu3 %v9959_v12  ;;  %v9968_v12 = vld [vmem:[%s16791_s10 + $0x18] sm:$0xf0] }
0x1538   :  { %v9971_v63 = vor.u32 %v10677_v44, %v9968_v12 }
0x153a   :  { %7849 = vmatpush.bf16.msra.mxu1 %v9971_v63 }
0x153b   :  { %7804 = vmatpush.bf16.msra.mxu3 %v10079_v5 }
0x153f   :  { %7805 = vmatpush.bf16.msra.mxu3 %v10063_v38 }
0x1543   :  { %7806 = vmatpush.bf16.msra.mxu3 %v10047_v29 }
0x1547   :  { %7807 = vmatpush.bf16.msra.mxu3 %v10031_v8 }
0x154b   :  { %7808 = vmatpush.bf16.msra.mxu3 %v10015_v0 }
0x154f   :  { %7809 = vmatpush.bf16.msra.mxu3 %v9999_v24 }
0x1553   :  { %7810 = vmatpush.bf16.msra.mxu3 %v9983_v60 }
0x1557   :  { %7811 = vmatpush.bf16.msra.mxu3 %v9967_v55 }
0x155b   :  { %v7214_v23 = vpop.f32.mrf.mxu0 }
0x155f   :  { %v7153_v61 = vpop.f32.mrf.mxu3 }
0x1560   :  { %v7340_v33 = vpack.c.bf16 %v7214_v23, %v7153_v61 }
0x1562   :  { %7736 = vmatmul.bf16.vlgmr.msrb.gmra.mxu3 %v7340_v33  ;;  %7774 = vmatmul.bf16.vlgmr.msrb.gmra.mxu1 %v7340_v33 }
0x1563   :  { %v7216_v35 = vpop.f32.mrf.mxu0  ;;  %v7275_v13 = vpop.f32.mrf.mxu1 }
0x1567   :  { %v7155_v14 = vpop.f32.mrf.mxu3 }
0x156b   :  { %v7277_v48 = vpop.f32.mrf.mxu1  ;;  %v7756_v25 = vpop.f32.mrf.mxu0 }
0x1573   :  { %v7758_v34 = vpop.f32.mrf.mxu0 }
0x1577   :  { %v7336_v59 = vpop.f32.mrf.mxu2 }
0x1578   :  { %v7342_v15 = vpack.c.bf16 %v7336_v59, %v7275_v13 }
0x157a   :  { %7741 = vmatmul.bf16.gmra.mxu3 %v7342_v15  ;;  %7779 = vmatmul.bf16.gmra.mxu1 %v7342_v15 }
0x157b   :  { %v7761_v0 = vpop.f32.mrf.mxu0 }
0x157f   :  { %v7338_v5 = vpop.f32.mrf.mxu2 }
0x1583   :  { %v7763_v35 = vpop.f32.mrf.mxu0 }
0x1587   :  { %v7794_v9 = vpop.f32.mrf.mxu2 }
0x158a   :  { %7812 = vmatmul.bf16.vlgmr.msra.gmra.mxu3 %v7340_v33  ;;  %7850 = vmatmul.bf16.vlgmr.msra.gmra.mxu1 %v7340_v33 }
0x158f   :  { %v7796_v52 = vpop.f32.mrf.mxu2 }
0x1597   :  { %v7799_v20 = vpop.f32.mrf.mxu2 }
0x159a   :  { %7817 = vmatmul.bf16.gmra.mxu3 %v7342_v15  ;;  %7855 = vmatmul.bf16.gmra.mxu1 %v7342_v15 }
0x159f   :  { %v7801_v18 = vpop.f32.mrf.mxu2 }
0x15df   :  { %v7775_v26 = vpop.f32.mrf.mxu1 }
0x15e0   :  { %v7776_v41 = vadd.f32 %v7775_v26, %v14983_v50  ;;  %v7870_v26 = vpop.f32.mrf.mxu2 }
0x15e2   :  { %v7795_v51 = vadd.f32 %v7794_v9, %v7776_v41 }
0x15e4   :  { %v10216_v29 = vmul.f32 -1.442695, %v7795_v51 }
0x15e5   :  { %v7737_v31 = vpop.f32.mrf.mxu3 }
0x15e6   :  { %v7738_v11 = vadd.f32 %v7737_v31, %v14975_v27 }
0x15e7   :  { %v7777_v38 = vpop.f32.mrf.mxu1 }
0x15e8   :  { %v7757_v10 = vadd.f32 %v7756_v25, %v7738_v11  ;;  %v7778_v53 = vadd.f32 %v7777_v38, %v14983_v50 }
0x15ea   :  { %v10212_v28 = vmul.f32 -1.442695, %v7757_v10  ;;  %v7797_v1 = vadd.f32 %v7796_v52, %v7778_v53  ;;  %v7832_v10 = vpop.f32.mrf.mxu0 }
0x15ec   :  { %11870 = vpow2.f32 %v10212_v28  ;;  %v10217_v8 = vmul.f32 -1.442695, %v7797_v1 }
0x15ed   :  { %11872 = vpow2.f32 %v10216_v29  ;;  %v7739_v46 = vpop.f32.mrf.mxu3 }
0x15ee   :  { %v7740_v37 = vadd.f32 %v7739_v46, %v14975_v27  ;;  %11874 = vpow2.f32 %v10217_v8 }
0x15f0   :  { %v7759_v21 = vadd.f32 %v7758_v34, %v7740_v37 }
0x15f2   :  { %v11871_v7 = vpop.eup %11870  ;;  %v10213_v54 = vmul.f32 -1.442695, %v7759_v21 }
0x15f3   :  { %v11873_v19 = vpop.eup %11872  ;;  %v16518_v23 = vadd.f32 1.0, %v11871_v7 }
0x15f4   :  { %11876 = vpow2.f32 %v10213_v54  ;;  %v16521_v36 = vadd.f32 1.0, %v11873_v19  ;;  %v11875_v16 = vpop.eup %11874 }
0x15f5   :  { %11878 = vrcp.f32 %v16518_v23  ;;  %v16529_v45 = vadd.f32 1.0, %v11875_v16  ;;  %v7907_v52 = vand.u32 2147483648, %v16518_v23  ;;  %vm7901_vm14 = vweird.f32 %v16518_v23 }
0x15f6   :  { %11880 = vrcp.f32 %v16521_v36  ;;  %v7981_v29 = vand.u32 2147483647, %v16521_v36  ;;  %v7905_v34 = vand.u32 2147483647, %v16518_v23  ;;  %vm7977_vm0 = vweird.f32 %v16521_v36 }
0x15f7   :  { %v7780_v47 = vpop.f32.mrf.mxu1  ;;  %v7983_v8 = vand.u32 2147483648, %v16521_v36  ;;  %vm7992_vm5 = vweird.f32 %v16529_v45 }
0x15f8   :  { %v7781_v22 = vadd.f32 %v7780_v47, %v14983_v50  ;;  %vm16577_vm1 = vcmp.eq.f32.partialorder %v7981_v29, 8.507059e+37  ;;  %vm7906_vm2 = vcmp.eq.f32.partialorder %v7905_v34, 8.507059e+37 }
0x15fa   :  { %v11877_v6 = vpop.eup %11876  ;;  %v7800_v24 = vadd.f32 %v7799_v20, %v7781_v22  ;;  %v7908_v20 = vor.u32 1.1754944e-38, %v7907_v52 }
0x15fb   :  { %v16525_v61 = vpop.eup %11878  ;;  %v16527_v56 = vadd.f32 1.0, %v11877_v6 }
0x15fc   :  { %v10218_v39 = vmul.f32 -1.442695, %v7800_v24  ;;  %v7897_v33 = vmul.f32 %v16525_v61, %v16518_v23  ;;  %v16535_v49 = vpop.eup %11880  ;;  %vm7902_vm13 = vweird.f32 %v16525_v61 }
0x15fd   :  { %11882 = vrcp.f32 %v16527_v56  ;;  %v7742_v42 = vpop.f32.mrf.mxu3  ;;  %v7973_v44 = vmul.f32 %v16535_v49, %v16521_v36  ;;  %vm16565_vm15 = vmor %vm7901_vm14, %vm7902_vm13  ;;  %vm7978_vm3 = vweird.f32 %v16535_v49  ;;  %vm7916_vm6 = vweird.f32 %v16527_v56 }
0x15fe   :  { %11884 = vpow2.f32 %v10218_v39  ;;  %v7743_v60 = vadd.f32 %v7742_v42, %v14975_v27  ;;  %v7898_v32 = vsub.f32 1.0, %v7897_v33  ;;  %v7996_v39 = vand.u32 2147483647, %v16529_v45  ;;  %vm16602_vm7 = vmor %vm7977_vm0, %vm7978_vm3 }
0x15ff   :  { %v7782_v13 = vpop.f32.mrf.mxu1  ;;  %11886 = vrcp.f32 %v16529_v45  ;;  %v7974_v41 = vsub.f32 1.0, %v7973_v44  ;;  %v7920_v44 = vand.u32 2147483647, %v16527_v56 }
0x1600   :  { %v7762_v3 = vadd.f32 %v7761_v0, %v7743_v60  ;;  %v7783_v40 = vadd.f32 %v7782_v13, %v14983_v50  ;;  %v7899_v48 = vmul.f32 %v16525_v61, %v7898_v32  ;;  %v7872_v13 = vpop.f32.mrf.mxu2  ;;  %vm16624_vm9 = vcmp.eq.f32.partialorder %v7996_v39, 8.507059e+37 }
0x1601   :  { %v7975_v37 = vmul.f32 %v16535_v49, %v7974_v41  ;;  %vm7921_vm11 = vcmp.eq.f32.partialorder %v7920_v44, 8.507059e+37 }
0x1602   :  { %v10214_v62 = vmul.f32 -1.442695, %v7762_v3  ;;  %v7802_v55 = vadd.f32 %v7801_v18, %v7783_v40  ;;  %v7900_v11 = vadd.f32 %v16525_v61, %v7899_v48  ;;  %v7922_v3 = vand.u32 2147483648, %v16527_v56  ;;  %v7834_v48 = vpop.f32.mrf.mxu0 }
0x1603   :  { %v16539_v14 = vpop.eup %11882  ;;  %v7984_v40 = vor.u32 1.1754944e-38, %v7983_v8 }
0x1604   :  { %v11885_v12 = vpop.eup %11884  ;;  %11888 = vpow2.f32 %v10214_v62  ;;  %v10219_v63 = vmul.f32 -1.442695, %v7802_v55  ;;  %v7912_v59 = vmul.f32 %v16539_v14, %v16527_v56  ;;  %v7904_v54 = vsel %vm16565_vm15, %v16525_v61, %v7900_v11 }
0x1605   :  { %v7744_v15 = vpop.f32.mrf.mxu3  ;;  %v16546_v5 = vpop.eup %11886  ;;  %v16548_v50 = vadd.f32 1.0, %v11885_v12  ;;  %v7909_v6 = vsel %vm7906_vm2, %v7908_v20, %v7904_v54  ;;  %vm7917_vm4 = vweird.f32 %v16539_v14  ;;  %v7976_v61 = vadd.f32 %v16535_v49, %v7975_v37 }
0x1606   :  { %11890 = vpow2.f32 %v10219_v63  ;;  %v7745_v9 = vadd.f32 %v7744_v15, %v14975_v27  ;;  %v7913_v38 = vsub.f32 1.0, %v7912_v59  ;;  %v7988_v53 = vmul.f32 %v16546_v5, %v16529_v45  ;;  %vm16612_vm8 = vmor %vm7916_vm6, %vm7917_vm4 }
0x1607   :  { %v7851_v25 = vpop.f32.mrf.mxu1  ;;  %11892 = vrcp.f32 %v16548_v50  ;;  %v7980_v36 = vsel %vm16602_vm7, %v16535_v49, %v7976_v61  ;;  %v7998_v56 = vand.u32 2147483648, %v16529_v45  ;;  %vm7993_vm10 = vweird.f32 %v16546_v5 }
0x1608   :  { %v7764_v51 = vadd.f32 %v7763_v35, %v7745_v9  ;;  %v7852_v31 = vadd.f32 %v7851_v25, %v15049_v43  ;;  %v7914_v19 = vmul.f32 %v16539_v14, %v7913_v38  ;;  %v7989_v47 = vsub.f32 1.0, %v7988_v53  ;;  %vm16642_vm13 = vmor %vm7992_vm5, %vm7993_vm10 }
0x1609   :  { %v7999_v20 = vor.u32 1.1754944e-38, %v7998_v56  ;;  %vm8007_vm3 = vweird.f32 %v16548_v50 }
0x160a   :  { %v11889_v27 = vpop.eup %11888  ;;  %v10215_v28 = vmul.f32 -1.442695, %v7764_v51  ;;  %v7871_v7 = vadd.f32 %v7870_v26, %v7852_v31  ;;  %v7915_v35 = vadd.f32 %v16539_v14, %v7914_v19  ;;  %v7990_v32 = vmul.f32 %v16546_v5, %v7989_v47 }
0x160b   :  { %v16561_v1 = vadd.f32 1.0, %v11889_v27  ;;  %v7923_v31 = vor.u32 1.1754944e-38, %v7922_v3  ;;  %v8013_v3 = vand.u32 2147483648, %v16548_v50 }
0x160c   :  { %v11891_v21 = vpop.eup %11890  ;;  %11894 = vpow2.f32 %v10215_v28  ;;  %v8032_v18 = vmul.f32 %v7909_v6, %v7871_v7  ;;  %v7919_v25 = vsel %vm16612_vm8, %v16539_v14, %v7915_v35  ;;  %v7991_v49 = vadd.f32 %v16546_v5, %v7990_v32  ;;  %v7875_v6 = vpop.f32.mrf.mxu2 }
0x160d   :  { %11896 = vrcp.f32 %v16561_v1  ;;  %v7813_v23 = vpop.f32.mrf.mxu3  ;;  %v16581_v22 = vadd.f32 1.0, %v11891_v21  ;;  %v16588_v33 = vpop.eup %11892  ;;  %v7985_v14 = vsel %vm16577_vm1, %v7984_v40, %v7980_v36  ;;  %v7924_v53 = vsel %vm7921_vm11, %v7923_v31, %v7919_v25 }
0x160e   :  { %v7814_v16 = vadd.f32 %v7813_v23, %v15046_v2  ;;  %v8003_v59 = vmul.f32 %v16588_v33, %v16548_v50  ;;  %v7935_v29 = vand.u32 2147483647, %v16561_v1  ;;  %v7937_v27 = vand.u32 2147483648, %v16561_v1 }
0x160f   :  { %v7853_v24 = vpop.f32.mrf.mxu1  ;;  %11898 = vrcp.f32 %v16581_v22  ;;  %v8044_v7 = vsub.f32 1.0, %v7985_v14  ;;  %v8052_v54 = vmul.f32 %v7985_v14, %v16039_v57  ;;  %v7995_v19 = vsel %vm16642_vm13, %v16546_v5, %v7991_v49 }
0x1610   :  { %v7833_v42 = vadd.f32 %v7832_v10, %v7814_v16  ;;  %v7854_v60 = vadd.f32 %v7853_v24, %v15049_v43  ;;  %v8004_v28 = vsub.f32 1.0, %v8003_v59  ;;  %vm7931_vm14 = vweird.f32 %v16561_v1 }
0x1611   :  { %v7938_v61 = vor.u32 1.1754944e-38, %v7937_v27  ;;  %vm7936_vm0 = vcmp.eq.f32.partialorder %v7935_v29, 8.507059e+37  ;;  %vm8008_vm1 = vweird.f32 %v16588_v33  ;;  %v8011_v25 = vand.u32 2147483647, %v16548_v50 }
0x1612   :  { %v11895_v62 = vpop.eup %11894  ;;  %v8036_v55 = vadd.f32 %v8032_v18, %v7833_v42  ;;  %v7873_v26 = vadd.f32 %v7872_v13, %v7854_v60  ;;  %v8005_v39 = vmul.f32 %v16588_v33, %v8004_v28  ;;  %v7837_v42 = vpop.f32.mrf.mxu0  ;;  %vm16674_vm5 = vmor %vm8007_vm3, %vm8008_vm1  ;;  %v8014_v14 = vor.u32 1.1754944e-38, %v8013_v3 }
0x1613   :  { %v11897_v63 = vpop.eup %11896  ;;  %v16608_v15 = vadd.f32 1.0, %v11895_v62  ;;  %vm8012_vm8 = vcmp.eq.f32.partialorder %v8011_v25, 8.507059e+37  ;;  %vm8022_vm10 = vweird.f32 %v16581_v22 }
0x1614   :  { %11900 = vtanh.f32 %v8036_v55  ;;  %v7927_v41 = vmul.f32 %v11897_v63, %v16561_v1  ;;  %v8033_v46 = vmul.f32 %v7924_v53, %v7873_v26  ;;  %vm7932_vm12 = vweird.f32 %v11897_v63 }
0x1615   :  { %11902 = vrcp.f32 %v16608_v15  ;;  %v7815_v11 = vpop.f32.mrf.mxu3  ;;  %v16636_v34 = vpop.eup %11898  ;;  %vm7933_vm15 = vmor %vm7931_vm14, %vm7932_vm12  ;;  %v8000_v1 = vsel %vm16624_vm9, %v7999_v20, %v7995_v19  ;;  %v7950_v44 = vand.u32 2147483647, %v16608_v15  ;;  %v7952_v12 = vand.u32 2147483648, %v16608_v15 }
0x1616   :  { %v7816_v38 = vadd.f32 %v7815_v11, %v15046_v2  ;;  %v7928_v10 = vsub.f32 1.0, %v7927_v41  ;;  %v8018_v24 = vmul.f32 %v16636_v34, %v16581_v22  ;;  %v8045_v56 = vsub.f32 1.0, %v8000_v1 }
0x1617   :  { %v7856_v52 = vpop.f32.mrf.mxu1  ;;  %v8053_v26 = vmul.f32 %v8000_v1, %v16043_v58  ;;  %vm7946_vm4 = vweird.f32 %v16608_v15  ;;  %vm7951_vm7 = vcmp.eq.f32.partialorder %v7950_v44, 8.507059e+37  ;;  %vm8023_vm9 = vweird.f32 %v16636_v34 }
0x1618   :  { %v7835_v37 = vadd.f32 %v7834_v48, %v7816_v38  ;;  %v7929_v8 = vmul.f32 %v11897_v63, %v7928_v10  ;;  %v7857_v47 = vadd.f32 %v7856_v52, %v15049_v43  ;;  %v8019_v48 = vsub.f32 1.0, %v8018_v24  ;;  %vm8024_vm11 = vmor %vm8022_vm10, %vm8023_vm9 }
0x1619   :  { %v7953_v38 = vor.u32 1.1754944e-38, %v7952_v12  ;;  %v8026_v19 = vand.u32 2147483647, %v16581_v22 }
0x161a   :  { %v11901_v23 = vpop.eup %11900  ;;  %v8037_v0 = vadd.f32 %v8033_v46, %v7835_v37  ;;  %v7930_v16 = vadd.f32 %v11897_v63, %v7929_v8  ;;  %v7876_v40 = vadd.f32 %v7875_v6, %v7857_v47  ;;  %v8020_v10 = vmul.f32 %v16636_v34, %v8019_v48  ;;  %v7839_v37 = vpop.f32.mrf.mxu0  ;;  %v10746_v48 = vld [vmem:[%s16795_s14 + $0x30] sm:$0xff] }
0x161b   :  { %v11903_v45 = vpop.eup %11902  ;;  %v8048_v57 = vmul.f32 %v11901_v23, %v8044_v7  ;;  %v8028_v7 = vand.u32 2147483648, %v16581_v22  ;;  %vm8027_vm12 = vcmp.eq.f32.partialorder %v8026_v19, 8.507059e+37  ;;  %v10754_v19 = vld [vmem:[#allocation7 + $0x30] sm:$0xff] }
0x161c   :  { %11904 = vtanh.f32 %v8037_v0  ;;  %v7934_v5 = vsel %vm7933_vm15, %v11897_v63, %v7930_v16  ;;  %v7942_v18 = vmul.f32 %v11903_v45, %v16608_v15  ;;  %v8006_v63 = vadd.f32 %v16588_v33, %v8005_v39  ;;  %v7877_v15 = vpop.f32.mrf.mxu2 }
0x161d   :  { %v7939_v60 = vsel %vm7936_vm0, %v7938_v61, %v7934_v5  ;;  %v7818_v35 = vpop.f32.mrf.mxu3  ;;  %v16656_v13 = vadd.f32 %v8052_v54, %v8048_v57  ;;  %vm7947_vm2 = vweird.f32 %v11903_v45  ;;  %v8029_v16 = vor.u32 1.1754944e-38, %v8028_v7 }
0x161e   :  { %v7819_v32 = vadd.f32 %v7818_v35, %v15046_v2  ;;  %v7943_v62 = vsub.f32 1.0, %v7942_v18  ;;  %v8034_v59 = vmul.f32 %v7939_v60, %v7876_v40  ;;  %vm7948_vm6 = vmor %vm7946_vm4, %vm7947_vm2  ;;  %v8010_v50 = vsel %vm16674_vm5, %v16588_v33, %v8006_v63  ;;  %v10747_v63 = vld [vmem:[%s16795_s14 + $0x38] sm:$0xff] }
0x161f   :  { %v7858_v55 = vpop.f32.mrf.mxu1  ;;  %8060 = vadd.xlane.f32.xlu0 %v16656_v13  ;;  %v8015_v46 = vsel %vm8012_vm8, %v8014_v14, %v8010_v50  ;;  %v8021_v33 = vadd.f32 %v16636_v34, %v8020_v10  ;;  %8214 = vmatpush.bf16.msrb.mxu3 %v10747_v63  ;;  %v10740_v10 = vld [vmem:[%s16795_s14] sm:$0xff] }
0x1620   :  { %v7838_v9 = vadd.f32 %v7837_v42, %v7819_v32  ;;  %v7944_v36 = vmul.f32 %v11903_v45, %v7943_v62  ;;  %v7859_v31 = vadd.f32 %v7858_v55, %v15049_v43  ;;  %v8046_v54 = vsub.f32 1.0, %v8015_v46 }
0x1621   :  { %v8054_v0 = vmul.f32 %v8015_v46, %v16047_v4  ;;  %v8025_v47 = vsel %vm8024_vm11, %v16636_v34, %v8021_v33  ;;  %v10755_v33 = vld [vmem:[#allocation7 + $0x38] sm:$0xff] }
0x1622   :  { %v11905_v41 = vpop.eup %11904  ;;  %v8038_v51 = vadd.f32 %v8034_v59, %v7838_v9  ;;  %v7945_v11 = vadd.f32 %v11903_v45, %v7944_v36  ;;  %v7878_v27 = vadd.f32 %v7877_v15, %v7859_v31  ;;  %v8030_v6 = vsel %vm8027_vm12, %v8029_v16, %v8025_v47  ;;  %v10745_v59 = vld [vmem:[%s16795_s14 + $0x28] sm:$0xff]  ;;  %v10744_v9 = vld [vmem:[%s16795_s14 + $0x20] sm:$0xff]  ;;  %8303 = vmatpush.bf16.msrb.mxu0 %v10755_v33 }
0x1623   :  { %v8049_v58 = vmul.f32 %v11905_v41, %v8045_v56  ;;  %v8047_v24 = vsub.f32 1.0, %v8030_v6  ;;  %v8055_v22 = vmul.f32 %v8030_v6, %v16051_v30  ;;  %8215 = vmatpush.bf16.msrb.mxu3 %v10746_v48  ;;  %v10742_v41 = vld [vmem:[%s16795_s14 + $0x10] sm:$0xff]  ;;  %11297 = vmatpush.bf16.msrb.mxu1 %v10755_v33  ;;  %v10753_v6 = vld [vmem:[#allocation7 + $0x28] sm:$0xff] }
0x1624   :  { %11906 = vtanh.f32 %v8038_v51  ;;  %v7949_v43 = vsel %vm7948_vm6, %v11903_v45, %v7945_v11  ;;  %v10741_v11 = vld [vmem:[%s16795_s14 + $0x8] sm:$0xff] }
0x1625   :  { %v7954_v53 = vsel %vm7951_vm7, %v7953_v38, %v7949_v43  ;;  %v7820_v52 = vpop.f32.mrf.mxu3  ;;  %v16682_v29 = vadd.f32 %v8053_v26, %v8049_v58  ;;  %v10743_v26 = vld [vmem:[%s16795_s14 + $0x18] sm:$0xff] }
0x1626   :  { %v7821_v28 = vadd.f32 %v7820_v52, %v15046_v2  ;;  %v8035_v8 = vmul.f32 %v7954_v53, %v7878_v27  ;;  %8304 = vmatpush.bf16.msrb.mxu0 %v10754_v19 }
0x1627   :  { %8062 = vadd.xlane.f32.xlu1 %v16682_v29  ;;  %8216 = vmatpush.bf16.msrb.mxu3 %v10745_v59 }
0x1628   :  { %v7840_v21 = vadd.f32 %v7839_v37, %v7821_v28  ;;  %11298 = vmatpush.bf16.msrb.mxu1 %v10754_v19 }
0x162a   :  { %v11907_v20 = vpop.eup %11906  ;;  %v8039_v23 = vadd.f32 %v8035_v8, %v7840_v21  ;;  %8305 = vmatpush.bf16.msrb.mxu0 %v10753_v6 }
0x162b   :  { %v8050_v2 = vmul.f32 %v11907_v20, %v8046_v54  ;;  %8217 = vmatpush.bf16.msrb.mxu3 %v10744_v9 }
0x162c   :  { %11908 = vtanh.f32 %v8039_v23  ;;  %11299 = vmatpush.bf16.msrb.mxu1 %v10753_v6 }
0x162d   :  { %v16693_v45 = vadd.f32 %v8054_v0, %v8050_v2 }
0x162f   :  { %8064 = vadd.xlane.f32.xlu2 %v16693_v45  ;;  %8218 = vmatpush.bf16.msrb.mxu3 %v10743_v26 }
0x1632   :  { %v11909_v61 = vpop.eup %11908 }
0x1633   :  { %v8051_v57 = vmul.f32 %v11909_v61, %v8047_v24  ;;  %8219 = vmatpush.bf16.msrb.mxu3 %v10742_v41 }
0x1635   :  { %v16697_v39 = vadd.f32 %v8055_v22, %v8051_v57 }
0x1637   :  { %8066 = vadd.xlane.f32.xlu0 %v16697_v39  ;;  %8220 = vmatpush.bf16.msrb.mxu3 %v10741_v11  ;;  %v10750_v11 = vld [vmem:[#allocation7 + $0x10] sm:$0xff] }
0x163b   :  { %8221 = vmatpush.bf16.msrb.mxu3 %v10740_v10 }
0x1692   :  { %v8061_v4 = vpop.xlane.xlu0 %8060 }
0x1693   :  { %v8068_v34 = vmul.f32 %v8061_v4, %v12207_v17 }
0x1695   :  { %v16702_v5 = vsub.f32 %v16656_v13, %v8068_v34 }
0x1697   :  { %v8076_v18 = vmul.f32 %v16702_v5, %v16702_v5 }
0x1699   :  { %8080 = vadd.xlane.f32.xlu1 %v8076_v18 }
0x169a   :  { %v8063_v42 = vpop.xlane.xlu1 %8062 }
0x169b   :  { %v8069_v60 = vmul.f32 %v8063_v42, %v12207_v17 }
0x169d   :  { %v16708_v35 = vsub.f32 %v16682_v29, %v8069_v60  ;;  %v11939_v60 = vld [vmem:[%s16794_s13] ss:$0 sm:$0xff] }
0x169f   :  { %v8077_v30 = vmul.f32 %v16708_v35, %v16708_v35 }
0x16a1   :  { %8082 = vadd.xlane.f32.xlu2 %v8077_v30 }
0x16a2   :  { %v8065_v1 = vpop.xlane.xlu2 %8064 }
0x16a3   :  { %v8070_v3 = vmul.f32 %v8065_v1, %v12207_v17 }
0x16a5   :  { %v16714_v40 = vsub.f32 %v16693_v45, %v8070_v3 }
0x16a7   :  { %v8078_v32 = vmul.f32 %v16714_v40, %v16714_v40 }
0x16a9   :  { %8084 = vadd.xlane.f32.xlu0 %v8078_v32 }
0x16aa   :  { %v8067_v62 = vpop.xlane.xlu0 %8066 }
0x16ab   :  { %v8071_v55 = vmul.f32 %v8067_v62, %v12207_v17 }
0x16ad   :  { %v16720_v44 = vsub.f32 %v16697_v39, %v8071_v55 }
0x16af   :  { %v8079_v12 = vmul.f32 %v16720_v44, %v16720_v44 }
0x16b1   :  { %8086 = vadd.xlane.f32.xlu1 %v8079_v12 }
0x170c   :  { %v8081_v36 = vpop.xlane.xlu1 %8080 }
0x170d   :  { %v8088_v56 = vmul.f32 %v8081_v36, %v12207_v17 }
0x170f   :  { %v8092_v25 = vadd.f32 1e-05, %v8088_v56 }
0x1711   :  { %11910 = vrsqrt.f32 %v8092_v25  ;;  %vm8102_vm14 = vweird.f32 %v8092_v25 }
0x1714   :  { %v8083_v51 = vpop.xlane.xlu2 %8082 }
0x1715   :  { %v8089_v31 = vmul.f32 %v8083_v51, %v12207_v17 }
0x1717   :  { %v11911_v49 = vpop.eup %11910  ;;  %v8093_v38 = vadd.f32 1e-05, %v8089_v31  ;;  %v10751_v31 = vld [vmem:[#allocation7 + $0x18] sm:$0xff] }
0x1718   :  { %v8097_v58 = vmul.f32 %v11911_v49, %v8092_v25  ;;  %vm8103_vm13 = vweird.f32 %v11911_v49 }
0x1719   :  { %11912 = vrsqrt.f32 %v8093_v38  ;;  %vm8104_vm15 = vmor %vm8102_vm14, %vm8103_vm13  ;;  %vm8112_vm1 = vweird.f32 %v8093_v38 }
0x171a   :  { %v8098_v50 = vmul.f32 %v11911_v49, %v8097_v58 }
0x171c   :  { %v8099_v43 = vmul.f32 0.5, %v8098_v50  ;;  %v8085_v14 = vpop.xlane.xlu0 %8084 }
0x171d   :  { %v8090_v15 = vmul.f32 %v8085_v14, %v12207_v17 }
0x171e   :  { %v8100_v53 = vsub.f32 1.5, %v8099_v43 }
0x171f   :  { %v11913_v52 = vpop.eup %11912  ;;  %v8094_v27 = vadd.f32 1e-05, %v8090_v15 }
0x1720   :  { %v8101_v28 = vmul.f32 %v11911_v49, %v8100_v53  ;;  %v8107_v46 = vmul.f32 %v11913_v52, %v8093_v38  ;;  %vm8113_vm0 = vweird.f32 %v11913_v52 }
0x1721   :  { %11914 = vrsqrt.f32 %v8094_v27  ;;  %vm8114_vm2 = vmor %vm8112_vm1, %vm8113_vm0  ;;  %vm8122_vm4 = vweird.f32 %v8094_v27 }
0x1722   :  { %v8108_v37 = vmul.f32 %v11913_v52, %v8107_v46  ;;  %v8105_v8 = vsel %vm8104_vm15, %v11911_v49, %v8101_v28  ;;  %v10749_v49 = vld [vmem:[#allocation7 + $0x8] sm:$0xff] }
0x1723   :  { %v8136_v2 = vmul.f32 %v8105_v8, %v16702_v5  ;;  %v10752_v5 = vld [vmem:[#allocation7 + $0x20] sm:$0xff] }
0x1724   :  { %v8109_v21 = vmul.f32 0.5, %v8108_v37  ;;  %v8087_v7 = vpop.xlane.xlu1 %8086  ;;  %8306 = vmatpush.bf16.msrb.mxu0 %v10752_v5  ;;  %11300 = vmatpush.bf16.msrb.mxu1 %v10752_v5 }
0x1725   :  { %v8091_v54 = vmul.f32 %v8087_v7, %v12207_v17  ;;  %v11938_v17 = vld [vmem:[%s16793_s12] ss:$0 sm:$0xff] }
0x1726   :  { %v8110_v20 = vsub.f32 1.5, %v8109_v21  ;;  %v8140_v57 = vmul.f32 %v11938_v17, %v8136_v2  ;;  %v11941_v21 = vld [vmem:[#allocation9] ss:$0 sm:$0xff] }
0x1727   :  { %v11915_v23 = vpop.eup %11914  ;;  %v8095_v0 = vadd.f32 1e-05, %v8091_v54 }
0x1728   :  { %v8111_v47 = vmul.f32 %v11913_v52, %v8110_v20  ;;  %v8117_v16 = vmul.f32 %v11915_v23, %v8094_v27  ;;  %v8144_v30 = vadd.f32 %v11939_v60, %v8140_v57  ;;  %vm8123_vm3 = vweird.f32 %v11915_v23  ;;  %8307 = vmatpush.bf16.msrb.mxu0 %v10751_v31  ;;  %11301 = vmatpush.bf16.msrb.mxu1 %v10751_v31 }
0x1729   :  { %11916 = vrsqrt.f32 %v8095_v0  ;;  %vm8124_vm5 = vmor %vm8122_vm4, %vm8123_vm3  ;;  %vm8132_vm7 = vweird.f32 %v8095_v0 }
0x172a   :  { %v8115_v24 = vsel %vm8114_vm2, %v11913_v52, %v8111_v47  ;;  %v8118_v61 = vmul.f32 %v11915_v23, %v8117_v16 }
0x172b   :  { %v8137_v22 = vmul.f32 %v8115_v24, %v16708_v35 }
0x172c   :  { %v8119_v4 = vmul.f32 0.5, %v8118_v61  ;;  %8308 = vmatpush.bf16.msrb.mxu0 %v10750_v11  ;;  %11302 = vmatpush.bf16.msrb.mxu1 %v10750_v11 }
0x172d   :  { %v8141_v34 = vmul.f32 %v11938_v17, %v8137_v22 }
0x172e   :  { %v8120_v18 = vsub.f32 1.5, %v8119_v4 }
0x172f   :  { %v11917_v42 = vpop.eup %11916  ;;  %v8145_v1 = vadd.f32 %v11939_v60, %v8141_v34 }
0x1730   :  { %v8121_v3 = vmul.f32 %v11915_v23, %v8120_v18  ;;  %v8127_v32 = vmul.f32 %v11917_v42, %v8095_v0  ;;  %vm8133_vm6 = vweird.f32 %v11917_v42  ;;  %8309 = vmatpush.bf16.msrb.mxu0 %v10749_v49  ;;  %11303 = vmatpush.bf16.msrb.mxu1 %v10749_v49 }
0x1731   :  { %v8148_v62 = vpack.c.bf16 %v8145_v1, %v8144_v30  ;;  %vm8134_vm8 = vmor %vm8132_vm7, %vm8133_vm6 }
0x1732   :  { %v8128_v35 = vmul.f32 %v11917_v42, %v8127_v32  ;;  %v8125_v55 = vsel %vm8124_vm5, %v11915_v23, %v8121_v3 }
0x1733   :  { %8222 = vmatmul.bf16.vlgmr.msrb.gmra.mxu3 %v8148_v62  ;;  %v8138_v48 = vmul.f32 %v8125_v55, %v16714_v40  ;;  %v10748_v40 = vld [vmem:[#allocation7] sm:$0xff] }
0x1734   :  { %v8129_v12 = vmul.f32 0.5, %v8128_v35  ;;  %8310 = vmatpush.bf16.msrb.mxu0 %v10748_v40  ;;  %11304 = vmatpush.bf16.msrb.mxu1 %v10748_v40 }
0x1735   :  { %v8142_v56 = vmul.f32 %v11938_v17, %v8138_v48 }
0x1736   :  { %v8130_v63 = vsub.f32 1.5, %v8129_v12 }
0x1737   :  { %v8146_v25 = vadd.f32 %v11939_v60, %v8142_v56 }
0x1738   :  { %v8131_v59 = vmul.f32 %v11917_v42, %v8130_v63 }
0x173a   :  { %v8135_v9 = vsel %vm8134_vm8, %v11917_v42, %v8131_v59 }
0x173b   :  { %v8139_v36 = vmul.f32 %v8135_v9, %v16720_v44  ;;  %v11940_v44 = vld [vmem:[%s16796_s15] ss:$0 sm:$0xff]  ;;  %s8353_s15 = sshll.u32 %s16800_s19, 4  ;;  %s12079_s19 = smov [#allocation10]   ;;  %s8354_s15 = int_to_ptr.hbm [resolvable:$true] %s8353_s15 }
0x173c   :  { %8359 = dma.vmem_to_hbm [thread:$0]  %s8352_s24, 512, %s8354_s15, [#allocation12], %s12074_s28, %s12074_s28, %s12075_s29  }
0x173d   :  { %v8143_v26 = vmul.f32 %v11938_v17, %v8139_v36  ;;  %s8338_s10 = sshll.u32 %s12079_s19, 4  ;;  %s8339_s10 = int_to_ptr.vmem [resolvable:$true] %s8338_s10 }
0x173f   :  { %v8147_v41 = vadd.f32 %v11939_v60, %v8143_v26 }
0x1741   :  { %v8149_v51 = vpack.c.bf16 %v8147_v41, %v8146_v25 }
0x1743   :  { %8227 = vmatmul.bf16.gmra.mxu3 %v8149_v51 }
0x17b6   :  { %v8223_v38 = vpop.f32.mrf.mxu3 }
0x17b7   :  { %v8224_v58 = vadd.f32 %v11940_v44, %v8223_v38 }
0x17b9   :  { %v8233_v43 = vmax.f32 %v8224_v58, 0.0 }
0x17be   :  { %v8225_v50 = vpop.f32.mrf.mxu3 }
0x17bf   :  { %v8226_v10 = vadd.f32 %v11940_v44, %v8225_v50 }
0x17c1   :  { %v8234_v14 = vmax.f32 %v8226_v10, 0.0 }
0x17c3   :  { %v8237_v15 = vpack.c.bf16 %v8234_v14, %v8233_v43 }
0x17c5   :  { %8311 = vmatmul.bf16.vlgmr.msrb.gmra.mxu0 %v8237_v15 }
0x17c6   :  { %v8228_v53 = vpop.f32.mrf.mxu3 }
0x17c7   :  { %v8229_v52 = vadd.f32 %v11940_v44, %v8228_v53 }
0x17c9   :  { %v8235_v46 = vmax.f32 %v8229_v52, 0.0 }
0x17ce   :  { %v8230_v27 = vpop.f32.mrf.mxu3 }
0x17cf   :  { %v8231_v28 = vadd.f32 %v11940_v44, %v8230_v27 }
0x17d1   :  { %v8236_v37 = vmax.f32 %v8231_v28, 0.0 }
0x17d3   :  { %v8238_v33 = vpack.c.bf16 %v8236_v37, %v8235_v46 }
0x17d5   :  { %8316 = vmatmul.bf16.vlgmr.msrb.gmra.mxu1 %v8238_v33 }
0x1842   :  { %v8312_v8 = vpop.f32.mrf.mxu0 }
0x1843   :  { %v8313_v7 = vadd.f32 %v11941_v21, %v8312_v8 }
0x1845   :  { %v8322_v54 = vadd.f32 %v8313_v7, %v16656_v13 }
0x1847   :  { %8326 = vst [vmem:[#allocation10] sm:$0xff] %v8322_v54 }
0x184a   :  { %v8314_v19 = vpop.f32.mrf.mxu0 }
0x184b   :  { %v8315_v20 = vadd.f32 %v11941_v21, %v8314_v19 }
0x184d   :  { %v8323_v23 = vadd.f32 %v8315_v20, %v16682_v29 }
0x184f   :  { %8327 = vst [vmem:[#allocation10 + $0x8] sm:$0xff] %v8323_v23 }
0x1852   :  { %v8317_v2 = vpop.f32.mrf.mxu1 }
0x1853   :  { %v8318_v0 = vadd.f32 %v11941_v21, %v8317_v2 }
0x1855   :  { %v8324_v47 = vadd.f32 %v8318_v0, %v16693_v45 }
0x1857   :  { %8328 = vst [vmem:[#allocation10 + $0x10] sm:$0xff] %v8324_v47 }
0x185a   :  { %v8319_v16 = vpop.f32.mrf.mxu1 }
0x185b   :  { %v8320_v6 = vadd.f32 %v11941_v21, %v8319_v16 }
0x185d   :  { %v8325_v13 = vadd.f32 %v8320_v6, %v16697_v39 }
0x185f   :  { %8329 = vst [vmem:[#allocation10 + $0x18] sm:$0xff] %v8325_v13 }
0x1860   :  { %8346 = dma.vmem_to_hbm [thread:$0]  %s8339_s10, 512, %s8341_s26, [#allocation6], %s12074_s28, %s12074_s28, %s12075_s29  }
0x1861   :  { %12066 = dma.done.wait [#allocation6], 512  }
0x1862   :  { %12067 = vsyncadd [#allocation6], 4294966784 }
0x1863   :  { %12068 = dma.done.wait [#allocation12], 512  }
0x1864   :  { %12069 = vsyncadd [#allocation12], 4294966784 }
0x1865   :  { %8368 = vsyncpa [#allocation5], 1 }
0x1866   :  { %8369 = vsyncpa [#allocation8], 1 }
0x1867   :  { %8370 = vsyncpa [#allocation6], 1 }
0x1868   :  { %8371 = vsyncpa [#allocation12], 1 }

</bundles_post_ra>
